<compile_context>
chip_gen: v7x
topology: tpu7x:2x2x1
jax: 0.10.0
libtpu: 0.0.40
codegen_flags: <defaults>
</compile_context>

<pallas_src>
import functools

import jax
import jax.numpy as jnp
from jax import lax
from jax.experimental import pallas as pl
from jax.experimental.pallas import tpu as pltpu


# ----------------------------------------------------------------------------
# helpers
# ----------------------------------------------------------------------------
def _round_up(a: int, b: int) -> int:
    return (a + b - 1) // b * b


def _vmem_capacity_bytes() -> int:
    """Generation-aware VMEM capacity; conservative fallback if query fails."""
    try:
        return int(pltpu.get_tpu_info().vmem_capacity_bytes)
    except Exception:
        return 64 << 20   # v7x per-TensorCore VMEM (most restrictive)


@functools.lru_cache(maxsize=None)
def _single_buffer_supported() -> bool:
    """Feature-probe pl.Buffered(1) (single-buffered constant-index blocks)."""
    try:
        def k(x_ref, w_ref, o_ref):
            o_ref[...] = x_ref[...] + w_ref[...]

        w_spec = pl.BlockSpec((8, 128), lambda i: (0, 0),
                              pipeline_mode=pl.Buffered(1))
        out = pl.pallas_call(
            k,
            grid=(2,),
            in_specs=[pl.BlockSpec((8, 128), lambda i: (i, 0)), w_spec],
            out_specs=pl.BlockSpec((8, 128), lambda i: (i, 0)),
            out_shape=jax.ShapeDtypeStruct((16, 128), jnp.float32),
        )(jnp.ones((16, 128), jnp.float32), jnp.ones((8, 128), jnp.float32))
        jax.block_until_ready(out)
        return bool(jnp.all(out == 2.0))   # also reject silently-wrong results
    except Exception:
        return False


def _full_spec(shape, single_buffer: bool):
    """Whole-array block, constant index across the 1-D grid (VMEM-resident)."""
    nd = len(shape)
    idx = lambda i, _nd=nd: (0,) * _nd
    if single_buffer:
        return pl.BlockSpec(shape, idx, pipeline_mode=pl.Buffered(1))
    return pl.BlockSpec(shape, idx)


# ----------------------------------------------------------------------------
# fused kernel: Linear->GELU, n_layers x (Linear->GELU + skip), Linear->GELU + x
# ----------------------------------------------------------------------------
def _make_linear_residual_kernel(n_layers: int, compute_dtype, approximate: bool):
    def kernel(*refs):
        if n_layers > 0:
            x_ref, wf_ref, bf_ref, wi_ref, bi_ref, wl_ref, bl_ref, o_ref = refs
        else:
            x_ref, wf_ref, bf_ref, wl_ref, bl_ref, o_ref = refs
            wi_ref = bi_ref = None

        x_f32 = x_ref[...].astype(jnp.float32)            # skip connection, f32

        # l_first: Linear -> GELU (Dropout == identity at inference)
        h = jnp.dot(x_f32.astype(compute_dtype), wf_ref[...],
                    preferred_element_type=jnp.float32)
        h = jax.nn.gelu(h + bf_ref[...], approximate=approximate)

        # l_inner: out = GELU(Linear(out)) + out
        # fori_loop bounds live ranges per iteration; unrolled for short chains
        # so the LLO scheduler still sees the whole body.
        if n_layers > 0:
            def body(l, h_carry):
                y = jnp.dot(h_carry.astype(compute_dtype), wi_ref[l],
                            preferred_element_type=jnp.float32)
                y = jax.nn.gelu(y + bi_ref[l], approximate=approximate)
                return y + h_carry                          # residual add in f32

            h = lax.fori_loop(0, n_layers, body, h, unroll=(n_layers <= 8))

        # l_last: out = GELU(Linear(out)) + x
        y = jnp.dot(h.astype(compute_dtype), wl_ref[...],
                    preferred_element_type=jnp.float32)
        y = jax.nn.gelu(y + bl_ref[...], approximate=approximate)
        o_ref[...] = (y + x_f32).astype(o_ref.dtype)

    return kernel


# ----------------------------------------------------------------------------
# wrapper
# ----------------------------------------------------------------------------
def linear_residual_forward(params, x, *, block_rows=512,
                            compute_dtype=jnp.bfloat16,
                            gelu_approximate=True):
    """Fused LinearResidual forward (eval mode). x: (..., interface_dim)."""
    wf, bf = params["w_first"], params["b_first"]
    wl, bl = params["w_last"], params["b_last"]
    wi, bi = params["w_inner"], params["b_inner"]     # (L, Dh, Dh), (L, Dh)
    n_layers = int(wi.shape[0])

    d_if = x.shape[-1]
    d_h = wf.shape[1]
    lead_shape = x.shape[:-1]

    # Collapse all leading dims into one dense row axis.
    x2 = x.reshape(-1, d_if)
    n = x2.shape[0]

    # bf16 MXU operands, f32 biases (epilogue stays f32).
    wf_c = wf.astype(compute_dtype)
    wl_c = wl.astype(compute_dtype)
    bf2 = bf.reshape(1, d_h).astype(jnp.float32)
    bl2 = bl.reshape(1, d_if).astype(jnp.float32)
    weight_args = [wf_c, bf2]
    if n_layers > 0:
        wi_c = wi.astype(compute_dtype)
        bi2 = bi.reshape(n_layers, 1, d_h).astype(jnp.float32)
        weight_args += [wi_c, bi2]
    weight_args += [wl_c, bl2]
    param_bytes = sum(int(a.size) * a.dtype.itemsize for a in weight_args)

    single_buffer = _single_buffer_supported()
    weight_bufs = 1 if single_buffer else 2

    # --- row tile size -------------------------------------------------------
    # At least 2 grid steps so dimension_semantics=("parallel",) can split the
    # row axis across v7x's two TensorCores; multiple of 8 sublanes.
    tm_cap = _round_up(max(pl.cdiv(n, 2), 8), 8)
    tm = max(8, min(_round_up(block_rows, 8), tm_cap))

    # VMEM estimate: resident weights + double-buffered x/out tiles + live f32
    # intermediates of one tile (h, y, x_f32, bf16 cast copies, GELU temps).
    def est_vmem(tm_):
        io_tiles = 2 * 2 * tm_ * d_if * 4
        live = 6 * tm_ * max(d_h, d_if) * 4
        return weight_bufs * param_bytes + io_tiles + live + (8 << 20)

    vmem_clamp = (_vmem_capacity_bytes() * 3) // 4   # ~48 MiB v7x, ~96 MiB v5e/v6e
    while tm > 8 and est_vmem(tm) > vmem_clamp:
        tm = max(8, _round_up(tm // 2, 8))
    vmem_limit = int(min(max(est_vmem(tm), 16 << 20), vmem_clamp))

    n_pad = _round_up(n, tm)
    if n_pad != n:
        x2 = jnp.pad(x2, ((0, n_pad - n), (0, 0)))

    in_specs = [pl.BlockSpec((tm, d_if), lambda i: (i, 0))]
    in_specs += [_full_spec(a.shape, single_buffer) for a in weight_args]

    # Advisory cost so XLA schedules surrounding ops around a right-sized call.
    flops = 2 * n_pad * (2 * d_if * d_h + n_layers * d_h * d_h)
    transcendentals = n_pad * (d_h * (n_layers + 1) + d_if)
    bytes_accessed = 2 * n_pad * d_if * 4 + param_bytes
    cost = pl.CostEstimate(flops=flops, transcendentals=transcendentals,
                           bytes_accessed=bytes_accessed)

    out = pl.pallas_call(
        _make_linear_residual_kernel(n_layers, compute_dtype, gelu_approximate),
        grid=(n_pad // tm,),
        in_specs=in_specs,
        out_specs=pl.BlockSpec((tm, d_if), lambda i: (i, 0)),
        out_shape=jax.ShapeDtypeStruct((n_pad, d_if), x.dtype),
        compiler_params=pltpu.CompilerParams(
            dimension_semantics=("parallel",),      # row tiles -> both TCs (v7x)
            vmem_limit_bytes=vmem_limit,
        ),
        cost_estimate=cost,
    )(x2, *weight_args)

    if n_pad != n:
        out = out[:n]
    return out.reshape(*lead_shape, d_if)


# ----------------------------------------------------------------------------
# deterministic parameter init (PyTorch nn.Linear-style uniform)
# ----------------------------------------------------------------------------
def init_params(key, interface_dim, layer_dim=512, n_layers=5):
    keys = jax.random.split(key, 2 * (n_layers + 2))

    def lin(kw, kb, din, dout):
        bound = 1.0 / (din ** 0.5)
        w = jax.random.uniform(kw, (din, dout), jnp.float32, -bound, bound)
        b = jax.random.uniform(kb, (dout,), jnp.float32, -bound, bound)
        return w, b

    w_first, b_first = lin(keys[0], keys[1], interface_dim, layer_dim)
    wi_l, bi_l = [], []
    for l in range(n_layers):
        w, b = lin(keys[2 + 2 * l], keys[3 + 2 * l], layer_dim, layer_dim)
        wi_l.append(w)
        bi_l.append(b)
    w_last, b_last = lin(keys[-2], keys[-1], layer_dim, interface_dim)

    if n_layers > 0:
        w_inner = jnp.stack(wi_l)
        b_inner = jnp.stack(bi_l)
    else:
        w_inner = jnp.zeros((0, layer_dim, layer_dim), jnp.float32)
        b_inner = jnp.zeros((0, layer_dim), jnp.float32)

    return {"w_first": w_first, "b_first": b_first,
            "w_inner": w_inner, "b_inner": b_inner,
            "w_last": w_last, "b_last": b_last}


# ----------------------------------------------------------------------------
# pure-JAX float32 reference (for verification)
# ----------------------------------------------------------------------------
def linear_residual_reference(params, x, *, approximate=False):
    gelu = functools.partial(jax.nn.gelu, approximate=approximate)
    out = gelu(x @ params["w_first"] + params["b_first"])
    for l in range(params["w_inner"].shape[0]):
        out = gelu(out @ params["w_inner"][l] + params["b_inner"][l]) + out
    out = gelu(out @ params["w_last"] + params["b_last"]) + x
    return out


# ----------------------------------------------------------------------------
if __name__ == "__main__":
    # Small, lane-dense shapes: batch=2, seq=256, interface_dim=128, hidden=256.
    interface_dim, layer_dim, n_layers = 128, 256, 3
    B, S = 2, 256   # 512 rows -> tm=256 -> grid=(2,) "parallel" (2-TC split)

    key = jax.random.PRNGKey(0)
    pkey, xkey = jax.random.split(key)
    params = init_params(pkey, interface_dim, layer_dim, n_layers)
    x = jax.random.normal(xkey, (B, S, interface_dim), jnp.float32)

    fwd = jax.jit(functools.partial(linear_residual_forward, block_rows=512))
    out = jax.block_until_ready(fwd(params, x))

    assert out.shape == x.shape, out.shape
    assert bool(jnp.all(jnp.isfinite(out)))

    # Kernel-math check: same tanh-GELU in f32 -> only bf16-MXU drift remains.
    ref_tanh = linear_residual_reference(params, x, approximate=True)
    err_tanh = float(jnp.max(jnp.abs(out - ref_tanh)))
    assert err_tanh < 0.1, f"max abs err vs tanh-GELU f32 reference: {err_tanh}"

    # Fidelity vs torch's default exact-erf nn.GELU(): looser budget because we
    # adopt the tanh approximation for performance (review item re-validated).
    ref_erf = linear_residual_reference(params, x, approximate=False)
    err_erf = float(jnp.max(jnp.abs(out - ref_erf)))
    assert err_erf < 0.25, f"max abs err vs exact-erf f32 reference: {err_erf}"

    print("KERNEL_OK")
</pallas_src>

<mosaic_0001>
module attributes {stable_mosaic.version = 11 : i64} {
  func.func @kernel(%arg0: i32, %arg1: memref<256x128xf32, #tpu.memory_space<vmem>>, %arg2: memref<128x256xbf16, #tpu.memory_space<vmem>>, %arg3: memref<1x256xf32, #tpu.memory_space<vmem>>, %arg4: memref<3x256x256xbf16, #tpu.memory_space<vmem>>, %arg5: memref<3x1x256xf32, #tpu.memory_space<vmem>>, %arg6: memref<256x128xbf16, #tpu.memory_space<vmem>>, %arg7: memref<1x128xf32, #tpu.memory_space<vmem>>, %arg8: memref<256x128xf32, #tpu.memory_space<vmem>>) attributes {dimension_semantics = [#tpu.dimension_semantics<parallel>], iteration_bounds = array<i64: 2>, scalar_prefetch = 0 : i64, scratch_operands = 0 : i64, tpu.core_type = #tpu.core_type<tc>, window_params = [{transform_indices = @transform_0, window_bounds = array<i64: 256, 128>}, {pipeline_mode = #tpu.pipeline_mode<synchronous>, transform_indices = @transform_1, window_bounds = array<i64: 128, 256>}, {pipeline_mode = #tpu.pipeline_mode<synchronous>, transform_indices = @transform_2, window_bounds = array<i64: 1, 256>}, {pipeline_mode = #tpu.pipeline_mode<synchronous>, transform_indices = @transform_3, window_bounds = array<i64: 3, 256, 256>}, {pipeline_mode = #tpu.pipeline_mode<synchronous>, transform_indices = @transform_4, window_bounds = array<i64: 3, 1, 256>}, {pipeline_mode = #tpu.pipeline_mode<synchronous>, transform_indices = @transform_5, window_bounds = array<i64: 256, 128>}, {pipeline_mode = #tpu.pipeline_mode<synchronous>, transform_indices = @transform_6, window_bounds = array<i64: 1, 128>}, {transform_indices = @transform_7, window_bounds = array<i64: 256, 128>}]} {
    %c0 = arith.constant 0 : index
    %c0_0 = arith.constant 0 : index
    %0 = vector.load %arg1[%c0, %c0_0] : memref<256x128xf32, #tpu.memory_space<vmem>>, vector<256x128xf32>
    %1 = arith.truncf %0 : vector<256x128xf32> to vector<256x128xbf16>
    %c0_1 = arith.constant 0 : index
    %c0_2 = arith.constant 0 : index
    %2 = vector.load %arg2[%c0_1, %c0_2] : memref<128x256xbf16, #tpu.memory_space<vmem>>, vector<128x256xbf16>
    %cst = arith.constant dense<0.000000e+00> : vector<256x256xf32>
    %3 = tpu.matmul %1, %2, %cst {dimension_numbers = #tpu.dot_dimension_numbers<[1], [0], [0], [1], [0, 0, 1, 1], [], []>} : vector<256x128xbf16>, vector<128x256xbf16>, vector<256x256xf32> -> vector<256x256xf32>
    %c0_3 = arith.constant 0 : index
    %c0_4 = arith.constant 0 : index
    %4 = vector.load %arg3[%c0_3, %c0_4] : memref<1x256xf32, #tpu.memory_space<vmem>>, vector<1x256xf32>
    %5 = vector.broadcast %4 : vector<1x256xf32> to vector<256x256xf32>
    %6 = arith.addf %3, %5 : vector<256x256xf32>
    %7 = arith.mulf %6, %6 : vector<256x256xf32>
    %8 = arith.mulf %6, %7 : vector<256x256xf32>
    %cst_5 = arith.constant 4.471500e-02 : f32
    %9 = vector.broadcast %cst_5 : f32 to vector<256x256xf32>
    %10 = arith.mulf %9, %8 : vector<256x256xf32>
    %11 = arith.addf %6, %10 : vector<256x256xf32>
    %cst_6 = arith.constant 0.797884583 : f32
    %12 = vector.broadcast %cst_6 : f32 to vector<256x256xf32>
    %13 = arith.mulf %12, %11 : vector<256x256xf32>
    %14 = math.tanh %13 : vector<256x256xf32>
    %cst_7 = arith.constant 1.000000e+00 : f32
    %15 = vector.broadcast %cst_7 : f32 to vector<256x256xf32>
    %16 = arith.addf %15, %14 : vector<256x256xf32>
    %cst_8 = arith.constant 5.000000e-01 : f32
    %17 = vector.broadcast %cst_8 : f32 to vector<256x256xf32>
    %18 = arith.mulf %17, %16 : vector<256x256xf32>
    %19 = arith.mulf %6, %18 : vector<256x256xf32>
    %c0_i32 = arith.constant 0 : i32
    %20 = arith.truncf %19 : vector<256x256xf32> to vector<256x256xbf16>
    %21 = arith.index_cast %c0_i32 : i32 to index
    %c0_9 = arith.constant 0 : index
    %c0_10 = arith.constant 0 : index
    %22 = vector.load %arg4[%21, %c0_9, %c0_10] : memref<3x256x256xbf16, #tpu.memory_space<vmem>>, vector<1x256x256xbf16>
    %23 = vector.shape_cast %22 : vector<1x256x256xbf16> to vector<256x256xbf16>
    %cst_11 = arith.constant dense<0.000000e+00> : vector<256x256xf32>
    %24 = tpu.matmul %20, %23, %cst_11 {dimension_numbers = #tpu.dot_dimension_numbers<[1], [0], [0], [1], [0, 0, 1, 1], [], []>} : vector<256x256xbf16>, vector<256x256xbf16>, vector<256x256xf32> -> vector<256x256xf32>
    %25 = arith.index_cast %c0_i32 : i32 to index
    %c0_12 = arith.constant 0 : index
    %c0_13 = arith.constant 0 : index
    %26 = vector.load %arg5[%25, %c0_12, %c0_13] : memref<3x1x256xf32, #tpu.memory_space<vmem>>, vector<1x1x256xf32>
    %27 = vector.shape_cast %26 : vector<1x1x256xf32> to vector<1x256xf32>
    %28 = vector.broadcast %27 : vector<1x256xf32> to vector<256x256xf32>
    %29 = arith.addf %24, %28 : vector<256x256xf32>
    %30 = arith.mulf %29, %29 : vector<256x256xf32>
    %31 = arith.mulf %29, %30 : vector<256x256xf32>
    %cst_14 = arith.constant 4.471500e-02 : f32
    %32 = vector.broadcast %cst_14 : f32 to vector<256x256xf32>
    %33 = arith.mulf %32, %31 : vector<256x256xf32>
    %34 = arith.addf %29, %33 : vector<256x256xf32>
    %cst_15 = arith.constant 0.797884583 : f32
    %35 = vector.broadcast %cst_15 : f32 to vector<256x256xf32>
    %36 = arith.mulf %35, %34 : vector<256x256xf32>
    %37 = math.tanh %36 : vector<256x256xf32>
    %cst_16 = arith.constant 1.000000e+00 : f32
    %38 = vector.broadcast %cst_16 : f32 to vector<256x256xf32>
    %39 = arith.addf %38, %37 : vector<256x256xf32>
    %cst_17 = arith.constant 5.000000e-01 : f32
    %40 = vector.broadcast %cst_17 : f32 to vector<256x256xf32>
    %41 = arith.mulf %40, %39 : vector<256x256xf32>
    %42 = arith.mulf %29, %41 : vector<256x256xf32>
    %43 = arith.addf %42, %19 : vector<256x256xf32>
    %c1_i32 = arith.constant 1 : i32
    %44 = arith.truncf %43 : vector<256x256xf32> to vector<256x256xbf16>
    %45 = arith.index_cast %c1_i32 : i32 to index
    %c0_18 = arith.constant 0 : index
    %c0_19 = arith.constant 0 : index
    %46 = vector.load %arg4[%45, %c0_18, %c0_19] : memref<3x256x256xbf16, #tpu.memory_space<vmem>>, vector<1x256x256xbf16>
    %47 = vector.shape_cast %46 : vector<1x256x256xbf16> to vector<256x256xbf16>
    %cst_20 = arith.constant dense<0.000000e+00> : vector<256x256xf32>
    %48 = tpu.matmul %44, %47, %cst_20 {dimension_numbers = #tpu.dot_dimension_numbers<[1], [0], [0], [1], [0, 0, 1, 1], [], []>} : vector<256x256xbf16>, vector<256x256xbf16>, vector<256x256xf32> -> vector<256x256xf32>
    %49 = arith.index_cast %c1_i32 : i32 to index
    %c0_21 = arith.constant 0 : index
    %c0_22 = arith.constant 0 : index
    %50 = vector.load %arg5[%49, %c0_21, %c0_22] : memref<3x1x256xf32, #tpu.memory_space<vmem>>, vector<1x1x256xf32>
    %51 = vector.shape_cast %50 : vector<1x1x256xf32> to vector<1x256xf32>
    %52 = vector.broadcast %51 : vector<1x256xf32> to vector<256x256xf32>
    %53 = arith.addf %48, %52 : vector<256x256xf32>
    %54 = arith.mulf %53, %53 : vector<256x256xf32>
    %55 = arith.mulf %53, %54 : vector<256x256xf32>
    %cst_23 = arith.constant 4.471500e-02 : f32
    %56 = vector.broadcast %cst_23 : f32 to vector<256x256xf32>
    %57 = arith.mulf %56, %55 : vector<256x256xf32>
    %58 = arith.addf %53, %57 : vector<256x256xf32>
    %cst_24 = arith.constant 0.797884583 : f32
    %59 = vector.broadcast %cst_24 : f32 to vector<256x256xf32>
    %60 = arith.mulf %59, %58 : vector<256x256xf32>
    %61 = math.tanh %60 : vector<256x256xf32>
    %cst_25 = arith.constant 1.000000e+00 : f32
    %62 = vector.broadcast %cst_25 : f32 to vector<256x256xf32>
    %63 = arith.addf %62, %61 : vector<256x256xf32>
    %cst_26 = arith.constant 5.000000e-01 : f32
    %64 = vector.broadcast %cst_26 : f32 to vector<256x256xf32>
    %65 = arith.mulf %64, %63 : vector<256x256xf32>
    %66 = arith.mulf %53, %65 : vector<256x256xf32>
    %67 = arith.addf %66, %43 : vector<256x256xf32>
    %c2_i32 = arith.constant 2 : i32
    %68 = arith.truncf %67 : vector<256x256xf32> to vector<256x256xbf16>
    %69 = arith.index_cast %c2_i32 : i32 to index
    %c0_27 = arith.constant 0 : index
    %c0_28 = arith.constant 0 : index
    %70 = vector.load %arg4[%69, %c0_27, %c0_28] : memref<3x256x256xbf16, #tpu.memory_space<vmem>>, vector<1x256x256xbf16>
    %71 = vector.shape_cast %70 : vector<1x256x256xbf16> to vector<256x256xbf16>
    %cst_29 = arith.constant dense<0.000000e+00> : vector<256x256xf32>
    %72 = tpu.matmul %68, %71, %cst_29 {dimension_numbers = #tpu.dot_dimension_numbers<[1], [0], [0], [1], [0, 0, 1, 1], [], []>} : vector<256x256xbf16>, vector<256x256xbf16>, vector<256x256xf32> -> vector<256x256xf32>
    %73 = arith.index_cast %c2_i32 : i32 to index
    %c0_30 = arith.constant 0 : index
    %c0_31 = arith.constant 0 : index
    %74 = vector.load %arg5[%73, %c0_30, %c0_31] : memref<3x1x256xf32, #tpu.memory_space<vmem>>, vector<1x1x256xf32>
    %75 = vector.shape_cast %74 : vector<1x1x256xf32> to vector<1x256xf32>
    %76 = vector.broadcast %75 : vector<1x256xf32> to vector<256x256xf32>
    %77 = arith.addf %72, %76 : vector<256x256xf32>
    %78 = arith.mulf %77, %77 : vector<256x256xf32>
    %79 = arith.mulf %77, %78 : vector<256x256xf32>
    %cst_32 = arith.constant 4.471500e-02 : f32
    %80 = vector.broadcast %cst_32 : f32 to vector<256x256xf32>
    %81 = arith.mulf %80, %79 : vector<256x256xf32>
    %82 = arith.addf %77, %81 : vector<256x256xf32>
    %cst_33 = arith.constant 0.797884583 : f32
    %83 = vector.broadcast %cst_33 : f32 to vector<256x256xf32>
    %84 = arith.mulf %83, %82 : vector<256x256xf32>
    %85 = math.tanh %84 : vector<256x256xf32>
    %cst_34 = arith.constant 1.000000e+00 : f32
    %86 = vector.broadcast %cst_34 : f32 to vector<256x256xf32>
    %87 = arith.addf %86, %85 : vector<256x256xf32>
    %cst_35 = arith.constant 5.000000e-01 : f32
    %88 = vector.broadcast %cst_35 : f32 to vector<256x256xf32>
    %89 = arith.mulf %88, %87 : vector<256x256xf32>
    %90 = arith.mulf %77, %89 : vector<256x256xf32>
    %91 = arith.addf %90, %67 : vector<256x256xf32>
    %c3_i32 = arith.constant 3 : i32
    %92 = arith.truncf %91 : vector<256x256xf32> to vector<256x256xbf16>
    %c0_36 = arith.constant 0 : index
    %c0_37 = arith.constant 0 : index
    %93 = vector.load %arg6[%c0_36, %c0_37] : memref<256x128xbf16, #tpu.memory_space<vmem>>, vector<256x128xbf16>
    %cst_38 = arith.constant dense<0.000000e+00> : vector<256x128xf32>
    %94 = tpu.matmul %92, %93, %cst_38 {dimension_numbers = #tpu.dot_dimension_numbers<[1], [0], [0], [1], [0, 0, 1, 1], [], []>} : vector<256x256xbf16>, vector<256x128xbf16>, vector<256x128xf32> -> vector<256x128xf32>
    %c0_39 = arith.constant 0 : index
    %c0_40 = arith.constant 0 : index
    %95 = vector.load %arg7[%c0_39, %c0_40] : memref<1x128xf32, #tpu.memory_space<vmem>>, vector<1x128xf32>
    %96 = vector.broadcast %95 : vector<1x128xf32> to vector<256x128xf32>
    %97 = arith.addf %94, %96 : vector<256x128xf32>
    %98 = arith.mulf %97, %97 : vector<256x128xf32>
    %99 = arith.mulf %97, %98 : vector<256x128xf32>
    %cst_41 = arith.constant 4.471500e-02 : f32
    %100 = vector.broadcast %cst_41 : f32 to vector<256x128xf32>
    %101 = arith.mulf %100, %99 : vector<256x128xf32>
    %102 = arith.addf %97, %101 : vector<256x128xf32>
    %cst_42 = arith.constant 0.797884583 : f32
    %103 = vector.broadcast %cst_42 : f32 to vector<256x128xf32>
    %104 = arith.mulf %103, %102 : vector<256x128xf32>
    %105 = math.tanh %104 : vector<256x128xf32>
    %cst_43 = arith.constant 1.000000e+00 : f32
    %106 = vector.broadcast %cst_43 : f32 to vector<256x128xf32>
    %107 = arith.addf %106, %105 : vector<256x128xf32>
    %cst_44 = arith.constant 5.000000e-01 : f32
    %108 = vector.broadcast %cst_44 : f32 to vector<256x128xf32>
    %109 = arith.mulf %108, %107 : vector<256x128xf32>
    %110 = arith.mulf %97, %109 : vector<256x128xf32>
    %111 = arith.addf %110, %0 : vector<256x128xf32>
    %c0_45 = arith.constant 0 : index
    %c0_46 = arith.constant 0 : index
    %112 = vector.load %arg8[%c0_45, %c0_46] : memref<256x128xf32, #tpu.memory_space<vmem>>, vector<256x128xf32>
    tpu.vector_store %arg8[%c0_45, %c0_46], %111 {strides = array<i32>} : memref<256x128xf32, #tpu.memory_space<vmem>>, vector<256x128xf32>,
    return
  }
  func.func @transform_0(%arg0: i32) -> (i32, i32) {
    %c0_i32 = arith.constant 0 : i32
    %c0_i32_0 = arith.constant 0 : i32
    return %arg0, %c0_i32 : i32, i32
  }
  func.func @transform_1(%arg0: i32) -> (i32, i32) {
    %c0_i32 = arith.constant 0 : i32
    %c0_i32_0 = arith.constant 0 : i32
    %c0_i32_1 = arith.constant 0 : i32
    return %c0_i32, %c0_i32_0 : i32, i32
  }
  func.func @transform_2(%arg0: i32) -> (i32, i32) {
    %c0_i32 = arith.constant 0 : i32
    %c0_i32_0 = arith.constant 0 : i32
    %c0_i32_1 = arith.constant 0 : i32
    return %c0_i32, %c0_i32_0 : i32, i32
  }
  func.func @transform_3(%arg0: i32) -> (i32, i32, i32) {
    %c0_i32 = arith.constant 0 : i32
    %c0_i32_0 = arith.constant 0 : i32
    %c0_i32_1 = arith.constant 0 : i32
    %c0_i32_2 = arith.constant 0 : i32
    return %c0_i32, %c0_i32_0, %c0_i32_1 : i32, i32, i32
  }
  func.func @transform_4(%arg0: i32) -> (i32, i32, i32) {
    %c0_i32 = arith.constant 0 : i32
    %c0_i32_0 = arith.constant 0 : i32
    %c0_i32_1 = arith.constant 0 : i32
    %c0_i32_2 = arith.constant 0 : i32
    return %c0_i32, %c0_i32_0, %c0_i32_1 : i32, i32, i32
  }
  func.func @transform_5(%arg0: i32) -> (i32, i32) {
    %c0_i32 = arith.constant 0 : i32
    %c0_i32_0 = arith.constant 0 : i32
    %c0_i32_1 = arith.constant 0 : i32
    return %c0_i32, %c0_i32_0 : i32, i32
  }
  func.func @transform_6(%arg0: i32) -> (i32, i32) {
    %c0_i32 = arith.constant 0 : i32
    %c0_i32_0 = arith.constant 0 : i32
    %c0_i32_1 = arith.constant 0 : i32
    return %c0_i32, %c0_i32_0 : i32, i32
  }
  func.func @transform_7(%arg0: i32) -> (i32, i32) {
    %c0_i32 = arith.constant 0 : i32
    %c0_i32_0 = arith.constant 0 : i32
    return %arg0, %c0_i32 : i32, i32
  }
}

</mosaic_0001>

<bundles_post_ra>
// kernel: linear_residual_forward.1
= control target key start
LH: loop header
LB: loop body
LE: loop exit
PB: predicated region body
PF: predicated region fallthrough
CT: control target
= control target key end

     0   :  { %12 = vsyncpa [#allocation3], 0  ;;  %s10517_s0 = inlined_call_operand.vmem [shape: f32[512,128], index: 0, kind: input, shape index: {}]   ;;  %s10518_s1 = inlined_call_operand.vmem [shape: bf16[128,256], index: 1, kind: input, shape index: {}]   ;;  %s10519_s2 = inlined_call_operand.vmem [shape: f32[1,256], index: 2, kind: input, shape index: {}]   ;;  %s10520_s3 = inlined_call_operand.vmem [shape: bf16[3,256,256], index: 3, kind: input, shape index: {}]   ;;  %s10521_s4 = inlined_call_operand.vmem [shape: f32[3,1,256], index: 4, kind: input, shape index: {}]   ;;  %s10522_s5 = inlined_call_operand.vmem [shape: bf16[256,128], index: 5, kind: input, shape index: {}]   ;;  %s10523_s6 = inlined_call_operand.vmem [shape: f32[1,128], index: 6, kind: input, shape index: {}]   ;;  %s10524_s7 = inlined_call_operand.hbm [shape: f32[512,128], index: 7, kind: output, shape index: {}]  }
   0x1   :  { %14 = vsyncpa [#allocation3 + $0x1], 0  ;;  %s6451_s24 = smov 0   ;;  %s6453_s25 = smov 0  }
   0x2   :  { %s6455_s26 = smov 0   ;;  %s6457_s27 = smov 0  }
   0x3 LB: > { %s6472_s28 = sadd.s32 4294967295, %s6405_s27   ;;  %s5173_s29 = sadd.s32 4294967294, %s6405_s27   ;;  %s6405_s27 = sphi %s6457_s27, %s11060_s27   ;;  %s6401_s26 = sphi %s6455_s26, %s11059_s26   ;;  %s6397_s25 = sphi %s6453_s25, %s11058_s25   ;;  %s6393_s24 = sphi %s6451_s24, %s11057_s24  }
   0x4   : > { %s6476_s30 = sadd.s32 1, %s6405_s27   ;;  %s179_s8 = sadd.s32 1, %s6401_s26 }
   0x5   : > { %s176_s9 = ssub.s32 %s6405_s27, %s6476_s30  ;;  %p189_p0 = scmp.ne.s32.totalorder %s6401_s26, %s6397_s25 }
   0x6   : > { %p177_p1 = scmp.eq.s32.totalorder %s176_s9, 0  ;;  %p190_p2 = scmp.eq.s32.totalorder %s6472_s28, 1 }
   0x7   : > { %p195_p3 = scmp.ne.s32.totalorder %s6397_s25, %s6393_s24  ;;  %p196_p4 = scmp.eq.s32.totalorder %s5173_s29, 1 }
   0x8   : > { %s6487_s10 = scalar_select %p177_p1, %s6401_s26, %s179_s8  }
   0x9   : > { %p6489_p5 = por %p190_p2, %p189_p0  ;;  %p6493_p6 = por %p196_p4, %p195_p3 }
   0xa   : > { %p5176_p7 = scmp.ge.s32.totalorder %s6405_s27, 1  ;;  %p241_p8 = scmp.lt.s32.totalorder %s6405_s27, 3 }
   0xc   : > { %p242_p9 = pnand %p5176_p7, %p241_p8 }
   0xe   : > { %245 = sbr.rel (%p242_p9) target bundleno = 1538 (0x602), region = 48 }
  0x15   : > { %v5551_v0 = vld [vmem:[%s10518_s1 + $0x4] ss:$8 sps:$4 sm:$0xff]   ;;  %v5553_v1 = vld [vmem:[%s10518_s1] ss:$8 sps:$4 sm:$0xff]   ;;  %v6407_v2 = vmov 0   ;;  %s5178_s13 = sshll.u32 %s6472_s28, 5 }
  0x16   : > { %469 = vmatprep.mubr.bf16.mxu0 %v6407_v2  ;;  %549 = vmatprep.mubr.bf16.mxu1 %v6407_v2  ;;  %v5554_v3 = vld [vmem:[%s10518_s1 + $0x14] ss:$8 sps:$4 sm:$0xff]   ;;  %v5556_v4 = vld [vmem:[%s10518_s1 + $0x10] ss:$8 sps:$4 sm:$0xff]   ;;  %v5557_v5 = vld [vmem:[%s10518_s1 + $0x24] ss:$8 sps:$4 sm:$0xff]  }
  0x17   : > { %437 = vmatprep.subr.bf16.mxu0 %v5551_v0  ;;  %5493 = vmatprep.subr.bf16.mxu1 %v5551_v0  ;;  %v5559_v6 = vld [vmem:[%s10518_s1 + $0x20] ss:$8 sps:$4 sm:$0xff]   ;;  %v5560_v7 = vld [vmem:[%s10518_s1 + $0x34] ss:$8 sps:$4 sm:$0xff]   ;;  %v5562_v8 = vld [vmem:[%s10518_s1 + $0x30] ss:$8 sps:$4 sm:$0xff]  }
  0x18   : > { %438 = vmatpush1.bf16.msra.mxu0 %v5553_v1  ;;  %5501 = vmatpush1.bf16.msra.mxu1 %v5553_v1  ;;  %v5563_v9 = vld [vmem:[%s10518_s1 + $0x44] ss:$8 sps:$4 sm:$0xff]   ;;  %p274_p10 = scmp.lt.s32.totalorder %s5178_s13, 63  ;;  %v5565_v10 = vld [vmem:[%s10518_s1 + $0x40] ss:$8 sps:$4 sm:$0xff]   ;;  %s270_s22 = sand.u32 1, %s6397_s25  }
  0x19   : > { %439 = vmatprep.subr.bf16.mxu0 %v5554_v3  ;;  %5494 = vmatprep.subr.bf16.mxu1 %v5554_v3  ;;  %v5566_v11 = vld [vmem:[%s10518_s1 + $0x54] ss:$8 sps:$4 sm:$0xff]   ;;  %v5568_v12 = vld [vmem:[%s10518_s1 + $0x50] ss:$8 sps:$4 sm:$0xff]   ;;  %v5569_v13 = vld [vmem:[%s10518_s1 + $0x64] ss:$8 sps:$4 sm:$0xff]  }
  0x1a   : > { %s11062_s13 = smov (!%p274_p10, %s5178_s13), 63  ;;  %v5571_v14 = vld [vmem:[%s10518_s1 + $0x60] ss:$8 sps:$4 sm:$0xff]   ;;  %v5572_v15 = vld [vmem:[%s10518_s1 + $0x74] ss:$8 sps:$4 sm:$0xff]   ;;  %s5177_s23 = sshll.u32 %s270_s22, 8 }
  0x1b   : > { %s5179_s9 = sshll.u32 %s11062_s13, 3  ;;  %v5574_v16 = vld [vmem:[%s10518_s1 + $0x70] ss:$8 sps:$4 sm:$0xff]   ;;  %v5577_v21 = vld [vmem:[%s10520_s3 + $0x4] ss:$8 sps:$4 sm:$0xff]   ;;  %s10253_s29 = scalar_lea.vmem [#allocation2], %s5177_s23 }
  0x1c   : > { %440 = vmatpush1.bf16.msra.mxu0 %v5556_v4  ;;  %5502 = vmatpush1.bf16.msra.mxu1 %v5556_v4  ;;  %s6547_s18 = scalar_lea.vmem %s10517_s0, %s5179_s9  ;;  %v5575_v24 = vld [vmem:[%s10520_s3] ss:$8 sps:$4 sm:$0xff]   ;;  %v5580_v25 = vld [vmem:[%s10520_s3 + $0x14] ss:$8 sps:$4 sm:$0xff]   ;;  %v5578_v30 = vld [vmem:[%s10520_s3 + $0x10] ss:$8 sps:$4 sm:$0xff]  }
  0x1d   : > { %441 = vmatprep.subr.bf16.mxu0 %v5557_v5  ;;  %5495 = vmatprep.subr.bf16.mxu1 %v5557_v5  ;;  %v281_v17 = vld [vmem:[%s6547_s18] sm:$0xff]  ;;  %v282_v18 = vld [vmem:[%s6547_s18 + $0x8] sm:$0xff]  ;;  %v283_v26 = vld [vmem:[%s6547_s18 + $0x10] sm:$0xff]  ;;  %s5380_s8 = sshll.u32 %s6472_s28, 12  ;;  %s5111_s9 = sshll.u32 %s10253_s29, 4  ;;  %s10469_s9 = int_to_ptr.vmem [resolvable:$true] %s5111_s9 }
  0x1e   : > { %v297_v19 = vld [vmem:[%s6547_s18 + $0x80] sm:$0xff]  ;;  %v298_v20 = vld [vmem:[%s6547_s18 + $0x88] sm:$0xff]  ;;  %v313_v22 = vpack.c.bf16 %v282_v18, %v281_v17  ;;  %v284_v27 = vld [vmem:[%s6547_s18 + $0x18] sm:$0xff]  ;;  %s10467_s16 = scalar_lea.hbm %s10524_s7, %s5380_s8  ;;  %s10476_s28 = scalar_lea.sflag [#allocation3], %s270_s22 }
  0x1f   : > { %v321_v23 = vpack.c.bf16 %v298_v20, %v297_v19  ;;  %v299_v28 = vld [vmem:[%s6547_s18 + $0x90] sm:$0xff]  ;;  %v300_v29 = vld [vmem:[%s6547_s18 + $0x98] sm:$0xff]  ;;  %v5583_v31 = vld [vmem:[%s10520_s3 + $0x24] ss:$8 sps:$4 sm:$0xff]   ;;  %v314_v32 = vpack.c.bf16 %v284_v27, %v283_v26  ;;  %s6343_s17 = scalar_lea.vmem %s10469_s9, 4096  ;;  %s6408_s19 = smov [#allocation2]  }
  0x20   : > { %442 = vmatpush1.bf16.msra.mxu0 %v5559_v6  ;;  %5503 = vmatpush1.bf16.msra.mxu1 %v5559_v6  ;;  %v322_v33 = vpack.c.bf16 %v300_v29, %v299_v28  ;;  %v5581_v34 = vld [vmem:[%s10520_s3 + $0x20] ss:$8 sps:$4 sm:$0xff]   ;;  %v5586_v35 = vld [vmem:[%s10520_s3 + $0x34] ss:$8 sps:$4 sm:$0xff]   ;;  %v5584_v40 = vld [vmem:[%s10520_s3 + $0x30] ss:$8 sps:$4 sm:$0xff]   ;;  %p6344_p11 = scmp.ne.s32.totalorder %s10469_s9, %s6343_s17 }
  0x21   : > { %443 = vmatprep.subr.bf16.mxu0 %v5560_v7  ;;  %5496 = vmatprep.subr.bf16.mxu1 %v5560_v7  ;;  %v285_v36 = vld [vmem:[%s6547_s18 + $0x20] sm:$0xff]  ;;  %v286_v37 = vld [vmem:[%s6547_s18 + $0x28] sm:$0xff]  ;;  %v5592_v45 = vld [vmem:[%s10520_s3 + $0x54] ss:$8 sps:$4 sm:$0xff]   ;;  %s6347_s20 = sshll.u32 %s6408_s19, 4  ;;  %s6348_s20 = int_to_ptr.vmem [resolvable:$false] %s6347_s20 }
  0x22   : > { %v301_v38 = vld [vmem:[%s6547_s18 + $0xa0] sm:$0xff]  ;;  %v302_v39 = vld [vmem:[%s6547_s18 + $0xa8] sm:$0xff]  ;;  %v315_v42 = vpack.c.bf16 %v286_v37, %v285_v36  ;;  %v287_v46 = vld [vmem:[%s6547_s18 + $0x30] sm:$0xff]  ;;  %p6345_p12 = pnand %p6344_p11, %p6489_p5  ;;  %s6349_s13 = scalar_lea.vmem %s6348_s20, 8192 }
  0x23   : > { %v5589_v41 = vld [vmem:[%s10520_s3 + $0x44] ss:$8 sps:$4 sm:$0xff]   ;;  %v323_v43 = vpack.c.bf16 %v302_v39, %v301_v38  ;;  %v5587_v44 = vld [vmem:[%s10520_s3 + $0x40] ss:$8 sps:$4 sm:$0xff]   ;;  %v288_v47 = vld [vmem:[%s6547_s18 + $0x38] sm:$0xff]  ;;  %p6350_p0 = scmp.lt.s32.totalorder %s10469_s9, %s6348_s20  ;;  %p6351_p1 = scmp.lt.s32.totalorder %s6349_s13, %s6343_s17 }
  0x24   : > { %444 = vmatpush1.bf16.msra.mxu0 %v5562_v8  ;;  %5504 = vmatpush1.bf16.msra.mxu1 %v5562_v8  ;;  %v303_v48 = vld [vmem:[%s6547_s18 + $0xb0] sm:$0xff]  ;;  %v304_v49 = vld [vmem:[%s6547_s18 + $0xb8] sm:$0xff]  ;;  %v5595_v51 = vld [vmem:[%s10520_s3 + $0x64] ss:$8 sps:$4 sm:$0xff]   ;;  %v316_v52 = vpack.c.bf16 %v288_v47, %v287_v46  ;;  %p6346_p13 = pneg %p6345_p12 }
  0x25   : > { %445 = vmatprep.subr.bf16.mxu0 %v5563_v9  ;;  %5497 = vmatprep.subr.bf16.mxu1 %v5563_v9  ;;  %v5590_v50 = vld [vmem:[%s10520_s3 + $0x50] ss:$8 sps:$4 sm:$0xff]   ;;  %v324_v53 = vpack.c.bf16 %v304_v49, %v303_v48  ;;  %v5593_v54 = vld [vmem:[%s10520_s3 + $0x60] ss:$8 sps:$4 sm:$0xff]   ;;  %v5598_v55 = vld [vmem:[%s10520_s3 + $0x74] ss:$8 sps:$4 sm:$0xff]   ;;  %p6352_p2 = por %p6351_p1, %p6350_p0 }
  0x26   : > { %v289_v56 = vld [vmem:[%s6547_s18 + $0x40] sm:$0xff]  ;;  %v290_v57 = vld [vmem:[%s6547_s18 + $0x48] sm:$0xff]  ;;  %v5596_v60 = vld [vmem:[%s10520_s3 + $0x70] ss:$8 sps:$4 sm:$0xff]  }
  0x27   : > { %v305_v58 = vld [vmem:[%s6547_s18 + $0xc0] sm:$0xff]  ;;  %v306_v59 = vld [vmem:[%s6547_s18 + $0xc8] sm:$0xff]  ;;  %v317_v61 = vpack.c.bf16 %v290_v57, %v289_v56  ;;  %v291_v63 = vld [vmem:[%s6547_s18 + $0x50] sm:$0xff]  ;;  %p6353_p3 = pnand %p6352_p2, %p6346_p13 }
  0x28   : > { %446 = vmatpush1.bf16.msra.mxu0 %v5565_v10  ;;  %5505 = vmatpush1.bf16.msra.mxu1 %v5565_v10  ;;  %v325_v62 = vpack.c.bf16 %v306_v59, %v305_v58  ;;  %v292_v0 = vld [vmem:[%s6547_s18 + $0x58] sm:$0xff]  ;;  %v307_v1 = vld [vmem:[%s6547_s18 + $0xd0] sm:$0xff]  ;;  %v293_v6 = vld [vmem:[%s6547_s18 + $0x60] sm:$0xff] }
  0x29   : > { %447 = vmatprep.subr.bf16.mxu0 %v5566_v11  ;;  %5498 = vmatprep.subr.bf16.mxu1 %v5566_v11  ;;  %v308_v3 = vld [vmem:[%s6547_s18 + $0xd8] sm:$0xff]  ;;  %v318_v4 = vpack.c.bf16 %v292_v0, %v291_v63  ;;  %v294_v7 = vld [vmem:[%s6547_s18 + $0x68] sm:$0xff]  ;;  %v309_v8 = vld [vmem:[%s6547_s18 + $0xe0] sm:$0xff] }
  0x2a   : > { %v326_v5 = vpack.c.bf16 %v308_v3, %v307_v1  ;;  %v310_v9 = vld [vmem:[%s6547_s18 + $0xe8] sm:$0xff]  ;;  %v319_v10 = vpack.c.bf16 %v294_v7, %v293_v6  ;;  %v5602_v20 = vld [vmem:[%s10520_s3 + $0x90] ss:$8 sps:$4 sm:$0xff]   ;;  %v5616_v27 = vld [vmem:[%s10520_s3 + $0xd4] ss:$8 sps:$4 sm:$0xff]  }
  0x2b   : > { %v327_v11 = vpack.c.bf16 %v310_v9, %v309_v8  ;;  %v5601_v18 = vld [vmem:[%s10520_s3 + $0x84] ss:$8 sps:$4 sm:$0xff]   ;;  %v5599_v19 = vld [vmem:[%s10520_s3 + $0x80] ss:$8 sps:$4 sm:$0xff]   ;;  %v5614_v28 = vld [vmem:[%s10520_s3 + $0xd0] ss:$8 sps:$4 sm:$0xff]  }
  0x2c   : > { %448 = vmatpush1.bf16.msra.mxu0 %v5568_v12  ;;  %5506 = vmatpush1.bf16.msra.mxu1 %v5568_v12  ;;  %v295_v12 = vld [vmem:[%s6547_s18 + $0x70] sm:$0xff]  ;;  %v5611_v26 = vld [vmem:[%s10520_s3 + $0xc0] ss:$8 sps:$4 sm:$0xff]   ;;  %v5619_v29 = vld [vmem:[%s10520_s3 + $0xe4] ss:$8 sps:$4 sm:$0xff]  }
  0x2d   : > { %449 = vmatprep.subr.bf16.mxu0 %v5569_v13  ;;  %5499 = vmatprep.subr.bf16.mxu1 %v5569_v13  ;;  %v296_v13 = vld [vmem:[%s6547_s18 + $0x78] sm:$0xff]  ;;  %v345_v36 = vld [vmem:[%s10519_s2] sm:$0x3] }
  0x30   : > { %450 = vmatpush1.bf16.msra.mxu0 %v5571_v14  ;;  %5507 = vmatpush1.bf16.msra.mxu1 %v5571_v14  ;;  %v311_v14 = vld [vmem:[%s6547_s18 + $0xf0] sm:$0xff] }
  0x31   : > { %451 = vmatprep.subr.bf16.mxu0 %v5572_v15  ;;  %5500 = vmatprep.subr.bf16.mxu1 %v5572_v15  ;;  %v312_v15 = vld [vmem:[%s6547_s18 + $0xf8] sm:$0xff] }
  0x32   : > { %v328_v17 = vpack.c.bf16 %v312_v15, %v311_v14 }
  0x34   : > { %452 = vmatpush1.bf16.msra.mxu0 %v5574_v16  ;;  %5508 = vmatpush1.bf16.msra.mxu1 %v5574_v16  ;;  %v320_v16 = vpack.c.bf16 %v296_v13, %v295_v12 }
  0x35   : > { %1442 = vmatprep.subr.bf16.mxu1 %v5577_v21  ;;  %v5607_v21 = vld [vmem:[%s10520_s3 + $0xa4] ss:$8 sps:$4 sm:$0xff]  }
  0x37   : > { %470 = vmatmul.mubr.bf16.vlgmr.msra.gmra.mrb[0].mxu0 %v313_v22  ;;  %550 = vmatmul.mubr.bf16.vlgmr.msra.gmra.mrb[0].mxu1 %v321_v23  ;;  %v5605_v22 = vld [vmem:[%s10520_s3 + $0xa0] ss:$8 sps:$4 sm:$0xff]   ;;  %v5610_v23 = vld [vmem:[%s10520_s3 + $0xb4] ss:$8 sps:$4 sm:$0xff]  }
  0x38   : > { %479 = vmatprep.mubr.bf16.mxu0 %v6407_v2  ;;  %559 = vmatprep.mubr.bf16.mxu1 %v6407_v2 }
  0x39   : > { %1443 = vmatpush1.bf16.msra.mxu1 %v5575_v24  ;;  %v5608_v24 = vld [vmem:[%s10520_s3 + $0xb0] ss:$8 sps:$4 sm:$0xff]  }
  0x3a   : > { %1444 = vmatprep.subr.bf16.mxu1 %v5580_v25  ;;  %v5613_v25 = vld [vmem:[%s10520_s3 + $0xc4] ss:$8 sps:$4 sm:$0xff]  }
  0x3d   : > { %1445 = vmatpush1.bf16.msra.mxu1 %v5578_v30  ;;  %v5617_v30 = vld [vmem:[%s10520_s3 + $0xe0] ss:$8 sps:$4 sm:$0xff]  }
  0x3e   : > { %1446 = vmatprep.subr.bf16.mxu1 %v5583_v31  ;;  %v5622_v31 = vld [vmem:[%s10520_s3 + $0xf4] ss:$8 sps:$4 sm:$0xff]  }
  0x3f   : > { %480 = vmatmul.mubr.bf16.gmra.mrb[4].mxu0 %v314_v32  ;;  %560 = vmatmul.mubr.bf16.gmra.mrb[4].mxu1 %v322_v33  ;;  %v5620_v32 = vld [vmem:[%s10520_s3 + $0xf0] ss:$8 sps:$4 sm:$0xff]   ;;  %v347_v33 = vlaneseq }
  0x40   : > { %489 = vmatprep.mubr.bf16.mxu0 %v6407_v2  ;;  %569 = vmatprep.mubr.bf16.mxu1 %v6407_v2 }
  0x41   : > { %1447 = vmatpush1.bf16.msra.mxu1 %v5581_v34  ;;  %v348_v34 = vshrl.u32 %v347_v33, 7 }
  0x42   : > { %1448 = vmatprep.subr.bf16.mxu1 %v5586_v35 }
  0x43   : > { %v6697_v35 = vsub.s32 0, %v348_v34  ;;  %v6702_v37 = vsub.s32 1, %v348_v34 }
  0x45   : > { %1449 = vmatpush1.bf16.msra.mxu1 %v5584_v40  ;;  %10691 = vst [vmem:[#allocation5_spill] sm:$0xff] %v6697_v35  ;;  %10692 = vst [vmem:[#allocation6_spill] sm:$0xff] %v6702_v37  ;;  %v6705_v38 = vrot.slane %v345_v36, %v6697_v35  ;;  %v6708_v39 = vrot.slane %v345_v36, %v6702_v37 }
  0x46   : > { %1450 = vmatprep.subr.bf16.mxu1 %v5589_v41 }
  0x47   : > { %490 = vmatmul.mubr.bf16.gmra.mrb[8].mxu0 %v315_v42  ;;  %570 = vmatmul.mubr.bf16.gmra.mrb[8].mxu1 %v323_v43 }
  0x48   : > { %499 = vmatprep.mubr.bf16.mxu0 %v6407_v2  ;;  %579 = vmatprep.mubr.bf16.mxu1 %v6407_v2 }
  0x49   : > { %1451 = vmatpush1.bf16.msra.mxu1 %v5587_v44 }
  0x4a   : > { %1452 = vmatprep.subr.bf16.mxu1 %v5592_v45 }
  0x4d   : > { %1453 = vmatpush1.bf16.msra.mxu1 %v5590_v50 }
  0x4e   : > { %1454 = vmatprep.subr.bf16.mxu1 %v5595_v51 }
  0x4f   : > { %500 = vmatmul.mubr.bf16.gmra.mrb[12].mxu0 %v316_v52  ;;  %580 = vmatmul.mubr.bf16.gmra.mrb[12].mxu1 %v324_v53 }
  0x50   : > { %509 = vmatprep.mubr.bf16.mxu0 %v6407_v2  ;;  %589 = vmatprep.mubr.bf16.mxu1 %v6407_v2 }
  0x51   : > { %1455 = vmatpush1.bf16.msra.mxu1 %v5593_v54 }
  0x52   : > { %1456 = vmatprep.subr.bf16.mxu1 %v5598_v55 }
  0x55   : > { %1457 = vmatpush1.bf16.msra.mxu1 %v5596_v60 }
  0x56   : > { %1458 = vmatprep.subr.bf16.mxu1 %v5601_v18 }
  0x57   : > { %510 = vmatmul.mubr.bf16.gmra.mrb[16].mxu0 %v317_v61  ;;  %590 = vmatmul.mubr.bf16.gmra.mrb[16].mxu1 %v325_v62 }
  0x58   : > { %519 = vmatprep.mubr.bf16.mxu0 %v6407_v2  ;;  %599 = vmatprep.mubr.bf16.mxu1 %v6407_v2 }
  0x59   : > { %1459 = vmatpush1.bf16.msra.mxu1 %v5599_v19 }
  0x5f   : > { %520 = vmatmul.mubr.bf16.gmra.mrb[20].mxu0 %v318_v4  ;;  %600 = vmatmul.mubr.bf16.gmra.mrb[20].mxu1 %v326_v5 }
  0x60   : > { %529 = vmatprep.mubr.bf16.mxu0 %v6407_v2  ;;  %609 = vmatprep.mubr.bf16.mxu1 %v6407_v2 }
  0x67   : > { %530 = vmatmul.mubr.bf16.gmra.mrb[24].mxu0 %v319_v10  ;;  %610 = vmatmul.mubr.bf16.gmra.mrb[24].mxu1 %v327_v11 }
  0x68   : > { %539 = vmatprep.mubr.bf16.mxu0 %v6407_v2  ;;  %619 = vmatprep.mubr.bf16.mxu1 %v6407_v2  ;;  %v5604_v2 = vld [vmem:[%s10520_s3 + $0x94] ss:$8 sps:$4 sm:$0xff]  }
  0x69   : > { %1460 = vmatprep.subr.bf16.mxu1 %v5604_v2 }
  0x6a   : > { %1461 = vmatpush1.bf16.msra.mxu1 %v5602_v20 }
  0x6b   : > { %1462 = vmatprep.subr.bf16.mxu1 %v5607_v21 }
  0x6e   : > { %1463 = vmatpush1.bf16.msra.mxu1 %v5605_v22 }
  0x6f   : > { %540 = vmatmul.mubr.bf16.gmra.mrb[28].mxu0 %v320_v16  ;;  %620 = vmatmul.mubr.bf16.gmra.mrb[28].mxu1 %v328_v17 }
  0x70   : > { %1464 = vmatprep.subr.bf16.mxu1 %v5610_v23 }
  0x72   : > { %1465 = vmatpush1.bf16.msra.mxu1 %v5608_v24 }
  0x73   : > { %1466 = vmatprep.subr.bf16.mxu1 %v5613_v25 }
  0x76   : > { %1467 = vmatpush1.bf16.msra.mxu1 %v5611_v26 }
  0x77   : > { %1468 = vmatprep.subr.bf16.mxu1 %v5616_v27 }
  0x7a   : > { %1469 = vmatpush1.bf16.msra.mxu1 %v5614_v28 }
  0x7b   : > { %1470 = vmatprep.subr.bf16.mxu1 %v5619_v29 }
  0x7e   : > { %1471 = vmatpush1.bf16.msra.mxu1 %v5617_v30 }
  0x7f   : > { %1472 = vmatprep.subr.bf16.mxu1 %v5622_v31 }
  0x82   : > { %1473 = vmatpush1.bf16.msra.mxu1 %v5620_v32 }
 0x10a   : > { %v471_v40 = vpop.f32.mrb[0].mxu0  ;;  %v551_v41 = vpop.f32.mrb[0].mxu1 }
 0x10b   : > { %v6711_v42 = vadd.f32 %v471_v40, %v6705_v38  ;;  %v473_v43 = vpop.f32.mrb[1].mxu0  ;;  %v553_v44 = vpop.f32.mrb[1].mxu1  ;;  %v6737_v58 = vadd.f32 %v551_v41, %v6705_v38 }
 0x10c   : > { %v6714_v45 = vadd.f32 %v473_v43, %v6708_v39  ;;  %v475_v46 = vpop.f32.mrb[2].mxu0  ;;  %v6716_v47 = vpop.f32.mrb[2].mxu1  ;;  %v6747_v5 = vadd.f32 %v553_v44, %v6708_v39 }
 0x10d   : > { %v630_v48 = vmul.f32 %v6711_v42, %v6711_v42  ;;  %v6721_v49 = vadd.f32 %v475_v46, %v6705_v38  ;;  %v477_v50 = vpop.f32.mrb[3].mxu0  ;;  %v6723_v51 = vpop.f32.mrb[3].mxu1  ;;  %10693 = vst [vmem:[#allocation7_spill] sm:$0xff] %v6737_v58  ;;  %v662_v11 = vmul.f32 %v6737_v58, %v6737_v58 }
 0x10e   : > { %v631_v52 = vmul.f32 %v6714_v45, %v6714_v45  ;;  %v6728_v53 = vadd.f32 %v477_v50, %v6708_v39  ;;  %10694 = vst [vmem:[#allocation8_spill] sm:$0xff] %v6747_v5  ;;  %v663_v20 = vmul.f32 %v6747_v5, %v6747_v5 }
 0x10f   : > { %v694_v54 = vmul.f32 %v630_v48, %v6711_v42  ;;  %v632_v55 = vmul.f32 %v6721_v49, %v6721_v49  ;;  %v726_v23 = vmul.f32 %v662_v11, %v6737_v58 }
 0x110   : > { %v695_v56 = vmul.f32 %v631_v52, %v6714_v45  ;;  %v633_v57 = vmul.f32 %v6728_v53, %v6728_v53  ;;  %v727_v33 = vmul.f32 %v663_v20, %v6747_v5  ;;  %v6798_v52 = vadd.f32 %v6716_v47, %v6705_v38 }
 0x111   : > { %v696_v59 = vmul.f32 %v632_v55, %v6721_v49  ;;  %v758_v0 = vmul.f32 0.044715, %v694_v54  ;;  %v790_v41 = vmul.f32 0.044715, %v726_v23 }
 0x112   : > { %v759_v60 = vmul.f32 0.044715, %v695_v56  ;;  %v697_v61 = vmul.f32 %v633_v57, %v6728_v53  ;;  %v481_v62 = vpop.f32.mrb[4].mxu0  ;;  %v6741_v63 = vpop.f32.mrb[4].mxu1  ;;  %10695 = vst [vmem:[#allocation9_spill] sm:$0xff] %v6798_v52 }
 0x113   : > { %v760_v1 = vmul.f32 0.044715, %v696_v59  ;;  %v6744_v3 = vadd.f32 %v481_v62, %v6705_v38  ;;  %v483_v4 = vpop.f32.mrb[5].mxu0  ;;  %v6749_v6 = vpop.f32.mrb[5].mxu1  ;;  %v822_v18 = vadd.f32 %v758_v0, %v6711_v42  ;;  %v791_v56 = vmul.f32 0.044715, %v727_v33 }
 0x114   : > { %v823_v7 = vadd.f32 %v759_v60, %v6714_v45  ;;  %v761_v8 = vmul.f32 0.044715, %v697_v61  ;;  %v6753_v9 = vadd.f32 %v483_v4, %v6708_v39  ;;  %v485_v10 = vpop.f32.mrb[6].mxu0  ;;  %v6757_v12 = vpop.f32.mrb[6].mxu1  ;;  %v854_v60 = vadd.f32 %v790_v41, %v6737_v58 }
 0x115   : > { %v824_v13 = vadd.f32 %v760_v1, %v6721_v49  ;;  %v487_v14 = vpop.f32.mrb[7].mxu0  ;;  %v6760_v15 = vpop.f32.mrb[7].mxu1  ;;  %v6764_v17 = vadd.f32 %v485_v10, %v6705_v38  ;;  %v634_v19 = vmul.f32 %v6744_v3, %v6744_v3  ;;  %v886_v29 = vmul.f32 0.7978846, %v822_v18 }
 0x116   : > { %v825_v16 = vadd.f32 %v761_v8, %v6728_v53  ;;  %v6770_v2 = vadd.f32 %v487_v14, %v6708_v39  ;;  %v887_v21 = vmul.f32 0.7978846, %v823_v7  ;;  %v635_v22 = vmul.f32 %v6753_v9, %v6753_v9 }
 0x117   : > { %v888_v24 = vmul.f32 0.7978846, %v824_v13  ;;  %v636_v26 = vmul.f32 %v6764_v17, %v6764_v17  ;;  %v698_v30 = vmul.f32 %v634_v19, %v6744_v3  ;;  %v664_v4 = vmul.f32 %v6798_v52, %v6798_v52 }
 0x118   : > { %v889_v25 = vmul.f32 0.7978846, %v825_v16  ;;  %v637_v31 = vmul.f32 %v6770_v2, %v6770_v2  ;;  %5735 = vtanh.f32 %v887_v21  ;;  %v699_v36 = vmul.f32 %v635_v22, %v6753_v9 }
 0x119   : > { %5737 = vtanh.f32 %v888_v24  ;;  %v700_v50 = vmul.f32 %v636_v26, %v6764_v17  ;;  %v762_v54 = vmul.f32 0.044715, %v698_v30  ;;  %v855_v14 = vadd.f32 %v791_v56, %v6747_v5 }
 0x11a   : > { %v491_v27 = vpop.f32.mrb[8].mxu0  ;;  %v6779_v28 = vpop.f32.mrb[8].mxu1  ;;  %5739 = vtanh.f32 %v889_v25  ;;  %v701_v55 = vmul.f32 %v637_v31, %v6770_v2  ;;  %v763_v57 = vmul.f32 0.044715, %v699_v36  ;;  %v918_v21 = vmul.f32 0.7978846, %v854_v60 }
 0x11b   : > { %v493_v32 = vpop.f32.mrb[9].mxu0  ;;  %v6785_v34 = vpop.f32.mrb[9].mxu1  ;;  %v6791_v44 = vadd.f32 %v491_v27, %v6705_v38  ;;  %5741 = vtanh.f32 %v886_v29  ;;  %v764_v0 = vmul.f32 0.044715, %v700_v50  ;;  %v826_v8 = vadd.f32 %v762_v54, %v6744_v3 }
 0x11c   : > { %v495_v40 = vpop.f32.mrb[10].mxu0  ;;  %v6788_v43 = vpop.f32.mrb[10].mxu1  ;;  %v6802_v59 = vadd.f32 %v493_v32, %v6708_v39  ;;  %v765_v10 = vmul.f32 0.044715, %v701_v55  ;;  %v827_v18 = vadd.f32 %v763_v57, %v6753_v9  ;;  %v6844_v33 = vadd.f32 %v6723_v51, %v6708_v39 }
 0x11d   : > { %v497_v46 = vpop.f32.mrb[11].mxu0  ;;  %v6793_v48 = vpop.f32.mrb[11].mxu1  ;;  %v638_v61 = vmul.f32 %v6791_v44, %v6791_v44  ;;  %v6808_v62 = vadd.f32 %v495_v40, %v6705_v38  ;;  %v828_v31 = vadd.f32 %v764_v0, %v6764_v17  ;;  %v890_v40 = vmul.f32 0.7978846, %v826_v8 }
 0x11e   : > { %v6811_v47 = vadd.f32 %v497_v46, %v6708_v39  ;;  %v639_v19 = vmul.f32 %v6802_v59, %v6802_v59  ;;  %10697 = vst [vmem:[#allocation11_spill] sm:$0xff] %v6844_v33  ;;  %v829_v41 = vadd.f32 %v765_v10, %v6770_v2  ;;  %v6847_v46 = vmul.f32 0.7978846, %v855_v14 }
 0x11f   : > { %v702_v23 = vmul.f32 %v638_v61, %v6791_v44  ;;  %v640_v24 = vmul.f32 %v6808_v62, %v6808_v62  ;;  %v6850_v50 = vmul.f32 %v664_v4, %v6798_v52  ;;  %v891_v55 = vmul.f32 0.7978846, %v827_v18 }
 0x120   : > { %v641_v25 = vmul.f32 %v6811_v47, %v6811_v47  ;;  %v703_v56 = vmul.f32 %v639_v19, %v6802_v59  ;;  %5743 = vtanh.f32 %v918_v21  ;;  %v892_v4 = vmul.f32 0.7978846, %v828_v31 }
 0x121   : > { %v766_v51 = vmul.f32 0.044715, %v702_v23  ;;  %v704_v61 = vmul.f32 %v640_v24, %v6808_v62  ;;  %5745 = vtanh.f32 %v890_v40  ;;  %v893_v19 = vmul.f32 0.7978846, %v829_v41 }
 0x122   : > { %v501_v1 = vpop.f32.mrb[12].mxu0  ;;  %v6815_v7 = vpop.f32.mrb[12].mxu1  ;;  %v705_v0 = vmul.f32 %v641_v25, %v6811_v47  ;;  %5747 = vtanh.f32 %v891_v55 }
 0x123   : > { %v6819_v11 = vadd.f32 %v501_v1, %v6705_v38  ;;  %v503_v13 = vpop.f32.mrb[13].mxu0  ;;  %v6822_v16 = vpop.f32.mrb[13].mxu1  ;;  %v768_v35 = vmul.f32 0.044715, %v704_v61  ;;  %5749 = vtanh.f32 %v893_v19 }
 0x124   : > { %v505_v20 = vpop.f32.mrb[14].mxu0  ;;  %v6827_v22 = vpop.f32.mrb[14].mxu1  ;;  %v6835_v26 = vadd.f32 %v503_v13, %v6708_v39  ;;  %v769_v58 = vmul.f32 0.044715, %v705_v0  ;;  %5751 = vtanh.f32 %v892_v4 }
 0x125   : > { %v507_v27 = vpop.f32.mrb[15].mxu0  ;;  %v6837_v29 = vpop.f32.mrb[15].mxu1  ;;  %v642_v32 = vmul.f32 %v6819_v11, %v6819_v11  ;;  %v6858_v1 = vadd.f32 %v505_v20, %v6705_v38  ;;  %v767_v20 = vmul.f32 0.044715, %v703_v56  ;;  %5753 = vtanh.f32 %v6847_v46 }
 0x126   : > { %10696 = vst [vmem:[#allocation10_spill] sm:$0xff] %v6837_v29  ;;  %v5736_v30 = vpop.eup %5735  ;;  %v643_v57 = vmul.f32 %v6835_v26, %v6835_v26  ;;  %v6862_v13 = vadd.f32 %v507_v27, %v6708_v39  ;;  %v830_v27 = vadd.f32 %v766_v51, %v6791_v44 }
 0x127   : > { %v5738_v36 = vpop.eup %5737  ;;  %v706_v10 = vmul.f32 %v642_v32, %v6819_v11  ;;  %v1015_v23 = vadd.f32 1.0, %v5736_v30  ;;  %v644_v40 = vmul.f32 %v6858_v1, %v6858_v1  ;;  %v831_v0 = vadd.f32 %v767_v20, %v6802_v59 }
 0x128   : > { %v5740_v54 = vpop.eup %5739  ;;  %v1016_v8 = vadd.f32 1.0, %v5738_v36  ;;  %v707_v31 = vmul.f32 %v643_v57, %v6835_v26  ;;  %v645_v55 = vmul.f32 %v6862_v13, %v6862_v13 }
 0x129   : > { %v5742_v60 = vpop.eup %5741  ;;  %v1017_v24 = vadd.f32 1.0, %v5740_v54  ;;  %v770_v5 = vmul.f32 0.044715, %v706_v10  ;;  %v833_v10 = vadd.f32 %v769_v58, %v6811_v47 }
 0x12a   : > { %v511_v14 = vpop.f32.mrb[16].mxu0  ;;  %v6864_v18 = vpop.f32.mrb[16].mxu1  ;;  %v1014_v25 = vadd.f32 1.0, %v5742_v60  ;;  %v1080_v54 = vmul.f32 0.5, %v1016_v8  ;;  %v1079_v60 = vmul.f32 0.5, %v1015_v23  ;;  %v832_v8 = vadd.f32 %v768_v35, %v6808_v62 }
 0x12b   : > { %10698 = vst [vmem:[#allocation12_spill] sm:$0xff] %v6864_v18  ;;  %v513_v21 = vpop.f32.mrb[17].mxu0  ;;  %v6866_v37 = vpop.f32.mrb[17].mxu1  ;;  %v6879_v56 = vadd.f32 %v511_v14, %v6705_v38  ;;  %v1081_v51 = vmul.f32 0.5, %v1017_v24  ;;  %v709_v23 = vmul.f32 %v645_v55, %v6862_v13 }
 0x12c   : > { %10699 = vst [vmem:[#allocation13_spill] sm:$0xff] %v6866_v37  ;;  %v515_v36 = vpop.f32.mrb[18].mxu0  ;;  %v6869_v32 = vpop.f32.mrb[18].mxu1  ;;  %v6882_v57 = vadd.f32 %v513_v21, %v6708_v39  ;;  %v1078_v61 = vmul.f32 0.5, %v1014_v25  ;;  %v708_v37 = vmul.f32 %v644_v40, %v6858_v1  ;;  %v6891_v19 = vmul.f32 %v1080_v54, %v6721_v49 }
 0x12d   : > { %10700 = vst [vmem:[#allocation14_spill] sm:$0xff] %v6869_v32  ;;  %v517_v41 = vpop.f32.mrb[19].mxu0  ;;  %v6874_v30 = vpop.f32.mrb[19].mxu1  ;;  %10702 = vst [vmem:[#allocation16_spill] sm:$0xff] %v6879_v56  ;;  %v771_v32 = vmul.f32 0.044715, %v707_v31  ;;  %v834_v21 = vadd.f32 %v770_v5, %v6819_v11  ;;  %v646_v4 = vmul.f32 %v6879_v56, %v6879_v56  ;;  %v6902_v58 = vadd.f32 %v515_v36, %v6705_v38 }
 0x12e   : > { %10701 = vst [vmem:[#allocation15_spill] sm:$0xff] %v6874_v30  ;;  %v894_v30 = vmul.f32 0.7978846, %v830_v27  ;;  %v6888_v14 = vpop.eup %5743  ;;  %10704 = vst [vmem:[#allocation18_spill] sm:$0xff] %v6891_v19  ;;  %v647_v35 = vmul.f32 %v6882_v57, %v6882_v57  ;;  %v6905_v20 = vmul.f32 %v1079_v60, %v6714_v45  ;;  %v6908_v49 = vmul.f32 %v1081_v51, %v6728_v53 }
 0x12f   : > { %10703 = vst [vmem:[#allocation17_spill] sm:$0xff] %v6888_v14  ;;  %10706 = vst [vmem:[#allocation20_spill] sm:$0xff] %v6902_v58  ;;  %v6913_v27 = vmul.f32 %v1078_v61, %v6711_v42  ;;  %v895_v40 = vmul.f32 0.7978846, %v831_v0  ;;  %v835_v54 = vadd.f32 %v771_v32, %v6835_v26  ;;  %v5746_v14 = vpop.eup %5745  ;;  %v896_v45 = vmul.f32 0.7978846, %v832_v8 }
 0x130   : > { %10707 = vst [vmem:[#allocation21_spill] sm:$0xff] %v6905_v20  ;;  %10708 = vst [vmem:[#allocation22_spill] sm:$0xff] %v6908_v49  ;;  %v772_v60 = vmul.f32 0.044715, %v708_v37  ;;  %v6920_v53 = vadd.f32 %v517_v41, %v6708_v39  ;;  %v1207_v51 = vpack.c.bf16 %v6908_v49, %v6905_v20  ;;  %v5748_v61 = vpop.eup %5747  ;;  %v897_v32 = vmul.f32 0.7978846, %v833_v10 }
 0x131   : > { %10710 = vst [vmem:[#allocation24_spill] sm:$0xff] %v6913_v27  ;;  %v1206_v46 = vpack.c.bf16 %v6891_v19, %v6913_v27  ;;  %v773_v0 = vmul.f32 0.044715, %v709_v23  ;;  %5755 = vtanh.f32 %v894_v30  ;;  %v898_v37 = vmul.f32 0.7978846, %v834_v21 }
 0x132   : > { %v521_v24 = vpop.f32.mrb[20].mxu0  ;;  %v6897_v25 = vpop.f32.mrb[20].mxu1  ;;  %v711_v41 = vmul.f32 %v647_v35, %v6882_v57  ;;  %v648_v8 = vmul.f32 %v6902_v58, %v6902_v58  ;;  %1474 = vmatprep.mubr.bf16.mxu1 %v1207_v51  ;;  %5757 = vtanh.f32 %v895_v40  ;;  %v899_v49 = vmul.f32 0.7978846, %v835_v54 }
 0x133   : > { %10705 = vst [vmem:[#allocation19_spill] sm:$0xff] %v6897_v25  ;;  %v523_v5 = vpop.f32.mrb[21].mxu0  ;;  %v6910_v31 = vpop.f32.mrb[21].mxu1  ;;  %1475 = vmatmul.mubr.bf16.vlgmr.msra.gmra.mrb[32].mxu1 %v1206_v46  ;;  %v665_v20 = vmul.f32 %v6844_v33, %v6844_v33  ;;  %5759 = vtanh.f32 %v896_v45  ;;  %v836_v10 = vadd.f32 %v772_v60, %v6858_v1  ;;  %v649_v30 = vmul.f32 %v6920_v53, %v6920_v53 }
 0x134   : > { %10709 = vst [vmem:[#allocation23_spill] sm:$0xff] %v6910_v31  ;;  %v525_v55 = vpop.f32.mrb[22].mxu0  ;;  %v6917_v36 = vpop.f32.mrb[22].mxu1  ;;  %v6940_v21 = vadd.f32 %v521_v24, %v6705_v38  ;;  %5761 = vtanh.f32 %v897_v32  ;;  %v1019_v40 = vadd.f32 1.0, %v5748_v61  ;;  %v775_v45 = vmul.f32 0.044715, %v711_v41 }
 0x135   : > { %10711 = vst [vmem:[#allocation25_spill] sm:$0xff] %v6917_v36  ;;  %v6924_v31 = vpop.f32.mrb[23].mxu0  ;;  %v6926_v42 = vpop.f32.mrb[23].mxu1  ;;  %v710_v36 = vmul.f32 %v646_v4, %v6879_v56  ;;  %v837_v4 = vadd.f32 %v773_v0, %v6862_v13  ;;  %5763 = vtanh.f32 %v898_v37  ;;  %v712_v60 = vmul.f32 %v648_v8, %v6902_v58 }
 0x136   : > { %10712 = vst [vmem:[#allocation26_spill] sm:$0xff] %v6926_v42  ;;  %v5750_v42 = vpop.eup %5749  ;;  %v792_v46 = vmul.f32 0.044715, %v6850_v50  ;;  %5765 = vtanh.f32 %v899_v49  ;;  %v729_v32 = vmul.f32 %v665_v20, %v6844_v33  ;;  %v713_v37 = vmul.f32 %v649_v30, %v6920_v53 }
 0x137   : > { %v5752_v23 = vpop.eup %5751  ;;  %v774_v35 = vmul.f32 0.044715, %v710_v36  ;;  %v1021_v0 = vadd.f32 1.0, %v5750_v42  ;;  %v1083_v36 = vmul.f32 0.5, %v1019_v40  ;;  %v650_v41 = vmul.f32 %v6940_v21, %v6940_v21 }
 0x138   : > { %v6962_v50 = vadd.f32 %v523_v5, %v6708_v39  ;;  %v6964_v8 = vpop.eup %5753  ;;  %v901_v49 = vmul.f32 0.7978846, %v837_v4  ;;  %v1018_v40 = vadd.f32 1.0, %v5746_v14  ;;  %v776_v30 = vmul.f32 0.044715, %v712_v60 }
 0x139   : > { %10716 = vst [vmem:[#allocation30_spill] sm:$0xff] %v6964_v8  ;;  %v838_v20 = vadd.f32 %v774_v35, %v6879_v56  ;;  %v1085_v42 = vmul.f32 0.5, %v1021_v0  ;;  %v6974_v18 = vadd.f32 %v525_v55, %v6705_v38  ;;  %v6977_v5 = vmul.f32 %v1083_v36, %v6753_v9 }
 0x13a   : > { %v6943_v54 = vpop.f32.mrb[24].mxu0  ;;  %v6945_v51 = vpop.f32.mrb[24].mxu1  ;;  %v1020_v35 = vadd.f32 1.0, %v5752_v23  ;;  %v1082_v14 = vmul.f32 0.5, %v1018_v40  ;;  %v777_v8 = vmul.f32 0.044715, %v713_v37  ;;  %v6989_v55 = vadd.f32 %v6924_v31, %v6708_v39 }
 0x13b   : > { %10713 = vst [vmem:[#allocation27_spill] sm:$0xff] %v6945_v51  ;;  %v6949_v27 = vpop.f32.mrb[25].mxu0  ;;  %v6951_v24 = vpop.f32.mrb[25].mxu1  ;;  %v900_v51 = vmul.f32 0.7978846, %v836_v10  ;;  %v839_v10 = vadd.f32 %v775_v45, %v6882_v57  ;;  %10718 = vst [vmem:[#allocation32_spill] sm:$0xff] %v6977_v5  ;;  %v6980_v4 = vmul.f32 %v1085_v42, %v6770_v2  ;;  %v651_v45 = vmul.f32 %v6962_v50, %v6962_v50 }
 0x13c   : > { %10714 = vst [vmem:[#allocation28_spill] sm:$0xff] %v6951_v24  ;;  %v6954_v61 = vpop.f32.mrb[26].mxu0  ;;  %v6956_v19 = vpop.f32.mrb[26].mxu1  ;;  %v902_v9 = vmul.f32 0.7978846, %v838_v20  ;;  %v6995_v23 = vadd.f32 %v6741_v63, %v6705_v38  ;;  %v652_v20 = vmul.f32 %v6974_v18, %v6974_v18  ;;  %v840_v63 = vadd.f32 %v776_v30, %v6902_v58 }
 0x13d   : > { %10715 = vst [vmem:[#allocation29_spill] sm:$0xff] %v6956_v19  ;;  %v6967_v24 = vpop.f32.mrb[27].mxu0  ;;  %v6969_v25 = vpop.f32.mrb[27].mxu1  ;;  %v856_v19 = vadd.f32 %v792_v46, %v6798_v52  ;;  %10719 = vst [vmem:[#allocation33_spill] sm:$0xff] %v6980_v4  ;;  %v1209_v2 = vpack.c.bf16 %v6980_v4, %v6977_v5  ;;  %v1084_v46 = vmul.f32 0.5, %v1020_v35  ;;  %5767 = vtanh.f32 %v900_v51 }
 0x13e   : > { %10717 = vst [vmem:[#allocation31_spill] sm:$0xff] %v6969_v25  ;;  %v6982_v0 = vpop.eup %5755  ;;  %v714_v25 = vmul.f32 %v650_v41, %v6940_v21  ;;  %10720 = vst [vmem:[#allocation34_spill] sm:$0xff] %v6995_v23  ;;  %v903_v42 = vmul.f32 0.7978846, %v839_v10  ;;  %v793_v31 = vmul.f32 0.044715, %v729_v32  ;;  %v7011_v35 = vmul.f32 %v1082_v14, %v6744_v3 }
 0x13f   : > { %v5758_v60 = vpop.eup %5757  ;;  %1484 = vmatprep.mubr.bf16.mxu1 %v1209_v2  ;;  %v7018_v51 = vadd.f32 %v6749_v6, %v6708_v39  ;;  %v715_v2 = vmul.f32 %v651_v45, %v6962_v50  ;;  %v653_v3 = vmul.f32 %v6989_v55, %v6989_v55  ;;  %5769 = vtanh.f32 %v901_v49 }
 0x140   : > { %v7001_v41 = vpop.eup %5759  ;;  %10723 = vst [vmem:[#allocation37_spill] sm:$0xff] %v7011_v35  ;;  %v778_v30 = vmul.f32 0.044715, %v714_v25  ;;  %v7042_v25 = vadd.f32 %v6757_v12, %v6705_v38  ;;  %v920_v45 = vmul.f32 0.7978846, %v856_v19  ;;  %v716_v29 = vmul.f32 %v652_v20, %v6974_v18 }
 0x141   : > { %v5762_v5 = vpop.eup %5761  ;;  %10725 = vst [vmem:[#allocation39_spill] sm:$0xff] %v7018_v51  ;;  %5771 = vtanh.f32 %v902_v9  ;;  %v904_v58 = vmul.f32 0.7978846, %v840_v63  ;;  %v779_v12 = vmul.f32 0.044715, %v715_v2  ;;  %v717_v56 = vmul.f32 %v653_v3, %v6989_v55 }
 0x142   : > { %v6997_v36 = vpop.f32.mrb[28].mxu0  ;;  %v6999_v37 = vpop.f32.mrb[28].mxu1  ;;  %5773 = vtanh.f32 %v903_v42  ;;  %v668_v19 = vmul.f32 %v7042_v25, %v7042_v25  ;;  %v780_v20 = vmul.f32 0.044715, %v716_v29  ;;  %v1023_v63 = vadd.f32 1.0, %v5758_v60 }
 0x143   : > { %10721 = vst [vmem:[#allocation35_spill] sm:$0xff] %v6999_v37  ;;  %v7005_v40 = vpop.f32.mrb[29].mxu0  ;;  %v7007_v4 = vpop.f32.mrb[29].mxu1  ;;  %v7014_v37 = vmul.f32 %v1084_v46, %v6764_v17  ;;  %v666_v46 = vmul.f32 %v6995_v23, %v6995_v23  ;;  %5775 = vtanh.f32 %v920_v45  ;;  %v7062_v42 = vadd.f32 %v6943_v54, %v6705_v38 }
 0x144   : > { %10722 = vst [vmem:[#allocation36_spill] sm:$0xff] %v7007_v4  ;;  %v7020_v32 = vpop.f32.mrb[30].mxu0  ;;  %v7022_v10 = vpop.f32.mrb[30].mxu1  ;;  %v841_v4 = vadd.f32 %v777_v8, %v6920_v53  ;;  %v7046_v8 = vadd.f32 %v6760_v15, %v6708_v39  ;;  %v842_v15 = vadd.f32 %v778_v30, %v6940_v21  ;;  %5777 = vtanh.f32 %v904_v58 }
 0x145   : > { %10724 = vst [vmem:[#allocation38_spill] sm:$0xff] %v7014_v37  ;;  %10726 = vst [vmem:[#allocation40_spill] sm:$0xff] %v7022_v10  ;;  %v7024_v52 = vpop.eup %5763  ;;  %v7030_v17 = vpop.f32.mrb[31].mxu0  ;;  %v1208_v10 = vpack.c.bf16 %v7014_v37, %v7011_v35  ;;  %v667_v35 = vmul.f32 %v7018_v51, %v7018_v51  ;;  %v730_v49 = vmul.f32 %v666_v46, %v6995_v23  ;;  %v781_v3 = vmul.f32 0.044715, %v717_v56 }
 0x146   : > { %v7032_v14 = vpop.f32.mrb[31].mxu1  ;;  %v7034_v6 = vpop.eup %5765  ;;  %v905_v37 = vmul.f32 0.7978846, %v841_v4  ;;  %v669_v9 = vmul.f32 %v7046_v8, %v7046_v8  ;;  %v843_v2 = vadd.f32 %v779_v12, %v6962_v50  ;;  %v7073_v29 = vadd.f32 %v6954_v61, %v6705_v38 }
 0x147   : > { %10727 = vst [vmem:[#allocation41_spill] sm:$0xff] %v7032_v14  ;;  %v857_v14 = vadd.f32 %v793_v31, %v6844_v33  ;;  %1485 = vmatmul.mubr.bf16.gmra.mrb[36].mxu1 %v1208_v10  ;;  %v731_v4 = vmul.f32 %v667_v35, %v7018_v51  ;;  %v7066_v10 = vadd.f32 %v6949_v27, %v6708_v39  ;;  %v7068_v30 = vpop.eup %5767  ;;  %v906_v58 = vmul.f32 0.7978846, %v842_v15 }
 0x148   : > { %5779 = vtanh.f32 %v905_v37  ;;  %v794_v60 = vmul.f32 0.044715, %v730_v49  ;;  %v732_v35 = vmul.f32 %v668_v19, %v7042_v25  ;;  %v733_v54 = vmul.f32 %v669_v9, %v7046_v8 }
 0x149   : > { %v921_v31 = vmul.f32 0.7978846, %v857_v14  ;;  %v844_v27 = vadd.f32 %v780_v20, %v6974_v18  ;;  %v1025_v14 = vadd.f32 1.0, %v5762_v5  ;;  %v1087_v46 = vmul.f32 0.5, %v1023_v63  ;;  %v7086_v12 = vpop.eup %5769 }
 0x14a   : > { %v795_v45 = vmul.f32 0.044715, %v731_v4  ;;  %v654_v37 = vmul.f32 %v7062_v42, %v7062_v42  ;;  %v655_v56 = vmul.f32 %v7066_v10, %v7066_v10  ;;  %v7084_v61 = vadd.f32 %v6967_v24, %v6708_v39 }
 0x14b   : > { %5781 = vtanh.f32 %v921_v31  ;;  %v907_v15 = vmul.f32 0.7978846, %v843_v2  ;;  %v845_v49 = vadd.f32 %v781_v3, %v6989_v55  ;;  %v656_v5 = vmul.f32 %v7073_v29, %v7073_v29  ;;  %v7091_v9 = vpop.eup %5771 }
 0x14c   : > { %v1089_v19 = vmul.f32 0.5, %v1025_v14  ;;  %5783 = vtanh.f32 %v906_v58  ;;  %v858_v31 = vadd.f32 %v794_v60, %v6995_v23  ;;  %v796_v20 = vmul.f32 0.044715, %v732_v35  ;;  %v7094_v4 = vpop.eup %5773 }
 0x14d   : > { %v797_v63 = vmul.f32 0.044715, %v733_v54  ;;  %v7097_v24 = vmul.f32 %v1087_v46, %v6802_v59  ;;  %v1022_v3 = vadd.f32 1.0, %v6982_v0  ;;  %v1024_v33 = vadd.f32 1.0, %v7001_v41  ;;  %v7109_v54 = vpop.eup %5775 }
 0x14e   : > { %v7100_v2 = vmul.f32 %v1089_v19, %v6811_v47  ;;  %v859_v14 = vadd.f32 %v795_v45, %v7018_v51  ;;  %v718_v58 = vmul.f32 %v654_v37, %v7062_v42  ;;  %v719_v60 = vmul.f32 %v655_v56, %v7066_v10  ;;  %v7114_v19 = vpop.eup %5777  ;;  %v5623_v37 = vld [vmem:[%s10520_s3 + $0x100] ss:$8 sps:$4 sm:$0xff]   ;;  %v5625_v56 = vld [vmem:[%s10520_s3 + $0x104] ss:$8 sps:$4 sm:$0xff]  }
 0x14f   : > { %10728 = vst [vmem:[#allocation42_spill] sm:$0xff] %v7097_v24  ;;  %v657_v35 = vmul.f32 %v7084_v61, %v7084_v61  ;;  %v720_v59 = vmul.f32 %v656_v5, %v7073_v29  ;;  %v1086_v46 = vmul.f32 0.5, %v1022_v3  ;;  %v1088_v0 = vmul.f32 0.5, %v1024_v33  ;;  %2513 = vmatprep.subr.bf16.mxu0 %v5625_v56  ;;  %v5629_v56 = vld [vmem:[%s10520_s3 + $0x120] ss:$8 sps:$4 sm:$0xff]  }
 0x150   : > { %10729 = vst [vmem:[#allocation43_spill] sm:$0xff] %v7100_v2  ;;  %v1211_v47 = vpack.c.bf16 %v7100_v2, %v7097_v24  ;;  %5785 = vtanh.f32 %v907_v15  ;;  %v908_v41 = vmul.f32 0.7978846, %v844_v27  ;;  %v7118_v45 = vadd.f32 %v6779_v28, %v6705_v38  ;;  %v5628_v15 = vld [vmem:[%s10520_s3 + $0x114] ss:$8 sps:$4 sm:$0xff]   ;;  %2514 = vmatpush1.bf16.msra.mxu0 %v5623_v37 }
 0x151   : > { %v909_v3 = vmul.f32 0.7978846, %v845_v49  ;;  %v860_v33 = vadd.f32 %v796_v20, %v7042_v25  ;;  %v7130_v27 = vmul.f32 %v1086_v46, %v6791_v44  ;;  %v7133_v28 = vmul.f32 %v1088_v0, %v6808_v62  ;;  %v5626_v46 = vld [vmem:[%s10520_s3 + $0x110] ss:$8 sps:$4 sm:$0xff]   ;;  %2515 = vmatprep.subr.bf16.mxu0 %v5628_v15 }
 0x152   : > { %v7126_v5 = vpop.eup %5779  ;;  %1494 = vmatprep.mubr.bf16.mxu1 %v1211_v47  ;;  %v922_v2 = vmul.f32 0.7978846, %v858_v31  ;;  %v923_v24 = vmul.f32 0.7978846, %v859_v14  ;;  %v861_v23 = vadd.f32 %v797_v63, %v7046_v8  ;;  %v782_v51 = vmul.f32 0.044715, %v718_v58 }
 0x153   : > { %v783_v20 = vmul.f32 0.044715, %v719_v60  ;;  %v784_v47 = vmul.f32 0.044715, %v720_v59  ;;  %v721_v44 = vmul.f32 %v657_v35, %v7084_v61  ;;  %v1210_v62 = vpack.c.bf16 %v7133_v28, %v7130_v27  ;;  %v5631_v14 = vld [vmem:[%s10520_s3 + $0x124] ss:$8 sps:$4 sm:$0xff]  }
 0x154   : > { %5787 = vtanh.f32 %v908_v41  ;;  %v670_v31 = vmul.f32 %v7118_v45, %v7118_v45  ;;  %v7151_v63 = vadd.f32 %v6785_v34, %v6708_v39  ;;  %v924_v58 = vmul.f32 0.7978846, %v860_v33  ;;  %2516 = vmatpush1.bf16.msra.mxu0 %v5626_v46 }
 0x155   : > { %v7139_v49 = vpop.eup %5781  ;;  %5789 = vtanh.f32 %v909_v3  ;;  %1495 = vmatmul.mubr.bf16.gmra.mrb[40].mxu1 %v1210_v62  ;;  %v7158_v60 = vadd.f32 %v6788_v43, %v6705_v38  ;;  %v925_v59 = vmul.f32 0.7978846, %v861_v23  ;;  %v846_v0 = vadd.f32 %v782_v51, %v7062_v42  ;;  %2517 = vmatprep.subr.bf16.mxu0 %v5631_v14 }
 0x156   : > { %v7160_v35 = vpop.eup %5783  ;;  %5791 = vtanh.f32 %v922_v2  ;;  %v847_v34 = vadd.f32 %v783_v20, %v7066_v10  ;;  %v848_v41 = vadd.f32 %v784_v47, %v7073_v29  ;;  %v785_v37 = vmul.f32 0.044715, %v721_v44 }
 0x157   : > { %5793 = vtanh.f32 %v923_v24  ;;  %v734_v43 = vmul.f32 %v670_v31, %v7118_v45  ;;  %v671_v3 = vmul.f32 %v7151_v63, %v7151_v63  ;;  %v7173_v23 = vadd.f32 %v6793_v48, %v6708_v39  ;;  %v5634_v24 = vld [vmem:[%s10520_s3 + $0x134] ss:$8 sps:$4 sm:$0xff]  }
 0x158   : > { %v1027_v51 = vadd.f32 1.0, %v7034_v6  ;;  %5795 = vtanh.f32 %v924_v58  ;;  %v672_v2 = vmul.f32 %v7158_v60, %v7158_v60  ;;  %v7183_v33 = vadd.f32 %v6997_v36, %v6705_v38  ;;  %2518 = vmatpush1.bf16.msra.mxu0 %v5629_v56  ;;  %v5632_v36 = vld [vmem:[%s10520_s3 + $0x130] ss:$8 sps:$4 sm:$0xff]  }
 0x159   : > { %v910_v20 = vmul.f32 0.7978846, %v846_v0  ;;  %v7189_v48 = vadd.f32 %v7005_v40, %v6708_v39  ;;  %v1029_v6 = vadd.f32 1.0, %v7086_v12  ;;  %5797 = vtanh.f32 %v925_v59  ;;  %2519 = vmatprep.subr.bf16.mxu0 %v5634_v24  ;;  %v5637_v12 = vld [vmem:[%s10520_s3 + $0x144] ss:$8 sps:$4 sm:$0xff]  }
 0x15a   : > { %v7185_v15 = vpop.eup %5785  ;;  %v1091_v47 = vmul.f32 0.5, %v1027_v51  ;;  %v911_v44 = vmul.f32 0.7978846, %v847_v34  ;;  %v912_v62 = vmul.f32 0.7978846, %v848_v41  ;;  %v849_v46 = vadd.f32 %v785_v37, %v7084_v61 }
 0x15b   : > { %v798_v31 = vmul.f32 0.044715, %v734_v43  ;;  %v735_v14 = vmul.f32 %v671_v3, %v7151_v63  ;;  %v673_v40 = vmul.f32 %v7173_v23, %v7173_v23  ;;  %v1093_v58 = vmul.f32 0.5, %v1029_v6 }
 0x15c   : > { %v736_v59 = vmul.f32 %v672_v2, %v7158_v60  ;;  %v658_v0 = vmul.f32 %v7183_v33, %v7183_v33  ;;  %v7207_v34 = vadd.f32 %v7030_v17, %v6708_v39  ;;  %v1026_v41 = vadd.f32 1.0, %v7024_v52  ;;  %2520 = vmatpush1.bf16.msra.mxu0 %v5632_v36 }
 0x15d   : > { %v659_v56 = vmul.f32 %v7189_v48, %v7189_v48  ;;  %v7215_v43 = vmul.f32 %v1091_v47, %v6835_v26  ;;  %v7218_v3 = vmul.f32 %v1093_v58, %v6862_v13  ;;  %v1028_v51 = vadd.f32 1.0, %v7068_v30  ;;  %v5635_v26 = vld [vmem:[%s10520_s3 + $0x140] ss:$8 sps:$4 sm:$0xff]   ;;  %2521 = vmatprep.subr.bf16.mxu0 %v5637_v12 }
 0x15e   : > { %v7210_v37 = vpop.eup %5787  ;;  %5799 = vtanh.f32 %v910_v20  ;;  %v913_v17 = vmul.f32 0.7978846, %v849_v46  ;;  %v7225_v52 = vadd.f32 %v7020_v32, %v6705_v38  ;;  %v1090_v2 = vmul.f32 0.5, %v1026_v41  ;;  %v5640_v32 = vld [vmem:[%s10520_s3 + $0x154] ss:$8 sps:$4 sm:$0xff]  }
 0x15f   : > { %10730 = vst [vmem:[#allocation44_spill] sm:$0xff] %v7215_v43  ;;  %10731 = vst [vmem:[#allocation45_spill] sm:$0xff] %v7218_v3  ;;  %v7221_v24 = vpop.eup %5789  ;;  %v799_v13 = vmul.f32 0.044715, %v735_v14  ;;  %v737_v47 = vmul.f32 %v673_v40, %v7173_v23  ;;  %v1213_v30 = vpack.c.bf16 %v7218_v3, %v7215_v43  ;;  %v1092_v20 = vmul.f32 0.5, %v1028_v51 }
 0x160   : > { %v7230_v6 = vpop.eup %5791  ;;  %v862_v36 = vadd.f32 %v798_v31, %v7118_v45  ;;  %v800_v58 = vmul.f32 0.044715, %v736_v59  ;;  %v722_v41 = vmul.f32 %v658_v0, %v7183_v33  ;;  %v661_v14 = vmul.f32 %v7207_v34, %v7207_v34  ;;  %2522 = vmatpush1.bf16.msra.mxu0 %v5635_v26 }
 0x161   : > { %v7238_v46 = vpop.eup %5793  ;;  %v723_v40 = vmul.f32 %v659_v56, %v7189_v48  ;;  %1504 = vmatprep.mubr.bf16.mxu1 %v1213_v30  ;;  %v7246_v51 = vmul.f32 %v1090_v2, %v6819_v11  ;;  %v7249_v12 = vmul.f32 %v1092_v20, %v6858_v1  ;;  %v1031_v3 = vadd.f32 1.0, %v7094_v4  ;;  %v5638_v11 = vld [vmem:[%s10520_s3 + $0x150] ss:$8 sps:$4 sm:$0xff]   ;;  %2523 = vmatprep.subr.bf16.mxu0 %v5640_v32 }
 0x162   : > { %v7252_v43 = vpop.eup %5795  ;;  %5801 = vtanh.f32 %v911_v44  ;;  %v660_v31 = vmul.f32 %v7225_v52, %v7225_v52  ;;  %v7258_v59 = vadd.f32 %v6815_v7, %v6705_v38  ;;  %v1033_v0 = vadd.f32 1.0, %v7126_v5  ;;  %v5643_v7 = vld [vmem:[%s10520_s3 + $0x164] ss:$8 sps:$4 sm:$0xff]  }
 0x163   : > { %10732 = vst [vmem:[#allocation46_spill] sm:$0xff] %v7246_v51  ;;  %10733 = vst [vmem:[#allocation47_spill] sm:$0xff] %v7249_v12  ;;  %v863_v1 = vadd.f32 %v799_v13, %v7151_v63  ;;  %v801_v4 = vmul.f32 0.044715, %v737_v47  ;;  %v1212_v44 = vpack.c.bf16 %v7249_v12, %v7246_v51  ;;  %v1095_v56 = vmul.f32 0.5, %v1031_v3  ;;  %v7270_v2 = vpop.eup %5797 }
 0x164   : > { %5803 = vtanh.f32 %v912_v62  ;;  %v926_v5 = vmul.f32 0.7978846, %v862_v36  ;;  %v725_v26 = vmul.f32 %v661_v14, %v7207_v34  ;;  %v1097_v30 = vmul.f32 0.5, %v1033_v0  ;;  %2524 = vmatpush1.bf16.msra.mxu0 %v5638_v11  ;;  %v5641_v36 = vld [vmem:[%s10520_s3 + $0x160] ss:$8 sps:$4 sm:$0xff]  }
 0x165   : > { %v864_v20 = vadd.f32 %v800_v58, %v7158_v60  ;;  %v786_v13 = vmul.f32 0.044715, %v722_v41  ;;  %v787_v47 = vmul.f32 0.044715, %v723_v40  ;;  %1505 = vmatmul.mubr.bf16.gmra.mrb[44].mxu1 %v1212_v44  ;;  %v1030_v12 = vadd.f32 1.0, %v7091_v9  ;;  %2525 = vmatprep.subr.bf16.mxu0 %v5643_v7  ;;  %v10736_v44 = vld [vmem:[#allocation16_spill] sm:$0xff] }
 0x166   : > { %v724_v3 = vmul.f32 %v660_v31, %v7225_v52  ;;  %v674_v32 = vmul.f32 %v7258_v59, %v7258_v59  ;;  %v7279_v51 = vmul.f32 %v1095_v56, %v6882_v57  ;;  %v7282_v62 = vmul.f32 %v1097_v30, %v6920_v53  ;;  %v10738_v7 = vld [vmem:[#allocation20_spill] sm:$0xff] }
 0x167   : > { %v927_v58 = vmul.f32 0.7978846, %v863_v1  ;;  %v865_v41 = vadd.f32 %v801_v4, %v7173_v23  ;;  %v1032_v9 = vadd.f32 1.0, %v7114_v19  ;;  %v1094_v14 = vmul.f32 0.5, %v1030_v12 }
 0x168   : > { %10734 = vst [vmem:[#allocation48_spill] sm:$0xff] %v7279_v51  ;;  %10735 = vst [vmem:[#allocation49_spill] sm:$0xff] %v7282_v62  ;;  %v7289_v40 = vpop.eup %5799  ;;  %5805 = vtanh.f32 %v913_v17  ;;  %v789_v57 = vmul.f32 0.044715, %v725_v26  ;;  %v7293_v53 = vadd.f32 %v6822_v16, %v6708_v39  ;;  %v1215_v31 = vpack.c.bf16 %v7282_v62, %v7279_v51  ;;  %2526 = vmatpush1.bf16.msra.mxu0 %v5641_v36 }
 0x169   : > { %5807 = vtanh.f32 %v926_v5  ;;  %v928_v0 = vmul.f32 0.7978846, %v864_v20  ;;  %v851_v11 = vadd.f32 %v787_v47, %v7189_v48  ;;  %v1096_v1 = vmul.f32 0.5, %v1032_v9 }
 0x16a   : > { %v850_v19 = vadd.f32 %v786_v13, %v7183_v33  ;;  %v788_v12 = vmul.f32 0.044715, %v724_v3  ;;  %v738_v4 = vmul.f32 %v674_v32, %v7258_v59  ;;  %v7302_v17 = vadd.f32 %v6827_v22, %v6705_v38  ;;  %1514 = vmatprep.mubr.bf16.mxu1 %v1215_v31  ;;  %v10740_v13 = vld [vmem:[#allocation10_spill] sm:$0xff]  ;;  %v10741_v31 = vld [vmem:[#allocation12_spill] sm:$0xff] }
 0x16b   : > { %5809 = vtanh.f32 %v927_v58  ;;  %v929_v16 = vmul.f32 0.7978846, %v865_v41  ;;  %v7305_v56 = vmul.f32 %v1094_v14, %v10736_v44  ;;  %v7308_v5 = vmul.f32 %v1096_v1, %v10738_v7 }
 0x16c   : > { %v5802_v26 = vpop.eup %5801  ;;  %v853_v30 = vadd.f32 %v789_v57, %v7207_v34  ;;  %v675_v20 = vmul.f32 %v7293_v53, %v7293_v53  ;;  %v7315_v22 = vadd.f32 %v10740_v13, %v6708_v39  ;;  %v1035_v47 = vadd.f32 1.0, %v7185_v15 }
 0x16d   : > { %10737 = vst [vmem:[#allocation16_spill] sm:$0xff] %v7305_v56  ;;  %10739 = vst [vmem:[#allocation20_spill] sm:$0xff] %v7308_v5  ;;  %5811 = vtanh.f32 %v928_v0  ;;  %v915_v3 = vmul.f32 0.7978846, %v851_v11  ;;  %v1214_v32 = vpack.c.bf16 %v7308_v5, %v7305_v56  ;;  %v1037_v36 = vadd.f32 1.0, %v7221_v24 }
 0x16e   : > { %v7321_v58 = vpop.eup %5803  ;;  %v852_v41 = vadd.f32 %v788_v12, %v7225_v52  ;;  %v802_v9 = vmul.f32 0.044715, %v738_v4  ;;  %v676_v14 = vmul.f32 %v7302_v17, %v7302_v17  ;;  %v1099_v57 = vmul.f32 0.5, %v1035_v47  ;;  %v10742_v4 = vld [vmem:[#allocation13_spill] sm:$0xff] }
 0x16f   : > { %5813 = vtanh.f32 %v929_v16  ;;  %v7328_v15 = vadd.f32 %v10741_v31, %v6705_v38  ;;  %1515 = vmatmul.mubr.bf16.gmra.mrb[48].mxu1 %v1214_v32  ;;  %v1101_v0 = vmul.f32 0.5, %v1037_v36  ;;  %v1034_v11 = vadd.f32 1.0, %v7160_v35 }
 0x170   : > { %v917_v1 = vmul.f32 0.7978846, %v853_v30  ;;  %v739_v24 = vmul.f32 %v675_v20, %v7293_v53  ;;  %v677_v12 = vmul.f32 %v7315_v22, %v7315_v22  ;;  %v7336_v44 = vadd.f32 %v10742_v4, %v6708_v39 }
 0x171   : > { %v7339_v16 = vmul.f32 %v1099_v57, %v6962_v50  ;;  %v7342_v7 = vmul.f32 %v1101_v0, %v6989_v55  ;;  %v1036_v13 = vadd.f32 1.0, %v7210_v37  ;;  %v1098_v47 = vmul.f32 0.5, %v1034_v11  ;;  %v10745_v50 = vld [vmem:[#allocation14_spill] sm:$0xff]  ;;  %v10746_v11 = vld [vmem:[#allocation15_spill] sm:$0xff] }
 0x172   : > { %v5806_v35 = vpop.eup %5805  ;;  %v914_v30 = vmul.f32 0.7978846, %v850_v19  ;;  %5815 = vtanh.f32 %v915_v3  ;;  %v866_v20 = vadd.f32 %v802_v9, %v7258_v59  ;;  %v740_v32 = vmul.f32 %v676_v14, %v7302_v17 }
 0x173   : > { %10743 = vst [vmem:[#allocation10_spill] sm:$0xff] %v7339_v16  ;;  %10744 = vst [vmem:[#allocation12_spill] sm:$0xff] %v7342_v7  ;;  %v7347_v36 = vpop.eup %5807  ;;  %v678_v31 = vmul.f32 %v7328_v15, %v7328_v15  ;;  %v7353_v57 = vadd.f32 %v10745_v50, %v6705_v38  ;;  %v1217_v55 = vpack.c.bf16 %v7342_v7, %v7339_v16  ;;  %v1100_v37 = vmul.f32 0.5, %v1036_v13 }
 0x174   : > { %v916_v0 = vmul.f32 0.7978846, %v852_v41  ;;  %5817 = vtanh.f32 %v917_v1  ;;  %v803_v19 = vmul.f32 0.044715, %v739_v24  ;;  %v741_v3 = vmul.f32 %v677_v12, %v7315_v22  ;;  %v10749_v1 = vld [vmem:[#allocation19_spill] sm:$0xff] }
 0x175   : > { %v7358_v9 = vpop.eup %5809  ;;  %v679_v14 = vmul.f32 %v7336_v44, %v7336_v44  ;;  %v7364_v4 = vadd.f32 %v10746_v11, %v6708_v39  ;;  %1524 = vmatprep.mubr.bf16.mxu1 %v1217_v55  ;;  %v7367_v50 = vmul.f32 %v1098_v47, %v6940_v21  ;;  %v7370_v13 = vmul.f32 %v1100_v37, %v6974_v18 }
 0x176   : > { %5819 = vtanh.f32 %v914_v30  ;;  %v804_v41 = vmul.f32 0.044715, %v740_v32  ;;  %v7374_v24 = vadd.f32 %v10749_v1, %v6705_v38  ;;  %v1039_v12 = vadd.f32 1.0, %v5802_v26 }
 0x177   : > { %10747 = vst [vmem:[#allocation13_spill] sm:$0xff] %v7367_v50  ;;  %10748 = vst [vmem:[#allocation14_spill] sm:$0xff] %v7370_v13  ;;  %v7376_v7 = vpop.eup %5811  ;;  %v930_v16 = vmul.f32 0.7978846, %v866_v20  ;;  %v742_v11 = vmul.f32 %v678_v31, %v7328_v15  ;;  %v680_v55 = vmul.f32 %v7353_v57, %v7353_v57  ;;  %v1216_v21 = vpack.c.bf16 %v7370_v13, %v7367_v50 }
 0x178   : > { %5821 = vtanh.f32 %v916_v0  ;;  %v867_v18 = vadd.f32 %v803_v19, %v7293_v53  ;;  %v1041_v47 = vadd.f32 1.0, %v5806_v35  ;;  %v805_v32 = vmul.f32 0.044715, %v741_v3  ;;  %v10750_v3 = vld [vmem:[#allocation23_spill] sm:$0xff] }
 0x179   : > { %v7384_v30 = vpop.eup %5813  ;;  %v743_v26 = vmul.f32 %v679_v14, %v7336_v44  ;;  %v681_v20 = vmul.f32 %v7364_v4, %v7364_v4  ;;  %1525 = vmatmul.mubr.bf16.gmra.mrb[52].mxu1 %v1216_v21  ;;  %v1103_v31 = vmul.f32 0.5, %v1039_v12  ;;  %v868_v37 = vadd.f32 %v804_v41, %v7302_v17 }
 0x17a   : > { %v682_v1 = vmul.f32 %v7374_v24, %v7374_v24  ;;  %v1105_v13 = vmul.f32 0.5, %v1041_v47  ;;  %v1038_v0 = vadd.f32 1.0, %v7289_v40  ;;  %5823 = vtanh.f32 %v930_v16 }
 0x17b   : > { %v806_v35 = vmul.f32 0.044715, %v742_v11  ;;  %v744_v19 = vmul.f32 %v680_v55, %v7353_v57  ;;  %v7396_v14 = vadd.f32 %v10750_v3, %v6708_v39  ;;  %v7399_v21 = vmul.f32 %v1103_v31, %v7066_v10 }
 0x17c   : > { %v5816_v50 = vpop.eup %5815  ;;  %v7402_v41 = vmul.f32 %v1105_v13, %v7084_v61  ;;  %v1040_v12 = vadd.f32 1.0, %v7321_v58  ;;  %v1102_v47 = vmul.f32 0.5, %v1038_v0  ;;  %v931_v5 = vmul.f32 0.7978846, %v867_v18  ;;  %v10753_v18 = vld [vmem:[#allocation25_spill] sm:$0xff] }
 0x17d   : > { %10751 = vst [vmem:[#allocation15_spill] sm:$0xff] %v7399_v21  ;;  %v869_v40 = vadd.f32 %v805_v32, %v7315_v22  ;;  %v807_v16 = vmul.f32 0.044715, %v743_v26  ;;  %v745_v11 = vmul.f32 %v681_v20, %v7364_v4  ;;  %v932_v56 = vmul.f32 0.7978846, %v868_v37  ;;  %v10754_v20 = vld [vmem:[#allocation26_spill] sm:$0xff] }
 0x17e   : > { %10752 = vst [vmem:[#allocation19_spill] sm:$0xff] %v7402_v41  ;;  %v5818_v55 = vpop.eup %5817  ;;  %v746_v3 = vmul.f32 %v682_v1, %v7374_v24  ;;  %v1219_v10 = vpack.c.bf16 %v7402_v41, %v7399_v21  ;;  %v1104_v31 = vmul.f32 0.5, %v1040_v12  ;;  %v870_v61 = vadd.f32 %v806_v35, %v7328_v15 }
 0x17f   : > { %v808_v13 = vmul.f32 0.044715, %v744_v19  ;;  %v683_v58 = vmul.f32 %v7396_v14, %v7396_v14  ;;  %v7415_v32 = vadd.f32 %v10753_v18, %v6705_v38  ;;  %v7419_v37 = vadd.f32 %v10754_v20, %v6708_v39 }
 0x180   : > { %v5820_v26 = vpop.eup %5819  ;;  %1534 = vmatprep.mubr.bf16.mxu1 %v1219_v10  ;;  %v7422_v1 = vmul.f32 %v1102_v47, %v7062_v42  ;;  %v7425_v0 = vmul.f32 %v1104_v31, %v7073_v29  ;;  %v1043_v35 = vadd.f32 1.0, %v5816_v50  ;;  %5825 = vtanh.f32 %v931_v5 }
 0x181   : > { %v871_v19 = vadd.f32 %v807_v16, %v7336_v44  ;;  %v809_v12 = vmul.f32 0.044715, %v745_v11  ;;  %v1045_v41 = vadd.f32 1.0, %v5818_v55  ;;  %5827 = vtanh.f32 %v932_v56 }
 0x182   : > { %v5822_v18 = vpop.eup %5821  ;;  %v933_v21 = vmul.f32 0.7978846, %v869_v40  ;;  %v810_v62 = vmul.f32 0.044715, %v746_v3  ;;  %v1218_v20 = vpack.c.bf16 %v7425_v0, %v7422_v1  ;;  %v934_v10 = vmul.f32 0.7978846, %v870_v61 }
 0x183   : > { %v872_v42 = vadd.f32 %v808_v13, %v7353_v57  ;;  %v1107_v47 = vmul.f32 0.5, %v1043_v35  ;;  %v1109_v51 = vmul.f32 0.5, %v1045_v41  ;;  %v747_v29 = vmul.f32 %v683_v58, %v7396_v14 }
 0x184   : > { %v684_v5 = vmul.f32 %v7415_v32, %v7415_v32  ;;  %v685_v50 = vmul.f32 %v7419_v37, %v7419_v37  ;;  %1535 = vmatmul.mubr.bf16.gmra.mrb[56].mxu1 %v1218_v20  ;;  %v1042_v56 = vadd.f32 1.0, %v5820_v26  ;;  %v7436_v40 = vpop.eup %5823  ;;  %v935_v16 = vmul.f32 0.7978846, %v871_v19  ;;  %v10757_v20 = vld [vmem:[#allocation28_spill] sm:$0xff] }
 0x185   : > { %v873_v11 = vadd.f32 %v809_v12, %v7364_v4  ;;  %v7440_v55 = vmul.f32 %v1107_v47, %v7189_v48  ;;  %v7443_v41 = vmul.f32 %v1109_v51, %v7207_v34  ;;  %5829 = vtanh.f32 %v933_v21  ;;  %v10755_v34 = vld [vmem:[#allocation27_spill] sm:$0xff] }
 0x186   : > { %v874_v3 = vadd.f32 %v810_v62, %v7374_v24  ;;  %v1044_v31 = vadd.f32 1.0, %v5822_v18  ;;  %5831 = vtanh.f32 %v934_v10  ;;  %v936_v61 = vmul.f32 0.7978846, %v872_v42  ;;  %v10756_v62 = vld [vmem:[#allocation30_spill] sm:$0xff] }
 0x187   : > { %v1221_v13 = vpack.c.bf16 %v7443_v41, %v7440_v55  ;;  %v1106_v58 = vmul.f32 0.5, %v1042_v56  ;;  %v811_v26 = vmul.f32 0.044715, %v747_v29  ;;  %v748_v35 = vmul.f32 %v684_v5, %v7415_v32  ;;  %v10760_v5 = vld [vmem:[#allocation31_spill] sm:$0xff] }
 0x188   : > { %v749_v19 = vmul.f32 %v685_v50, %v7419_v37  ;;  %v1108_v48 = vmul.f32 0.5, %v1044_v31  ;;  %5833 = vtanh.f32 %v935_v16  ;;  %v937_v12 = vmul.f32 0.7978846, %v873_v11 }
 0x189   : > { %v7452_v51 = vadd.f32 %v10755_v34, %v6705_v38  ;;  %1544 = vmatprep.mubr.bf16.mxu1 %v1221_v13  ;;  %v1047_v21 = vadd.f32 1.0, %v10756_v62  ;;  %v938_v18 = vmul.f32 0.7978846, %v874_v3  ;;  %v7457_v10 = vadd.f32 %v10757_v20, %v6708_v39  ;;  %v10763_v34 = vld [vmem:[#allocation17_spill] sm:$0xff] }
 0x18a   : > { %v7460_v42 = vmul.f32 %v1106_v58, %v7183_v33  ;;  %v7463_v47 = vmul.f32 %v1108_v48, %v7225_v52  ;;  %v7465_v29 = vpop.eup %5825  ;;  %5835 = vtanh.f32 %v936_v61  ;;  %v7469_v50 = vadd.f32 %v10760_v5, %v6708_v39  ;;  %v10761_v58 = vld [vmem:[#allocation8_spill] sm:$0xff] }
 0x18b   : > { %v1049_v56 = vadd.f32 1.0, %v7139_v49  ;;  %v1111_v16 = vmul.f32 0.5, %v1047_v21  ;;  %v7472_v11 = vpop.eup %5827  ;;  %v875_v3 = vadd.f32 %v811_v26, %v7396_v14  ;;  %v812_v31 = vmul.f32 0.044715, %v748_v35 }
 0x18c   : > { %10758 = vst [vmem:[#allocation23_spill] sm:$0xff] %v7460_v42  ;;  %10759 = vst [vmem:[#allocation25_spill] sm:$0xff] %v7463_v47  ;;  %v813_v33 = vmul.f32 0.044715, %v749_v19  ;;  %v1220_v52 = vpack.c.bf16 %v7463_v47, %v7460_v42  ;;  %5837 = vtanh.f32 %v937_v12  ;;  %v686_v61 = vmul.f32 %v7452_v51, %v7452_v51  ;;  %v10764_v19 = vld [vmem:[#allocation11_spill] sm:$0xff]  ;;  %v10769_v42 = vld [vmem:[#allocation9_spill] sm:$0xff] }
 0x18d   : > { %v1113_v13 = vmul.f32 0.5, %v1049_v56  ;;  %v7480_v48 = vmul.f32 %v1111_v16, %v10761_v58  ;;  %5839 = vtanh.f32 %v938_v18  ;;  %v687_v49 = vmul.f32 %v7457_v10, %v7457_v10 }
 0x18e   : > { %1545 = vmatmul.mubr.bf16.gmra.mrb[60].mxu1 %v1220_v52  ;;  %v1046_v26 = vadd.f32 1.0, %v10763_v34  ;;  %v689_v35 = vmul.f32 %v7469_v50, %v7469_v50  ;;  %v1048_v12 = vadd.f32 1.0, %v7109_v54  ;;  %v1051_v21 = vadd.f32 1.0, %v7238_v46  ;;  %v10766_v46 = vld [vmem:[#allocation29_spill] sm:$0xff] }
 0x18f   : > { %10762 = vst [vmem:[#allocation26_spill] sm:$0xff] %v7480_v48  ;;  %v7488_v62 = vmul.f32 %v1113_v13, %v10764_v19  ;;  %v5830_v20 = vpop.eup %5829  ;;  %v939_v5 = vmul.f32 0.7978846, %v875_v3  ;;  %v876_v18 = vadd.f32 %v812_v31, %v7415_v32  ;;  %v877_v56 = vadd.f32 %v813_v33, %v7419_v37  ;;  %v10767_v31 = vld [vmem:[#allocation7_spill] sm:$0xff] }
 0x190   : > { %v1110_v16 = vmul.f32 0.5, %v1046_v26  ;;  %v7494_v52 = vpop.eup %5831  ;;  %v750_v58 = vmul.f32 %v686_v61, %v7452_v51  ;;  %v1112_v13 = vmul.f32 0.5, %v1048_v12  ;;  %v1053_v19 = vadd.f32 1.0, %v7270_v2 }
 0x191   : > { %10765 = vst [vmem:[#allocation27_spill] sm:$0xff] %v7488_v62  ;;  %v1223_v34 = vpack.c.bf16 %v7488_v62, %v7480_v48  ;;  %v751_v54 = vmul.f32 %v687_v49, %v7457_v10  ;;  %v7503_v3 = vadd.f32 %v10766_v46, %v6705_v38  ;;  %v1115_v33 = vmul.f32 0.5, %v1051_v21  ;;  %v10771_v49 = vld [vmem:[#allocation36_spill] sm:$0xff]  ;;  %v10772_v46 = vld [vmem:[#allocation41_spill] sm:$0xff]  ;;  %v10773_v21 = vld [vmem:[#allocation39_spill] sm:$0xff] }
 0x192   : > { %v7506_v47 = vmul.f32 %v1110_v16, %v10767_v31  ;;  %v7508_v26 = vpop.eup %5833  ;;  %v753_v61 = vmul.f32 %v689_v35, %v7469_v50  ;;  %v7512_v62 = vmul.f32 %v1112_v13, %v10769_v42  ;;  %v1117_v12 = vmul.f32 0.5, %v1053_v19 }
 0x193   : > { %1554 = vmatprep.mubr.bf16.mxu1 %v1223_v34  ;;  %v1050_v2 = vadd.f32 1.0, %v7230_v6  ;;  %v7517_v48 = vadd.f32 %v10771_v49, %v6708_v39  ;;  %v7521_v16 = vadd.f32 %v10772_v46, %v6708_v39  ;;  %v7524_v31 = vmul.f32 %v1115_v33, %v10773_v21 }
 0x194   : > { %10768 = vst [vmem:[#allocation30_spill] sm:$0xff] %v7506_v47  ;;  %10770 = vst [vmem:[#allocation28_spill] sm:$0xff] %v7512_v62  ;;  %v1052_v35 = vadd.f32 1.0, %v7252_v43  ;;  %v7527_v34 = vpop.eup %5835  ;;  %v1222_v42 = vpack.c.bf16 %v7512_v62, %v7506_v47  ;;  %v7532_v6 = vmul.f32 %v1117_v12, %v7046_v8  ;;  %v1055_v19 = vadd.f32 1.0, %v7358_v9 }
 0x195   : > { %10774 = vst [vmem:[#allocation31_spill] sm:$0xff] %v7524_v31  ;;  %v1114_v13 = vmul.f32 0.5, %v1050_v2  ;;  %5841 = vtanh.f32 %v939_v5  ;;  %v941_v49 = vmul.f32 0.7978846, %v877_v56  ;;  %v1057_v46 = vadd.f32 1.0, %v7384_v30  ;;  %v10776_v56 = vld [vmem:[#allocation34_spill] sm:$0xff] }
 0x196   : > { %10775 = vst [vmem:[#allocation8_spill] sm:$0xff] %v7532_v6  ;;  %v1116_v39 = vmul.f32 0.5, %v1052_v35  ;;  %v5838_v33 = vpop.eup %5837  ;;  %v815_v21 = vmul.f32 0.044715, %v751_v54  ;;  %v688_v43 = vmul.f32 %v7503_v3, %v7503_v3  ;;  %1555 = vmatmul.mubr.bf16.gmra.mrb[64].mxu1 %v1222_v42  ;;  %v1225_v62 = vpack.c.bf16 %v7532_v6, %v7524_v31 }
 0x197   : > { %v1119_v47 = vmul.f32 0.5, %v1055_v19  ;;  %v7540_v8 = vpop.eup %5839  ;;  %v817_v12 = vmul.f32 0.044715, %v753_v61  ;;  %v691_v9 = vmul.f32 %v7517_v48, %v7517_v48  ;;  %v693_v5 = vmul.f32 %v7521_v16, %v7521_v16 }
 0x198   : > { %v1121_v30 = vmul.f32 0.5, %v1057_v46  ;;  %1564 = vmatprep.mubr.bf16.mxu1 %v1225_v62  ;;  %v7547_v54 = vmul.f32 %v1114_v13, %v10776_v56  ;;  %v7550_v2 = vmul.f32 %v1116_v39, %v7042_v25  ;;  %v1054_v35 = vadd.f32 1.0, %v7347_v36  ;;  %v10777_v25 = vld [vmem:[#allocation35_spill] sm:$0xff]  ;;  %v10778_v36 = vld [vmem:[#allocation40_spill] sm:$0xff] }
 0x199   : > { %v1056_v42 = vadd.f32 1.0, %v7376_v7  ;;  %v7555_v61 = vmul.f32 %v1119_v47, %v7151_v63  ;;  %v1059_v6 = vadd.f32 1.0, %v7465_v29  ;;  %v1061_v46 = vadd.f32 1.0, %v5830_v20 }
 0x19a   : > { %v7558_v19 = vmul.f32 %v1121_v30, %v7173_v23  ;;  %v814_v62 = vmul.f32 0.044715, %v750_v58  ;;  %v879_v13 = vadd.f32 %v815_v21, %v7457_v10  ;;  %v752_v56 = vmul.f32 %v688_v43, %v7503_v3 }
 0x19b   : > { %v7565_v39 = vadd.f32 %v10777_v25, %v6705_v38  ;;  %v881_v7 = vadd.f32 %v817_v12, %v7469_v50  ;;  %v755_v63 = vmul.f32 %v691_v9, %v7517_v48  ;;  %v7571_v23 = vadd.f32 %v10778_v36, %v6705_v38 }
 0x19c   : > { %v757_v47 = vmul.f32 %v693_v5, %v7521_v16  ;;  %5843 = vtanh.f32 %v941_v49  ;;  %v1224_v29 = vpack.c.bf16 %v7550_v2, %v7547_v54  ;;  %v1118_v20 = vmul.f32 0.5, %v1054_v35 }
 0x19d   : > { %v1120_v58 = vmul.f32 0.5, %v1056_v42  ;;  %v940_v21 = vmul.f32 0.7978846, %v876_v18  ;;  %v1227_v43 = vpack.c.bf16 %v7558_v19, %v7555_v61  ;;  %v1123_v30 = vmul.f32 0.5, %v1059_v6 }
 0x19e   : > { %v1125_v12 = vmul.f32 0.5, %v1061_v46  ;;  %v878_v9 = vadd.f32 %v814_v62, %v7452_v51  ;;  %v943_v25 = vmul.f32 0.7978846, %v879_v13  ;;  %v816_v31 = vmul.f32 0.044715, %v752_v56  ;;  %1565 = vmatmul.mubr.bf16.gmra.mrb[68].mxu1 %v1224_v29 }
 0x19f   : > { %v690_v38 = vmul.f32 %v7565_v39, %v7565_v39  ;;  %v5842_v49 = vpop.eup %5841  ;;  %v945_v5 = vmul.f32 0.7978846, %v881_v7  ;;  %v819_v36 = vmul.f32 0.044715, %v755_v63  ;;  %v692_v35 = vmul.f32 %v7571_v23, %v7571_v23  ;;  %1574 = vmatprep.mubr.bf16.mxu1 %v1227_v43 }
 0x1a0   : > { %v821_v18 = vmul.f32 0.044715, %v757_v47  ;;  %v7584_v42 = vmul.f32 %v1118_v20, %v7118_v45  ;;  %v7587_v6 = vmul.f32 %v1120_v58, %v7158_v60  ;;  %v1058_v46 = vadd.f32 1.0, %v7436_v40  ;;  %v5644_v45 = vld [vmem:[%s10520_s3 + $0x170] ss:$8 sps:$4 sm:$0xff]  }
 0x1a1   : > { %v1060_v62 = vadd.f32 1.0, %v7472_v11  ;;  %v7592_v13 = vmul.f32 %v1123_v30, %v7293_v53  ;;  %v7595_v56 = vmul.f32 %v1125_v12, %v7315_v22  ;;  %v1063_v7 = vadd.f32 1.0, %v7508_v26  ;;  %v5646_v53 = vld [vmem:[%s10520_s3 + $0x174] ss:$8 sps:$4 sm:$0xff]   ;;  %v5647_v30 = vld [vmem:[%s10520_s3 + $0x180] ss:$8 sps:$4 sm:$0xff]  }
 0x1a2   : > { %10779 = vst [vmem:[#allocation17_spill] sm:$0xff] %v7584_v42  ;;  %10780 = vst [vmem:[#allocation11_spill] sm:$0xff] %v7587_v6  ;;  %v1065_v63 = vadd.f32 1.0, %v5838_v33  ;;  %5845 = vtanh.f32 %v940_v21  ;;  %v942_v60 = vmul.f32 0.7978846, %v878_v9  ;;  %v880_v47 = vadd.f32 %v816_v31, %v7503_v3  ;;  %2527 = vmatprep.subr.bf16.mxu0 %v5646_v53 }
 0x1a3   : > { %10781 = vst [vmem:[#allocation29_spill] sm:$0xff] %v7592_v13  ;;  %10782 = vst [vmem:[#allocation7_spill] sm:$0xff] %v7595_v56  ;;  %v754_v40 = vmul.f32 %v690_v38, %v7565_v39  ;;  %5847 = vtanh.f32 %v943_v25  ;;  %v883_v22 = vadd.f32 %v819_v36, %v7517_v48  ;;  %v756_v11 = vmul.f32 %v692_v35, %v7571_v23  ;;  %v5649_v31 = vld [vmem:[%s10520_s3 + $0x184] ss:$8 sps:$4 sm:$0xff]   ;;  %v5652_v38 = vld [vmem:[%s10520_s3 + $0x194] ss:$8 sps:$4 sm:$0xff]  }
 0x1a4   : > { %v885_v26 = vadd.f32 %v821_v18, %v7521_v16  ;;  %5849 = vtanh.f32 %v945_v5  ;;  %v1226_v33 = vpack.c.bf16 %v7587_v6, %v7584_v42  ;;  %v1122_v29 = vmul.f32 0.5, %v1058_v46  ;;  %2528 = vmatpush1.bf16.msra.mxu0 %v5644_v45 }
 0x1a5   : > { %v1124_v20 = vmul.f32 0.5, %v1060_v62  ;;  %v1229_v58 = vpack.c.bf16 %v7595_v56, %v7592_v13  ;;  %v1127_v21 = vmul.f32 0.5, %v1063_v7  ;;  %v1129_v43 = vmul.f32 0.5, %v1065_v63  ;;  %2529 = vmatprep.subr.bf16.mxu0 %v5649_v31 }
 0x1a6   : > { %v5844_v12 = vpop.eup %5843  ;;  %v944_v9 = vmul.f32 0.7978846, %v880_v47  ;;  %v818_v25 = vmul.f32 0.044715, %v754_v40  ;;  %1575 = vmatmul.mubr.bf16.gmra.mrb[72].mxu1 %v1226_v33  ;;  %5851 = vtanh.f32 %v942_v60  ;;  %v947_v5 = vmul.f32 0.7978846, %v883_v22 }
 0x1a7   : > { %v820_v36 = vmul.f32 0.044715, %v756_v11  ;;  %v949_v35 = vmul.f32 0.7978846, %v885_v26  ;;  %1584 = vmatprep.mubr.bf16.mxu1 %v1229_v58  ;;  %v7623_v18 = vmul.f32 %v1122_v29, %v7258_v59  ;;  %v7626_v46 = vmul.f32 %v1124_v20, %v7302_v17  ;;  %v5650_v59 = vld [vmem:[%s10520_s3 + $0x190] ss:$8 sps:$4 sm:$0xff]  }
 0x1a8   : > { %v1062_v62 = vadd.f32 1.0, %v7494_v52  ;;  %v1064_v7 = vadd.f32 1.0, %v7527_v34  ;;  %v7631_v63 = vmul.f32 %v1127_v21, %v7336_v44  ;;  %v7634_v45 = vmul.f32 %v1129_v43, %v7364_v4  ;;  %2530 = vmatpush1.bf16.msra.mxu0 %v5647_v30  ;;  %v5655_v52 = vld [vmem:[%s10520_s3 + $0x1a4] ss:$8 sps:$4 sm:$0xff]   ;;  %v5653_v33 = vld [vmem:[%s10520_s3 + $0x1a0] ss:$8 sps:$4 sm:$0xff]  }
 0x1a9   : > { %10783 = vst [vmem:[#allocation9_spill] sm:$0xff] %v7623_v18  ;;  %10784 = vst [vmem:[#allocation36_spill] sm:$0xff] %v7626_v46  ;;  %v1067_v60 = vadd.f32 1.0, %v5842_v49  ;;  %v1069_v47 = vadd.f32 1.0, %v5844_v12  ;;  %5853 = vtanh.f32 %v944_v9  ;;  %v882_v17 = vadd.f32 %v818_v25, %v7565_v39  ;;  %2531 = vmatprep.subr.bf16.mxu0 %v5652_v38 }
 0x1aa   : > { %10785 = vst [vmem:[#allocation41_spill] sm:$0xff] %v7631_v63  ;;  %10786 = vst [vmem:[#allocation39_spill] sm:$0xff] %v7634_v45  ;;  %5855 = vtanh.f32 %v947_v5  ;;  %v884_v44 = vadd.f32 %v820_v36, %v7571_v23  ;;  %v1228_v34 = vpack.c.bf16 %v7626_v46, %v7623_v18  ;;  %v1126_v49 = vmul.f32 0.5, %v1062_v62 }
 0x1ab   : > { %5857 = vtanh.f32 %v949_v35  ;;  %v1128_v40 = vmul.f32 0.5, %v1064_v7  ;;  %v1231_v22 = vpack.c.bf16 %v7634_v45, %v7631_v63  ;;  %v1131_v11 = vmul.f32 0.5, %v1067_v60 }
 0x1ac   : > { %v5846_v4 = vpop.eup %5845  ;;  %v1133_v26 = vmul.f32 0.5, %v1069_v47  ;;  %2532 = vmatpush1.bf16.msra.mxu0 %v5650_v59  ;;  %v946_v20 = vmul.f32 0.7978846, %v882_v17  ;;  %v948_v31 = vmul.f32 0.7978846, %v884_v44  ;;  %v7652_v58 = vmul.f32 %v1126_v49, %v7328_v15 }
 0x1ad   : > { %v5848_v53 = vpop.eup %5847  ;;  %2533 = vmatprep.subr.bf16.mxu0 %v5655_v52  ;;  %v7655_v21 = vmul.f32 %v1128_v40, %v7353_v57  ;;  %v1066_v43 = vadd.f32 1.0, %v7540_v8  ;;  %v1068_v30 = vadd.f32 1.0, %v5846_v4  ;;  %v7659_v9 = vmul.f32 %v1131_v11, %v7396_v14  ;;  %v5656_v8 = vld [vmem:[%s10520_s3 + $0x1b0] ss:$8 sps:$4 sm:$0xff]   ;;  %v5658_v14 = vld [vmem:[%s10520_s3 + $0x1b4] ss:$8 sps:$4 sm:$0xff]  }
 0x1ae   : > { %v5850_v29 = vpop.eup %5849  ;;  %1585 = vmatmul.mubr.bf16.gmra.mrb[76].mxu1 %v1228_v34  ;;  %10787 = vst [vmem:[#allocation34_spill] sm:$0xff] %v7652_v58  ;;  %v7662_v25 = vmul.f32 %v1133_v26, %v7419_v37  ;;  %v1071_v38 = vadd.f32 1.0, %v5848_v53  ;;  %5859 = vtanh.f32 %v946_v20  ;;  %v5661_v59 = vld [vmem:[%s10520_s3 + $0x1c4] ss:$8 sps:$4 sm:$0xff]   ;;  %v5659_v17 = vld [vmem:[%s10520_s3 + $0x1c0] ss:$8 sps:$4 sm:$0xff]  }
 0x1af   : > { %1594 = vmatprep.mubr.bf16.mxu1 %v1231_v22  ;;  %10788 = vst [vmem:[#allocation35_spill] sm:$0xff] %v7655_v21  ;;  %10789 = vst [vmem:[#allocation40_spill] sm:$0xff] %v7659_v9  ;;  %v1073_v5 = vadd.f32 1.0, %v5850_v29  ;;  %5861 = vtanh.f32 %v948_v31  ;;  %v1230_v57 = vpack.c.bf16 %v7655_v21, %v7652_v58  ;;  %v1130_v36 = vmul.f32 0.5, %v1066_v43 }
 0x1b0   : > { %v5852_v12 = vpop.eup %5851  ;;  %10790 = vst [vmem:[#allocation50_spill] sm:$0xff] %v7662_v25  ;;  %2534 = vmatpush1.bf16.msra.mxu0 %v5653_v33  ;;  %v1132_v35 = vmul.f32 0.5, %v1068_v30  ;;  %v1233_v62 = vpack.c.bf16 %v7662_v25, %v7659_v9  ;;  %v1135_v7 = vmul.f32 0.5, %v1071_v38 }
 0x1b1   : > { %v1137_v60 = vmul.f32 0.5, %v1073_v5  ;;  %2535 = vmatprep.subr.bf16.mxu0 %v5658_v14  ;;  %v7681_v52 = vmul.f32 %v1130_v36, %v7374_v24  ;;  %v1070_v4 = vadd.f32 1.0, %v5852_v12 }
 0x1b2   : > { %v7684_v44 = vmul.f32 %v1132_v35, %v7415_v32  ;;  %v7687_v49 = vmul.f32 %v1135_v7, %v7457_v10 }
 0x1b3   : > { %v5854_v15 = vpop.eup %5853  ;;  %10791 = vst [vmem:[#allocation51_spill] sm:$0xff] %v7681_v52  ;;  %v7690_v40 = vmul.f32 %v1137_v60, %v7469_v50  ;;  %v1134_v26 = vmul.f32 0.5, %v1070_v4  ;;  %v10802_v60 = vld [vmem:[#allocation6_spill] sm:$0xff] }
 0x1b4   : > { %v5856_v37 = vpop.eup %5855  ;;  %2536 = vmatpush1.bf16.msra.mxu0 %v5656_v8  ;;  %10792 = vst [vmem:[#allocation52_spill] sm:$0xff] %v7684_v44  ;;  %v1072_v34 = vadd.f32 1.0, %v5854_v15  ;;  %10793 = vst [vmem:[#allocation53_spill] sm:$0xff] %v7687_v49  ;;  %v1232_v24 = vpack.c.bf16 %v7684_v44, %v7681_v52  ;;  %v5665_v8 = vld [vmem:[%s10520_s3 + $0x1e0] ss:$8 sps:$4 sm:$0xff]  }
 0x1b5   : > { %v5858_v47 = vpop.eup %5857  ;;  %2537 = vmatprep.subr.bf16.mxu0 %v5661_v59  ;;  %10794 = vst [vmem:[#allocation54_spill] sm:$0xff] %v7690_v40  ;;  %v1075_v53 = vadd.f32 1.0, %v5856_v37  ;;  %v1235_v29 = vpack.c.bf16 %v7690_v40, %v7687_v49  ;;  %v7697_v10 = vmul.f32 %v1134_v26, %v7452_v51  ;;  %v5668_v37 = vld [vmem:[%s10520_s3 + $0x1f0] ss:$8 sps:$4 sm:$0xff]  }
 0x1b6   : > { %1595 = vmatmul.mubr.bf16.gmra.mrb[80].mxu1 %v1230_v57  ;;  %v1077_v22 = vadd.f32 1.0, %v5858_v47  ;;  %v1136_v33 = vmul.f32 0.5, %v1072_v34 }
 0x1b7   : > { %1604 = vmatprep.mubr.bf16.mxu1 %v1233_v62  ;;  %v1139_v20 = vmul.f32 0.5, %v1075_v53  ;;  %10795 = vst [vmem:[#allocation55_spill] sm:$0xff] %v7697_v10  ;;  %v10801_v62 = vld [vmem:[#allocation5_spill] sm:$0xff] }
 0x1b8   : > { %2538 = vmatpush1.bf16.msra.mxu0 %v5659_v17  ;;  %v5860_v11 = vpop.eup %5859  ;;  %v1141_v31 = vmul.f32 0.5, %v1077_v22  ;;  %v7700_v50 = vmul.f32 %v1136_v33, %v7503_v3  ;;  %v5662_v3 = vld [vmem:[%s10520_s3 + $0x1d0] ss:$8 sps:$4 sm:$0xff]  }
 0x1b9   : > { %v5862_v32 = vpop.eup %5861  ;;  %v1074_v43 = vadd.f32 1.0, %v5860_v11  ;;  %v7703_v12 = vmul.f32 %v1139_v20, %v7517_v48  ;;  %v5664_v48 = vld [vmem:[%s10520_s3 + $0x1d4] ss:$8 sps:$4 sm:$0xff]  }
 0x1ba   : > { %10796 = vst [vmem:[#allocation56_spill] sm:$0xff] %v7700_v50  ;;  %v1076_v30 = vadd.f32 1.0, %v5862_v32  ;;  %v7706_v38 = vmul.f32 %v1141_v31, %v7521_v16  ;;  %v1234_v5 = vpack.c.bf16 %v7700_v50, %v7697_v10  ;;  %2539 = vmatprep.subr.bf16.mxu0 %v5664_v48  ;;  %v5667_v16 = vld [vmem:[%s10520_s3 + $0x1e4] ss:$8 sps:$4 sm:$0xff]  }
 0x1bb   : > { %10797 = vst [vmem:[#allocation57_spill] sm:$0xff] %v7703_v12  ;;  %v1138_v15 = vmul.f32 0.5, %v1074_v43 }
 0x1bc   : > { %10798 = vst [vmem:[#allocation58_spill] sm:$0xff] %v7706_v38  ;;  %v1140_v57 = vmul.f32 0.5, %v1076_v30  ;;  %v1237_v51 = vpack.c.bf16 %v7706_v38, %v7703_v12  ;;  %2540 = vmatpush1.bf16.msra.mxu0 %v5662_v3 }
 0x1bd   : > { %v7722_v36 = vmul.f32 %v1138_v15, %v7565_v39  ;;  %2541 = vmatprep.subr.bf16.mxu0 %v5667_v16  ;;  %v5670_v39 = vld [vmem:[%s10520_s3 + $0x1f4] ss:$8 sps:$4 sm:$0xff]  }
 0x1be   : > { %1605 = vmatmul.mubr.bf16.gmra.mrb[84].mxu1 %v1232_v24  ;;  %v7725_v35 = vmul.f32 %v1140_v57, %v7571_v23  ;;  %v1270_v23 = vld [vmem:[%s10521_s4] sm:$0x3] }
 0x1bf   : > { %1614 = vmatprep.mubr.bf16.mxu1 %v1235_v29  ;;  %10799 = vst [vmem:[#allocation59_spill] sm:$0xff] %v7722_v36  ;;  %v7742_v7 = vrot.slane %v1270_v23, %v10801_v62  ;;  %v7745_v47 = vrot.slane %v1270_v23, %v10802_v60 }
 0x1c0   : > { %10800 = vst [vmem:[#allocation60_spill] sm:$0xff] %v7725_v35  ;;  %v1236_v14 = vpack.c.bf16 %v7725_v35, %v7722_v36  ;;  %2542 = vmatpush1.bf16.msra.mxu0 %v5665_v8 }
 0x1c1   : > { %2543 = vmatprep.subr.bf16.mxu0 %v5670_v39 }
 0x1c4   : > { %2544 = vmatpush1.bf16.msra.mxu0 %v5668_v37 }
 0x1c6   : > { %1615 = vmatmul.mubr.bf16.gmra.mrb[88].mxu1 %v1234_v5 }
 0x1c7   : > { %1624 = vmatprep.mubr.bf16.mxu1 %v1237_v51 }
 0x1ce   : > { %1625 = vmatmul.mubr.bf16.gmra.mrb[92].mxu1 %v1236_v14 }
 0x206   : > { %v1476_v59 = vpop.f32.mrb[32].mxu1 }
 0x207   : > { %v7748_v17 = vadd.f32 %v1476_v59, %v7742_v7  ;;  %v1478_v4 = vpop.f32.mrb[33].mxu1 }
 0x208   : > { %v7751_v34 = vadd.f32 %v1478_v4, %v7745_v47  ;;  %v1480_v53 = vpop.f32.mrb[34].mxu1 }
 0x209   : > { %v1635_v22 = vmul.f32 %v7748_v17, %v7748_v17  ;;  %v7756_v11 = vadd.f32 %v1480_v53, %v7742_v7  ;;  %v1482_v24 = vpop.f32.mrb[35].mxu1 }
 0x20a   : > { %v1636_v26 = vmul.f32 %v7751_v34, %v7751_v34  ;;  %v7761_v33 = vadd.f32 %v1482_v24, %v7745_v47 }
 0x20b   : > { %v1699_v32 = vmul.f32 %v1635_v22, %v7748_v17  ;;  %v1637_v29 = vmul.f32 %v7756_v11, %v7756_v11 }
 0x20c   : > { %v1700_v20 = vmul.f32 %v1636_v26, %v7751_v34  ;;  %v1638_v31 = vmul.f32 %v7761_v33, %v7761_v33 }
 0x20d   : > { %v1763_v43 = vmul.f32 0.044715, %v1699_v32  ;;  %v1701_v30 = vmul.f32 %v1637_v29, %v7756_v11 }
 0x20e   : > { %v1764_v5 = vmul.f32 0.044715, %v1700_v20  ;;  %v1702_v15 = vmul.f32 %v1638_v31, %v7761_v33 }
 0x20f   : > { %v1827_v57 = vadd.f32 %v1763_v43, %v7748_v17  ;;  %v1765_v51 = vmul.f32 0.044715, %v1701_v30 }
 0x210   : > { %v1828_v3 = vadd.f32 %v1764_v5, %v7751_v34  ;;  %v1766_v48 = vmul.f32 0.044715, %v1702_v15 }
 0x211   : > { %v1891_v16 = vmul.f32 0.7978846, %v1827_v57  ;;  %v1829_v8 = vadd.f32 %v1765_v51, %v7756_v11 }
 0x212   : > { %v1892_v14 = vmul.f32 0.7978846, %v1828_v3  ;;  %v1830_v37 = vadd.f32 %v1766_v48, %v7761_v33 }
 0x213   : > { %5863 = vtanh.f32 %v1891_v16  ;;  %v1893_v39 = vmul.f32 0.7978846, %v1829_v8 }
 0x214   : > { %5865 = vtanh.f32 %v1892_v14  ;;  %v1894_v23 = vmul.f32 0.7978846, %v1830_v37 }
 0x215   : > { %5867 = vtanh.f32 %v1893_v39 }
 0x216   : > { %5869 = vtanh.f32 %v1894_v23 }
 0x21a   : > { %v1486_v59 = vpop.f32.mrb[36].mxu1 }
 0x21b   : > { %v7776_v4 = vadd.f32 %v1486_v59, %v7742_v7  ;;  %v1488_v53 = vpop.f32.mrb[37].mxu1 }
 0x21c   : > { %v7779_v22 = vadd.f32 %v1488_v53, %v7745_v47  ;;  %v1490_v24 = vpop.f32.mrb[38].mxu1 }
 0x21d   : > { %v1639_v26 = vmul.f32 %v7776_v4, %v7776_v4  ;;  %v7784_v32 = vadd.f32 %v1490_v24, %v7742_v7  ;;  %v1492_v29 = vpop.f32.mrb[39].mxu1  ;;  %v5864_v57 = vpop.eup %5863 }
 0x21e   : > { %v1640_v20 = vmul.f32 %v7779_v22, %v7779_v22  ;;  %v7789_v31 = vadd.f32 %v1492_v29, %v7745_v47  ;;  %v5866_v48 = vpop.eup %5865  ;;  %v2019_v16 = vadd.f32 1.0, %v5864_v57 }
 0x21f   : > { %v1703_v43 = vmul.f32 %v1639_v26, %v7776_v4  ;;  %v1641_v30 = vmul.f32 %v7784_v32, %v7784_v32  ;;  %v5868_v37 = vpop.eup %5867  ;;  %v2020_v59 = vadd.f32 1.0, %v5866_v48 }
 0x220   : > { %v1704_v5 = vmul.f32 %v1640_v20, %v7779_v22  ;;  %v1642_v15 = vmul.f32 %v7789_v31, %v7789_v31  ;;  %v5870_v53 = vpop.eup %5869  ;;  %v2083_v24 = vmul.f32 0.5, %v2019_v16  ;;  %v2021_v26 = vadd.f32 1.0, %v5868_v37  ;;  %v10803_v37 = vld [vmem:[#allocation18_spill] sm:$0xff] }
 0x221   : > { %v1767_v51 = vmul.f32 0.044715, %v1703_v43  ;;  %v1705_v3 = vmul.f32 %v1641_v30, %v7784_v32  ;;  %v2022_v30 = vadd.f32 1.0, %v5870_v53  ;;  %v2084_v62 = vmul.f32 0.5, %v2020_v59 }
 0x222   : > { %v1768_v8 = vmul.f32 0.044715, %v1704_v5  ;;  %v1706_v14 = vmul.f32 %v1642_v15, %v7789_v31  ;;  %v2085_v57 = vmul.f32 0.5, %v2021_v26  ;;  %v2147_v48 = vmul.f32 %v2083_v24, %v7748_v17 }
 0x223   : > { %v1831_v39 = vadd.f32 %v1767_v51, %v7776_v4  ;;  %v1769_v23 = vmul.f32 0.044715, %v1705_v3  ;;  %v2086_v51 = vmul.f32 0.5, %v2022_v30  ;;  %v2148_v3 = vmul.f32 %v2084_v62, %v7751_v34  ;;  %v10809_v62 = vld [vmem:[#allocation24_spill] sm:$0xff] }
 0x224   : > { %v1832_v29 = vadd.f32 %v1768_v8, %v7779_v22  ;;  %v1770_v20 = vmul.f32 0.044715, %v1706_v14  ;;  %v2149_v16 = vmul.f32 %v2085_v57, %v7756_v11  ;;  %v7817_v34 = vadd.f32 %v2147_v48, %v10809_v62 }
 0x225   : > { %v1895_v60 = vmul.f32 0.7978846, %v1831_v39  ;;  %v1833_v43 = vadd.f32 %v1769_v23, %v7784_v32  ;;  %v2150_v14 = vmul.f32 %v2086_v51, %v7761_v33  ;;  %v10805_v23 = vld [vmem:[#allocation21_spill] sm:$0xff] }
 0x226   : > { %v1896_v5 = vmul.f32 0.7978846, %v1832_v29  ;;  %v1834_v15 = vadd.f32 %v1770_v20, %v7789_v31  ;;  %v7808_v39 = vadd.f32 %v2149_v16, %v10803_v37  ;;  %v7811_v59 = vadd.f32 %v2148_v3, %v10805_v23  ;;  %10810 = vst [vmem:[#allocation24_spill] sm:$0xff] %v7817_v34 }
 0x227   : > { %5871 = vtanh.f32 %v1895_v60  ;;  %v1897_v36 = vmul.f32 0.7978846, %v1833_v43  ;;  %v10807_v60 = vld [vmem:[#allocation22_spill] sm:$0xff] }
 0x228   : > { %5873 = vtanh.f32 %v1896_v5  ;;  %v1898_v8 = vmul.f32 0.7978846, %v1834_v15  ;;  %10804 = vst [vmem:[#allocation18_spill] sm:$0xff] %v7808_v39  ;;  %10806 = vst [vmem:[#allocation21_spill] sm:$0xff] %v7811_v59  ;;  %v7814_v53 = vadd.f32 %v2150_v14, %v10807_v60  ;;  %v1496_v17 = vpop.f32.mrb[40].mxu1  ;;  %v2275_v24 = vpack.c.bf16 %v7808_v39, %v7817_v34 }
 0x229   : > { %5875 = vtanh.f32 %v1897_v36  ;;  %v7822_v36 = vadd.f32 %v1496_v17, %v7742_v7  ;;  %v1498_v33 = vpop.f32.mrb[41].mxu1 }
 0x22a   : > { %5877 = vtanh.f32 %v1898_v8  ;;  %10808 = vst [vmem:[#allocation22_spill] sm:$0xff] %v7814_v53  ;;  %v2276_v11 = vpack.c.bf16 %v7814_v53, %v7811_v59  ;;  %v7827_v26 = vadd.f32 %v1498_v33, %v7745_v47  ;;  %v1500_v29 = vpop.f32.mrb[42].mxu1 }
 0x22b   : > { %v1643_v20 = vmul.f32 %v7822_v36, %v7822_v36  ;;  %v7832_v43 = vadd.f32 %v1500_v29, %v7742_v7  ;;  %v1502_v30 = vpop.f32.mrb[43].mxu1 }
 0x22c   : > { %2545 = vmatprep.mubr.bf16.mxu0 %v2276_v11  ;;  %v1644_v5 = vmul.f32 %v7827_v26, %v7827_v26  ;;  %v7837_v15 = vadd.f32 %v1502_v30, %v7745_v47 }
 0x22d   : > { %2546 = vmatmul.mubr.bf16.vlgmr.msra.gmra.mrb[32].mxu0 %v2275_v24  ;;  %v1707_v3 = vmul.f32 %v1643_v20, %v7822_v36  ;;  %v1645_v48 = vmul.f32 %v7832_v43, %v7832_v43 }
 0x22e   : > { %v1708_v14 = vmul.f32 %v1644_v5, %v7827_v26  ;;  %v1646_v37 = vmul.f32 %v7837_v15, %v7837_v15 }
 0x22f   : > { %v1771_v62 = vmul.f32 0.044715, %v1707_v3  ;;  %v1709_v17 = vmul.f32 %v1645_v48, %v7832_v43 }
 0x230   : > { %v1772_v24 = vmul.f32 0.044715, %v1708_v14  ;;  %v1710_v29 = vmul.f32 %v1646_v37, %v7837_v15 }
 0x231   : > { %v5872_v57 = vpop.eup %5871  ;;  %v1773_v34 = vmul.f32 0.044715, %v1709_v17 }
 0x232   : > { %v5874_v51 = vpop.eup %5873  ;;  %v2023_v16 = vadd.f32 1.0, %v5872_v57  ;;  %v1835_v57 = vadd.f32 %v1771_v62, %v7822_v36  ;;  %v1836_v5 = vadd.f32 %v1772_v24, %v7827_v26  ;;  %v1774_v59 = vmul.f32 0.044715, %v1710_v29  ;;  %v10811_v62 = vld [vmem:[#allocation38_spill] sm:$0xff] }
 0x233   : > { %v5876_v8 = vpop.eup %5875  ;;  %v2024_v23 = vadd.f32 1.0, %v5874_v51  ;;  %v1837_v48 = vadd.f32 %v1773_v34, %v7832_v43  ;;  %v10815_v34 = vld [vmem:[#allocation33_spill] sm:$0xff] }
 0x234   : > { %v5878_v60 = vpop.eup %5877  ;;  %v2025_v11 = vadd.f32 1.0, %v5876_v8  ;;  %v2087_v33 = vmul.f32 0.5, %v2023_v16  ;;  %v1899_v3 = vmul.f32 0.7978846, %v1835_v57  ;;  %v1900_v14 = vmul.f32 0.7978846, %v1836_v5 }
 0x235   : > { %v2026_v20 = vadd.f32 1.0, %v5878_v60  ;;  %v2088_v30 = vmul.f32 0.5, %v2024_v23  ;;  %v1838_v37 = vadd.f32 %v1774_v59, %v7837_v15  ;;  %v1901_v60 = vmul.f32 0.7978846, %v1837_v48 }
 0x236   : > { %v2089_v53 = vmul.f32 0.5, %v2025_v11  ;;  %v2151_v16 = vmul.f32 %v2087_v33, %v7776_v4  ;;  %5879 = vtanh.f32 %v1899_v3  ;;  %v10817_v4 = vld [vmem:[#allocation37_spill] sm:$0xff] }
 0x237   : > { %v2090_v39 = vmul.f32 0.5, %v2026_v20  ;;  %v2152_v51 = vmul.f32 %v2088_v30, %v7779_v22  ;;  %5881 = vtanh.f32 %v1900_v14  ;;  %v1902_v11 = vmul.f32 0.7978846, %v1838_v37  ;;  %v10813_v22 = vld [vmem:[#allocation32_spill] sm:$0xff] }
 0x238   : > { %v2153_v8 = vmul.f32 %v2089_v53, %v7784_v32  ;;  %5883 = vtanh.f32 %v1901_v60  ;;  %v7865_v32 = vadd.f32 %v2151_v16, %v10817_v4 }
 0x239   : > { %v2154_v23 = vmul.f32 %v2090_v39, %v7789_v31  ;;  %v7859_v24 = vadd.f32 %v2152_v51, %v10813_v22  ;;  %5885 = vtanh.f32 %v1902_v11  ;;  %v1506_v39 = vpop.f32.mrb[44].mxu1 }
 0x23a   : > { %v7856_v17 = vadd.f32 %v2153_v8, %v10811_v62  ;;  %10818 = vst [vmem:[#allocation37_spill] sm:$0xff] %v7865_v32  ;;  %v7872_v53 = vadd.f32 %v1506_v39, %v7742_v7  ;;  %v1508_v33 = vpop.f32.mrb[45].mxu1 }
 0x23b   : > { %10814 = vst [vmem:[#allocation32_spill] sm:$0xff] %v7859_v24  ;;  %v7862_v29 = vadd.f32 %v2154_v23, %v10815_v34  ;;  %v7875_v20 = vadd.f32 %v1508_v33, %v7745_v47  ;;  %v1510_v30 = vpop.f32.mrb[46].mxu1 }
 0x23c   : > { %10812 = vst [vmem:[#allocation38_spill] sm:$0xff] %v7856_v17  ;;  %v2277_v59 = vpack.c.bf16 %v7856_v17, %v7865_v32  ;;  %v1647_v57 = vmul.f32 %v7872_v53, %v7872_v53  ;;  %v7880_v5 = vadd.f32 %v1510_v30, %v7742_v7  ;;  %v1512_v51 = vpop.f32.mrb[47].mxu1 }
 0x23d   : > { %10816 = vst [vmem:[#allocation33_spill] sm:$0xff] %v7862_v29  ;;  %v2278_v31 = vpack.c.bf16 %v7862_v29, %v7859_v24  ;;  %v1648_v3 = vmul.f32 %v7875_v20, %v7875_v20  ;;  %v7885_v48 = vadd.f32 %v1512_v51, %v7745_v47 }
 0x23e   : > { %v1711_v16 = vmul.f32 %v1647_v57, %v7872_v53  ;;  %v1649_v8 = vmul.f32 %v7880_v5, %v7880_v5 }
 0x23f   : > { %2555 = vmatprep.mubr.bf16.mxu0 %v2278_v31  ;;  %v1712_v37 = vmul.f32 %v1648_v3, %v7875_v20  ;;  %v1650_v23 = vmul.f32 %v7885_v48, %v7885_v48 }
 0x240   : > { %2556 = vmatmul.mubr.bf16.gmra.mrb[36].mxu0 %v2277_v59  ;;  %v5880_v14 = vpop.eup %5879  ;;  %v1775_v62 = vmul.f32 0.044715, %v1711_v16  ;;  %v1713_v11 = vmul.f32 %v1649_v8, %v7880_v5 }
 0x241   : > { %v5882_v60 = vpop.eup %5881  ;;  %v2027_v22 = vadd.f32 1.0, %v5880_v14  ;;  %v1776_v4 = vmul.f32 0.044715, %v1712_v37  ;;  %v1714_v31 = vmul.f32 %v1650_v23, %v7885_v48 }
 0x242   : > { %v5884_v34 = vpop.eup %5883  ;;  %v2028_v39 = vadd.f32 1.0, %v5882_v60  ;;  %v1839_v33 = vadd.f32 %v1775_v62, %v7872_v53  ;;  %v1777_v30 = vmul.f32 0.044715, %v1713_v11  ;;  %v1516_v29 = vpop.f32.mrb[48].mxu1 }
 0x243   : > { %v5886_v59 = vpop.eup %5885  ;;  %v2029_v57 = vadd.f32 1.0, %v5884_v34  ;;  %v2091_v51 = vmul.f32 0.5, %v2027_v22  ;;  %v1840_v3 = vadd.f32 %v1776_v4, %v7875_v20  ;;  %v1778_v32 = vmul.f32 0.044715, %v1714_v31  ;;  %v1518_v37 = vpop.f32.mrb[49].mxu1 }
 0x244   : > { %v2030_v24 = vadd.f32 1.0, %v5886_v59  ;;  %v2092_v16 = vmul.f32 0.5, %v2028_v39  ;;  %v1903_v17 = vmul.f32 0.7978846, %v1839_v33  ;;  %v1841_v8 = vadd.f32 %v1777_v30, %v7880_v5  ;;  %v1520_v22 = vpop.f32.mrb[50].mxu1 }
 0x245   : > { %v7899_v14 = vadd.f32 %v1516_v29, %v7742_v7  ;;  %v2093_v23 = vmul.f32 0.5, %v2029_v57  ;;  %v1904_v60 = vmul.f32 0.7978846, %v1840_v3  ;;  %v1842_v62 = vadd.f32 %v1778_v32, %v7885_v48  ;;  %v1522_v29 = vpop.f32.mrb[51].mxu1 }
 0x246   : > { %v7903_v11 = vadd.f32 %v1518_v37, %v7745_v47  ;;  %v2094_v34 = vmul.f32 0.5, %v2030_v24  ;;  %5887 = vtanh.f32 %v1903_v17  ;;  %v1905_v4 = vmul.f32 0.7978846, %v1841_v8 }
 0x247   : > { %v1651_v31 = vmul.f32 %v7899_v14, %v7899_v14  ;;  %v7908_v39 = vadd.f32 %v1520_v22, %v7742_v7  ;;  %5889 = vtanh.f32 %v1904_v60  ;;  %v1906_v59 = vmul.f32 0.7978846, %v1842_v62  ;;  %v10819_v62 = vld [vmem:[#allocation42_spill] sm:$0xff] }
 0x248   : > { %v1652_v33 = vmul.f32 %v7903_v11, %v7903_v11  ;;  %v7913_v32 = vadd.f32 %v1522_v29, %v7745_v47  ;;  %5891 = vtanh.f32 %v1905_v4  ;;  %v2156_v30 = vmul.f32 %v2092_v16, %v7827_v26  ;;  %v10821_v26 = vld [vmem:[#allocation43_spill] sm:$0xff] }
 0x249   : > { %v1715_v24 = vmul.f32 %v1651_v31, %v7899_v14  ;;  %v1653_v17 = vmul.f32 %v7908_v39, %v7908_v39  ;;  %5893 = vtanh.f32 %v1906_v59  ;;  %v2158_v8 = vmul.f32 %v2094_v34, %v7837_v15 }
 0x24a   : > { %v1716_v57 = vmul.f32 %v1652_v33, %v7903_v11  ;;  %v1654_v3 = vmul.f32 %v7913_v32, %v7913_v32  ;;  %v7925_v22 = vadd.f32 %v2156_v30, %v10819_v62  ;;  %v2155_v4 = vmul.f32 %v2091_v51, %v7822_v36 }
 0x24b   : > { %v1779_v37 = vmul.f32 0.044715, %v1715_v24  ;;  %v1717_v60 = vmul.f32 %v1653_v17, %v7908_v39  ;;  %v7930_v16 = vadd.f32 %v2158_v8, %v10821_v26  ;;  %v2157_v59 = vmul.f32 %v2093_v23, %v7832_v43 }
 0x24c   : > { %10820 = vst [vmem:[#allocation42_spill] sm:$0xff] %v7925_v22  ;;  %v1780_v31 = vmul.f32 0.044715, %v1716_v57  ;;  %v1718_v29 = vmul.f32 %v1654_v3, %v7913_v32  ;;  %v7935_v15 = vadd.f32 %v2155_v4, %v7130_v27  ;;  %v1526_v17 = vpop.f32.mrb[52].mxu1 }
 0x24d   : > { %10822 = vst [vmem:[#allocation43_spill] sm:$0xff] %v7930_v16  ;;  %v1843_v33 = vadd.f32 %v1779_v37, %v7899_v14  ;;  %v1781_v35 = vmul.f32 0.044715, %v1717_v60  ;;  %v2280_v36 = vpack.c.bf16 %v7930_v16, %v7925_v22  ;;  %v7941_v51 = vadd.f32 %v2157_v59, %v7133_v28  ;;  %v1528_v23 = vpop.f32.mrb[53].mxu1 }
 0x24e   : > { %10823 = vst [vmem:[#allocation61_spill] sm:$0xff] %v7935_v15  ;;  %v1844_v34 = vadd.f32 %v1780_v31, %v7903_v11  ;;  %v1782_v24 = vmul.f32 0.044715, %v1718_v29  ;;  %v7945_v43 = vadd.f32 %v1526_v17, %v7742_v7  ;;  %v7949_v8 = vadd.f32 %v1528_v23, %v7745_v47  ;;  %v1530_v37 = vpop.f32.mrb[54].mxu1 }
 0x24f   : > { %10824 = vst [vmem:[#allocation62_spill] sm:$0xff] %v7941_v51  ;;  %v1907_v30 = vmul.f32 0.7978846, %v1843_v33  ;;  %v1845_v57 = vadd.f32 %v1781_v35, %v7908_v39  ;;  %2565 = vmatprep.mubr.bf16.mxu0 %v2280_v36  ;;  %v2279_v60 = vpack.c.bf16 %v7941_v51, %v7935_v15  ;;  %v7956_v4 = vadd.f32 %v1530_v37, %v7742_v7  ;;  %v1532_v31 = vpop.f32.mrb[55].mxu1 }
 0x250   : > { %v1908_v3 = vmul.f32 0.7978846, %v1844_v34  ;;  %v1846_v27 = vadd.f32 %v1782_v24, %v7913_v32  ;;  %v5888_v28 = vpop.eup %5887  ;;  %v1655_v35 = vmul.f32 %v7945_v43, %v7945_v43  ;;  %v1656_v59 = vmul.f32 %v7949_v8, %v7949_v8 }
 0x251   : > { %5895 = vtanh.f32 %v1907_v30  ;;  %v1909_v62 = vmul.f32 0.7978846, %v1845_v57  ;;  %v5890_v29 = vpop.eup %5889  ;;  %v7961_v33 = vadd.f32 %v1532_v31, %v7745_v47  ;;  %2566 = vmatmul.mubr.bf16.gmra.mrb[40].mxu0 %v2279_v60  ;;  %v1657_v17 = vmul.f32 %v7956_v4, %v7956_v4 }
 0x252   : > { %5897 = vtanh.f32 %v1908_v3  ;;  %v1910_v26 = vmul.f32 0.7978846, %v1846_v27  ;;  %v5892_v34 = vpop.eup %5891  ;;  %v1719_v24 = vmul.f32 %v1655_v35, %v7945_v43  ;;  %v2032_v36 = vadd.f32 1.0, %v5890_v29 }
 0x253   : > { %5899 = vtanh.f32 %v1909_v62  ;;  %v5894_v30 = vpop.eup %5893  ;;  %v1720_v57 = vmul.f32 %v1656_v59, %v7949_v8  ;;  %v1658_v23 = vmul.f32 %v7961_v33, %v7961_v33  ;;  %v2031_v3 = vadd.f32 1.0, %v5888_v28 }
 0x254   : > { %5901 = vtanh.f32 %v1910_v26  ;;  %v1783_v27 = vmul.f32 0.044715, %v1719_v24  ;;  %v1721_v37 = vmul.f32 %v1657_v17, %v7956_v4  ;;  %v2034_v60 = vadd.f32 1.0, %v5894_v30 }
 0x255   : > { %v2096_v31 = vmul.f32 0.5, %v2032_v36  ;;  %v1784_v62 = vmul.f32 0.044715, %v1720_v57  ;;  %v1722_v35 = vmul.f32 %v1658_v23, %v7961_v33  ;;  %v2033_v15 = vadd.f32 1.0, %v5892_v34  ;;  %v10825_v34 = vld [vmem:[#allocation44_spill] sm:$0xff] }
 0x256   : > { %v2095_v16 = vmul.f32 0.5, %v2031_v3  ;;  %v1847_v29 = vadd.f32 %v1783_v27, %v7945_v43  ;;  %v1785_v22 = vmul.f32 0.044715, %v1721_v37  ;;  %v2098_v26 = vmul.f32 0.5, %v2034_v60 }
 0x257   : > { %v2160_v59 = vmul.f32 %v2096_v31, %v7875_v20  ;;  %v1848_v51 = vadd.f32 %v1784_v62, %v7949_v8  ;;  %v1786_v10 = vmul.f32 0.044715, %v1722_v35  ;;  %v2097_v28 = vmul.f32 0.5, %v2033_v15  ;;  %v1536_v30 = vpop.f32.mrb[56].mxu1 }
 0x258   : > { %v2159_v24 = vmul.f32 %v2095_v16, %v7872_v53  ;;  %v1911_v17 = vmul.f32 0.7978846, %v1847_v29  ;;  %v1849_v36 = vadd.f32 %v1785_v22, %v7956_v4  ;;  %v2162_v57 = vmul.f32 %v2098_v26, %v7885_v48  ;;  %v1538_v37 = vpop.f32.mrb[57].mxu1  ;;  %v10827_v48 = vld [vmem:[#allocation45_spill] sm:$0xff] }
 0x259   : > { %v7978_v23 = vadd.f32 %v2160_v59, %v10825_v34  ;;  %v1912_v3 = vmul.f32 0.7978846, %v1848_v51  ;;  %v1850_v27 = vadd.f32 %v1786_v10, %v7961_v33  ;;  %v7982_v20 = vadd.f32 %v1536_v30, %v7742_v7  ;;  %v1540_v16 = vpop.f32.mrb[58].mxu1 }
 0x25a   : > { %v2161_v15 = vmul.f32 %v2097_v28, %v7880_v5  ;;  %5903 = vtanh.f32 %v1911_v17  ;;  %v1913_v53 = vmul.f32 0.7978846, %v1849_v36  ;;  %v7986_v22 = vadd.f32 %v1538_v37, %v7745_v47  ;;  %v1542_v5 = vpop.f32.mrb[59].mxu1  ;;  %v10831_v37 = vld [vmem:[#allocation47_spill] sm:$0xff] }
 0x25b   : > { %10826 = vst [vmem:[#allocation44_spill] sm:$0xff] %v7978_v23  ;;  %v5896_v60 = vpop.eup %5895  ;;  %v7989_v31 = vadd.f32 %v2162_v57, %v10827_v48  ;;  %5905 = vtanh.f32 %v1912_v3  ;;  %v1914_v51 = vmul.f32 0.7978846, %v1850_v27  ;;  %v1659_v10 = vmul.f32 %v7982_v20, %v7982_v20  ;;  %v10829_v57 = vld [vmem:[#allocation46_spill] sm:$0xff] }
 0x25c   : > { %v5898_v62 = vpop.eup %5897  ;;  %v7994_v35 = vadd.f32 %v1540_v16, %v7742_v7  ;;  %5907 = vtanh.f32 %v1913_v53  ;;  %v1660_v26 = vmul.f32 %v7986_v22, %v7986_v22  ;;  %v7999_v59 = vadd.f32 %v1542_v5, %v7745_v47 }
 0x25d   : > { %10828 = vst [vmem:[#allocation45_spill] sm:$0xff] %v7989_v31  ;;  %v5900_v29 = vpop.eup %5899  ;;  %v2282_v28 = vpack.c.bf16 %v7989_v31, %v7978_v23  ;;  %5909 = vtanh.f32 %v1914_v51  ;;  %v1723_v36 = vmul.f32 %v1659_v10, %v7982_v20  ;;  %v8007_v34 = vadd.f32 %v2159_v24, %v10829_v57 }
 0x25e   : > { %v5902_v17 = vpop.eup %5901  ;;  %v1661_v30 = vmul.f32 %v7994_v35, %v7994_v35  ;;  %v1724_v3 = vmul.f32 %v1660_v26, %v7986_v22  ;;  %v1662_v27 = vmul.f32 %v7999_v59, %v7999_v59  ;;  %v8013_v53 = vadd.f32 %v2161_v15, %v10831_v37 }
 0x25f   : > { %10830 = vst [vmem:[#allocation46_spill] sm:$0xff] %v8007_v34  ;;  %2575 = vmatprep.mubr.bf16.mxu0 %v2282_v28  ;;  %v2036_v16 = vadd.f32 1.0, %v5898_v62  ;;  %v1787_v48 = vmul.f32 0.044715, %v1723_v36  ;;  %v2038_v10 = vadd.f32 1.0, %v5902_v17  ;;  %v2035_v5 = vadd.f32 1.0, %v5896_v60 }
 0x260   : > { %10832 = vst [vmem:[#allocation47_spill] sm:$0xff] %v8013_v53  ;;  %v1725_v51 = vmul.f32 %v1661_v30, %v7994_v35  ;;  %v1788_v31 = vmul.f32 0.044715, %v1724_v3  ;;  %v1726_v23 = vmul.f32 %v1662_v27, %v7999_v59  ;;  %v2281_v24 = vpack.c.bf16 %v8013_v53, %v8007_v34  ;;  %v5676_v53 = vld [vmem:[%s10520_s3 + $0x214] ss:$8 sps:$4 sm:$0xff]  }
 0x261   : > { %v2100_v26 = vmul.f32 0.5, %v2036_v16  ;;  %v1851_v57 = vadd.f32 %v1787_v48, %v7982_v20  ;;  %v2102_v28 = vmul.f32 0.5, %v2038_v10  ;;  %v2037_v50 = vadd.f32 1.0, %v5900_v29  ;;  %v1546_v36 = vpop.f32.mrb[60].mxu1 }
 0x262   : > { %v1789_v12 = vmul.f32 0.044715, %v1725_v51  ;;  %v1852_v15 = vadd.f32 %v1788_v31, %v7986_v22  ;;  %v1790_v62 = vmul.f32 0.044715, %v1726_v23  ;;  %2576 = vmatmul.mubr.bf16.gmra.mrb[44].mxu0 %v2281_v24  ;;  %v2099_v60 = vmul.f32 0.5, %v2035_v5  ;;  %v1548_v37 = vpop.f32.mrb[61].mxu1 }
 0x263   : > { %v2164_v17 = vmul.f32 %v2100_v26, %v7903_v11  ;;  %v1915_v30 = vmul.f32 0.7978846, %v1851_v57  ;;  %v8024_v27 = vadd.f32 %v1546_v36, %v7742_v7  ;;  %v2166_v16 = vmul.f32 %v2102_v28, %v7913_v32  ;;  %v1550_v51 = vpop.f32.mrb[62].mxu1  ;;  %v10833_v11 = vld [vmem:[#allocation48_spill] sm:$0xff] }
 0x264   : > { %v1853_v3 = vadd.f32 %v1789_v12, %v7994_v35  ;;  %v8027_v48 = vpop.eup %5903  ;;  %v1916_v29 = vmul.f32 0.7978846, %v1852_v15  ;;  %v1854_v31 = vadd.f32 %v1790_v62, %v7999_v59  ;;  %v8031_v23 = vadd.f32 %v1548_v37, %v7745_v47  ;;  %v1552_v26 = vpop.f32.mrb[63].mxu1 }
 0x265   : > { %v8034_v10 = vadd.f32 %v2164_v17, %v10833_v11  ;;  %v5906_v5 = vpop.eup %5905  ;;  %5911 = vtanh.f32 %v1915_v30  ;;  %v1663_v24 = vmul.f32 %v8024_v27, %v8024_v27  ;;  %v8039_v32 = vadd.f32 %v1550_v51, %v7742_v7 }
 0x266   : > { %v1917_v12 = vmul.f32 0.7978846, %v1853_v3  ;;  %v8041_v57 = vpop.eup %5907  ;;  %5913 = vtanh.f32 %v1916_v29  ;;  %v1918_v28 = vmul.f32 0.7978846, %v1854_v31  ;;  %v1664_v15 = vmul.f32 %v8031_v23, %v8031_v23  ;;  %v10835_v3 = vld [vmem:[#allocation49_spill] sm:$0xff] }
 0x267   : > { %10834 = vst [vmem:[#allocation48_spill] sm:$0xff] %v8034_v10  ;;  %v8046_v62 = vadd.f32 %v1552_v26, %v7745_v47  ;;  %v5910_v36 = vpop.eup %5909  ;;  %v1727_v17 = vmul.f32 %v1663_v24, %v8024_v27  ;;  %v1665_v30 = vmul.f32 %v8039_v32, %v8039_v32  ;;  %v8052_v37 = vadd.f32 %v2166_v16, %v10835_v3  ;;  %v5671_v16 = vld [vmem:[%s10520_s3 + $0x200] ss:$8 sps:$4 sm:$0xff]  }
 0x268   : > { %5915 = vtanh.f32 %v1917_v12  ;;  %v1728_v29 = vmul.f32 %v1664_v15, %v8031_v23  ;;  %v2101_v51 = vmul.f32 0.5, %v2037_v50  ;;  %v2163_v24 = vmul.f32 %v2099_v60, %v7899_v14  ;;  %v10837_v14 = vld [vmem:[#allocation16_spill] sm:$0xff] }
 0x269   : > { %10836 = vst [vmem:[#allocation49_spill] sm:$0xff] %v8052_v37  ;;  %5917 = vtanh.f32 %v1918_v28  ;;  %v1666_v31 = vmul.f32 %v8046_v62, %v8046_v62  ;;  %v1791_v11 = vmul.f32 0.044715, %v1727_v17  ;;  %v1729_v26 = vmul.f32 %v1665_v30, %v8039_v32  ;;  %v5673_v28 = vld [vmem:[%s10520_s3 + $0x204] ss:$8 sps:$4 sm:$0xff]  }
 0x26a   : > { %v2284_v12 = vpack.c.bf16 %v8052_v37, %v8034_v10  ;;  %v1792_v15 = vmul.f32 0.044715, %v1728_v29  ;;  %v2165_v50 = vmul.f32 %v2101_v51, %v7908_v39  ;;  %v2040_v17 = vadd.f32 1.0, %v5906_v5  ;;  %v1556_v37 = vpop.f32.mrb[64].mxu1  ;;  %3584 = vmatprep.subr.bf16.mxu1 %v5673_v28  ;;  %v10839_v51 = vld [vmem:[#allocation20_spill] sm:$0xff] }
 0x26b   : > { %v1730_v3 = vmul.f32 %v1666_v31, %v8046_v62  ;;  %v1855_v30 = vadd.f32 %v1791_v11, %v8024_v27  ;;  %v1793_v34 = vmul.f32 0.044715, %v1729_v26  ;;  %v8071_v60 = vadd.f32 %v2163_v24, %v10837_v14  ;;  %v1558_v5 = vpop.f32.mrb[65].mxu1  ;;  %3585 = vmatpush1.bf16.msra.mxu1 %v5671_v16 }
 0x26c   : > { %2585 = vmatprep.mubr.bf16.mxu0 %v2284_v12  ;;  %v2042_v10 = vadd.f32 1.0, %v5910_v36  ;;  %v1856_v29 = vadd.f32 %v1792_v15, %v8031_v23  ;;  %v8078_v39 = vadd.f32 %v1556_v37, %v7742_v7  ;;  %v8081_v11 = vadd.f32 %v2165_v50, %v10839_v51  ;;  %v5674_v36 = vld [vmem:[%s10520_s3 + $0x210] ss:$8 sps:$4 sm:$0xff]   ;;  %v1560_v28 = vpop.f32.mrb[66].mxu1  ;;  %3586 = vmatprep.subr.bf16.mxu1 %v5676_v53  ;;  %v5679_v37 = vld [vmem:[%s10520_s3 + $0x224] ss:$8 sps:$4 sm:$0xff]  }
 0x26d   : > { %10838 = vst [vmem:[#allocation16_spill] sm:$0xff] %v8071_v60  ;;  %v1794_v31 = vmul.f32 0.044715, %v1730_v3  ;;  %v1919_v26 = vmul.f32 0.7978846, %v1855_v30  ;;  %v1857_v12 = vadd.f32 %v1793_v34, %v8039_v32  ;;  %v8088_v24 = vadd.f32 %v1558_v5, %v7745_v47  ;;  %v1562_v34 = vpop.f32.mrb[67].mxu1 }
 0x26e   : > { %10840 = vst [vmem:[#allocation20_spill] sm:$0xff] %v8081_v11  ;;  %v2104_v15 = vmul.f32 0.5, %v2040_v17  ;;  %v1920_v3 = vmul.f32 0.7978846, %v1856_v29  ;;  %v1667_v50 = vmul.f32 %v8078_v39, %v8078_v39  ;;  %v8097_v30 = vadd.f32 %v1560_v28, %v7742_v7 }
 0x26f   : > { %v1858_v16 = vadd.f32 %v1794_v31, %v8046_v62  ;;  %v8099_v14 = vpop.eup %5911  ;;  %5919 = vtanh.f32 %v1919_v26  ;;  %v1921_v5 = vmul.f32 0.7978846, %v1857_v12  ;;  %v1668_v53 = vmul.f32 %v8088_v24, %v8088_v24  ;;  %3587 = vmatpush1.bf16.msra.mxu1 %v5674_v36  ;;  %v5677_v26 = vld [vmem:[%s10520_s3 + $0x220] ss:$8 sps:$4 sm:$0xff]   ;;  %v5682_v36 = vld [vmem:[%s10520_s3 + $0x234] ss:$8 sps:$4 sm:$0xff]  }
 0x270   : > { %v8104_v17 = vadd.f32 %v1562_v34, %v7745_v47  ;;  %v8106_v29 = vpop.eup %5913  ;;  %5921 = vtanh.f32 %v1920_v3  ;;  %v1731_v51 = vmul.f32 %v1667_v50, %v8078_v39  ;;  %v1669_v28 = vmul.f32 %v8097_v30, %v8097_v30  ;;  %3588 = vmatprep.subr.bf16.mxu1 %v5679_v37 }
 0x271   : > { %v1922_v31 = vmul.f32 0.7978846, %v1858_v16  ;;  %5923 = vtanh.f32 %v1921_v5  ;;  %v1732_v34 = vmul.f32 %v1668_v53, %v8088_v24  ;;  %v2283_v3 = vpack.c.bf16 %v8081_v11, %v8071_v60  ;;  %v1566_v49 = vpop.f32.mrb[68].mxu1 }
 0x272   : > { %v8114_v12 = vpop.eup %5915  ;;  %v1670_v38 = vmul.f32 %v8104_v17, %v8104_v17  ;;  %v1795_v50 = vmul.f32 0.044715, %v1731_v51  ;;  %v1733_v52 = vmul.f32 %v1669_v28, %v8097_v30  ;;  %v2106_v5 = vmul.f32 0.5, %v2042_v10 }
 0x273   : > { %v8124_v16 = vpop.eup %5917  ;;  %5925 = vtanh.f32 %v1922_v31  ;;  %v1796_v40 = vmul.f32 0.044715, %v1732_v34  ;;  %2586 = vmatmul.mubr.bf16.gmra.mrb[48].mxu0 %v2283_v3  ;;  %v2168_v44 = vmul.f32 %v2104_v15, %v7949_v8  ;;  %v2039_v37 = vadd.f32 1.0, %v8027_v48  ;;  %v1568_v31 = vpop.f32.mrb[69].mxu1  ;;  %3589 = vmatpush1.bf16.msra.mxu1 %v5677_v26  ;;  %v10841_v15 = vld [vmem:[#allocation10_spill] sm:$0xff] }
 0x274   : > { %v1734_v53 = vmul.f32 %v1670_v38, %v8104_v17  ;;  %v1859_v11 = vadd.f32 %v1795_v50, %v8078_v39  ;;  %v1797_v60 = vmul.f32 0.044715, %v1733_v52  ;;  %v8132_v25 = vadd.f32 %v1566_v49, %v7742_v7  ;;  %v5680_v38 = vld [vmem:[%s10520_s3 + $0x230] ss:$8 sps:$4 sm:$0xff]   ;;  %v1570_v48 = vpop.f32.mrb[70].mxu1  ;;  %3590 = vmatprep.subr.bf16.mxu1 %v5682_v36 }
 0x275   : > { %v2170_v51 = vmul.f32 %v2106_v5, %v7961_v33  ;;  %v1860_v10 = vadd.f32 %v1796_v40, %v8088_v24  ;;  %v8140_v8 = vadd.f32 %v1568_v31, %v7745_v47  ;;  %v8143_v52 = vadd.f32 %v2168_v44, %v10841_v15  ;;  %v5685_v49 = vld [vmem:[%s10520_s3 + $0x244] ss:$8 sps:$4 sm:$0xff]   ;;  %v1572_v3 = vpop.f32.mrb[71].mxu1  ;;  %v5683_v31 = vld [vmem:[%s10520_s3 + $0x240] ss:$8 sps:$4 sm:$0xff]  }
 0x276   : > { %v1798_v28 = vmul.f32 0.044715, %v1734_v53  ;;  %v1923_v33 = vmul.f32 0.7978846, %v1859_v11  ;;  %v1861_v26 = vadd.f32 %v1797_v60, %v8097_v30  ;;  %v1671_v34 = vmul.f32 %v8132_v25, %v8132_v25 }
 0x277   : > { %10842 = vst [vmem:[#allocation10_spill] sm:$0xff] %v8143_v52  ;;  %v8152_v40 = vadd.f32 %v1570_v48, %v7742_v7  ;;  %v1924_v50 = vmul.f32 0.7978846, %v1860_v10  ;;  %v1672_v44 = vmul.f32 %v8140_v8, %v8140_v8  ;;  %v8158_v36 = vadd.f32 %v1572_v3, %v7745_v47  ;;  %3591 = vmatpush1.bf16.msra.mxu1 %v5680_v38  ;;  %v10843_v3 = vld [vmem:[#allocation12_spill] sm:$0xff] }
 0x278   : > { %v1862_v5 = vadd.f32 %v1798_v28, %v8104_v17  ;;  %5927 = vtanh.f32 %v1923_v33  ;;  %v1925_v11 = vmul.f32 0.7978846, %v1861_v26  ;;  %v1735_v60 = vmul.f32 %v1671_v34, %v8132_v25  ;;  %3592 = vmatprep.subr.bf16.mxu1 %v5685_v49  ;;  %v5688_v33 = vld [vmem:[%s10520_s3 + $0x254] ss:$8 sps:$4 sm:$0xff]  }
 0x279   : > { %v1673_v53 = vmul.f32 %v8152_v40, %v8152_v40  ;;  %v8166_v10 = vpop.eup %5919  ;;  %5929 = vtanh.f32 %v1924_v50  ;;  %v1736_v48 = vmul.f32 %v1672_v44, %v8140_v8  ;;  %v1674_v15 = vmul.f32 %v8158_v36, %v8158_v36  ;;  %v1576_v21 = vpop.f32.mrb[72].mxu1 }
 0x27a   : > { %v1926_v28 = vmul.f32 0.7978846, %v1862_v5  ;;  %v8174_v26 = vpop.eup %5921  ;;  %5931 = vtanh.f32 %v1925_v11  ;;  %v1799_v38 = vmul.f32 0.044715, %v1735_v60  ;;  %v8178_v9 = vadd.f32 %v2170_v51, %v10843_v3  ;;  %v1578_v51 = vpop.f32.mrb[73].mxu1 }
 0x27b   : > { %v1737_v34 = vmul.f32 %v1673_v53, %v8152_v40  ;;  %v8180_v50 = vpop.eup %5923  ;;  %v1800_v5 = vmul.f32 0.044715, %v1736_v48  ;;  %v1738_v44 = vmul.f32 %v1674_v15, %v8158_v36  ;;  %v2041_v49 = vadd.f32 1.0, %v8041_v57  ;;  %3593 = vmatpush1.bf16.msra.mxu1 %v5683_v31  ;;  %v1580_v63 = vpop.f32.mrb[74].mxu1 }
 0x27c   : > { %10844 = vst [vmem:[#allocation12_spill] sm:$0xff] %v8178_v9  ;;  %5933 = vtanh.f32 %v1926_v28  ;;  %v1863_v45 = vadd.f32 %v1799_v38, %v8132_v25  ;;  %v2286_v60 = vpack.c.bf16 %v8178_v9, %v8143_v52  ;;  %v2103_v53 = vmul.f32 0.5, %v2039_v37  ;;  %v5686_v28 = vld [vmem:[%s10520_s3 + $0x250] ss:$8 sps:$4 sm:$0xff]   ;;  %3594 = vmatprep.subr.bf16.mxu1 %v5688_v33  ;;  %v5691_v38 = vld [vmem:[%s10520_s3 + $0x264] ss:$8 sps:$4 sm:$0xff]  }
 0x27d   : > { %v8184_v58 = vpop.eup %5925  ;;  %v1801_v11 = vmul.f32 0.044715, %v1737_v34  ;;  %v1864_v48 = vadd.f32 %v1800_v5, %v8140_v8  ;;  %v1802_v15 = vmul.f32 0.044715, %v1738_v44  ;;  %v2105_v57 = vmul.f32 0.5, %v2041_v49  ;;  %v1582_v5 = vpop.f32.mrb[75].mxu1 }
 0x27e   : > { %v8194_v3 = vadd.f32 %v1576_v21, %v7742_v7  ;;  %v1927_v37 = vmul.f32 0.7978846, %v1863_v45  ;;  %2595 = vmatprep.mubr.bf16.mxu0 %v2286_v60  ;;  %v2167_v34 = vmul.f32 %v2103_v53, %v7945_v43  ;;  %v8202_v9 = vadd.f32 %v1578_v51, %v7745_v47  ;;  %v10845_v45 = vld [vmem:[#allocation13_spill] sm:$0xff]  ;;  %v10847_v53 = vld [vmem:[#allocation14_spill] sm:$0xff] }
 0x27f   : > { %v1865_v31 = vadd.f32 %v1801_v11, %v8152_v40  ;;  %v1928_v44 = vmul.f32 0.7978846, %v1864_v48  ;;  %v1866_v21 = vadd.f32 %v1802_v15, %v8158_v36  ;;  %v2169_v49 = vmul.f32 %v2105_v57, %v7956_v4  ;;  %3595 = vmatpush1.bf16.msra.mxu1 %v5686_v28  ;;  %v5689_v11 = vld [vmem:[%s10520_s3 + $0x260] ss:$8 sps:$4 sm:$0xff]   ;;  %v5694_v48 = vld [vmem:[%s10520_s3 + $0x274] ss:$8 sps:$4 sm:$0xff]  }
 0x280   : > { %v1675_v33 = vmul.f32 %v8194_v3, %v8194_v3  ;;  %5935 = vtanh.f32 %v1927_v37  ;;  %v8209_v46 = vadd.f32 %v2167_v34, %v10845_v45  ;;  %v1676_v43 = vmul.f32 %v8202_v9, %v8202_v9  ;;  %3596 = vmatprep.subr.bf16.mxu1 %v5691_v38 }
 0x281   : > { %v1929_v52 = vmul.f32 0.7978846, %v1865_v31  ;;  %5937 = vtanh.f32 %v1928_v44  ;;  %v1930_v60 = vmul.f32 0.7978846, %v1866_v21  ;;  %v8217_v4 = vadd.f32 %v2169_v49, %v10847_v53  ;;  %v1586_v21 = vpop.f32.mrb[76].mxu1 }
 0x282   : > { %10846 = vst [vmem:[#allocation13_spill] sm:$0xff] %v8209_v46  ;;  %v1739_v51 = vmul.f32 %v1675_v33, %v8194_v3  ;;  %v8223_v15 = vpop.eup %5927  ;;  %v1740_v28 = vmul.f32 %v1676_v43, %v8202_v9  ;;  %v8227_v57 = vadd.f32 %v1580_v63, %v7742_v7  ;;  %v8230_v37 = vadd.f32 %v1582_v5, %v7745_v47  ;;  %v1588_v45 = vpop.f32.mrb[77].mxu1  ;;  %v5692_v43 = vld [vmem:[%s10520_s3 + $0x270] ss:$8 sps:$4 sm:$0xff]  }
 0x283   : > { %10848 = vst [vmem:[#allocation14_spill] sm:$0xff] %v8217_v4  ;;  %5939 = vtanh.f32 %v1929_v52  ;;  %v8232_v31 = vpop.eup %5929  ;;  %v2285_v38 = vpack.c.bf16 %v8217_v4, %v8209_v46  ;;  %v2044_v44 = vadd.f32 1.0, %v8106_v29  ;;  %v2046_v33 = vadd.f32 1.0, %v8124_v16  ;;  %3597 = vmatpush1.bf16.msra.mxu1 %v5689_v11  ;;  %v1590_v4 = vpop.f32.mrb[78].mxu1  ;;  %v5697_v16 = vld [vmem:[%s10520_s3 + $0x284] ss:$8 sps:$4 sm:$0xff]  }
 0x284   : > { %5941 = vtanh.f32 %v1930_v60  ;;  %v1803_v34 = vmul.f32 0.044715, %v1739_v51  ;;  %v8237_v49 = vpop.eup %5931  ;;  %v1804_v52 = vmul.f32 0.044715, %v1740_v28  ;;  %v1677_v63 = vmul.f32 %v8227_v57, %v8227_v57  ;;  %3598 = vmatprep.subr.bf16.mxu1 %v5694_v48  ;;  %v1592_v56 = vpop.f32.mrb[79].mxu1 }
 0x285   : > { %v1678_v5 = vmul.f32 %v8230_v37, %v8230_v37  ;;  %2596 = vmatmul.mubr.bf16.gmra.mrb[52].mxu0 %v2285_v38  ;;  %v2108_v53 = vmul.f32 0.5, %v2044_v44  ;;  %v2043_v51 = vadd.f32 1.0, %v8099_v14  ;;  %v2045_v28 = vadd.f32 1.0, %v8114_v12  ;;  %v5695_v12 = vld [vmem:[%s10520_s3 + $0x280] ss:$8 sps:$4 sm:$0xff]  }
 0x286   : > { %v8247_v60 = vpop.eup %5933  ;;  %v1867_v29 = vadd.f32 %v1803_v34, %v8194_v3  ;;  %v1868_v11 = vadd.f32 %v1804_v52, %v8202_v9  ;;  %v1741_v46 = vmul.f32 %v1677_v63, %v8227_v57  ;;  %v2110_v38 = vmul.f32 0.5, %v2046_v33 }
 0x287   : > { %v1742_v18 = vmul.f32 %v1678_v5, %v8230_v37  ;;  %v2172_v44 = vmul.f32 %v2108_v53, %v7986_v22  ;;  %v2107_v14 = vmul.f32 0.5, %v2043_v51  ;;  %v2109_v13 = vmul.f32 0.5, %v2045_v28  ;;  %3599 = vmatpush1.bf16.msra.mxu1 %v5692_v43  ;;  %v5700_v22 = vld [vmem:[%s10520_s3 + $0x294] ss:$8 sps:$4 sm:$0xff]  }
 0x288   : > { %v1931_v34 = vmul.f32 0.7978846, %v1867_v29  ;;  %v1932_v48 = vmul.f32 0.7978846, %v1868_v11  ;;  %v1805_v6 = vmul.f32 0.044715, %v1741_v46  ;;  %v2174_v52 = vmul.f32 %v2110_v38, %v7999_v59  ;;  %3600 = vmatprep.subr.bf16.mxu1 %v5697_v16 }
 0x289   : > { %v1806_v42 = vmul.f32 0.044715, %v1742_v18  ;;  %v2171_v63 = vmul.f32 %v2107_v14, %v7982_v20  ;;  %v2173_v5 = vmul.f32 %v2109_v13, %v7994_v35  ;;  %v10849_v18 = vld [vmem:[#allocation15_spill] sm:$0xff]  ;;  %v8287_v51 = vadd.f32 %v1586_v21, %v7742_v7 }
 0x28a   : > { %5943 = vtanh.f32 %v1931_v34  ;;  %v8268_v33 = vpop.eup %5935  ;;  %v1869_v29 = vadd.f32 %v1805_v6, %v8227_v57  ;;  %v8273_v53 = vadd.f32 %v2172_v44, %v10849_v18  ;;  %v10851_v59 = vld [vmem:[#allocation19_spill] sm:$0xff]  ;;  %v8290_v6 = vadd.f32 %v1588_v45, %v7745_v47 }
 0x28b   : > { %v1870_v46 = vadd.f32 %v1806_v42, %v8230_v37  ;;  %v8276_v43 = vadd.f32 %v2174_v52, %v10851_v59  ;;  %v8278_v20 = vpop.eup %5937  ;;  %v8281_v13 = vadd.f32 %v2171_v63, %v7422_v1  ;;  %v8284_v35 = vadd.f32 %v2173_v5, %v7425_v0  ;;  %v8292_v42 = vpop.f32.mrb[80].mxu1  ;;  %3601 = vmatpush1.bf16.msra.mxu1 %v5695_v12  ;;  %v5698_v21 = vld [vmem:[%s10520_s3 + $0x290] ss:$8 sps:$4 sm:$0xff]   ;;  %v5703_v12 = vld [vmem:[%s10520_s3 + $0x2a4] ss:$8 sps:$4 sm:$0xff]  }
 0x28c   : > { %10850 = vst [vmem:[#allocation15_spill] sm:$0xff] %v8273_v53  ;;  %5945 = vtanh.f32 %v1932_v48  ;;  %v1933_v16 = vmul.f32 0.7978846, %v1869_v29  ;;  %v8299_v1 = vadd.f32 %v1590_v4, %v7742_v7  ;;  %v8301_v0 = vpop.f32.mrb[81].mxu1  ;;  %v1679_v34 = vmul.f32 %v8287_v51, %v8287_v51  ;;  %3602 = vmatprep.subr.bf16.mxu1 %v5700_v22 }
 0x28d   : > { %10852 = vst [vmem:[#allocation19_spill] sm:$0xff] %v8276_v43  ;;  %10853 = vst [vmem:[#allocation63_spill] sm:$0xff] %v8281_v13  ;;  %v8294_v28 = vpop.eup %5939  ;;  %v2288_v11 = vpack.c.bf16 %v8276_v43, %v8273_v53  ;;  %v2287_v38 = vpack.c.bf16 %v8284_v35, %v8281_v13  ;;  %v1680_v44 = vmul.f32 %v8290_v6, %v8290_v6  ;;  %v1600_v14 = vpop.f32.mrb[82].mxu1  ;;  %v1934_v48 = vmul.f32 0.7978846, %v1870_v46 }
 0x28e   : > { %10854 = vst [vmem:[#allocation64_spill] sm:$0xff] %v8284_v35  ;;  %v8306_v45 = vpop.eup %5941  ;;  %v8315_v4 = vadd.f32 %v1592_v56, %v7745_v47  ;;  %v1681_v52 = vmul.f32 %v8299_v1, %v8299_v1  ;;  %v2048_v63 = vadd.f32 1.0, %v8174_v26  ;;  %v2050_v5 = vadd.f32 1.0, %v8184_v58  ;;  %v1602_v29 = vpop.f32.mrb[83].mxu1  ;;  %v5701_v46 = vld [vmem:[%s10520_s3 + $0x2a0] ss:$8 sps:$4 sm:$0xff]  }
 0x28f   : > { %2605 = vmatprep.mubr.bf16.mxu0 %v2288_v11  ;;  %5947 = vtanh.f32 %v1933_v16  ;;  %v1743_v56 = vmul.f32 %v1679_v34, %v8287_v51  ;;  %v1744_v22 = vmul.f32 %v1680_v44, %v8290_v6  ;;  %v2047_v58 = vadd.f32 1.0, %v8166_v10  ;;  %3603 = vmatpush1.bf16.msra.mxu1 %v5698_v21  ;;  %v5706_v16 = vld [vmem:[%s10520_s3 + $0x2b4] ss:$8 sps:$4 sm:$0xff]  }
 0x290   : > { %2606 = vmatmul.mubr.bf16.gmra.mrb[56].mxu0 %v2287_v38  ;;  %v1682_v18 = vmul.f32 %v8315_v4, %v8315_v4  ;;  %v1745_v59 = vmul.f32 %v1681_v52, %v8299_v1  ;;  %v2112_v11 = vmul.f32 0.5, %v2048_v63  ;;  %v2114_v26 = vmul.f32 0.5, %v2050_v5  ;;  %3604 = vmatprep.subr.bf16.mxu1 %v5703_v12 }
 0x291   : > { %v1807_v38 = vmul.f32 0.044715, %v1743_v56  ;;  %v1808_v34 = vmul.f32 0.044715, %v1744_v22  ;;  %v2049_v35 = vadd.f32 1.0, %v8180_v50  ;;  %v2111_v63 = vmul.f32 0.5, %v2047_v58 }
 0x292   : > { %v1746_v44 = vmul.f32 %v1682_v18, %v8315_v4  ;;  %v1809_v13 = vmul.f32 0.044715, %v1745_v59  ;;  %v2176_v43 = vmul.f32 %v2112_v11, %v8031_v23  ;;  %v2178_v52 = vmul.f32 %v2114_v26, %v8046_v62  ;;  %v8344_v22 = vpop.f32.mrb[84].mxu1  ;;  %v5704_v59 = vld [vmem:[%s10520_s3 + $0x2b0] ss:$8 sps:$4 sm:$0xff]  }
 0x293   : > { %v1871_v10 = vadd.f32 %v1807_v38, %v8287_v51  ;;  %v1872_v21 = vadd.f32 %v1808_v34, %v8290_v6  ;;  %v2113_v56 = vmul.f32 0.5, %v2049_v35  ;;  %v2175_v62 = vmul.f32 %v2111_v63, %v8024_v27  ;;  %v8354_v12 = vpop.f32.mrb[85].mxu1  ;;  %3605 = vmatpush1.bf16.msra.mxu1 %v5701_v46 }
 0x294   : > { %v8340_v5 = vpop.eup %5943  ;;  %v1810_v53 = vmul.f32 0.044715, %v1746_v44  ;;  %v1873_v18 = vadd.f32 %v1809_v13, %v8299_v1  ;;  %v8348_v50 = vadd.f32 %v2176_v43, %v7440_v55  ;;  %v8351_v23 = vadd.f32 %v2178_v52, %v7443_v41  ;;  %v8361_v55 = vpop.f32.mrb[86].mxu1  ;;  %3606 = vmatprep.subr.bf16.mxu1 %v5706_v16 }
 0x295   : > { %v1935_v35 = vmul.f32 0.7978846, %v1871_v10  ;;  %v1936_v11 = vmul.f32 0.7978846, %v1872_v21  ;;  %v2177_v13 = vmul.f32 %v2113_v56, %v8039_v32  ;;  %5949 = vtanh.f32 %v1934_v48  ;;  %v8371_v58 = vpop.f32.mrb[87].mxu1  ;;  %v10859_v32 = vld [vmem:[#allocation25_spill] sm:$0xff] }
 0x296   : > { %10855 = vst [vmem:[#allocation65_spill] sm:$0xff] %v8348_v50  ;;  %10856 = vst [vmem:[#allocation66_spill] sm:$0xff] %v8351_v23  ;;  %v1874_v26 = vadd.f32 %v1810_v53, %v8315_v4  ;;  %v8363_v41 = vpop.eup %5945  ;;  %v1937_v27 = vmul.f32 0.7978846, %v1873_v18  ;;  %v2290_v43 = vpack.c.bf16 %v8351_v23, %v8348_v50  ;;  %v8369_v46 = vadd.f32 %v8292_v42, %v7742_v7  ;;  %v10857_v53 = vld [vmem:[#allocation23_spill] sm:$0xff] }
 0x297   : > { %5951 = vtanh.f32 %v1935_v35  ;;  %v8374_v38 = vadd.f32 %v2175_v62, %v10857_v53  ;;  %v8377_v34 = vadd.f32 %v2177_v13, %v10859_v32  ;;  %v8381_v48 = vadd.f32 %v8301_v0, %v7745_v47  ;;  %3607 = vmatpush1.bf16.msra.mxu1 %v5704_v59 }
 0x298   : > { %v1938_v16 = vmul.f32 0.7978846, %v1874_v26  ;;  %2615 = vmatprep.mubr.bf16.mxu0 %v2290_v43  ;;  %v1683_v44 = vmul.f32 %v8369_v46, %v8369_v46  ;;  %v8386_v42 = vadd.f32 %v1600_v14, %v7742_v7  ;;  %v8389_v52 = vadd.f32 %v1602_v29, %v7745_v47 }
 0x299   : > { %10858 = vst [vmem:[#allocation23_spill] sm:$0xff] %v8374_v38  ;;  %10860 = vst [vmem:[#allocation25_spill] sm:$0xff] %v8377_v34  ;;  %v8391_v63 = vpop.eup %5947  ;;  %5953 = vtanh.f32 %v1936_v11  ;;  %v2289_v10 = vpack.c.bf16 %v8377_v34, %v8374_v38  ;;  %v1684_v0 = vmul.f32 %v8381_v48, %v8381_v48  ;;  %v2052_v21 = vadd.f32 1.0, %v8232_v31  ;;  %v8406_v11 = vpop.f32.mrb[88].mxu1 }
 0x29a   : > { %5955 = vtanh.f32 %v1937_v27  ;;  %v1747_v56 = vmul.f32 %v1683_v44, %v8369_v46  ;;  %v1685_v14 = vmul.f32 %v8386_v42, %v8386_v42  ;;  %v1686_v29 = vmul.f32 %v8389_v52, %v8389_v52  ;;  %v8411_v43 = vpop.f32.mrb[89].mxu1 }
 0x29b   : > { %2616 = vmatmul.mubr.bf16.gmra.mrb[60].mxu0 %v2289_v10  ;;  %v1748_v18 = vmul.f32 %v1684_v0, %v8381_v48  ;;  %v2054_v62 = vadd.f32 1.0, %v8247_v60  ;;  %v2116_v59 = vmul.f32 0.5, %v2052_v21  ;;  %v2051_v35 = vadd.f32 1.0, %v8223_v15  ;;  %v8414_v60 = vpop.f32.mrb[90].mxu1 }
 0x29c   : > { %v1811_v31 = vmul.f32 0.044715, %v1747_v56  ;;  %v1749_v26 = vmul.f32 %v1685_v14, %v8386_v42  ;;  %v1750_v13 = vmul.f32 %v1686_v29, %v8389_v52  ;;  %v2053_v27 = vadd.f32 1.0, %v8237_v49  ;;  %v8417_v34 = vpop.f32.mrb[91].mxu1 }
 0x29d   : > { %v1812_v53 = vmul.f32 0.044715, %v1748_v18  ;;  %v2118_v32 = vmul.f32 0.5, %v2054_v62  ;;  %v2180_v44 = vmul.f32 %v2116_v59, %v8088_v24  ;;  %v2115_v10 = vmul.f32 0.5, %v2051_v35  ;;  %v5707_v24 = vld [vmem:[%s10520_s3 + $0x2c0] ss:$8 sps:$4 sm:$0xff]  }
 0x29e   : > { %v1875_v15 = vadd.f32 %v1811_v31, %v8369_v46  ;;  %v1813_v0 = vmul.f32 0.044715, %v1749_v26  ;;  %v1814_v21 = vmul.f32 0.044715, %v1750_v13  ;;  %v2117_v56 = vmul.f32 0.5, %v2053_v27  ;;  %v10861_v13 = vld [vmem:[#allocation26_spill] sm:$0xff] }
 0x29f   : > { %5957 = vtanh.f32 %v1938_v16  ;;  %v1876_v14 = vadd.f32 %v1812_v53, %v8381_v48  ;;  %v2182_v49 = vmul.f32 %v2118_v32, %v8104_v17  ;;  %v2179_v29 = vmul.f32 %v2115_v10, %v8078_v39  ;;  %v5709_v18 = vld [vmem:[%s10520_s3 + $0x2c4] ss:$8 sps:$4 sm:$0xff]   ;;  %v8428_v62 = vpop.eup %5949  ;;  %v5712_v39 = vld [vmem:[%s10520_s3 + $0x2d4] ss:$8 sps:$4 sm:$0xff]  }
 0x2a0   : > { %v1939_v59 = vmul.f32 0.7978846, %v1875_v15  ;;  %v1877_v35 = vadd.f32 %v1813_v0, %v8386_v42  ;;  %v1878_v16 = vadd.f32 %v1814_v21, %v8389_v52  ;;  %v2181_v31 = vmul.f32 %v2117_v56, %v8097_v30  ;;  %v10863_v53 = vld [vmem:[#allocation27_spill] sm:$0xff]  ;;  %3608 = vmatprep.subr.bf16.mxu1 %v5709_v18  ;;  %v10865_v15 = vld [vmem:[#allocation30_spill] sm:$0xff]  ;;  %v10867_v21 = vld [vmem:[#allocation28_spill] sm:$0xff] }
 0x2a1   : > { %v8436_v17 = vpop.eup %5951  ;;  %v1940_v26 = vmul.f32 0.7978846, %v1876_v14  ;;  %v8439_v27 = vadd.f32 %v2180_v44, %v10861_v13  ;;  %v8442_v32 = vadd.f32 %v2182_v49, %v10863_v53  ;;  %v8446_v10 = vadd.f32 %v8344_v22, %v7742_v7  ;;  %3609 = vmatpush1.bf16.msra.mxu1 %v5707_v24  ;;  %v5710_v44 = vld [vmem:[%s10520_s3 + $0x2d0] ss:$8 sps:$4 sm:$0xff]  }
 0x2a2   : > { %5959 = vtanh.f32 %v1939_v59  ;;  %v1941_v30 = vmul.f32 0.7978846, %v1877_v35  ;;  %v8449_v0 = vadd.f32 %v2179_v29, %v10865_v15  ;;  %v8452_v56 = vadd.f32 %v2181_v31, %v10867_v21  ;;  %v8467_v59 = vpop.f32.mrb[92].mxu1  ;;  %3610 = vmatprep.subr.bf16.mxu1 %v5712_v39 }
 0x2a3   : > { %10862 = vst [vmem:[#allocation26_spill] sm:$0xff] %v8439_v27  ;;  %10864 = vst [vmem:[#allocation27_spill] sm:$0xff] %v8442_v32  ;;  %v8457_v14 = vpop.eup %5953  ;;  %v1942_v49 = vmul.f32 0.7978846, %v1878_v16  ;;  %v2292_v22 = vpack.c.bf16 %v8442_v32, %v8439_v27  ;;  %v1687_v18 = vmul.f32 %v8446_v10, %v8446_v10  ;;  %v8465_v29 = vadd.f32 %v8354_v12, %v7745_v47  ;;  %v8481_v13 = vpop.f32.mrb[93].mxu1 }
 0x2a4   : > { %10866 = vst [vmem:[#allocation30_spill] sm:$0xff] %v8449_v0  ;;  %10868 = vst [vmem:[#allocation28_spill] sm:$0xff] %v8452_v56  ;;  %v8469_v24 = vpop.eup %5955  ;;  %5961 = vtanh.f32 %v1940_v26  ;;  %v2291_v35 = vpack.c.bf16 %v8452_v56, %v8449_v0  ;;  %v8475_v16 = vadd.f32 %v8361_v55, %v7742_v7  ;;  %v8479_v31 = vadd.f32 %v8371_v58, %v7745_v47  ;;  %v8487_v53 = vpop.f32.mrb[94].mxu1 }
 0x2a5   : > { %5963 = vtanh.f32 %v1941_v30  ;;  %2625 = vmatprep.mubr.bf16.mxu0 %v2292_v22  ;;  %v1751_v12 = vmul.f32 %v1687_v18, %v8446_v10  ;;  %v1688_v39 = vmul.f32 %v8465_v29, %v8465_v29  ;;  %v2056_v26 = vadd.f32 1.0, %v8278_v20  ;;  %v8495_v21 = vpop.f32.mrb[95].mxu1  ;;  %3611 = vmatpush1.bf16.msra.mxu1 %v5710_v44 }
 0x2a6   : > { %2626 = vmatmul.mubr.bf16.gmra.mrb[64].mxu0 %v2291_v35  ;;  %v1689_v55 = vmul.f32 %v8475_v16, %v8475_v16  ;;  %v1690_v58 = vmul.f32 %v8479_v31, %v8479_v31  ;;  %v2058_v15 = vadd.f32 1.0, %v8306_v45  ;;  %v2055_v30 = vadd.f32 1.0, %v8268_v33 }
 0x2a7   : > { %v1815_v22 = vmul.f32 0.044715, %v1751_v12  ;;  %v1752_v18 = vmul.f32 %v1688_v39, %v8465_v29  ;;  %v2120_v20 = vmul.f32 0.5, %v2056_v26  ;;  %v2057_v56 = vadd.f32 1.0, %v8294_v28 }
 0x2a8   : > { %v1753_v35 = vmul.f32 %v1689_v55, %v8475_v16  ;;  %v1754_v0 = vmul.f32 %v1690_v58, %v8479_v31  ;;  %v2122_v32 = vmul.f32 0.5, %v2058_v15  ;;  %v2119_v27 = vmul.f32 0.5, %v2055_v30 }
 0x2a9   : > { %v8501_v38 = vpop.eup %5957  ;;  %v1879_v45 = vadd.f32 %v1815_v22, %v8446_v10  ;;  %v1816_v33 = vmul.f32 0.044715, %v1752_v18  ;;  %v2184_v23 = vmul.f32 %v2120_v20, %v8140_v8  ;;  %v2121_v44 = vmul.f32 0.5, %v2057_v56  ;;  %v10869_v8 = vld [vmem:[#allocation31_spill] sm:$0xff] }
 0x2aa   : > { %v1817_v12 = vmul.f32 0.044715, %v1753_v35  ;;  %v1818_v50 = vmul.f32 0.044715, %v1754_v0  ;;  %v2186_v39 = vmul.f32 %v2122_v32, %v8158_v36  ;;  %v2183_v28 = vmul.f32 %v2119_v27, %v8132_v25  ;;  %v10870_v0 = vld [vmem:[#allocation8_spill] sm:$0xff] }
 0x2ab   : > { %5965 = vtanh.f32 %v1942_v49  ;;  %v1943_v26 = vmul.f32 0.7978846, %v1879_v45  ;;  %v1880_v55 = vadd.f32 %v1816_v33, %v8465_v29  ;;  %v2185_v58 = vmul.f32 %v2121_v44, %v8152_v40 }
 0x2ac   : > { %v8509_v15 = vpop.eup %5959  ;;  %v1881_v30 = vadd.f32 %v1817_v12, %v8475_v16  ;;  %v1882_v22 = vadd.f32 %v1818_v50, %v8479_v31  ;;  %v8514_v56 = vadd.f32 %v2184_v23, %v10869_v8  ;;  %v8517_v18 = vadd.f32 %v2186_v39, %v10870_v0 }
 0x2ad   : > { %v1944_v36 = vmul.f32 0.7978846, %v1880_v55  ;;  %v8520_v25 = vadd.f32 %v2183_v28, %v7547_v54  ;;  %v8523_v27 = vadd.f32 %v2185_v58, %v7550_v2  ;;  %v8527_v40 = vadd.f32 %v8406_v11, %v7742_v7 }
 0x2ae   : > { %v8529_v32 = vpop.eup %5961  ;;  %5967 = vtanh.f32 %v1943_v26  ;;  %v2294_v50 = vpack.c.bf16 %v8517_v18, %v8514_v56  ;;  %v8535_v23 = vadd.f32 %v8411_v43, %v7745_v47  ;;  %v1945_v54 = vmul.f32 0.7978846, %v1881_v30 }
 0x2af   : > { %v8537_v49 = vpop.eup %5963  ;;  %v2293_v2 = vpack.c.bf16 %v8523_v27, %v8520_v25  ;;  %v1691_v11 = vmul.f32 %v8527_v40, %v8527_v40  ;;  %v8545_v20 = vadd.f32 %v8414_v60, %v7742_v7  ;;  %v1946_v35 = vmul.f32 0.7978846, %v1882_v22 }
 0x2b0   : > { %2635 = vmatprep.mubr.bf16.mxu0 %v2294_v50  ;;  %v1692_v45 = vmul.f32 %v8535_v23, %v8535_v23  ;;  %v8551_v43 = vadd.f32 %v8417_v34, %v7745_v47  ;;  %v2060_v33 = vadd.f32 1.0, %v8363_v41  ;;  %5969 = vtanh.f32 %v1944_v36  ;;  %v5713_v36 = vld [vmem:[%s10520_s3 + $0x2e0] ss:$8 sps:$4 sm:$0xff]  }
 0x2b1   : > { %2636 = vmatmul.mubr.bf16.gmra.mrb[68].mxu0 %v2293_v2  ;;  %v1755_v44 = vmul.f32 %v1691_v11, %v8527_v40  ;;  %v1693_v12 = vmul.f32 %v8545_v20, %v8545_v20  ;;  %v2062_v60 = vadd.f32 1.0, %v8428_v62  ;;  %v2059_v34 = vadd.f32 1.0, %v8340_v5 }
 0x2b2   : > { %v1756_v39 = vmul.f32 %v1692_v45, %v8535_v23  ;;  %v1694_v28 = vmul.f32 %v8551_v43, %v8551_v43  ;;  %v2124_v26 = vmul.f32 0.5, %v2060_v33  ;;  %v2061_v30 = vadd.f32 1.0, %v8391_v63  ;;  %v5715_v63 = vld [vmem:[%s10520_s3 + $0x2e4] ss:$8 sps:$4 sm:$0xff]  }
 0x2b3   : > { %v1819_v55 = vmul.f32 0.044715, %v1755_v44  ;;  %v1757_v41 = vmul.f32 %v1693_v12, %v8545_v20  ;;  %v2126_v58 = vmul.f32 0.5, %v2062_v60  ;;  %v2123_v62 = vmul.f32 0.5, %v2059_v34  ;;  %3612 = vmatprep.subr.bf16.mxu1 %v5715_v63 }
 0x2b4   : > { %v1820_v22 = vmul.f32 0.044715, %v1756_v39  ;;  %v1758_v8 = vmul.f32 %v1694_v28, %v8551_v43  ;;  %v2188_v0 = vmul.f32 %v2124_v26, %v8202_v9  ;;  %v2125_v45 = vmul.f32 0.5, %v2061_v30  ;;  %3613 = vmatpush1.bf16.msra.mxu1 %v5713_v36 }
 0x2b5   : > { %v8569_v50 = vpop.eup %5965  ;;  %v1883_v5 = vadd.f32 %v1819_v55, %v8527_v40  ;;  %v1821_v2 = vmul.f32 0.044715, %v1757_v41  ;;  %v2190_v11 = vmul.f32 %v2126_v58, %v8230_v37  ;;  %v2187_v12 = vmul.f32 %v2123_v62, %v8194_v3 }
 0x2b6   : > { %v1884_v33 = vadd.f32 %v1820_v22, %v8535_v23  ;;  %v1822_v9 = vmul.f32 0.044715, %v1758_v8  ;;  %v8578_v44 = vadd.f32 %v2188_v0, %v7555_v61  ;;  %v2189_v37 = vmul.f32 %v2125_v45, %v8227_v57  ;;  %v10872_v57 = vld [vmem:[#allocation11_spill] sm:$0xff] }
 0x2b7   : > { %v1947_v60 = vmul.f32 0.7978846, %v1883_v5  ;;  %v1885_v39 = vadd.f32 %v1821_v2, %v8545_v20  ;;  %v8583_v28 = vadd.f32 %v2190_v11, %v7558_v19  ;;  %5971 = vtanh.f32 %v1945_v54  ;;  %v10871_v19 = vld [vmem:[#allocation17_spill] sm:$0xff] }
 0x2b8   : > { %v8586_v26 = vpop.eup %5967  ;;  %v1948_v34 = vmul.f32 0.7978846, %v1884_v33  ;;  %v1886_v55 = vadd.f32 %v1822_v9, %v8551_v43  ;;  %v8591_v61 = vadd.f32 %v8467_v59, %v7742_v7  ;;  %5973 = vtanh.f32 %v1946_v35 }
 0x2b9   : > { %v2296_v3 = vpack.c.bf16 %v8583_v28, %v8578_v44  ;;  %v8596_v41 = vadd.f32 %v2187_v12, %v10871_v19  ;;  %v8599_v58 = vadd.f32 %v2189_v37, %v10872_v57  ;;  %5975 = vtanh.f32 %v1947_v60 }
 0x2ba   : > { %v1949_v54 = vmul.f32 0.7978846, %v1885_v39  ;;  %v1695_v30 = vmul.f32 %v8591_v61, %v8591_v61  ;;  %v8605_v59 = vadd.f32 %v8481_v13, %v7745_v47  ;;  %v5970_v22 = vpop.eup %5969  ;;  %5977 = vtanh.f32 %v1948_v34 }
 0x2bb   : > { %2645 = vmatprep.mubr.bf16.mxu0 %v2296_v3  ;;  %v2295_v35 = vpack.c.bf16 %v8599_v58, %v8596_v41  ;;  %v8611_v8 = vadd.f32 %v8487_v53, %v7742_v7  ;;  %v8615_v0 = vadd.f32 %v8495_v21, %v7745_v47  ;;  %v1950_v62 = vmul.f32 0.7978846, %v1886_v55 }
 0x2bc   : > { %v1759_v36 = vmul.f32 %v1695_v30, %v8591_v61  ;;  %v1696_v13 = vmul.f32 %v8605_v59, %v8605_v59  ;;  %v2064_v5 = vadd.f32 1.0, %v8457_v14  ;;  %v2066_v53 = vadd.f32 1.0, %v8501_v38 }
 0x2bd   : > { %2646 = vmatmul.mubr.bf16.gmra.mrb[72].mxu0 %v2295_v35  ;;  %v1697_v2 = vmul.f32 %v8611_v8, %v8611_v8  ;;  %v1698_v7 = vmul.f32 %v8615_v0, %v8615_v0  ;;  %v2063_v47 = vadd.f32 1.0, %v8436_v17  ;;  %v2065_v63 = vadd.f32 1.0, %v8469_v24 }
 0x2be   : > { %v1823_v21 = vmul.f32 0.044715, %v1759_v36  ;;  %v1760_v11 = vmul.f32 %v1696_v13, %v8605_v59  ;;  %v2128_v45 = vmul.f32 0.5, %v2064_v5  ;;  %v2130_v9 = vmul.f32 0.5, %v2066_v53  ;;  %v10874_v13 = vld [vmem:[#allocation7_spill] sm:$0xff]  ;;  %v10875_v5 = vld [vmem:[#allocation9_spill] sm:$0xff] }
 0x2bf   : > { %v1761_v33 = vmul.f32 %v1697_v2, %v8611_v8  ;;  %v1762_v14 = vmul.f32 %v1698_v7, %v8615_v0  ;;  %v2127_v12 = vmul.f32 0.5, %v2063_v47  ;;  %5979 = vtanh.f32 %v1950_v62  ;;  %v10873_v62 = vld [vmem:[#allocation29_spill] sm:$0xff]  ;;  %v10876_v7 = vld [vmem:[#allocation36_spill] sm:$0xff] }
 0x2c0   : > { %v1824_v60 = vmul.f32 0.044715, %v1760_v11  ;;  %v2192_v39 = vmul.f32 %v2128_v45, %v8290_v6  ;;  %v2129_v37 = vmul.f32 0.5, %v2065_v63  ;;  %v2194_v17 = vmul.f32 %v2130_v9, %v8315_v4 }
 0x2c1   : > { %v1825_v38 = vmul.f32 0.044715, %v1761_v33  ;;  %v1826_v34 = vmul.f32 0.044715, %v1762_v14  ;;  %v2191_v55 = vmul.f32 %v2127_v12, %v8287_v51  ;;  %v5972_v3 = vpop.eup %5971  ;;  %5981 = vtanh.f32 %v1949_v54  ;;  %v5716_v12 = vld [vmem:[%s10520_s3 + $0x2f0] ss:$8 sps:$4 sm:$0xff]  }
 0x2c2   : > { %v1887_v24 = vadd.f32 %v1823_v21, %v8591_v61  ;;  %v1888_v19 = vadd.f32 %v1824_v60, %v8605_v59  ;;  %v2193_v57 = vmul.f32 %v2129_v37, %v8299_v1  ;;  %v5974_v30 = vpop.eup %5973  ;;  %v8640_v36 = vadd.f32 %v2192_v39, %v10873_v62 }
 0x2c3   : > { %v1889_v35 = vadd.f32 %v1825_v38, %v8611_v8  ;;  %v1890_v6 = vadd.f32 %v1826_v34, %v8615_v0  ;;  %v8643_v4 = vadd.f32 %v2194_v17, %v10874_v13  ;;  %v8645_v51 = vpop.eup %5975  ;;  %v8648_v2 = vadd.f32 %v2191_v55, %v10875_v5 }
 0x2c4   : > { %v1952_v54 = vmul.f32 0.7978846, %v1888_v19  ;;  %v8651_v53 = vadd.f32 %v2193_v57, %v10876_v7  ;;  %v2068_v1 = vadd.f32 1.0, %v8529_v32  ;;  %v5978_v47 = vpop.eup %5977  ;;  %v2070_v63 = vadd.f32 1.0, %v8569_v50  ;;  %v5718_v32 = vld [vmem:[%s10520_s3 + $0x2f4] ss:$8 sps:$4 sm:$0xff]  }
 0x2c5   : > { %v1953_v21 = vmul.f32 0.7978846, %v1889_v35  ;;  %v1954_v11 = vmul.f32 0.7978846, %v1890_v6  ;;  %v2298_v45 = vpack.c.bf16 %v8643_v4, %v8640_v36  ;;  %v2067_v9 = vadd.f32 1.0, %v8509_v15  ;;  %3614 = vmatprep.subr.bf16.mxu1 %v5718_v32  ;;  %v10877_v6 = vld [vmem:[#allocation41_spill] sm:$0xff] }
 0x2c6   : > { %5983 = vtanh.f32 %v1952_v54  ;;  %v2297_v33 = vpack.c.bf16 %v8651_v53, %v8648_v2  ;;  %v2132_v14 = vmul.f32 0.5, %v2068_v1  ;;  %v1951_v60 = vmul.f32 0.7978846, %v1887_v24  ;;  %3615 = vmatpush1.bf16.msra.mxu1 %v5716_v12 }
 0x2c7   : > { %2655 = vmatprep.mubr.bf16.mxu0 %v2298_v45  ;;  %v2134_v39 = vmul.f32 0.5, %v2070_v63  ;;  %v2069_v50 = vadd.f32 1.0, %v8537_v49  ;;  %v2072_v37 = vadd.f32 1.0, %v5970_v22  ;;  %5985 = vtanh.f32 %v1954_v11  ;;  %v10881_v63 = vld [vmem:[#allocation40_spill] sm:$0xff] }
 0x2c8   : > { %2656 = vmatmul.mubr.bf16.gmra.mrb[76].mxu0 %v2297_v33  ;;  %v2196_v38 = vmul.f32 %v2132_v14, %v8381_v48  ;;  %v2131_v34 = vmul.f32 0.5, %v2067_v9  ;;  %v2074_v15 = vadd.f32 1.0, %v5974_v30  ;;  %v2071_v57 = vadd.f32 1.0, %v8586_v26  ;;  %v10878_v48 = vld [vmem:[#allocation39_spill] sm:$0xff] }
 0x2c9   : > { %v2198_v17 = vmul.f32 %v2134_v39, %v8389_v52  ;;  %v2133_v55 = vmul.f32 0.5, %v2069_v50  ;;  %v2136_v19 = vmul.f32 0.5, %v2072_v37  ;;  %v5980_v24 = vpop.eup %5979  ;;  %5987 = vtanh.f32 %v1953_v21  ;;  %v10880_v21 = vld [vmem:[#allocation35_spill] sm:$0xff] }
 0x2ca   : > { %v2195_v35 = vmul.f32 %v2131_v34, %v8369_v46  ;;  %v2138_v49 = vmul.f32 0.5, %v2074_v15  ;;  %v2073_v22 = vadd.f32 1.0, %v5972_v3  ;;  %v8672_v62 = vadd.f32 %v2196_v38, %v10877_v6  ;;  %v10879_v3 = vld [vmem:[#allocation34_spill] sm:$0xff]  ;;  %v10889_v6 = vld [vmem:[#allocation51_spill] sm:$0xff] }
 0x2cb   : > { %v8675_v13 = vadd.f32 %v2198_v17, %v10878_v48  ;;  %v2197_v30 = vmul.f32 %v2133_v55, %v8386_v42  ;;  %v2200_v52 = vmul.f32 %v2136_v19, %v8465_v29  ;;  %v5982_v54 = vpop.eup %5981  ;;  %5989 = vtanh.f32 %v1951_v60  ;;  %v10882_v29 = vld [vmem:[#allocation50_spill] sm:$0xff]  ;;  %v10883_v55 = vld [vmem:[#allocation52_spill] sm:$0xff] }
 0x2cc   : > { %v2202_v26 = vmul.f32 %v2138_v49, %v8479_v31  ;;  %v2137_v5 = vmul.f32 0.5, %v2073_v22  ;;  %v2076_v7 = vadd.f32 1.0, %v5978_v47  ;;  %v8683_v1 = vadd.f32 %v2195_v35, %v10879_v3  ;;  %v10885_v35 = vld [vmem:[#allocation53_spill] sm:$0xff] }
 0x2cd   : > { %v2300_v46 = vpack.c.bf16 %v8675_v13, %v8672_v62  ;;  %v8686_v11 = vadd.f32 %v2197_v30, %v10880_v21  ;;  %v2135_v45 = vmul.f32 0.5, %v2071_v57  ;;  %v8689_v42 = vadd.f32 %v2200_v52, %v10881_v63 }
 0x2ce   : > { %v8692_v33 = vadd.f32 %v2202_v26, %v10882_v29  ;;  %v2078_v14 = vadd.f32 1.0, %v5980_v24  ;;  %v2140_v31 = vmul.f32 0.5, %v2076_v7  ;;  %v2201_v9 = vmul.f32 %v2137_v5, %v8475_v16  ;;  %v10893_v29 = vld [vmem:[#allocation56_spill] sm:$0xff] }
 0x2cf   : > { %2665 = vmatprep.mubr.bf16.mxu0 %v2300_v46  ;;  %v2299_v47 = vpack.c.bf16 %v8686_v11, %v8683_v1  ;;  %v2077_v12 = vadd.f32 1.0, %v5982_v54  ;;  %v2199_v37 = vmul.f32 %v2135_v45, %v8446_v10  ;;  %v2075_v38 = vadd.f32 1.0, %v8645_v51  ;;  %v10891_v45 = vld [vmem:[#allocation58_spill] sm:$0xff] }
 0x2d0   : > { %v5984_v32 = vpop.eup %5983  ;;  %v2302_v60 = vpack.c.bf16 %v8692_v33, %v8689_v42  ;;  %v2142_v39 = vmul.f32 0.5, %v2078_v14  ;;  %v2204_v50 = vmul.f32 %v2140_v31, %v8535_v23  ;;  %v8704_v16 = vadd.f32 %v2201_v9, %v10883_v55  ;;  %v10887_v23 = vld [vmem:[#allocation54_spill] sm:$0xff] }
 0x2d1   : > { %2666 = vmatmul.mubr.bf16.gmra.mrb[80].mxu0 %v2299_v47  ;;  %v2080_v34 = vadd.f32 1.0, %v5984_v32  ;;  %v5986_v15 = vpop.eup %5985  ;;  %v2141_v19 = vmul.f32 0.5, %v2077_v12  ;;  %v8713_v51 = vadd.f32 %v2199_v37, %v10889_v6  ;;  %v2139_v48 = vmul.f32 0.5, %v2075_v38  ;;  %v10895_v47 = vld [vmem:[#allocation57_spill] sm:$0xff]  ;;  %v10901_v37 = vld [vmem:[#allocation59_spill] sm:$0xff]  ;;  %v10904_v55 = vld [vmem:[#allocation6_spill] sm:$0xff] }
 0x2d2   : > { %2675 = vmatprep.mubr.bf16.mxu0 %v2302_v60  ;;  %v2206_v17 = vmul.f32 %v2142_v39, %v8551_v43  ;;  %10884 = vst [vmem:[#allocation31_spill] sm:$0xff] %v8704_v16  ;;  %v2082_v57 = vadd.f32 1.0, %v5986_v15  ;;  %v8707_v49 = vadd.f32 %v2204_v50, %v10885_v35  ;;  %v10899_v39 = vld [vmem:[#allocation60_spill] sm:$0xff]  ;;  %v5260_v15 = vld [vmem:[%s10521_s4 + $0x2] sm:$0x3] }
 0x2d3   : > { %v5988_v24 = vpop.eup %5987  ;;  %v2144_v10 = vmul.f32 0.5, %v2080_v34  ;;  %10890 = vst [vmem:[#allocation11_spill] sm:$0xff] %v8713_v51  ;;  %v2301_v54 = vpack.c.bf16 %v8704_v16, %v8713_v51  ;;  %v2205_v26 = vmul.f32 %v2141_v19, %v8545_v20  ;;  %v2203_v3 = vmul.f32 %v2139_v48, %v8527_v40  ;;  %v10897_v20 = vld [vmem:[#allocation55_spill] sm:$0xff] }
 0x2d4   : > { %10886 = vst [vmem:[#allocation8_spill] sm:$0xff] %v8707_v49  ;;  %v8710_v22 = vadd.f32 %v2206_v17, %v10887_v23  ;;  %v2146_v30 = vmul.f32 0.5, %v2082_v57  ;;  %v2081_v7 = vadd.f32 1.0, %v5988_v24  ;;  %v10903_v17 = vld [vmem:[#allocation5_spill] sm:$0xff] }
 0x2d5   : > { %v5990_v52 = vpop.eup %5989  ;;  %v2208_v46 = vmul.f32 %v2144_v10, %v8605_v59  ;;  %v8727_v14 = vadd.f32 %v2205_v26, %v10893_v29 }
 0x2d6   : > { %10888 = vst [vmem:[#allocation17_spill] sm:$0xff] %v8710_v22  ;;  %v2304_v43 = vpack.c.bf16 %v8710_v22, %v8707_v49  ;;  %v2210_v5 = vmul.f32 %v2146_v30, %v8615_v0  ;;  %v2079_v21 = vadd.f32 1.0, %v5990_v52  ;;  %v2145_v31 = vmul.f32 0.5, %v2081_v7 }
 0x2d7   : > { %10894 = vst [vmem:[#allocation7_spill] sm:$0xff] %v8727_v14  ;;  %v8730_v9 = vadd.f32 %v2208_v46, %v10895_v47  ;;  %v8733_v0 = vadd.f32 %v2203_v3, %v10897_v20 }
 0x2d8   : > { %v8724_v63 = vadd.f32 %v2210_v5, %v10891_v45  ;;  %v2143_v12 = vmul.f32 0.5, %v2079_v21  ;;  %v2209_v32 = vmul.f32 %v2145_v31, %v8611_v8  ;;  %v8753_v8 = vrot.slane %v5260_v15, %v10903_v17 }
 0x2d9   : > { %2676 = vmatmul.mubr.bf16.gmra.mrb[84].mxu0 %v2301_v54  ;;  %10896 = vst [vmem:[#allocation9_spill] sm:$0xff] %v8730_v9  ;;  %10898 = vst [vmem:[#allocation36_spill] sm:$0xff] %v8733_v0  ;;  %v2303_v40 = vpack.c.bf16 %v8727_v14, %v8733_v0 }
 0x2da   : > { %2685 = vmatprep.mubr.bf16.mxu0 %v2304_v43  ;;  %10892 = vst [vmem:[#allocation29_spill] sm:$0xff] %v8724_v63  ;;  %v2306_v59 = vpack.c.bf16 %v8724_v63, %v8730_v9  ;;  %v2207_v60 = vmul.f32 %v2143_v12, %v8591_v61  ;;  %v8742_v50 = vadd.f32 %v2209_v32, %v10899_v39 }
 0x2db   : > { %v8756_v61 = vrot.slane %v5260_v15, %v10904_v55 }
 0x2dc   : > { %10900 = vst [vmem:[#allocation41_spill] sm:$0xff] %v8742_v50  ;;  %v8745_v38 = vadd.f32 %v2207_v60, %v10901_v37 }
 0x2de   : > { %10902 = vst [vmem:[#allocation39_spill] sm:$0xff] %v8745_v38  ;;  %v2305_v34 = vpack.c.bf16 %v8742_v50, %v8745_v38 }
 0x2e1   : > { %2686 = vmatmul.mubr.bf16.gmra.mrb[88].mxu0 %v2303_v40 }
 0x2e2   : > { %2695 = vmatprep.mubr.bf16.mxu0 %v2306_v59 }
 0x2e9   : > { %2696 = vmatmul.mubr.bf16.gmra.mrb[92].mxu0 %v2305_v34 }
 0x300   : > { %v2547_v19 = vpop.f32.mrb[32].mxu0 }
 0x301   : > { %v8759_v57 = vadd.f32 %v2547_v19, %v8753_v8  ;;  %v2549_v24 = vpop.f32.mrb[33].mxu0 }
 0x302   : > { %v8762_v35 = vadd.f32 %v2549_v24, %v8756_v61  ;;  %v2551_v23 = vpop.f32.mrb[34].mxu0 }
 0x303   : > { %v2706_v10 = vmul.f32 %v8759_v57, %v8759_v57  ;;  %v8767_v6 = vadd.f32 %v2551_v23, %v8753_v8  ;;  %v2553_v48 = vpop.f32.mrb[35].mxu0 }
 0x304   : > { %v2707_v30 = vmul.f32 %v8762_v35, %v8762_v35  ;;  %v8772_v52 = vadd.f32 %v2553_v48, %v8756_v61 }
 0x305   : > { %v2770_v43 = vmul.f32 %v2706_v10, %v8759_v57  ;;  %v2708_v54 = vmul.f32 %v8767_v6, %v8767_v6 }
 0x306   : > { %v2771_v26 = vmul.f32 %v2707_v30, %v8762_v35  ;;  %v2709_v5 = vmul.f32 %v8772_v52, %v8772_v52 }
 0x307   : > { %v2834_v7 = vmul.f32 0.044715, %v2770_v43  ;;  %v2772_v46 = vmul.f32 %v2708_v54, %v8767_v6 }
 0x308   : > { %v2835_v3 = vmul.f32 0.044715, %v2771_v26  ;;  %v2773_v21 = vmul.f32 %v2709_v5, %v8772_v52 }
 0x309   : > { %v2898_v45 = vadd.f32 %v2834_v7, %v8759_v57  ;;  %v2836_v29 = vmul.f32 0.044715, %v2772_v46 }
 0x30a   : > { %v2899_v31 = vadd.f32 %v2835_v3, %v8762_v35  ;;  %v2837_v47 = vmul.f32 0.044715, %v2773_v21 }
 0x30b   : > { %v2962_v20 = vmul.f32 0.7978846, %v2898_v45  ;;  %v2900_v12 = vadd.f32 %v2836_v29, %v8767_v6 }
 0x30c   : > { %v2963_v59 = vmul.f32 0.7978846, %v2899_v31  ;;  %v2901_v40 = vadd.f32 %v2837_v47, %v8772_v52 }
 0x30d   : > { %5991 = vtanh.f32 %v2962_v20  ;;  %v2964_v32 = vmul.f32 0.7978846, %v2900_v12 }
 0x30e   : > { %5993 = vtanh.f32 %v2963_v59  ;;  %v2965_v60 = vmul.f32 0.7978846, %v2901_v40 }
 0x30f   : > { %5995 = vtanh.f32 %v2964_v32 }
 0x310   : > { %5997 = vtanh.f32 %v2965_v60 }
 0x313   : > { %v2557_v39 = vpop.f32.mrb[36].mxu0 }
 0x314   : > { %v8787_v37 = vadd.f32 %v2557_v39, %v8753_v8  ;;  %v2559_v34 = vpop.f32.mrb[37].mxu0 }
 0x315   : > { %v8790_v15 = vadd.f32 %v2559_v34, %v8756_v61  ;;  %v2561_v19 = vpop.f32.mrb[38].mxu0 }
 0x316   : > { %v2710_v24 = vmul.f32 %v8787_v37, %v8787_v37  ;;  %v8795_v23 = vadd.f32 %v2561_v19, %v8753_v8  ;;  %v2563_v10 = vpop.f32.mrb[39].mxu0 }
 0x317   : > { %v2711_v48 = vmul.f32 %v8790_v15, %v8790_v15  ;;  %v8800_v30 = vadd.f32 %v2563_v10, %v8756_v61  ;;  %v5992_v7 = vpop.eup %5991 }
 0x318   : > { %v2774_v43 = vmul.f32 %v2710_v24, %v8787_v37  ;;  %v2712_v54 = vmul.f32 %v8795_v23, %v8795_v23  ;;  %v5994_v21 = vpop.eup %5993  ;;  %v3090_v45 = vadd.f32 1.0, %v5992_v7 }
 0x319   : > { %v2775_v26 = vmul.f32 %v2711_v48, %v8790_v15  ;;  %v2713_v5 = vmul.f32 %v8800_v30, %v8800_v30  ;;  %v5996_v47 = vpop.eup %5995  ;;  %v3091_v59 = vadd.f32 1.0, %v5994_v21 }
 0x31a   : > { %v2838_v46 = vmul.f32 0.044715, %v2774_v43  ;;  %v2776_v3 = vmul.f32 %v2712_v54, %v8795_v23  ;;  %v5998_v40 = vpop.eup %5997  ;;  %v3154_v32 = vmul.f32 0.5, %v3090_v45  ;;  %v3092_v60 = vadd.f32 1.0, %v5996_v47 }
 0x31b   : > { %v2839_v29 = vmul.f32 0.044715, %v2775_v26  ;;  %v2777_v31 = vmul.f32 %v2713_v5, %v8800_v30  ;;  %v3093_v10 = vadd.f32 1.0, %v5998_v40  ;;  %v3155_v48 = vmul.f32 0.5, %v3091_v59  ;;  %v10909_v59 = vld [vmem:[#allocation22_spill] sm:$0xff] }
 0x31c   : > { %v2902_v20 = vadd.f32 %v2838_v46, %v8787_v37  ;;  %v2840_v12 = vmul.f32 0.044715, %v2776_v3  ;;  %v3156_v43 = vmul.f32 0.5, %v3092_v60  ;;  %v3218_v3 = vmul.f32 %v3154_v32, %v8759_v57 }
 0x31d   : > { %v2903_v39 = vadd.f32 %v2839_v29, %v8790_v15  ;;  %v2841_v34 = vmul.f32 0.044715, %v2777_v31  ;;  %v3157_v7 = vmul.f32 0.5, %v3093_v10  ;;  %v3219_v46 = vmul.f32 %v3155_v48, %v8762_v35  ;;  %v10905_v31 = vld [vmem:[#allocation18_spill] sm:$0xff]  ;;  %v10911_v35 = vld [vmem:[#allocation24_spill] sm:$0xff] }
 0x31e   : > { %v2966_v19 = vmul.f32 0.7978846, %v2902_v20  ;;  %v2904_v24 = vadd.f32 %v2840_v12, %v8795_v23  ;;  %v3220_v21 = vmul.f32 %v3156_v43, %v8767_v6  ;;  %v10907_v20 = vld [vmem:[#allocation21_spill] sm:$0xff]  ;;  %v8828_v60 = vadd.f32 %v3218_v3, %v10911_v35 }
 0x31f   : > { %v2967_v54 = vmul.f32 0.7978846, %v2903_v39  ;;  %v2905_v26 = vadd.f32 %v2841_v34, %v8800_v30  ;;  %v3221_v29 = vmul.f32 %v3157_v7, %v8772_v52  ;;  %v8822_v12 = vadd.f32 %v3219_v46, %v10907_v20 }
 0x320   : > { %5999 = vtanh.f32 %v2966_v19  ;;  %v2968_v5 = vmul.f32 0.7978846, %v2904_v24  ;;  %v8819_v47 = vadd.f32 %v3220_v21, %v10905_v31  ;;  %10912 = vst [vmem:[#allocation50_spill] sm:$0xff] %v8828_v60 }
 0x321   : > { %6001 = vtanh.f32 %v2967_v54  ;;  %v2969_v45 = vmul.f32 0.7978846, %v2905_v26  ;;  %10908 = vst [vmem:[#allocation35_spill] sm:$0xff] %v8822_v12  ;;  %v8825_v40 = vadd.f32 %v3221_v29, %v10909_v59 }
 0x322   : > { %6003 = vtanh.f32 %v2968_v5  ;;  %10906 = vst [vmem:[#allocation34_spill] sm:$0xff] %v8819_v47  ;;  %v3346_v6 = vpack.c.bf16 %v8819_v47, %v8828_v60 }
 0x323   : > { %6005 = vtanh.f32 %v2969_v45  ;;  %10910 = vst [vmem:[#allocation40_spill] sm:$0xff] %v8825_v40  ;;  %v3347_v57 = vpack.c.bf16 %v8825_v40, %v8822_v12  ;;  %v10913_v40 = vld [vmem:[#allocation38_spill] sm:$0xff] }
 0x324   : > { %v2567_v52 = vpop.f32.mrb[40].mxu0 }
 0x325   : > { %3616 = vmatprep.mubr.bf16.mxu1 %v3347_v57  ;;  %v8835_v39 = vadd.f32 %v2567_v52, %v8753_v8  ;;  %v2569_v34 = vpop.f32.mrb[41].mxu0 }
 0x326   : > { %3617 = vmatmul.mubr.bf16.vlgmr.msra.gmra.mrb[96].mxu1 %v3346_v6  ;;  %v8838_v24 = vadd.f32 %v2569_v34, %v8756_v61  ;;  %v2571_v10 = vpop.f32.mrb[42].mxu0 }
 0x327   : > { %v2714_v54 = vmul.f32 %v8835_v39, %v8835_v39  ;;  %v8843_v26 = vadd.f32 %v2571_v10, %v8753_v8  ;;  %v2573_v5 = vpop.f32.mrb[43].mxu0 }
 0x328   : > { %v2715_v3 = vmul.f32 %v8838_v24, %v8838_v24  ;;  %v8848_v21 = vadd.f32 %v2573_v5, %v8756_v61 }
 0x329   : > { %v2778_v31 = vmul.f32 %v2714_v54, %v8835_v39  ;;  %v2716_v20 = vmul.f32 %v8843_v26, %v8843_v26 }
 0x32a   : > { %v6000_v32 = vpop.eup %5999  ;;  %v2779_v57 = vmul.f32 %v2715_v3, %v8838_v24  ;;  %v2717_v6 = vmul.f32 %v8848_v21, %v8848_v21 }
 0x32b   : > { %v6002_v19 = vpop.eup %6001  ;;  %v3094_v48 = vadd.f32 1.0, %v6000_v32  ;;  %v2842_v32 = vmul.f32 0.044715, %v2778_v31  ;;  %v2780_v34 = vmul.f32 %v2716_v20, %v8843_v26 }
 0x32c   : > { %v6004_v43 = vpop.eup %6003  ;;  %v3095_v7 = vadd.f32 1.0, %v6002_v19 }
 0x32d   : > { %v6006_v46 = vpop.eup %6005  ;;  %v3096_v45 = vadd.f32 1.0, %v6004_v43  ;;  %v3158_v29 = vmul.f32 0.5, %v3094_v48  ;;  %v2843_v48 = vmul.f32 0.044715, %v2779_v57  ;;  %v2781_v43 = vmul.f32 %v2717_v6, %v8848_v21 }
 0x32e   : > { %v3097_v59 = vadd.f32 1.0, %v6006_v46  ;;  %v3159_v35 = vmul.f32 0.5, %v3095_v7  ;;  %v2906_v7 = vadd.f32 %v2842_v32, %v8835_v39  ;;  %v2844_v46 = vmul.f32 0.044715, %v2780_v34 }
 0x32f   : > { %v3160_v52 = vmul.f32 0.5, %v3096_v45  ;;  %v3222_v54 = vmul.f32 %v3158_v29, %v8787_v37  ;;  %v2907_v45 = vadd.f32 %v2843_v48, %v8838_v24  ;;  %v2845_v31 = vmul.f32 0.044715, %v2781_v43  ;;  %v10917_v37 = vld [vmem:[#allocation33_spill] sm:$0xff] }
 0x330   : > { %v3161_v19 = vmul.f32 0.5, %v3097_v59  ;;  %v3223_v10 = vmul.f32 %v3159_v35, %v8790_v15  ;;  %v2970_v59 = vmul.f32 0.7978846, %v2906_v7  ;;  %v2908_v15 = vadd.f32 %v2844_v46, %v8843_v26  ;;  %v10915_v35 = vld [vmem:[#allocation32_spill] sm:$0xff] }
 0x331   : > { %v3224_v5 = vmul.f32 %v3160_v52, %v8795_v23  ;;  %v2971_v23 = vmul.f32 0.7978846, %v2907_v45  ;;  %v2909_v6 = vadd.f32 %v2845_v31, %v8848_v21  ;;  %v10919_v52 = vld [vmem:[#allocation37_spill] sm:$0xff] }
 0x332   : > { %v3225_v3 = vmul.f32 %v3161_v19, %v8800_v30  ;;  %v8869_v57 = vadd.f32 %v3223_v10, %v10915_v35  ;;  %v8876_v30 = vadd.f32 %v3222_v54, %v10919_v52  ;;  %6007 = vtanh.f32 %v2970_v59 }
 0x333   : > { %v8865_v20 = vadd.f32 %v3224_v5, %v10913_v40  ;;  %v2972_v32 = vmul.f32 0.7978846, %v2908_v15  ;;  %6009 = vtanh.f32 %v2971_v23  ;;  %v2973_v34 = vmul.f32 0.7978846, %v2909_v6 }
 0x334   : > { %10916 = vst [vmem:[#allocation53_spill] sm:$0xff] %v8869_v57  ;;  %v8872_v29 = vadd.f32 %v3225_v3, %v10917_v37  ;;  %10920 = vst [vmem:[#allocation51_spill] sm:$0xff] %v8876_v30 }
 0x335   : > { %10914 = vst [vmem:[#allocation52_spill] sm:$0xff] %v8865_v20  ;;  %v3348_v19 = vpack.c.bf16 %v8865_v20, %v8876_v30  ;;  %6011 = vtanh.f32 %v2972_v32  ;;  %v2577_v10 = vpop.f32.mrb[44].mxu0 }
 0x336   : > { %10918 = vst [vmem:[#allocation54_spill] sm:$0xff] %v8872_v29  ;;  %v3349_v40 = vpack.c.bf16 %v8872_v29, %v8869_v57  ;;  %6013 = vtanh.f32 %v2973_v34  ;;  %v8883_v48 = vadd.f32 %v2577_v10, %v8753_v8  ;;  %v2579_v43 = vpop.f32.mrb[45].mxu0 }
 0x337   : > { %v8886_v54 = vadd.f32 %v2579_v43, %v8756_v61  ;;  %v2581_v5 = vpop.f32.mrb[46].mxu0 }
 0x338   : > { %3626 = vmatprep.mubr.bf16.mxu1 %v3349_v40  ;;  %v2718_v7 = vmul.f32 %v8883_v48, %v8883_v48  ;;  %v8891_v46 = vadd.f32 %v2581_v5, %v8753_v8  ;;  %v2583_v3 = vpop.f32.mrb[47].mxu0 }
 0x339   : > { %3627 = vmatmul.mubr.bf16.gmra.mrb[100].mxu1 %v3348_v19  ;;  %v2719_v45 = vmul.f32 %v8886_v54, %v8886_v54  ;;  %v8896_v31 = vadd.f32 %v2583_v3, %v8756_v61 }
 0x33a   : > { %v2782_v59 = vmul.f32 %v2718_v7, %v8883_v48  ;;  %v2720_v15 = vmul.f32 %v8891_v46, %v8891_v46 }
 0x33b   : > { %v2783_v37 = vmul.f32 %v2719_v45, %v8886_v54  ;;  %v2721_v23 = vmul.f32 %v8896_v31, %v8896_v31 }
 0x33c   : > { %v6008_v35 = vpop.eup %6007  ;;  %v2846_v52 = vmul.f32 0.044715, %v2782_v59  ;;  %v2784_v32 = vmul.f32 %v2720_v15, %v8891_v46 }
 0x33d   : > { %v6010_v6 = vpop.eup %6009  ;;  %v3098_v40 = vadd.f32 1.0, %v6008_v35  ;;  %v2847_v19 = vmul.f32 0.044715, %v2783_v37  ;;  %v2785_v10 = vmul.f32 %v2721_v23, %v8896_v31 }
 0x33e   : > { %v3099_v43 = vadd.f32 1.0, %v6010_v6  ;;  %v2910_v7 = vadd.f32 %v2846_v52, %v8883_v48  ;;  %v2848_v3 = vmul.f32 0.044715, %v2784_v32 }
 0x33f   : > { %v6012_v34 = vpop.eup %6011  ;;  %v3162_v57 = vmul.f32 0.5, %v3098_v40  ;;  %v2911_v45 = vadd.f32 %v2847_v19, %v8886_v54  ;;  %v2849_v20 = vmul.f32 0.044715, %v2785_v10  ;;  %v10921_v10 = vld [vmem:[#allocation62_spill] sm:$0xff] }
 0x340   : > { %v6014_v5 = vpop.eup %6013  ;;  %v3100_v29 = vadd.f32 1.0, %v6012_v34  ;;  %v3163_v12 = vmul.f32 0.5, %v3099_v43  ;;  %v2974_v59 = vmul.f32 0.7978846, %v2910_v7  ;;  %v2912_v15 = vadd.f32 %v2848_v3, %v8891_v46 }
 0x341   : > { %v3101_v30 = vadd.f32 1.0, %v6014_v5  ;;  %v2975_v47 = vmul.f32 0.7978846, %v2911_v45  ;;  %v2913_v37 = vadd.f32 %v2849_v20, %v8896_v31  ;;  %v3226_v32 = vmul.f32 %v3162_v57, %v8835_v39  ;;  %v10927_v5 = vld [vmem:[#allocation61_spill] sm:$0xff] }
 0x342   : > { %v3164_v35 = vmul.f32 0.5, %v3100_v29  ;;  %v3227_v6 = vmul.f32 %v3163_v12, %v8838_v24  ;;  %6015 = vtanh.f32 %v2974_v59  ;;  %v2976_v52 = vmul.f32 0.7978846, %v2912_v15  ;;  %v10923_v29 = vld [vmem:[#allocation42_spill] sm:$0xff] }
 0x343   : > { %v3165_v23 = vmul.f32 0.5, %v3101_v30  ;;  %6017 = vtanh.f32 %v2975_v47  ;;  %v2977_v34 = vmul.f32 0.7978846, %v2913_v37  ;;  %v10925_v30 = vld [vmem:[#allocation43_spill] sm:$0xff]  ;;  %v8924_v39 = vadd.f32 %v3226_v32, %v10927_v5 }
 0x344   : > { %v3228_v40 = vmul.f32 %v3164_v35, %v8843_v26  ;;  %6019 = vtanh.f32 %v2976_v52  ;;  %v8918_v20 = vadd.f32 %v3227_v6, %v10923_v29 }
 0x345   : > { %v3229_v19 = vmul.f32 %v3165_v23, %v8848_v21  ;;  %6021 = vtanh.f32 %v2977_v34  ;;  %10928 = vst [vmem:[#allocation55_spill] sm:$0xff] %v8924_v39 }
 0x346   : > { %v8915_v43 = vadd.f32 %v3228_v40, %v10921_v10  ;;  %10924 = vst [vmem:[#allocation56_spill] sm:$0xff] %v8918_v20  ;;  %v2587_v24 = vpop.f32.mrb[48].mxu0 }
 0x347   : > { %v8921_v12 = vadd.f32 %v3229_v19, %v10925_v30  ;;  %v8927_v47 = vadd.f32 %v2587_v24, %v8753_v8  ;;  %v2589_v26 = vpop.f32.mrb[49].mxu0 }
 0x348   : > { %10922 = vst [vmem:[#allocation58_spill] sm:$0xff] %v8915_v43  ;;  %v8932_v57 = vadd.f32 %v2589_v26, %v8756_v61  ;;  %v2591_v7 = vpop.f32.mrb[50].mxu0  ;;  %v3350_v3 = vpack.c.bf16 %v8915_v43, %v8924_v39 }
 0x349   : > { %10926 = vst [vmem:[#allocation57_spill] sm:$0xff] %v8921_v12  ;;  %v3351_v21 = vpack.c.bf16 %v8921_v12, %v8918_v20  ;;  %v2722_v45 = vmul.f32 %v8927_v47, %v8927_v47  ;;  %v8939_v59 = vadd.f32 %v2591_v7, %v8753_v8  ;;  %v2593_v15 = vpop.f32.mrb[51].mxu0 }
 0x34a   : > { %v2723_v35 = vmul.f32 %v8932_v57, %v8932_v57  ;;  %v8944_v37 = vadd.f32 %v2593_v15, %v8756_v61 }
 0x34b   : > { %3636 = vmatprep.mubr.bf16.mxu1 %v3351_v21  ;;  %v2786_v23 = vmul.f32 %v2722_v45, %v8927_v47  ;;  %v2724_v6 = vmul.f32 %v8939_v59, %v8939_v59 }
 0x34c   : > { %3637 = vmatmul.mubr.bf16.gmra.mrb[104].mxu1 %v3350_v3  ;;  %v6016_v52 = vpop.eup %6015  ;;  %v2787_v32 = vmul.f32 %v2723_v35, %v8932_v57  ;;  %v2725_v40 = vmul.f32 %v8944_v37, %v8944_v37 }
 0x34d   : > { %v6018_v34 = vpop.eup %6017  ;;  %v2850_v19 = vmul.f32 0.044715, %v2786_v23  ;;  %v2788_v10 = vmul.f32 %v2724_v6, %v8939_v59  ;;  %v3102_v29 = vadd.f32 1.0, %v6016_v52 }
 0x34e   : > { %v6020_v30 = vpop.eup %6019  ;;  %v2851_v24 = vmul.f32 0.044715, %v2787_v32  ;;  %v2789_v5 = vmul.f32 %v2725_v40, %v8944_v37  ;;  %v3103_v26 = vadd.f32 1.0, %v6018_v34 }
 0x34f   : > { %v6022_v21 = vpop.eup %6021  ;;  %v2914_v7 = vadd.f32 %v2850_v19, %v8927_v47  ;;  %v2852_v3 = vmul.f32 0.044715, %v2788_v10  ;;  %v3104_v45 = vadd.f32 1.0, %v6020_v30  ;;  %v3166_v15 = vmul.f32 0.5, %v3102_v29 }
 0x350   : > { %v2915_v35 = vadd.f32 %v2851_v24, %v8932_v57  ;;  %v2853_v12 = vmul.f32 0.044715, %v2789_v5  ;;  %v3105_v20 = vadd.f32 1.0, %v6022_v21  ;;  %v3167_v43 = vmul.f32 0.5, %v3103_v26  ;;  %v10929_v5 = vld [vmem:[#allocation47_spill] sm:$0xff]  ;;  %v10931_v21 = vld [vmem:[#allocation44_spill] sm:$0xff] }
 0x351   : > { %v2978_v23 = vmul.f32 0.7978846, %v2914_v7  ;;  %v2916_v6 = vadd.f32 %v2852_v3, %v8939_v59  ;;  %v3168_v52 = vmul.f32 0.5, %v3104_v45  ;;  %v3230_v10 = vmul.f32 %v3166_v15, %v8883_v48 }
 0x352   : > { %v2979_v39 = vmul.f32 0.7978846, %v2915_v35  ;;  %v2917_v32 = vadd.f32 %v2853_v12, %v8944_v37  ;;  %v3169_v40 = vmul.f32 0.5, %v3105_v20  ;;  %v3231_v34 = vmul.f32 %v3167_v43, %v8886_v54  ;;  %v10933_v20 = vld [vmem:[#allocation45_spill] sm:$0xff]  ;;  %v10935_v43 = vld [vmem:[#allocation46_spill] sm:$0xff] }
 0x353   : > { %6023 = vtanh.f32 %v2978_v23  ;;  %v2980_v19 = vmul.f32 0.7978846, %v2916_v6  ;;  %v3232_v29 = vmul.f32 %v3168_v52, %v8891_v46  ;;  %v8972_v7 = vadd.f32 %v3230_v10, %v10935_v43 }
 0x354   : > { %6025 = vtanh.f32 %v2979_v39  ;;  %v2981_v30 = vmul.f32 0.7978846, %v2917_v32  ;;  %v3233_v24 = vmul.f32 %v3169_v40, %v8896_v31  ;;  %v8966_v12 = vadd.f32 %v3231_v34, %v10931_v21 }
 0x355   : > { %6027 = vtanh.f32 %v2980_v19  ;;  %v8963_v26 = vadd.f32 %v3232_v29, %v10929_v5  ;;  %10936 = vst [vmem:[#allocation21_spill] sm:$0xff] %v8972_v7 }
 0x356   : > { %6029 = vtanh.f32 %v2981_v30  ;;  %10932 = vst [vmem:[#allocation59_spill] sm:$0xff] %v8966_v12  ;;  %v8969_v54 = vadd.f32 %v3233_v24, %v10933_v20 }
 0x357   : > { %10930 = vst [vmem:[#allocation60_spill] sm:$0xff] %v8963_v26  ;;  %v3352_v3 = vpack.c.bf16 %v8963_v26, %v8972_v7 }
 0x358   : > { %10934 = vst [vmem:[#allocation18_spill] sm:$0xff] %v8969_v54  ;;  %v2597_v48 = vpop.f32.mrb[52].mxu0  ;;  %v3353_v46 = vpack.c.bf16 %v8969_v54, %v8966_v12 }
 0x359   : > { %v8977_v31 = vadd.f32 %v2597_v48, %v8753_v8  ;;  %v2599_v39 = vpop.f32.mrb[53].mxu0 }
 0x35a   : > { %v8982_v45 = vadd.f32 %v2599_v39, %v8756_v61  ;;  %v2601_v15 = vpop.f32.mrb[54].mxu0  ;;  %3646 = vmatprep.mubr.bf16.mxu1 %v3353_v46 }
 0x35b   : > { %v2726_v35 = vmul.f32 %v8977_v31, %v8977_v31  ;;  %v8987_v23 = vadd.f32 %v2601_v15, %v8753_v8  ;;  %v2603_v6 = vpop.f32.mrb[55].mxu0  ;;  %3647 = vmatmul.mubr.bf16.gmra.mrb[108].mxu1 %v3352_v3 }
 0x35c   : > { %v2727_v52 = vmul.f32 %v8982_v45, %v8982_v45  ;;  %v8992_v32 = vadd.f32 %v2603_v6, %v8756_v61 }
 0x35d   : > { %v6024_v40 = vpop.eup %6023  ;;  %v2790_v34 = vmul.f32 %v2726_v35, %v8977_v31  ;;  %v2728_v19 = vmul.f32 %v8987_v23, %v8987_v23 }
 0x35e   : > { %v6026_v10 = vpop.eup %6025  ;;  %v2791_v29 = vmul.f32 %v2727_v52, %v8982_v45  ;;  %v2729_v30 = vmul.f32 %v8992_v32, %v8992_v32  ;;  %v3106_v24 = vadd.f32 1.0, %v6024_v40 }
 0x35f   : > { %v6028_v5 = vpop.eup %6027  ;;  %v2854_v21 = vmul.f32 0.044715, %v2790_v34  ;;  %v2792_v20 = vmul.f32 %v2728_v19, %v8987_v23  ;;  %v3107_v43 = vadd.f32 1.0, %v6026_v10 }
 0x360   : > { %v6030_v48 = vpop.eup %6029  ;;  %v2855_v46 = vmul.f32 0.044715, %v2791_v29  ;;  %v2793_v39 = vmul.f32 %v2729_v30, %v8992_v32  ;;  %v3108_v3 = vadd.f32 1.0, %v6028_v5  ;;  %v3170_v15 = vmul.f32 0.5, %v3106_v24 }
 0x361   : > { %v2918_v35 = vadd.f32 %v2854_v21, %v8977_v31  ;;  %v2856_v6 = vmul.f32 0.044715, %v2792_v20  ;;  %v3109_v54 = vadd.f32 1.0, %v6030_v48  ;;  %v3171_v52 = vmul.f32 0.5, %v3107_v43 }
 0x362   : > { %v2919_v12 = vadd.f32 %v2855_v46, %v8982_v45  ;;  %v2857_v26 = vmul.f32 0.044715, %v2793_v39  ;;  %v3172_v7 = vmul.f32 0.5, %v3108_v3  ;;  %v3234_v34 = vmul.f32 %v3170_v15, %v8927_v47 }
 0x363   : > { %v2607_v40 = vpop.f32.mrb[56].mxu0  ;;  %v2982_v19 = vmul.f32 0.7978846, %v2918_v35  ;;  %v2920_v10 = vadd.f32 %v2856_v6, %v8987_v23  ;;  %v3173_v24 = vmul.f32 0.5, %v3109_v54  ;;  %v3235_v48 = vmul.f32 %v3171_v52, %v8932_v57 }
 0x364   : > { %v9007_v29 = vadd.f32 %v2607_v40, %v8753_v8  ;;  %v2609_v30 = vpop.f32.mrb[57].mxu0  ;;  %v2983_v5 = vmul.f32 0.7978846, %v2919_v12  ;;  %v2921_v21 = vadd.f32 %v2857_v26, %v8992_v32  ;;  %v10937_v40 = vld [vmem:[#allocation48_spill] sm:$0xff] }
 0x365   : > { %v9011_v20 = vadd.f32 %v2609_v30, %v8756_v61  ;;  %v2611_v43 = vpop.f32.mrb[58].mxu0  ;;  %6031 = vtanh.f32 %v2982_v19  ;;  %v2984_v46 = vmul.f32 0.7978846, %v2920_v10  ;;  %v3237_v35 = vmul.f32 %v3173_v24, %v8944_v37  ;;  %v10941_v24 = vld [vmem:[#allocation16_spill] sm:$0xff] }
 0x366   : > { %v2730_v47 = vmul.f32 %v9007_v29, %v9007_v29  ;;  %v9017_v39 = vadd.f32 %v2611_v43, %v8753_v8  ;;  %v2613_v3 = vpop.f32.mrb[59].mxu0  ;;  %6033 = vtanh.f32 %v2983_v5  ;;  %v2985_v54 = vmul.f32 0.7978846, %v2921_v21  ;;  %v10939_v5 = vld [vmem:[#allocation49_spill] sm:$0xff] }
 0x367   : > { %v2731_v26 = vmul.f32 %v9011_v20, %v9011_v20  ;;  %v9022_v12 = vadd.f32 %v2613_v3, %v8756_v61  ;;  %6035 = vtanh.f32 %v2984_v46  ;;  %v9032_v19 = vadd.f32 %v3235_v48, %v10937_v40 }
 0x368   : > { %v2794_v57 = vmul.f32 %v2730_v47, %v9007_v29  ;;  %v2732_v15 = vmul.f32 %v9017_v39, %v9017_v39  ;;  %6037 = vtanh.f32 %v2985_v54  ;;  %v9036_v21 = vadd.f32 %v3237_v35, %v10939_v5 }
 0x369   : > { %v2795_v6 = vmul.f32 %v2731_v26, %v9011_v20  ;;  %v2733_v52 = vmul.f32 %v9022_v12, %v9022_v12  ;;  %10938 = vst [vmem:[#allocation22_spill] sm:$0xff] %v9032_v19  ;;  %v3236_v43 = vmul.f32 %v3172_v7, %v8939_v59  ;;  %v9041_v47 = vadd.f32 %v3234_v34, %v10941_v24  ;;  %v10943_v26 = vld [vmem:[#allocation20_spill] sm:$0xff] }
 0x36a   : > { %v2858_v10 = vmul.f32 0.044715, %v2794_v57  ;;  %v2796_v30 = vmul.f32 %v2732_v15, %v9017_v39  ;;  %10940 = vst [vmem:[#allocation24_spill] sm:$0xff] %v9036_v21  ;;  %v3355_v48 = vpack.c.bf16 %v9036_v21, %v9032_v19 }
 0x36b   : > { %v2859_v46 = vmul.f32 0.044715, %v2795_v6  ;;  %v2797_v37 = vmul.f32 %v2733_v52, %v9022_v12  ;;  %10942 = vst [vmem:[#allocation38_spill] sm:$0xff] %v9041_v47  ;;  %v9047_v57 = vadd.f32 %v3236_v43, %v10943_v26 }
 0x36c   : > { %v2922_v3 = vadd.f32 %v2858_v10, %v9007_v29  ;;  %v2860_v54 = vmul.f32 0.044715, %v2796_v30  ;;  %3656 = vmatprep.mubr.bf16.mxu1 %v3355_v48 }
 0x36d   : > { %10944 = vst [vmem:[#allocation32_spill] sm:$0xff] %v9047_v57  ;;  %v2923_v15 = vadd.f32 %v2859_v46, %v9011_v20  ;;  %v2861_v35 = vmul.f32 0.044715, %v2797_v37  ;;  %v3354_v7 = vpack.c.bf16 %v9047_v57, %v9041_v47 }
 0x36e   : > { %v2986_v40 = vmul.f32 0.7978846, %v2922_v3  ;;  %v2924_v59 = vadd.f32 %v2860_v54, %v9017_v39  ;;  %v2617_v52 = vpop.f32.mrb[60].mxu0 }
 0x36f   : > { %v2987_v34 = vmul.f32 0.7978846, %v2923_v15  ;;  %v2925_v6 = vadd.f32 %v2861_v35, %v9022_v12  ;;  %v6032_v10 = vpop.eup %6031  ;;  %v9055_v5 = vadd.f32 %v2617_v52, %v8753_v8  ;;  %v2619_v43 = vpop.f32.mrb[61].mxu0  ;;  %3657 = vmatmul.mubr.bf16.gmra.mrb[112].mxu1 %v3354_v7  ;;  %v5719_v52 = vld [vmem:[%s10522_s5 + $0x40] sm:$0xff]  }
 0x370   : > { %6039 = vtanh.f32 %v2986_v40  ;;  %v2988_v30 = vmul.f32 0.7978846, %v2924_v59  ;;  %v6034_v46 = vpop.eup %6033  ;;  %v9058_v24 = vadd.f32 %v2619_v43, %v8756_v61  ;;  %v2621_v3 = vpop.f32.mrb[62].mxu0  ;;  %v3110_v54 = vadd.f32 1.0, %v6032_v10  ;;  %v5720_v10 = vld [vmem:[%s10522_s5] sm:$0xff]   ;;  %5381 = vmatprep.subr.bf16.mxu0 %v5719_v52 }
 0x371   : > { %6041 = vtanh.f32 %v2987_v34  ;;  %v2989_v37 = vmul.f32 0.7978846, %v2925_v6  ;;  %v6036_v48 = vpop.eup %6035  ;;  %v2734_v26 = vmul.f32 %v9055_v5, %v9055_v5  ;;  %v9063_v15 = vadd.f32 %v2621_v3, %v8753_v8  ;;  %v2623_v35 = vpop.f32.mrb[63].mxu0  ;;  %5382 = vmatpush3.bf16.msra.mxu0 %v5720_v10 }
 0x372   : > { %6043 = vtanh.f32 %v2988_v30  ;;  %v3111_v40 = vadd.f32 1.0, %v6034_v46  ;;  %v6038_v59 = vpop.eup %6037  ;;  %v2735_v7 = vmul.f32 %v9058_v24, %v9058_v24  ;;  %v9068_v34 = vadd.f32 %v2623_v35, %v8756_v61  ;;  %v5721_v30 = vld [vmem:[%s10522_s5 + $0x48] sm:$0xff]  }
 0x373   : > { %6045 = vtanh.f32 %v2989_v37  ;;  %v3112_v6 = vadd.f32 1.0, %v6036_v48  ;;  %v2798_v43 = vmul.f32 %v2734_v26, %v9055_v5  ;;  %v2736_v46 = vmul.f32 %v9063_v15, %v9063_v15  ;;  %v5722_v26 = vld [vmem:[%s10522_s5 + $0x8] sm:$0xff]   ;;  %5383 = vmatprep.subr.bf16.mxu0 %v5721_v30 }
 0x374   : > { %v3113_v37 = vadd.f32 1.0, %v6038_v59  ;;  %v3175_v3 = vmul.f32 0.5, %v3111_v40  ;;  %v2799_v48 = vmul.f32 %v2735_v7, %v9058_v24  ;;  %v2737_v35 = vmul.f32 %v9068_v34, %v9068_v34 }
 0x375   : > { %v3174_v21 = vmul.f32 0.5, %v3110_v54  ;;  %v3176_v19 = vmul.f32 0.5, %v3112_v6  ;;  %v2862_v57 = vmul.f32 0.044715, %v2798_v43  ;;  %v2800_v47 = vmul.f32 %v2736_v46, %v9063_v15  ;;  %v5723_v6 = vld [vmem:[%s10522_s5 + $0x50] sm:$0xff]   ;;  %5384 = vmatpush3.bf16.msra.mxu0 %v5722_v26  ;;  %v5725_v26 = vld [vmem:[%s10522_s5 + $0x58] sm:$0xff]  }
 0x376   : > { %v3177_v60 = vmul.f32 0.5, %v3113_v37  ;;  %v3239_v55 = vmul.f32 %v3175_v3, %v8982_v45  ;;  %v2863_v40 = vmul.f32 0.044715, %v2799_v48  ;;  %v2801_v59 = vmul.f32 %v2737_v35, %v9068_v34  ;;  %v10945_v37 = vld [vmem:[#allocation13_spill] sm:$0xff]  ;;  %v10947_v48 = vld [vmem:[#allocation14_spill] sm:$0xff]  ;;  %5385 = vmatprep.subr.bf16.mxu0 %v5723_v6 }
 0x377   : > { %v3238_v7 = vmul.f32 %v3174_v21, %v8977_v31  ;;  %v3240_v54 = vmul.f32 %v3176_v19, %v8987_v23  ;;  %v2926_v52 = vadd.f32 %v2862_v57, %v9055_v5  ;;  %v2864_v45 = vmul.f32 0.044715, %v2800_v47  ;;  %v10949_v35 = vld [vmem:[#allocation10_spill] sm:$0xff]  ;;  %v10951_v47 = vld [vmem:[#allocation12_spill] sm:$0xff] }
 0x378   : > { %v3241_v10 = vmul.f32 %v3177_v60, %v8992_v32  ;;  %v2927_v43 = vadd.f32 %v2863_v40, %v9058_v24  ;;  %v2865_v46 = vmul.f32 0.044715, %v2801_v59  ;;  %v9107_v17 = vadd.f32 %v3239_v55, %v10949_v35  ;;  %v5724_v60 = vld [vmem:[%s10522_s5 + $0x10] sm:$0xff]  }
 0x379   : > { %v9100_v3 = vadd.f32 %v3238_v7, %v10945_v37  ;;  %v9103_v31 = vadd.f32 %v3240_v54, %v10947_v48  ;;  %v2990_v19 = vmul.f32 0.7978846, %v2926_v52  ;;  %v2928_v21 = vadd.f32 %v2864_v45, %v9063_v15  ;;  %v2627_v30 = vpop.f32.mrb[64].mxu0  ;;  %5386 = vmatpush3.bf16.msra.mxu0 %v5724_v60 }
 0x37a   : > { %v6040_v23 = vpop.eup %6039  ;;  %10950 = vst [vmem:[#allocation62_spill] sm:$0xff] %v9107_v17  ;;  %v9110_v57 = vadd.f32 %v3241_v10, %v10951_v47  ;;  %v2991_v40 = vmul.f32 0.7978846, %v2927_v43  ;;  %v2929_v59 = vadd.f32 %v2865_v46, %v9068_v34  ;;  %v9117_v7 = vadd.f32 %v2627_v30, %v8753_v8  ;;  %v2629_v54 = vpop.f32.mrb[65].mxu0  ;;  %5387 = vmatprep.subr.bf16.mxu0 %v5725_v26 }
 0x37b   : > { %10946 = vst [vmem:[#allocation33_spill] sm:$0xff] %v9100_v3  ;;  %10948 = vst [vmem:[#allocation37_spill] sm:$0xff] %v9103_v31  ;;  %v6042_v32 = vpop.eup %6041  ;;  %v3356_v55 = vpack.c.bf16 %v9103_v31, %v9100_v3  ;;  %6047 = vtanh.f32 %v2990_v19  ;;  %v2992_v45 = vmul.f32 0.7978846, %v2928_v21  ;;  %v9125_v10 = vadd.f32 %v2629_v54, %v8756_v61  ;;  %v2631_v43 = vpop.f32.mrb[66].mxu0 }
 0x37c   : > { %10952 = vst [vmem:[#allocation42_spill] sm:$0xff] %v9110_v57  ;;  %v6044_v52 = vpop.eup %6043  ;;  %v3357_v46 = vpack.c.bf16 %v9110_v57, %v9107_v17  ;;  %6049 = vtanh.f32 %v2991_v40  ;;  %v2993_v48 = vmul.f32 0.7978846, %v2929_v59  ;;  %v2738_v6 = vmul.f32 %v9117_v7, %v9117_v7  ;;  %v2633_v35 = vpop.f32.mrb[67].mxu0  ;;  %v5726_v40 = vld [vmem:[%s10522_s5 + $0x18] sm:$0xff]  }
 0x37d   : > { %v6046_v37 = vpop.eup %6045  ;;  %v9132_v30 = vadd.f32 %v2631_v43, %v8753_v8  ;;  %6051 = vtanh.f32 %v2992_v45  ;;  %v2739_v19 = vmul.f32 %v9125_v10, %v9125_v10  ;;  %v9137_v21 = vadd.f32 %v2633_v35, %v8756_v61  ;;  %v5727_v43 = vld [vmem:[%s10522_s5 + $0x60] sm:$0xff]   ;;  %5388 = vmatpush3.bf16.msra.mxu0 %v5726_v40 }
 0x37e   : > { %3666 = vmatprep.mubr.bf16.mxu1 %v3357_v46  ;;  %v3115_v47 = vadd.f32 1.0, %v6042_v32  ;;  %6053 = vtanh.f32 %v2993_v48  ;;  %v2802_v59 = vmul.f32 %v2738_v6, %v9117_v7  ;;  %v3117_v45 = vadd.f32 1.0, %v6046_v37  ;;  %5389 = vmatprep.subr.bf16.mxu0 %v5727_v43 }
 0x37f   : > { %v2740_v54 = vmul.f32 %v9132_v30, %v9132_v30  ;;  %3667 = vmatmul.mubr.bf16.gmra.mrb[116].mxu1 %v3356_v55  ;;  %v2803_v32 = vmul.f32 %v2739_v19, %v9125_v10  ;;  %v2741_v60 = vmul.f32 %v9137_v21, %v9137_v21  ;;  %v3114_v35 = vadd.f32 1.0, %v6040_v23  ;;  %v5728_v19 = vld [vmem:[%s10522_s5 + $0x20] sm:$0xff]  }
 0x380   : > { %v3179_v46 = vmul.f32 0.5, %v3115_v47  ;;  %v2866_v48 = vmul.f32 0.044715, %v2802_v59  ;;  %v3181_v31 = vmul.f32 0.5, %v3117_v45  ;;  %v3116_v3 = vadd.f32 1.0, %v6044_v52  ;;  %v5729_v52 = vld [vmem:[%s10522_s5 + $0x68] sm:$0xff]  }
 0x381   : > { %v2804_v6 = vmul.f32 %v2740_v54, %v9132_v30  ;;  %v2867_v57 = vmul.f32 0.044715, %v2803_v32  ;;  %v2805_v55 = vmul.f32 %v2741_v60, %v9137_v21  ;;  %v3178_v37 = vmul.f32 0.5, %v3114_v35  ;;  %v10953_v45 = vld [vmem:[#allocation15_spill] sm:$0xff]  ;;  %5390 = vmatpush3.bf16.msra.mxu0 %v5728_v19 }
 0x382   : > { %v3243_v26 = vmul.f32 %v3179_v46, %v9011_v20  ;;  %v2930_v17 = vadd.f32 %v2866_v48, %v9117_v7  ;;  %v3245_v23 = vmul.f32 %v3181_v31, %v9022_v12  ;;  %v3180_v59 = vmul.f32 0.5, %v3116_v3  ;;  %v10955_v48 = vld [vmem:[#allocation19_spill] sm:$0xff]  ;;  %5391 = vmatprep.subr.bf16.mxu0 %v5729_v52  ;;  %v10959_v52 = vld [vmem:[#allocation64_spill] sm:$0xff] }
 0x383   : > { %v2868_v47 = vmul.f32 0.044715, %v2804_v6  ;;  %v2931_v54 = vadd.f32 %v2867_v57, %v9125_v10  ;;  %v2869_v20 = vmul.f32 0.044715, %v2805_v55  ;;  %v3242_v32 = vmul.f32 %v3178_v37, %v9007_v29 }
 0x384   : > { %v9164_v40 = vadd.f32 %v3243_v26, %v10953_v45  ;;  %v2994_v60 = vmul.f32 0.7978846, %v2930_v17  ;;  %v2637_v35 = vpop.f32.mrb[68].mxu0  ;;  %v9169_v12 = vadd.f32 %v3245_v23, %v10955_v48  ;;  %v3244_v3 = vmul.f32 %v3180_v59, %v9017_v39  ;;  %v10957_v26 = vld [vmem:[#allocation63_spill] sm:$0xff]  ;;  %v5730_v17 = vld [vmem:[%s10522_s5 + $0x28] sm:$0xff]  }
 0x385   : > { %v2932_v46 = vadd.f32 %v2868_v47, %v9132_v30  ;;  %v6048_v31 = vpop.eup %6047  ;;  %v2995_v43 = vmul.f32 0.7978846, %v2931_v54  ;;  %v2933_v6 = vadd.f32 %v2869_v20, %v9137_v21  ;;  %v9174_v57 = vadd.f32 %v2637_v35, %v8753_v8  ;;  %v2639_v55 = vpop.f32.mrb[69].mxu0  ;;  %5392 = vmatpush3.bf16.msra.mxu0 %v5730_v17 }
 0x386   : > { %10954 = vst [vmem:[#allocation43_spill] sm:$0xff] %v9164_v40  ;;  %10956 = vst [vmem:[#allocation61_spill] sm:$0xff] %v9169_v12  ;;  %v9177_v45 = vadd.f32 %v3242_v32, %v10957_v26  ;;  %v6050_v29 = vpop.eup %6049  ;;  %6055 = vtanh.f32 %v2994_v60  ;;  %v9183_v39 = vadd.f32 %v2639_v55, %v8756_v61  ;;  %v2641_v47 = vpop.f32.mrb[70].mxu0  ;;  %v3359_v23 = vpack.c.bf16 %v9169_v12, %v9164_v40 }
 0x387   : > { %v2996_v37 = vmul.f32 0.7978846, %v2932_v46  ;;  %v6052_v59 = vpop.eup %6051  ;;  %6057 = vtanh.f32 %v2995_v43  ;;  %v2997_v54 = vmul.f32 0.7978846, %v2933_v6  ;;  %v2742_v19 = vmul.f32 %v9174_v57, %v9174_v57  ;;  %v2643_v32 = vpop.f32.mrb[71].mxu0 }
 0x388   : > { %10958 = vst [vmem:[#allocation47_spill] sm:$0xff] %v9177_v45  ;;  %v9190_v20 = vadd.f32 %v2641_v47, %v8753_v8  ;;  %v6054_v60 = vpop.eup %6053  ;;  %v2743_v46 = vmul.f32 %v9183_v39, %v9183_v39  ;;  %v9195_v35 = vadd.f32 %v2643_v32, %v8756_v61  ;;  %3676 = vmatprep.mubr.bf16.mxu1 %v3359_v23  ;;  %v3119_v55 = vadd.f32 1.0, %v6050_v29 }
 0x389   : > { %6059 = vtanh.f32 %v2996_v37  ;;  %v9198_v48 = vadd.f32 %v3244_v3, %v10959_v52  ;;  %v2806_v43 = vmul.f32 %v2742_v19, %v9174_v57  ;;  %v3121_v23 = vadd.f32 1.0, %v6054_v60 }
 0x38a   : > { %6061 = vtanh.f32 %v2997_v54  ;;  %v2744_v6 = vmul.f32 %v9190_v20, %v9190_v20  ;;  %v2807_v26 = vmul.f32 %v2743_v46, %v9183_v39  ;;  %v2745_v37 = vmul.f32 %v9195_v35, %v9195_v35 }
 0x38b   : > { %10960 = vst [vmem:[#allocation44_spill] sm:$0xff] %v9198_v48  ;;  %v3358_v47 = vpack.c.bf16 %v9198_v48, %v9177_v45  ;;  %v2870_v32 = vmul.f32 0.044715, %v2806_v43  ;;  %v3183_v54 = vmul.f32 0.5, %v3119_v55  ;;  %v3118_v52 = vadd.f32 1.0, %v6048_v31 }
 0x38c   : > { %v2808_v3 = vmul.f32 %v2744_v6, %v9190_v20  ;;  %v2871_v19 = vmul.f32 0.044715, %v2807_v26  ;;  %v2809_v12 = vmul.f32 %v2745_v37, %v9195_v35  ;;  %v3185_v29 = vmul.f32 0.5, %v3121_v23  ;;  %v10961_v26 = vld [vmem:[#allocation65_spill] sm:$0xff] }
 0x38d   : > { %3677 = vmatmul.mubr.bf16.gmra.mrb[120].mxu1 %v3358_v47  ;;  %v3120_v17 = vadd.f32 1.0, %v6052_v59  ;;  %v2934_v46 = vadd.f32 %v2870_v32, %v9174_v57  ;;  %v3247_v38 = vmul.f32 %v3183_v54, %v9058_v24  ;;  %v3182_v50 = vmul.f32 0.5, %v3118_v52 }
 0x38e   : > { %v2872_v40 = vmul.f32 0.044715, %v2808_v3  ;;  %v2935_v48 = vadd.f32 %v2871_v19, %v9183_v39  ;;  %v2873_v60 = vmul.f32 0.044715, %v2809_v12  ;;  %v3249_v43 = vmul.f32 %v3185_v29, %v9068_v34  ;;  %v10963_v3 = vld [vmem:[#allocation66_spill] sm:$0xff]  ;;  %v10965_v19 = vld [vmem:[#allocation23_spill] sm:$0xff] }
 0x38f   : > { %v3184_v6 = vmul.f32 0.5, %v3120_v17  ;;  %v2998_v55 = vmul.f32 0.7978846, %v2934_v46  ;;  %v9216_v37 = vadd.f32 %v3247_v38, %v10961_v26  ;;  %v3246_v59 = vmul.f32 %v3182_v50, %v9055_v5 }
 0x390   : > { %v2936_v31 = vadd.f32 %v2872_v40, %v9190_v20  ;;  %v6056_v47 = vpop.eup %6055  ;;  %v2999_v23 = vmul.f32 0.7978846, %v2935_v48  ;;  %v2937_v32 = vadd.f32 %v2873_v60, %v9195_v35  ;;  %v2647_v24 = vpop.f32.mrb[72].mxu0  ;;  %v9221_v54 = vadd.f32 %v3249_v43, %v10963_v3 }
 0x391   : > { %10962 = vst [vmem:[#allocation45_spill] sm:$0xff] %v9216_v37  ;;  %v3248_v12 = vmul.f32 %v3184_v6, %v9063_v15  ;;  %v6058_v34 = vpop.eup %6057  ;;  %6063 = vtanh.f32 %v2998_v55  ;;  %v9225_v40 = vadd.f32 %v2647_v24, %v8753_v8  ;;  %v2649_v38 = vpop.f32.mrb[73].mxu0  ;;  %v9228_v29 = vadd.f32 %v3246_v59, %v10965_v19  ;;  %v10967_v55 = vld [vmem:[#allocation25_spill] sm:$0xff] }
 0x392   : > { %10964 = vst [vmem:[#allocation46_spill] sm:$0xff] %v9221_v54  ;;  %v3000_v52 = vmul.f32 0.7978846, %v2936_v31  ;;  %6065 = vtanh.f32 %v2999_v23  ;;  %v3001_v5 = vmul.f32 0.7978846, %v2937_v32  ;;  %v9231_v48 = vadd.f32 %v2649_v38, %v8756_v61  ;;  %v2651_v17 = vpop.f32.mrb[74].mxu0 }
 0x393   : > { %10966 = vst [vmem:[#allocation48_spill] sm:$0xff] %v9228_v29  ;;  %v6060_v50 = vpop.eup %6059  ;;  %v3361_v15 = vpack.c.bf16 %v9221_v54, %v9216_v37  ;;  %v2746_v60 = vmul.f32 %v9225_v40, %v9225_v40  ;;  %v9238_v43 = vadd.f32 %v2651_v17, %v8753_v8  ;;  %v2653_v6 = vpop.f32.mrb[75].mxu0  ;;  %v9241_v31 = vadd.f32 %v3248_v12, %v10967_v55  ;;  %v10969_v37 = vld [vmem:[#allocation26_spill] sm:$0xff] }
 0x394   : > { %v6062_v46 = vpop.eup %6061  ;;  %6067 = vtanh.f32 %v3000_v52  ;;  %v2747_v26 = vmul.f32 %v9231_v48, %v9231_v48  ;;  %v9246_v59 = vadd.f32 %v2653_v6, %v8756_v61  ;;  %v3123_v23 = vadd.f32 1.0, %v6058_v34  ;;  %v5731_v6 = vld [vmem:[%s10522_s5 + $0x70] sm:$0xff]  }
 0x395   : > { %10968 = vst [vmem:[#allocation49_spill] sm:$0xff] %v9241_v31  ;;  %6069 = vtanh.f32 %v3001_v5  ;;  %3686 = vmatprep.mubr.bf16.mxu1 %v3361_v15  ;;  %v2810_v32 = vmul.f32 %v2746_v60, %v9225_v40  ;;  %v2748_v24 = vmul.f32 %v9238_v43, %v9238_v43  ;;  %v3360_v3 = vpack.c.bf16 %v9241_v31, %v9228_v29 }
 0x396   : > { %v3125_v52 = vadd.f32 1.0, %v6062_v46  ;;  %v2811_v12 = vmul.f32 %v2747_v26, %v9231_v48  ;;  %v2749_v38 = vmul.f32 %v9246_v59, %v9246_v59  ;;  %v3187_v19 = vmul.f32 0.5, %v3123_v23  ;;  %v5732_v46 = vld [vmem:[%s10522_s5 + $0x30] sm:$0xff]   ;;  %5393 = vmatprep.subr.bf16.mxu0 %v5731_v6 }
 0x397   : > { %v3122_v5 = vadd.f32 1.0, %v6056_v47  ;;  %v2874_v17 = vmul.f32 0.044715, %v2810_v32  ;;  %v2812_v15 = vmul.f32 %v2748_v24, %v9238_v43  ;;  %3687 = vmatmul.mubr.bf16.gmra.mrb[124].mxu1 %v3360_v3  ;;  %v3124_v60 = vadd.f32 1.0, %v6060_v50  ;;  %5394 = vmatpush3.bf16.msra.mxu0 %v5732_v46 }
 0x398   : > { %v3189_v34 = vmul.f32 0.5, %v3125_v52  ;;  %v2875_v55 = vmul.f32 0.044715, %v2811_v12  ;;  %v2813_v26 = vmul.f32 %v2749_v38, %v9246_v59  ;;  %v3251_v23 = vmul.f32 %v3187_v19, %v9125_v10 }
 0x399   : > { %v3186_v47 = vmul.f32 0.5, %v3122_v5  ;;  %v2938_v32 = vadd.f32 %v2874_v17, %v9225_v40  ;;  %v2876_v24 = vmul.f32 0.044715, %v2812_v15  ;;  %v3188_v50 = vmul.f32 0.5, %v3124_v60  ;;  %v10971_v5 = vld [vmem:[#allocation27_spill] sm:$0xff] }
 0x39a   : > { %v3253_v3 = vmul.f32 %v3189_v34, %v9137_v21  ;;  %v2939_v52 = vadd.f32 %v2875_v55, %v9231_v48  ;;  %v2877_v54 = vmul.f32 0.044715, %v2813_v26  ;;  %v9269_v31 = vadd.f32 %v3251_v23, %v10969_v37 }
 0x39b   : > { %v3250_v12 = vmul.f32 %v3186_v47, %v9117_v7  ;;  %v6064_v38 = vpop.eup %6063  ;;  %v3002_v29 = vmul.f32 0.7978846, %v2938_v32  ;;  %v2940_v10 = vadd.f32 %v2876_v24, %v9238_v43  ;;  %v2657_v19 = vpop.f32.mrb[76].mxu0  ;;  %v3252_v21 = vmul.f32 %v3188_v50, %v9132_v30  ;;  %v10973_v7 = vld [vmem:[#allocation30_spill] sm:$0xff] }
 0x39c   : > { %10970 = vst [vmem:[#allocation16_spill] sm:$0xff] %v9269_v31  ;;  %v9274_v17 = vadd.f32 %v3253_v3, %v10971_v5  ;;  %v6066_v15 = vpop.eup %6065  ;;  %v3003_v34 = vmul.f32 0.7978846, %v2939_v52  ;;  %v2941_v60 = vadd.f32 %v2877_v54, %v9246_v59  ;;  %v9279_v37 = vadd.f32 %v2657_v19, %v8753_v8  ;;  %v2659_v6 = vpop.f32.mrb[77].mxu0 }
 0x39d   : > { %v9282_v46 = vadd.f32 %v3250_v12, %v10973_v7  ;;  %6071 = vtanh.f32 %v3002_v29  ;;  %v3004_v26 = vmul.f32 0.7978846, %v2940_v10  ;;  %v9285_v23 = vadd.f32 %v2659_v6, %v8756_v61  ;;  %v2661_v47 = vpop.f32.mrb[78].mxu0  ;;  %v10975_v12 = vld [vmem:[#allocation28_spill] sm:$0xff] }
 0x39e   : > { %10972 = vst [vmem:[#allocation20_spill] sm:$0xff] %v9274_v17  ;;  %v6068_v55 = vpop.eup %6067  ;;  %v3363_v30 = vpack.c.bf16 %v9274_v17, %v9269_v31  ;;  %6073 = vtanh.f32 %v3003_v34  ;;  %v3005_v54 = vmul.f32 0.7978846, %v2941_v60  ;;  %v2750_v24 = vmul.f32 %v9279_v37, %v9279_v37  ;;  %v2663_v50 = vpop.f32.mrb[79].mxu0 }
 0x39f   : > { %10974 = vst [vmem:[#allocation13_spill] sm:$0xff] %v9282_v46  ;;  %v6070_v32 = vpop.eup %6069  ;;  %v9292_v3 = vadd.f32 %v2661_v47, %v8753_v8  ;;  %6075 = vtanh.f32 %v3004_v26  ;;  %v2751_v29 = vmul.f32 %v9285_v23, %v9285_v23  ;;  %v9297_v52 = vadd.f32 %v2663_v50, %v8756_v61 }
 0x3a0   : > { %3696 = vmatprep.mubr.bf16.mxu1 %v3363_v30  ;;  %v9300_v10 = vadd.f32 %v3252_v21, %v10975_v12  ;;  %6077 = vtanh.f32 %v3005_v54  ;;  %v2814_v19 = vmul.f32 %v2750_v24, %v9279_v37  ;;  %v3127_v34 = vadd.f32 1.0, %v6066_v15 }
 0x3a1   : > { %v2752_v5 = vmul.f32 %v9292_v3, %v9292_v3  ;;  %v2815_v60 = vmul.f32 %v2751_v29, %v9285_v23  ;;  %v2753_v6 = vmul.f32 %v9297_v52, %v9297_v52  ;;  %v3129_v26 = vadd.f32 1.0, %v6070_v32 }
 0x3a2   : > { %10976 = vst [vmem:[#allocation14_spill] sm:$0xff] %v9300_v10  ;;  %v3362_v7 = vpack.c.bf16 %v9300_v10, %v9282_v46  ;;  %v2878_v47 = vmul.f32 0.044715, %v2814_v19  ;;  %v3191_v30 = vmul.f32 0.5, %v3127_v34  ;;  %v3126_v54 = vadd.f32 1.0, %v6064_v38 }
 0x3a3   : > { %v2816_v21 = vmul.f32 %v2752_v5, %v9292_v3  ;;  %v2879_v50 = vmul.f32 0.044715, %v2815_v60  ;;  %v2817_v24 = vmul.f32 %v2753_v6, %v9297_v52  ;;  %v3193_v12 = vmul.f32 0.5, %v3129_v26 }
 0x3a4   : > { %3697 = vmatmul.mubr.bf16.gmra.mrb[128].mxu1 %v3362_v7  ;;  %v3128_v15 = vadd.f32 1.0, %v6068_v55  ;;  %v2942_v29 = vadd.f32 %v2878_v47, %v9279_v37  ;;  %v2667_v31 = vpop.f32.mrb[80].mxu0  ;;  %v3255_v45 = vmul.f32 %v3191_v30, %v9183_v39  ;;  %v3190_v0 = vmul.f32 0.5, %v3126_v54 }
 0x3a5   : > { %v2880_v17 = vmul.f32 0.044715, %v2816_v21  ;;  %v2943_v32 = vadd.f32 %v2879_v50, %v9285_v23  ;;  %v2881_v19 = vmul.f32 0.044715, %v2817_v24  ;;  %v9316_v5 = vadd.f32 %v2667_v31, %v8753_v8  ;;  %v2669_v38 = vpop.f32.mrb[81].mxu0 }
 0x3a6   : > { %v3257_v34 = vmul.f32 %v3193_v12, %v9195_v35  ;;  %v3006_v60 = vmul.f32 0.7978846, %v2942_v29  ;;  %v9321_v55 = vadd.f32 %v2669_v38, %v8756_v61  ;;  %v2671_v7 = vpop.f32.mrb[82].mxu0  ;;  %v9324_v26 = vadd.f32 %v3255_v45, %v8514_v56 }
 0x3a7   : > { %v2944_v6 = vadd.f32 %v2880_v17, %v9292_v3  ;;  %v9326_v39 = vpop.eup %6071  ;;  %v3007_v47 = vmul.f32 0.7978846, %v2943_v32  ;;  %v2945_v21 = vadd.f32 %v2881_v19, %v9297_v52  ;;  %v2754_v31 = vmul.f32 %v9316_v5, %v9316_v5  ;;  %v2673_v30 = vpop.f32.mrb[83].mxu0 }
 0x3a8   : > { %10977 = vst [vmem:[#allocation10_spill] sm:$0xff] %v9324_v26  ;;  %v9332_v35 = vadd.f32 %v2671_v7, %v8753_v8  ;;  %v9334_v17 = vpop.eup %6073  ;;  %6079 = vtanh.f32 %v3006_v60  ;;  %v2755_v56 = vmul.f32 %v9321_v55, %v9321_v55  ;;  %v9339_v45 = vadd.f32 %v2673_v30, %v8756_v61 }
 0x3a9   : > { %v3008_v54 = vmul.f32 0.7978846, %v2944_v6  ;;  %v9341_v50 = vpop.eup %6075  ;;  %6081 = vtanh.f32 %v3007_v47  ;;  %v3009_v24 = vmul.f32 0.7978846, %v2945_v21  ;;  %v2818_v12 = vmul.f32 %v2754_v31, %v9316_v5 }
 0x3aa   : > { %v2756_v29 = vmul.f32 %v9332_v35, %v9332_v35  ;;  %v9346_v32 = vpop.eup %6077  ;;  %v2819_v19 = vmul.f32 %v2755_v56, %v9321_v55  ;;  %v2757_v38 = vmul.f32 %v9339_v45, %v9339_v45  ;;  %v9352_v60 = vadd.f32 %v3257_v34, %v8517_v18 }
 0x3ab   : > { %6083 = vtanh.f32 %v3008_v54  ;;  %v2882_v6 = vmul.f32 0.044715, %v2818_v12  ;;  %v3192_v47 = vmul.f32 0.5, %v3128_v15  ;;  %v3254_v56 = vmul.f32 %v3190_v0, %v9174_v57  ;;  %v5733_v15 = vld [vmem:[%s10522_s5 + $0x78] sm:$0xff]  }
 0x3ac   : > { %10978 = vst [vmem:[#allocation12_spill] sm:$0xff] %v9352_v60  ;;  %6085 = vtanh.f32 %v3009_v24  ;;  %v2820_v7 = vmul.f32 %v2756_v29, %v9332_v35  ;;  %v2883_v21 = vmul.f32 0.044715, %v2819_v19  ;;  %v2821_v31 = vmul.f32 %v2757_v38, %v9339_v45  ;;  %v2677_v30 = vpop.f32.mrb[84].mxu0  ;;  %v5734_v12 = vld [vmem:[%s10522_s5 + $0x38] sm:$0xff]   ;;  %5395 = vmatprep.subr.bf16.mxu0 %v5733_v15 }
 0x3ad   : > { %v3365_v54 = vpack.c.bf16 %v9352_v60, %v9324_v26  ;;  %v2946_v10 = vadd.f32 %v2882_v6, %v9316_v5  ;;  %v9361_v18 = vadd.f32 %v2677_v30, %v8753_v8  ;;  %v2679_v34 = vpop.f32.mrb[85].mxu0  ;;  %v3256_v24 = vmul.f32 %v3192_v47, %v9190_v20  ;;  %5396 = vmatpush3.bf16.msra.mxu0 %v5734_v12 }
 0x3ae   : > { %v2884_v46 = vmul.f32 0.044715, %v2820_v7  ;;  %v2947_v29 = vadd.f32 %v2883_v21, %v9321_v55  ;;  %v2885_v0 = vmul.f32 0.044715, %v2821_v31  ;;  %v9372_v57 = vadd.f32 %v2679_v34, %v8756_v61  ;;  %v2681_v19 = vpop.f32.mrb[86].mxu0 }
 0x3af   : > { %10979 = vst [vmem:[#allocation15_spill] sm:$0xff] %v9361_v18  ;;  %3706 = vmatprep.mubr.bf16.mxu1 %v3365_v54  ;;  %v9375_v38 = vadd.f32 %v3254_v56, %v8520_v25  ;;  %v3010_v20 = vmul.f32 0.7978846, %v2946_v10  ;;  %v2758_v7 = vmul.f32 %v9361_v18, %v9361_v18  ;;  %v9381_v47 = vadd.f32 %v2681_v19, %v8753_v8  ;;  %v2683_v30 = vpop.f32.mrb[87].mxu0 }
 0x3b0   : > { %v2948_v6 = vadd.f32 %v2884_v46, %v9332_v35  ;;  %v3011_v21 = vmul.f32 0.7978846, %v2947_v29  ;;  %v2949_v31 = vadd.f32 %v2885_v0, %v9339_v45  ;;  %v2759_v54 = vmul.f32 %v9372_v57, %v9372_v57 }
 0x3b1   : > { %10980 = vst [vmem:[#allocation19_spill] sm:$0xff] %v9375_v38  ;;  %10981 = vst [vmem:[#allocation63_spill] sm:$0xff] %v9381_v47  ;;  %v9387_v25 = vadd.f32 %v2683_v30, %v8756_v61  ;;  %6087 = vtanh.f32 %v3010_v20  ;;  %v2822_v10 = vmul.f32 %v2758_v7, %v9361_v18  ;;  %v2760_v56 = vmul.f32 %v9381_v47, %v9381_v47 }
 0x3b2   : > { %v3012_v46 = vmul.f32 0.7978846, %v2948_v6  ;;  %v9392_v34 = vpop.eup %6079  ;;  %6089 = vtanh.f32 %v3011_v21  ;;  %v3013_v15 = vmul.f32 0.7978846, %v2949_v31  ;;  %v2823_v29 = vmul.f32 %v2759_v54, %v9372_v57 }
 0x3b3   : > { %v2761_v0 = vmul.f32 %v9387_v25, %v9387_v25  ;;  %v9397_v19 = vpop.eup %6081  ;;  %v2886_v12 = vmul.f32 0.044715, %v2822_v10  ;;  %v2824_v20 = vmul.f32 %v2760_v56, %v9381_v47  ;;  %v9401_v6 = vadd.f32 %v3256_v24, %v8523_v27 }
 0x3b4   : > { %6091 = vtanh.f32 %v3012_v46  ;;  %v2887_v30 = vmul.f32 0.044715, %v2823_v29  ;;  %v2687_v31 = vpop.f32.mrb[88].mxu0  ;;  %v3131_v54 = vadd.f32 1.0, %v9334_v17  ;;  %v3133_v17 = vadd.f32 1.0, %v9346_v32 }
 0x3b5   : > { %10982 = vst [vmem:[#allocation64_spill] sm:$0xff] %v9401_v6  ;;  %v9403_v7 = vpop.eup %6083  ;;  %6093 = vtanh.f32 %v3013_v15  ;;  %v2825_v21 = vmul.f32 %v2761_v0, %v9387_v25  ;;  %v2950_v26 = vadd.f32 %v2886_v12, %v9361_v18  ;;  %v2888_v46 = vmul.f32 0.044715, %v2824_v20  ;;  %v2689_v24 = vpop.f32.mrb[89].mxu0 }
 0x3b6   : > { %v9407_v60 = vpop.eup %6085  ;;  %v3364_v10 = vpack.c.bf16 %v9401_v6, %v9375_v38  ;;  %v9413_v27 = vadd.f32 %v2687_v31, %v8753_v8  ;;  %v2951_v56 = vadd.f32 %v2887_v30, %v9372_v57  ;;  %v9417_v29 = vadd.f32 %v2689_v24, %v8756_v61  ;;  %v2691_v0 = vpop.f32.mrb[90].mxu0 }
 0x3b7   : > { %v2889_v15 = vmul.f32 0.044715, %v2825_v21  ;;  %v3014_v9 = vmul.f32 0.7978846, %v2950_v26  ;;  %v2952_v12 = vadd.f32 %v2888_v46, %v9381_v47  ;;  %v9424_v31 = vadd.f32 %v2691_v0, %v8753_v8  ;;  %v2693_v6 = vpop.f32.mrb[91].mxu0 }
 0x3b8   : > { %10983 = vst [vmem:[#allocation65_spill] sm:$0xff] %v9413_v27  ;;  %3707 = vmatmul.mubr.bf16.gmra.mrb[132].mxu1 %v3364_v10  ;;  %v2762_v20 = vmul.f32 %v9413_v27, %v9413_v27  ;;  %v3015_v38 = vmul.f32 0.7978846, %v2951_v56  ;;  %v2763_v21 = vmul.f32 %v9417_v29, %v9417_v29  ;;  %v9430_v24 = vadd.f32 %v2693_v6, %v8756_v61 }
 0x3b9   : > { %v2953_v30 = vadd.f32 %v2889_v15, %v9387_v25  ;;  %6095 = vtanh.f32 %v3014_v9  ;;  %v3016_v26 = vmul.f32 0.7978846, %v2952_v12  ;;  %v2764_v46 = vmul.f32 %v9424_v31, %v9424_v31 }
 0x3ba   : > { %v2826_v32 = vmul.f32 %v2762_v20, %v9413_v27  ;;  %6097 = vtanh.f32 %v3015_v38  ;;  %v2827_v10 = vmul.f32 %v2763_v21, %v9417_v29  ;;  %v2765_v56 = vmul.f32 %v9430_v24, %v9430_v24 }
 0x3bb   : > { %v9438_v15 = vpop.eup %6087  ;;  %v3017_v0 = vmul.f32 0.7978846, %v2953_v30  ;;  %v2828_v6 = vmul.f32 %v2764_v46, %v9424_v31  ;;  %v3195_v63 = vmul.f32 0.5, %v3131_v54  ;;  %6099 = vtanh.f32 %v3016_v26 }
 0x3bc   : > { %v2890_v14 = vmul.f32 0.044715, %v2826_v32  ;;  %v9441_v9 = vpop.eup %6089  ;;  %v2891_v12 = vmul.f32 0.044715, %v2827_v10  ;;  %v2829_v20 = vmul.f32 %v2765_v56, %v9430_v24  ;;  %v3197_v51 = vmul.f32 0.5, %v3133_v17  ;;  %v2697_v38 = vpop.f32.mrb[92].mxu0 }
 0x3bd   : > { %v2892_v49 = vmul.f32 0.044715, %v2828_v6  ;;  %v3259_v16 = vmul.f32 %v3195_v63, %v9231_v48  ;;  %v3130_v30 = vadd.f32 1.0, %v9326_v39  ;;  %v2699_v32 = vpop.f32.mrb[93].mxu0  ;;  %v3132_v17 = vadd.f32 1.0, %v9341_v50 }
 0x3be   : > { %v9444_v22 = vpop.eup %6091  ;;  %v2954_v21 = vadd.f32 %v2890_v14, %v9413_v27  ;;  %v2955_v54 = vadd.f32 %v2891_v12, %v9417_v29  ;;  %v2893_v26 = vmul.f32 0.044715, %v2829_v20  ;;  %v3261_v10 = vmul.f32 %v3197_v51, %v9246_v59  ;;  %v2701_v56 = vpop.f32.mrb[94].mxu0 }
 0x3bf   : > { %v9449_v46 = vpop.eup %6093  ;;  %v2956_v47 = vadd.f32 %v2892_v49, %v9424_v31  ;;  %v9456_v14 = vadd.f32 %v3259_v16, %v8578_v44  ;;  %v3194_v63 = vmul.f32 0.5, %v3130_v30  ;;  %v2703_v48 = vpop.f32.mrb[95].mxu0  ;;  %v3196_v12 = vmul.f32 0.5, %v3132_v17 }
 0x3c0   : > { %v3018_v18 = vmul.f32 0.7978846, %v2954_v21  ;;  %v3019_v39 = vmul.f32 0.7978846, %v2955_v54  ;;  %v2957_v6 = vadd.f32 %v2893_v26, %v9430_v24  ;;  %v9460_v27 = vadd.f32 %v3261_v10, %v8583_v28 }
 0x3c1   : > { %6101 = vtanh.f32 %v3017_v0  ;;  %v3258_v51 = vmul.f32 %v3194_v63, %v9225_v40  ;;  %v9464_v59 = vadd.f32 %v2697_v38, %v8753_v8  ;;  %v3020_v49 = vmul.f32 0.7978846, %v2956_v47 }
 0x3c2   : > { %6103 = vtanh.f32 %v3018_v18  ;;  %v3367_v44 = vpack.c.bf16 %v9460_v27, %v9456_v14  ;;  %v3260_v16 = vmul.f32 %v3196_v12, %v9238_v43  ;;  %v3021_v20 = vmul.f32 0.7978846, %v2957_v6 }
 0x3c3   : > { %v9469_v50 = vpop.eup %6095  ;;  %6105 = vtanh.f32 %v3019_v39  ;;  %v2766_v28 = vmul.f32 %v9464_v59, %v9464_v59  ;;  %v9474_v0 = vadd.f32 %v2699_v32, %v8756_v61  ;;  %v9477_v18 = vadd.f32 %v3258_v51, %v8596_v41 }
 0x3c4   : > { %v6098_v40 = vpop.eup %6097  ;;  %3716 = vmatprep.mubr.bf16.mxu1 %v3367_v44  ;;  %v9480_v47 = vadd.f32 %v3260_v16, %v8599_v58  ;;  %v9483_v43 = vadd.f32 %v2701_v56, %v8753_v8  ;;  %v9486_v38 = vadd.f32 %v2703_v48, %v8756_v61  ;;  %v3135_v32 = vadd.f32 1.0, %v9397_v19 }
 0x3c5   : > { %v2830_v21 = vmul.f32 %v2766_v28, %v9464_v59  ;;  %v2767_v30 = vmul.f32 %v9474_v0, %v9474_v0  ;;  %v3137_v54 = vadd.f32 1.0, %v9407_v60  ;;  %v9493_v41 = vpop.eup %6099  ;;  %v3134_v26 = vadd.f32 1.0, %v9392_v34 }
 0x3c6   : > { %v3366_v58 = vpack.c.bf16 %v9480_v47, %v9477_v18  ;;  %v2768_v8 = vmul.f32 %v9483_v43, %v9483_v43  ;;  %v2769_v61 = vmul.f32 %v9486_v38, %v9486_v38  ;;  %v3199_v56 = vmul.f32 0.5, %v3135_v32 }
 0x3c7   : > { %v2894_v10 = vmul.f32 0.044715, %v2830_v21  ;;  %v2831_v17 = vmul.f32 %v2767_v30, %v9474_v0  ;;  %v3201_v19 = vmul.f32 0.5, %v3137_v54  ;;  %v3136_v48 = vadd.f32 1.0, %v9403_v7 }
 0x3c8   : > { %3717 = vmatmul.mubr.bf16.gmra.mrb[136].mxu1 %v3366_v58  ;;  %v2832_v60 = vmul.f32 %v2768_v8, %v9483_v43  ;;  %v2833_v63 = vmul.f32 %v2769_v61, %v9486_v38  ;;  %v3198_v39 = vmul.f32 0.5, %v3134_v26  ;;  %6107 = vtanh.f32 %v3021_v20 }
 0x3c9   : > { %v2895_v6 = vmul.f32 0.044715, %v2831_v17  ;;  %v3263_v12 = vmul.f32 %v3199_v56, %v9285_v23  ;;  %v3265_v51 = vmul.f32 %v3201_v19, %v9297_v52  ;;  %v3200_v16 = vmul.f32 0.5, %v3136_v48 }
 0x3ca   : > { %v2896_v34 = vmul.f32 0.044715, %v2832_v60  ;;  %v2897_v44 = vmul.f32 0.044715, %v2833_v63  ;;  %v3262_v28 = vmul.f32 %v3198_v39, %v9279_v37  ;;  %6109 = vtanh.f32 %v3020_v49 }
 0x3cb   : > { %v6102_v21 = vpop.eup %6101  ;;  %v2959_v30 = vadd.f32 %v2895_v6, %v9474_v0  ;;  %v9511_v32 = vadd.f32 %v3263_v12, %v8640_v36  ;;  %v9514_v7 = vadd.f32 %v3265_v51, %v8643_v4  ;;  %v2958_v23 = vadd.f32 %v2894_v10, %v9464_v59 }
 0x3cc   : > { %v9516_v20 = vpop.eup %6103  ;;  %v2960_v52 = vadd.f32 %v2896_v34, %v9483_v43  ;;  %v2961_v54 = vadd.f32 %v2897_v44, %v9486_v38  ;;  %v3264_v37 = vmul.f32 %v3200_v16, %v9292_v3  ;;  %v9525_v36 = vadd.f32 %v3262_v28, %v8648_v2 }
 0x3cd   : > { %v6106_v58 = vpop.eup %6105  ;;  %v3023_v49 = vmul.f32 0.7978846, %v2959_v30  ;;  %v3369_v8 = vpack.c.bf16 %v9514_v7, %v9511_v32  ;;  %v3139_v4 = vadd.f32 1.0, %v9441_v9  ;;  %v3141_v17 = vadd.f32 1.0, %v9449_v46 }
 0x3ce   : > { %v3024_v61 = vmul.f32 0.7978846, %v2960_v52  ;;  %v3025_v26 = vmul.f32 0.7978846, %v2961_v54  ;;  %v9529_v10 = vadd.f32 %v3264_v37, %v8651_v53  ;;  %v3138_v56 = vadd.f32 1.0, %v9438_v15  ;;  %v10984_v54 = vld [vmem:[#allocation63_spill] sm:$0xff] }
 0x3cf   : > { %6111 = vtanh.f32 %v3023_v49  ;;  %3726 = vmatprep.mubr.bf16.mxu1 %v3369_v8  ;;  %v3203_v3 = vmul.f32 0.5, %v3139_v4  ;;  %v3140_v19 = vadd.f32 1.0, %v9444_v22  ;;  %v3022_v60 = vmul.f32 0.7978846, %v2958_v23  ;;  %v10985_v8 = vld [vmem:[#allocation15_spill] sm:$0xff] }
 0x3d0   : > { %v3368_v2 = vpack.c.bf16 %v9529_v10, %v9525_v36  ;;  %v3205_v63 = vmul.f32 0.5, %v3141_v17  ;;  %v3143_v9 = vadd.f32 1.0, %v6098_v40  ;;  %6113 = vtanh.f32 %v3025_v26 }
 0x3d1   : > { %v3267_v48 = vmul.f32 %v3203_v3, %v9321_v55  ;;  %v3202_v53 = vmul.f32 0.5, %v3138_v56  ;;  %v3204_v39 = vmul.f32 0.5, %v3140_v19  ;;  %v3145_v6 = vadd.f32 1.0, %v6102_v21  ;;  %v10986_v3 = vld [vmem:[#allocation31_spill] sm:$0xff] }
 0x3d2   : > { %3727 = vmatmul.mubr.bf16.gmra.mrb[140].mxu1 %v3368_v2  ;;  %v3269_v46 = vmul.f32 %v3205_v63, %v9339_v45  ;;  %v3207_v12 = vmul.f32 0.5, %v3143_v9  ;;  %v3142_v15 = vadd.f32 1.0, %v9469_v50  ;;  %v6108_v51 = vpop.eup %6107  ;;  %6115 = vtanh.f32 %v3024_v61  ;;  %v10989_v9 = vld [vmem:[#allocation17_spill] sm:$0xff] }
 0x3d3   : > { %v3266_v22 = vmul.f32 %v3202_v53, %v9316_v5  ;;  %v3268_v34 = vmul.f32 %v3204_v39, %v9332_v35  ;;  %v3144_v40 = vadd.f32 1.0, %v9493_v41  ;;  %v9543_v44 = vadd.f32 %v3267_v48, %v8672_v62  ;;  %v10991_v39 = vld [vmem:[#allocation11_spill] sm:$0xff] }
 0x3d4   : > { %v9546_v55 = vadd.f32 %v3269_v46, %v8675_v13  ;;  %v3209_v16 = vmul.f32 0.5, %v3145_v6  ;;  %v3271_v45 = vmul.f32 %v3207_v12, %v9372_v57  ;;  %v6110_v28 = vpop.eup %6109  ;;  %6117 = vtanh.f32 %v3022_v60 }
 0x3d5   : > { %v9550_v50 = vadd.f32 %v3268_v34, %v8686_v11  ;;  %v3208_v21 = vmul.f32 0.5, %v3144_v40  ;;  %v3147_v5 = vadd.f32 1.0, %v6106_v58  ;;  %v9555_v41 = vadd.f32 %v3266_v22, %v8683_v1 }
 0x3d6   : > { %v3371_v35 = vpack.c.bf16 %v9546_v55, %v9543_v44  ;;  %v3273_v62 = vmul.f32 %v3209_v16, %v9387_v25  ;;  %v3206_v13 = vmul.f32 0.5, %v3142_v15  ;;  %v9559_v30 = vadd.f32 %v3271_v45, %v8689_v42  ;;  %v10992_v16 = vld [vmem:[#allocation65_spill] sm:$0xff] }
 0x3d7   : > { %v3149_v57 = vadd.f32 1.0, %v6108_v51  ;;  %v3211_v23 = vmul.f32 0.5, %v3147_v5  ;;  %v3370_v11 = vpack.c.bf16 %v9550_v50, %v9555_v41  ;;  %v3272_v37 = vmul.f32 %v3208_v21, %v10984_v54  ;;  %v10993_v21 = vld [vmem:[#allocation29_spill] sm:$0xff] }
 0x3d8   : > { %3736 = vmatprep.mubr.bf16.mxu1 %v3371_v35  ;;  %v9564_v52 = vadd.f32 %v3273_v62, %v8692_v33  ;;  %v3148_v58 = vadd.f32 1.0, %v6110_v28  ;;  %v3270_v4 = vmul.f32 %v3206_v13, %v10985_v8  ;;  %v3146_v61 = vadd.f32 1.0, %v9516_v20  ;;  %v10995_v35 = vld [vmem:[#allocation7_spill] sm:$0xff] }
 0x3d9   : > { %v6112_v1 = vpop.eup %6111  ;;  %v3213_v49 = vmul.f32 0.5, %v3149_v57  ;;  %v3275_v25 = vmul.f32 %v3211_v23, %v9417_v29  ;;  %v9574_v56 = vadd.f32 %v3272_v37, %v10986_v3  ;;  %v10987_v29 = vld [vmem:[#allocation8_spill] sm:$0xff]  ;;  %v10997_v57 = vld [vmem:[#allocation9_spill] sm:$0xff] }
 0x3da   : > { %3737 = vmatmul.mubr.bf16.gmra.mrb[144].mxu1 %v3370_v11  ;;  %v3373_v42 = vpack.c.bf16 %v9564_v52, %v9559_v30  ;;  %v3151_v26 = vadd.f32 1.0, %v6112_v1  ;;  %v6114_v17 = vpop.eup %6113  ;;  %v3212_v19 = vmul.f32 0.5, %v3148_v58  ;;  %v9583_v20 = vadd.f32 %v3270_v4, %v10991_v39  ;;  %v11001_v1 = vld [vmem:[#allocation41_spill] sm:$0xff] }
 0x3db   : > { %v3277_v33 = vmul.f32 %v3213_v49, %v9430_v24  ;;  %v3153_v60 = vadd.f32 1.0, %v6114_v17  ;;  %v9577_v63 = vadd.f32 %v3275_v25, %v10987_v29  ;;  %v3210_v46 = vmul.f32 0.5, %v3146_v61  ;;  %v11003_v25 = vld [vmem:[#allocation39_spill] sm:$0xff]  ;;  %v5325_v4 = vld [vmem:[%s10521_s4 + $0x4] sm:$0x3] }
 0x3dc   : > { %3746 = vmatprep.mubr.bf16.mxu1 %v3373_v42  ;;  %v6116_v2 = vpop.eup %6115  ;;  %v3215_v53 = vmul.f32 0.5, %v3151_v26  ;;  %v3372_v15 = vpack.c.bf16 %v9574_v56, %v9583_v20  ;;  %v3276_v51 = vmul.f32 %v3212_v19, %v9424_v31  ;;  %v10999_v31 = vld [vmem:[#allocation36_spill] sm:$0xff]  ;;  %v11005_v61 = vld [vmem:[#allocation5_spill] sm:$0xff]  ;;  %v11006_v26 = vld [vmem:[#allocation6_spill] sm:$0xff] }
 0x3dd   : > { %10988 = vst [vmem:[#allocation66_spill] sm:$0xff] %v9577_v63  ;;  %v9580_v48 = vadd.f32 %v3277_v33, %v10989_v9  ;;  %v3217_v6 = vmul.f32 0.5, %v3153_v60  ;;  %v3152_v34 = vadd.f32 1.0, %v6116_v2  ;;  %v3274_v45 = vmul.f32 %v3210_v46, %v10992_v16 }
 0x3de   : > { %v6118_v24 = vpop.eup %6117  ;;  %v3279_v40 = vmul.f32 %v3215_v53, %v9474_v0  ;;  %v9597_v62 = vadd.f32 %v3276_v51, %v10995_v35 }
 0x3df   : > { %10990 = vst [vmem:[#allocation23_spill] sm:$0xff] %v9580_v48  ;;  %v3375_v12 = vpack.c.bf16 %v9580_v48, %v9577_v63  ;;  %v3281_v22 = vmul.f32 %v3217_v6, %v9486_v38  ;;  %v3150_v28 = vadd.f32 1.0, %v6118_v24  ;;  %v3216_v13 = vmul.f32 0.5, %v3152_v34 }
 0x3e0   : > { %10996 = vst [vmem:[#allocation26_spill] sm:$0xff] %v9597_v62  ;;  %v9600_v23 = vadd.f32 %v3279_v40, %v10997_v57  ;;  %v9603_v38 = vadd.f32 %v3274_v45, %v10999_v31 }
 0x3e1   : > { %v9594_v5 = vadd.f32 %v3281_v22, %v10993_v21  ;;  %v3214_v11 = vmul.f32 0.5, %v3150_v28  ;;  %v3280_v37 = vmul.f32 %v3216_v13, %v9483_v43  ;;  %v9623_v43 = vrot.slane %v5325_v4, %v11005_v61 }
 0x3e2   : > { %3747 = vmatmul.mubr.bf16.gmra.mrb[148].mxu1 %v3372_v15  ;;  %10998 = vst [vmem:[#allocation27_spill] sm:$0xff] %v9600_v23  ;;  %11000 = vst [vmem:[#allocation30_spill] sm:$0xff] %v9603_v38  ;;  %v3374_v54 = vpack.c.bf16 %v9597_v62, %v9603_v38 }
 0x3e3   : > { %3756 = vmatprep.mubr.bf16.mxu1 %v3375_v12  ;;  %10994 = vst [vmem:[#allocation25_spill] sm:$0xff] %v9594_v5  ;;  %v3377_v0 = vpack.c.bf16 %v9594_v5, %v9600_v23  ;;  %v3278_v58 = vmul.f32 %v3214_v11, %v9464_v59  ;;  %v9612_v49 = vadd.f32 %v3280_v37, %v11001_v1 }
 0x3e4   : > { %v9626_v59 = vrot.slane %v5325_v4, %v11006_v26 }
 0x3e5   : > { %11002 = vst [vmem:[#allocation28_spill] sm:$0xff] %v9612_v49  ;;  %v9615_v42 = vadd.f32 %v3278_v58, %v11003_v25 }
 0x3e7   : > { %11004 = vst [vmem:[#allocation63_spill] sm:$0xff] %v9615_v42  ;;  %v3376_v8 = vpack.c.bf16 %v9612_v49, %v9615_v42 }
 0x3ea   : > { %3757 = vmatmul.mubr.bf16.gmra.mrb[152].mxu1 %v3374_v54 }
 0x3eb   : > { %3766 = vmatprep.mubr.bf16.mxu1 %v3377_v0 }
 0x3f2   : > { %3767 = vmatmul.mubr.bf16.gmra.mrb[156].mxu1 %v3376_v8 }
 0x3f9   : > { %v3618_v17 = vpop.f32.mrb[96].mxu1 }
 0x3fa   : > { %v9629_v33 = vadd.f32 %v3618_v17, %v9623_v43  ;;  %v3620_v3 = vpop.f32.mrb[97].mxu1 }
 0x3fb   : > { %v9632_v19 = vadd.f32 %v3620_v3, %v9626_v59  ;;  %v3622_v60 = vpop.f32.mrb[98].mxu1 }
 0x3fc   : > { %v3777_v2 = vmul.f32 %v9629_v33, %v9629_v33  ;;  %v9637_v29 = vadd.f32 %v3622_v60, %v9623_v43  ;;  %v3624_v9 = vpop.f32.mrb[99].mxu1 }
 0x3fd   : > { %v3778_v53 = vmul.f32 %v9632_v19, %v9632_v19  ;;  %v9642_v39 = vadd.f32 %v3624_v9, %v9626_v59 }
 0x3fe   : > { %v3841_v46 = vmul.f32 %v3777_v2, %v9629_v33  ;;  %v3779_v6 = vmul.f32 %v9637_v29, %v9637_v29 }
 0x3ff   : > { %v3842_v24 = vmul.f32 %v3778_v53, %v9632_v19  ;;  %v3780_v12 = vmul.f32 %v9642_v39, %v9642_v39 }
 0x400   : > { %v3905_v15 = vmul.f32 0.044715, %v3841_v46  ;;  %v3843_v51 = vmul.f32 %v3779_v6, %v9637_v29 }
 0x401   : > { %v3906_v22 = vmul.f32 0.044715, %v3842_v24  ;;  %v3844_v34 = vmul.f32 %v3780_v12, %v9642_v39 }
 0x402   : > { %v3969_v40 = vadd.f32 %v3905_v15, %v9629_v33  ;;  %v3907_v16 = vmul.f32 0.044715, %v3843_v51 }
 0x403   : > { %v3970_v45 = vadd.f32 %v3906_v22, %v9632_v19  ;;  %v3908_v28 = vmul.f32 0.044715, %v3844_v34 }
 0x404   : > { %v4033_v21 = vmul.f32 0.7978846, %v3969_v40  ;;  %v3971_v35 = vadd.f32 %v3907_v16, %v9637_v29 }
 0x405   : > { %v4034_v13 = vmul.f32 0.7978846, %v3970_v45  ;;  %v3972_v57 = vadd.f32 %v3908_v28, %v9642_v39 }
 0x406   : > { %6119 = vtanh.f32 %v4033_v21  ;;  %v4035_v31 = vmul.f32 0.7978846, %v3971_v35 }
 0x407   : > { %6121 = vtanh.f32 %v4034_v13  ;;  %v4036_v11 = vmul.f32 0.7978846, %v3972_v57 }
 0x408   : > { %6123 = vtanh.f32 %v4035_v31 }
 0x409   : > { %6125 = vtanh.f32 %v4036_v11 }
 0x40c   : > { %v3628_v0 = vpop.f32.mrb[100].mxu1 }
 0x40d   : > { %v9657_v54 = vadd.f32 %v3628_v0, %v9623_v43  ;;  %v3630_v37 = vpop.f32.mrb[101].mxu1 }
 0x40e   : > { %v9660_v58 = vadd.f32 %v3630_v37, %v9626_v59  ;;  %v3632_v1 = vpop.f32.mrb[102].mxu1 }
 0x40f   : > { %v3781_v25 = vmul.f32 %v9657_v54, %v9657_v54  ;;  %v9665_v8 = vadd.f32 %v3632_v1, %v9623_v43  ;;  %v3634_v4 = vpop.f32.mrb[103].mxu1 }
 0x410   : > { %v3782_v61 = vmul.f32 %v9660_v58, %v9660_v58  ;;  %v9670_v26 = vadd.f32 %v3634_v4, %v9626_v59  ;;  %v6120_v9 = vpop.eup %6119 }
 0x411   : > { %v3845_v17 = vmul.f32 %v3781_v25, %v9657_v54  ;;  %v3783_v3 = vmul.f32 %v9665_v8, %v9665_v8  ;;  %v6122_v6 = vpop.eup %6121  ;;  %v4161_v24 = vadd.f32 1.0, %v6120_v9  ;;  %v11007_v9 = vld [vmem:[#allocation50_spill] sm:$0xff] }
 0x412   : > { %v3846_v60 = vmul.f32 %v3782_v61, %v9660_v58  ;;  %v3784_v2 = vmul.f32 %v9670_v26, %v9670_v26  ;;  %v6124_v51 = vpop.eup %6123  ;;  %v4162_v40 = vadd.f32 1.0, %v6122_v6  ;;  %v11009_v6 = vld [vmem:[#allocation35_spill] sm:$0xff] }
 0x413   : > { %v3909_v53 = vmul.f32 0.044715, %v3845_v17  ;;  %v3847_v46 = vmul.f32 %v3783_v3, %v9665_v8  ;;  %v6126_v16 = vpop.eup %6125  ;;  %v4225_v45 = vmul.f32 0.5, %v4161_v24  ;;  %v4163_v28 = vadd.f32 1.0, %v6124_v51 }
 0x414   : > { %v3910_v12 = vmul.f32 0.044715, %v3846_v60  ;;  %v3848_v15 = vmul.f32 %v3784_v2, %v9670_v26  ;;  %v4164_v31 = vadd.f32 1.0, %v6126_v16  ;;  %v4226_v11 = vmul.f32 0.5, %v4162_v40 }
 0x415   : > { %v3973_v22 = vadd.f32 %v3909_v53, %v9657_v54  ;;  %v3911_v34 = vmul.f32 0.044715, %v3847_v46  ;;  %v4289_v0 = vmul.f32 %v4225_v45, %v9629_v33  ;;  %v4227_v37 = vmul.f32 0.5, %v4163_v28  ;;  %v11008_v46 = vld [vmem:[#allocation34_spill] sm:$0xff] }
 0x416   : > { %v3974_v21 = vadd.f32 %v3910_v12, %v9660_v58  ;;  %v3912_v35 = vmul.f32 0.044715, %v3848_v15  ;;  %v4228_v61 = vmul.f32 0.5, %v4164_v31  ;;  %v4290_v17 = vmul.f32 %v4226_v11, %v9632_v19  ;;  %v11010_v12 = vld [vmem:[#allocation40_spill] sm:$0xff] }
 0x417   : > { %v4037_v13 = vmul.f32 0.7978846, %v3973_v22  ;;  %v3975_v57 = vadd.f32 %v3911_v34, %v9665_v8  ;;  %v4291_v3 = vmul.f32 %v4227_v37, %v9637_v29  ;;  %v4353_v53 = vadd.f32 %v4289_v0, %v11007_v9 }
 0x418   : > { %v4038_v1 = vmul.f32 0.7978846, %v3974_v21  ;;  %v3976_v25 = vadd.f32 %v3912_v35, %v9670_v26  ;;  %v4292_v2 = vmul.f32 %v4228_v61, %v9642_v39  ;;  %v4354_v24 = vadd.f32 %v4290_v17, %v11009_v6 }
 0x419   : > { %6127 = vtanh.f32 %v4037_v13  ;;  %v4039_v4 = vmul.f32 0.7978846, %v3975_v57  ;;  %v4355_v33 = vadd.f32 %v4291_v3, %v11008_v46 }
 0x41a   : > { %6129 = vtanh.f32 %v4038_v1  ;;  %v4040_v60 = vmul.f32 0.7978846, %v3976_v25  ;;  %v4356_v15 = vadd.f32 %v4292_v2, %v11010_v12 }
 0x41b   : > { %6131 = vtanh.f32 %v4039_v4  ;;  %v4417_v51 = vpack.c.bf16 %v4355_v33, %v4353_v53 }
 0x41c   : > { %6133 = vtanh.f32 %v4040_v60  ;;  %v4418_v22 = vpack.c.bf16 %v4356_v15, %v4354_v24 }
 0x41e   : > { %4616 = vmatprep.mubr.bf16.mxu0 %v4418_v22 }
 0x41f   : > { %v3638_v19 = vpop.f32.mrb[104].mxu1  ;;  %4617 = vmatmul.mubr.bf16.vlgmr.msra.gmra.mrb[96].mxu0 %v4417_v51 }
 0x420   : > { %v9693_v34 = vadd.f32 %v3638_v19, %v9623_v43  ;;  %v3640_v40 = vpop.f32.mrb[105].mxu1 }
 0x421   : > { %v9696_v16 = vadd.f32 %v3640_v40, %v9626_v59  ;;  %v3642_v45 = vpop.f32.mrb[106].mxu1 }
 0x422   : > { %v3785_v35 = vmul.f32 %v9693_v34, %v9693_v34  ;;  %v9701_v13 = vadd.f32 %v3642_v45, %v9623_v43  ;;  %v3644_v57 = vpop.f32.mrb[107].mxu1 }
 0x423   : > { %v6128_v29 = vpop.eup %6127  ;;  %v3786_v0 = vmul.f32 %v9696_v16, %v9696_v16  ;;  %v9706_v37 = vadd.f32 %v3644_v57, %v9626_v59  ;;  %v11013_v57 = vld [vmem:[#allocation53_spill] sm:$0xff] }
 0x424   : > { %v6130_v39 = vpop.eup %6129  ;;  %v4165_v28 = vadd.f32 1.0, %v6128_v29  ;;  %v3849_v4 = vmul.f32 %v3785_v35, %v9693_v34  ;;  %v3787_v61 = vmul.f32 %v9701_v13, %v9701_v13 }
 0x425   : > { %v6132_v21 = vpop.eup %6131  ;;  %v4166_v31 = vadd.f32 1.0, %v6130_v39  ;;  %v3850_v60 = vmul.f32 %v3786_v0, %v9696_v16  ;;  %v3788_v2 = vmul.f32 %v9706_v37, %v9706_v37 }
 0x426   : > { %v6134_v11 = vpop.eup %6133  ;;  %v4167_v1 = vadd.f32 1.0, %v6132_v21  ;;  %v4229_v25 = vmul.f32 0.5, %v4165_v28  ;;  %v3913_v46 = vmul.f32 0.044715, %v3849_v4  ;;  %v3851_v33 = vmul.f32 %v3787_v61, %v9701_v13  ;;  %v11012_v28 = vld [vmem:[#allocation52_spill] sm:$0xff] }
 0x427   : > { %v4168_v17 = vadd.f32 1.0, %v6134_v11  ;;  %v4230_v3 = vmul.f32 0.5, %v4166_v31  ;;  %v3914_v12 = vmul.f32 0.044715, %v3850_v60  ;;  %v3852_v15 = vmul.f32 %v3788_v2, %v9706_v37  ;;  %v11014_v11 = vld [vmem:[#allocation54_spill] sm:$0xff] }
 0x428   : > { %v4231_v9 = vmul.f32 0.5, %v4167_v1  ;;  %v4293_v53 = vmul.f32 %v4229_v25, %v9657_v54  ;;  %v3977_v22 = vadd.f32 %v3913_v46, %v9693_v34  ;;  %v3915_v19 = vmul.f32 0.044715, %v3851_v33  ;;  %v11011_v54 = vld [vmem:[#allocation51_spill] sm:$0xff] }
 0x429   : > { %v4232_v6 = vmul.f32 0.5, %v4168_v17  ;;  %v4294_v24 = vmul.f32 %v4230_v3, %v9660_v58  ;;  %v3978_v40 = vadd.f32 %v3914_v12, %v9696_v16  ;;  %v3916_v39 = vmul.f32 0.044715, %v3852_v15 }
 0x42a   : > { %v4295_v51 = vmul.f32 %v4231_v9, %v9665_v8  ;;  %v4357_v45 = vadd.f32 %v4293_v53, %v11011_v54  ;;  %v4041_v35 = vmul.f32 0.7978846, %v3977_v22  ;;  %v3979_v58 = vadd.f32 %v3915_v19, %v9701_v13 }
 0x42b   : > { %v4296_v29 = vmul.f32 %v4232_v6, %v9670_v26  ;;  %v4358_v31 = vadd.f32 %v4294_v24, %v11013_v57  ;;  %v4042_v8 = vmul.f32 0.7978846, %v3978_v40  ;;  %v3980_v1 = vadd.f32 %v3916_v39, %v9706_v37 }
 0x42c   : > { %v4359_v21 = vadd.f32 %v4295_v51, %v11012_v28  ;;  %6135 = vtanh.f32 %v4041_v35  ;;  %v4043_v26 = vmul.f32 0.7978846, %v3979_v58 }
 0x42d   : > { %v4360_v0 = vadd.f32 %v4296_v29, %v11014_v11  ;;  %6137 = vtanh.f32 %v4042_v8  ;;  %v4044_v61 = vmul.f32 0.7978846, %v3980_v1 }
 0x42e   : > { %v4419_v25 = vpack.c.bf16 %v4359_v21, %v4357_v45  ;;  %6139 = vtanh.f32 %v4043_v26  ;;  %v3648_v17 = vpop.f32.mrb[108].mxu1 }
 0x42f   : > { %v4420_v4 = vpack.c.bf16 %v4360_v0, %v4358_v31  ;;  %6141 = vtanh.f32 %v4044_v61  ;;  %v9729_v3 = vadd.f32 %v3648_v17, %v9623_v43  ;;  %v3650_v60 = vpop.f32.mrb[109].mxu1 }
 0x430   : > { %v9732_v2 = vadd.f32 %v3650_v60, %v9626_v59  ;;  %v3652_v9 = vpop.f32.mrb[110].mxu1 }
 0x431   : > { %4624 = vmatprep.mubr.bf16.mxu0 %v4420_v4  ;;  %v3789_v53 = vmul.f32 %v9729_v3, %v9729_v3  ;;  %v9737_v46 = vadd.f32 %v3652_v9, %v9623_v43  ;;  %v3654_v33 = vpop.f32.mrb[111].mxu1 }
 0x432   : > { %4625 = vmatmul.mubr.bf16.gmra.mrb[100].mxu0 %v4419_v25  ;;  %v3790_v6 = vmul.f32 %v9732_v2, %v9732_v2  ;;  %v9742_v24 = vadd.f32 %v3654_v33, %v9626_v59 }
 0x433   : > { %v3853_v12 = vmul.f32 %v3789_v53, %v9729_v3  ;;  %v3791_v15 = vmul.f32 %v9737_v46, %v9737_v46 }
 0x434   : > { %v3854_v22 = vmul.f32 %v3790_v6, %v9732_v2  ;;  %v3792_v19 = vmul.f32 %v9742_v24, %v9742_v24 }
 0x435   : > { %v3917_v40 = vmul.f32 0.044715, %v3853_v12  ;;  %v3855_v39 = vmul.f32 %v3791_v15, %v9737_v46 }
 0x436   : > { %v6136_v51 = vpop.eup %6135  ;;  %v3918_v28 = vmul.f32 0.044715, %v3854_v22  ;;  %v3856_v21 = vmul.f32 %v3792_v19, %v9742_v24  ;;  %v11015_v19 = vld [vmem:[#allocation55_spill] sm:$0xff] }
 0x437   : > { %v6138_v29 = vpop.eup %6137  ;;  %v4169_v54 = vadd.f32 1.0, %v6136_v51  ;;  %v3981_v57 = vadd.f32 %v3917_v40, %v9729_v3  ;;  %v3919_v31 = vmul.f32 0.044715, %v3855_v39  ;;  %v11016_v40 = vld [vmem:[#allocation58_spill] sm:$0xff] }
 0x438   : > { %v6140_v45 = vpop.eup %6139  ;;  %v4170_v35 = vadd.f32 1.0, %v6138_v29  ;;  %v3982_v8 = vadd.f32 %v3918_v28, %v9732_v2  ;;  %v3920_v1 = vmul.f32 0.044715, %v3856_v21 }
 0x439   : > { %v6142_v58 = vpop.eup %6141  ;;  %v4171_v11 = vadd.f32 1.0, %v6140_v45  ;;  %v4233_v0 = vmul.f32 0.5, %v4169_v54  ;;  %v4045_v4 = vmul.f32 0.7978846, %v3981_v57  ;;  %v3983_v61 = vadd.f32 %v3919_v31, %v9737_v46  ;;  %v11018_v45 = vld [vmem:[#allocation57_spill] sm:$0xff] }
 0x43a   : > { %v4172_v25 = vadd.f32 1.0, %v6142_v58  ;;  %v4234_v26 = vmul.f32 0.5, %v4170_v35  ;;  %v4046_v9 = vmul.f32 0.7978846, %v3982_v8  ;;  %v3984_v53 = vadd.f32 %v3920_v1, %v9742_v24 }
 0x43b   : > { %v4235_v17 = vmul.f32 0.5, %v4171_v11  ;;  %v4297_v60 = vmul.f32 %v4233_v0, %v9693_v34  ;;  %6143 = vtanh.f32 %v4045_v4  ;;  %v4047_v12 = vmul.f32 0.7978846, %v3983_v61  ;;  %v11017_v34 = vld [vmem:[#allocation56_spill] sm:$0xff] }
 0x43c   : > { %v4236_v33 = vmul.f32 0.5, %v4172_v25  ;;  %v4298_v6 = vmul.f32 %v4234_v26, %v9696_v16  ;;  %6145 = vtanh.f32 %v4046_v9  ;;  %v4048_v51 = vmul.f32 0.7978846, %v3984_v53 }
 0x43d   : > { %v4299_v15 = vmul.f32 %v4235_v17, %v9701_v13  ;;  %6147 = vtanh.f32 %v4047_v12  ;;  %v4361_v29 = vadd.f32 %v4297_v60, %v11015_v19 }
 0x43e   : > { %v4300_v22 = vmul.f32 %v4236_v33, %v9706_v37  ;;  %6149 = vtanh.f32 %v4048_v51  ;;  %v4362_v54 = vadd.f32 %v4298_v6, %v11017_v34 }
 0x43f   : > { %v4363_v39 = vadd.f32 %v4299_v15, %v11016_v40 }
 0x440   : > { %v4364_v28 = vadd.f32 %v4300_v22, %v11018_v45 }
 0x441   : > { %v4421_v21 = vpack.c.bf16 %v4363_v39, %v4361_v29 }
 0x442   : > { %v4422_v16 = vpack.c.bf16 %v4364_v28, %v4362_v54  ;;  %v3658_v35 = vpop.f32.mrb[112].mxu1 }
 0x443   : > { %v9765_v13 = vadd.f32 %v3658_v35, %v9623_v43  ;;  %v3660_v58 = vpop.f32.mrb[113].mxu1 }
 0x444   : > { %4632 = vmatprep.mubr.bf16.mxu0 %v4422_v16  ;;  %v9768_v37 = vadd.f32 %v3660_v58, %v9626_v59  ;;  %v3662_v57 = vpop.f32.mrb[114].mxu1 }
 0x445   : > { %4633 = vmatmul.mubr.bf16.gmra.mrb[104].mxu0 %v4421_v21  ;;  %v6144_v31 = vpop.eup %6143  ;;  %v3793_v11 = vmul.f32 %v9765_v13, %v9765_v13  ;;  %v9773_v0 = vadd.f32 %v3662_v57, %v9623_v43  ;;  %v3664_v8 = vpop.f32.mrb[115].mxu1 }
 0x446   : > { %v6146_v1 = vpop.eup %6145  ;;  %v3794_v25 = vmul.f32 %v9768_v37, %v9768_v37  ;;  %v9778_v26 = vadd.f32 %v3664_v8, %v9626_v59  ;;  %v4173_v4 = vadd.f32 1.0, %v6144_v31 }
 0x447   : > { %v6148_v61 = vpop.eup %6147  ;;  %v3857_v17 = vmul.f32 %v3793_v11, %v9765_v13  ;;  %v3795_v60 = vmul.f32 %v9773_v0, %v9773_v0  ;;  %v4174_v9 = vadd.f32 1.0, %v6146_v1 }
 0x448   : > { %v6150_v53 = vpop.eup %6149  ;;  %v3858_v33 = vmul.f32 %v3794_v25, %v9768_v37  ;;  %v3796_v6 = vmul.f32 %v9778_v26, %v9778_v26  ;;  %v4175_v12 = vadd.f32 1.0, %v6148_v61  ;;  %v4237_v15 = vmul.f32 0.5, %v4173_v4  ;;  %v11020_v61 = vld [vmem:[#allocation60_spill] sm:$0xff] }
 0x449   : > { %v3921_v51 = vmul.f32 0.044715, %v3857_v17  ;;  %v3859_v22 = vmul.f32 %v3795_v60, %v9773_v0  ;;  %v4176_v19 = vadd.f32 1.0, %v6150_v53  ;;  %v4238_v29 = vmul.f32 0.5, %v4174_v9  ;;  %v11022_v53 = vld [vmem:[#allocation18_spill] sm:$0xff] }
 0x44a   : > { %v3922_v40 = vmul.f32 0.044715, %v3858_v33  ;;  %v3860_v39 = vmul.f32 %v3796_v6, %v9778_v26  ;;  %v4239_v34 = vmul.f32 0.5, %v4175_v12  ;;  %v4301_v54 = vmul.f32 %v4237_v15, %v9729_v3  ;;  %v11019_v3 = vld [vmem:[#allocation21_spill] sm:$0xff] }
 0x44b   : > { %v3985_v45 = vadd.f32 %v3921_v51, %v9765_v13  ;;  %v3923_v28 = vmul.f32 0.044715, %v3859_v22  ;;  %v4240_v21 = vmul.f32 0.5, %v4176_v19  ;;  %v4302_v16 = vmul.f32 %v4238_v29, %v9732_v2  ;;  %v11021_v2 = vld [vmem:[#allocation59_spill] sm:$0xff] }
 0x44c   : > { %v3986_v35 = vadd.f32 %v3922_v40, %v9768_v37  ;;  %v3924_v58 = vmul.f32 0.044715, %v3860_v39  ;;  %v4303_v57 = vmul.f32 %v4239_v34, %v9737_v46  ;;  %v4365_v4 = vadd.f32 %v4301_v54, %v11019_v3 }
 0x44d   : > { %v4049_v31 = vmul.f32 0.7978846, %v3985_v45  ;;  %v3987_v11 = vadd.f32 %v3923_v28, %v9773_v0  ;;  %v4304_v8 = vmul.f32 %v4240_v21, %v9742_v24  ;;  %v4366_v9 = vadd.f32 %v4302_v16, %v11021_v2 }
 0x44e   : > { %v4050_v1 = vmul.f32 0.7978846, %v3986_v35  ;;  %v3988_v25 = vadd.f32 %v3924_v58, %v9778_v26  ;;  %v4367_v17 = vadd.f32 %v4303_v57, %v11020_v61 }
 0x44f   : > { %6151 = vtanh.f32 %v4049_v31  ;;  %v4051_v60 = vmul.f32 0.7978846, %v3987_v11  ;;  %v4368_v33 = vadd.f32 %v4304_v8, %v11022_v53 }
 0x450   : > { %6153 = vtanh.f32 %v4050_v1  ;;  %v4052_v46 = vmul.f32 0.7978846, %v3988_v25  ;;  %v4423_v6 = vpack.c.bf16 %v4367_v17, %v4365_v4 }
 0x451   : > { %6155 = vtanh.f32 %v4051_v60  ;;  %v4424_v15 = vpack.c.bf16 %v4368_v33, %v4366_v9 }
 0x452   : > { %v3668_v12 = vpop.f32.mrb[116].mxu1  ;;  %6157 = vtanh.f32 %v4052_v46 }
 0x453   : > { %v9801_v24 = vadd.f32 %v3668_v12, %v9623_v43  ;;  %v3670_v51 = vpop.f32.mrb[117].mxu1  ;;  %4640 = vmatprep.mubr.bf16.mxu0 %v4424_v15 }
 0x454   : > { %v9804_v22 = vadd.f32 %v3670_v51, %v9626_v59  ;;  %v3672_v19 = vpop.f32.mrb[118].mxu1  ;;  %4641 = vmatmul.mubr.bf16.gmra.mrb[108].mxu0 %v4423_v6 }
 0x455   : > { %v3797_v29 = vmul.f32 %v9801_v24, %v9801_v24  ;;  %v9809_v40 = vadd.f32 %v3672_v19, %v9623_v43  ;;  %v3674_v39 = vpop.f32.mrb[119].mxu1 }
 0x456   : > { %v3798_v34 = vmul.f32 %v9804_v22, %v9804_v22  ;;  %v9814_v54 = vadd.f32 %v3674_v39, %v9626_v59 }
 0x457   : > { %v3861_v45 = vmul.f32 %v3797_v29, %v9801_v24  ;;  %v3799_v28 = vmul.f32 %v9809_v40, %v9809_v40 }
 0x458   : > { %v3862_v21 = vmul.f32 %v3798_v34, %v9804_v22  ;;  %v3800_v16 = vmul.f32 %v9814_v54, %v9814_v54 }
 0x459   : > { %v3925_v35 = vmul.f32 0.044715, %v3861_v45  ;;  %v3863_v58 = vmul.f32 %v3799_v28, %v9809_v40  ;;  %v6152_v57 = vpop.eup %6151 }
 0x45a   : > { %v3926_v31 = vmul.f32 0.044715, %v3862_v21  ;;  %v3864_v11 = vmul.f32 %v3800_v16, %v9814_v54  ;;  %v6154_v8 = vpop.eup %6153  ;;  %v4177_v3 = vadd.f32 1.0, %v6152_v57 }
 0x45b   : > { %v3989_v1 = vadd.f32 %v3925_v35, %v9801_v24  ;;  %v3927_v25 = vmul.f32 0.044715, %v3863_v58  ;;  %v6156_v4 = vpop.eup %6155  ;;  %v4178_v60 = vadd.f32 1.0, %v6154_v8 }
 0x45c   : > { %v3990_v61 = vadd.f32 %v3926_v31, %v9804_v22  ;;  %v3928_v17 = vmul.f32 0.044715, %v3864_v11  ;;  %v6158_v2 = vpop.eup %6157  ;;  %v4179_v33 = vadd.f32 1.0, %v6156_v4  ;;  %v4241_v46 = vmul.f32 0.5, %v4177_v3  ;;  %v11024_v3 = vld [vmem:[#allocation32_spill] sm:$0xff] }
 0x45d   : > { %v4053_v9 = vmul.f32 0.7978846, %v3989_v1  ;;  %v3991_v53 = vadd.f32 %v3927_v25, %v9809_v40  ;;  %v4180_v15 = vadd.f32 1.0, %v6158_v2  ;;  %v4242_v51 = vmul.f32 0.5, %v4178_v60  ;;  %v11023_v1 = vld [vmem:[#allocation38_spill] sm:$0xff] }
 0x45e   : > { %v4054_v6 = vmul.f32 0.7978846, %v3990_v61  ;;  %v3992_v12 = vadd.f32 %v3928_v17, %v9814_v54  ;;  %v4243_v29 = vmul.f32 0.5, %v4179_v33  ;;  %v4305_v39 = vmul.f32 %v4241_v46, %v9765_v13  ;;  %v11025_v17 = vld [vmem:[#allocation22_spill] sm:$0xff] }
 0x45f   : > { %6159 = vtanh.f32 %v4053_v9  ;;  %v4055_v19 = vmul.f32 0.7978846, %v3991_v53  ;;  %v4244_v28 = vmul.f32 0.5, %v4180_v15  ;;  %v4306_v21 = vmul.f32 %v4242_v51, %v9768_v37 }
 0x460   : > { %6161 = vtanh.f32 %v4054_v6  ;;  %v4056_v34 = vmul.f32 0.7978846, %v3992_v12  ;;  %v3678_v45 = vpop.f32.mrb[120].mxu1  ;;  %v4307_v58 = vmul.f32 %v4243_v29, %v9773_v0  ;;  %v4369_v25 = vadd.f32 %v4305_v39, %v11023_v1 }
 0x461   : > { %6163 = vtanh.f32 %v4055_v19  ;;  %v9831_v16 = vadd.f32 %v3678_v45, %v9623_v43  ;;  %v3680_v35 = vpop.f32.mrb[121].mxu1  ;;  %v4308_v13 = vmul.f32 %v4244_v28, %v9778_v26  ;;  %v4370_v60 = vadd.f32 %v4306_v21, %v11025_v17  ;;  %v11026_v26 = vld [vmem:[#allocation24_spill] sm:$0xff] }
 0x462   : > { %6165 = vtanh.f32 %v4056_v34  ;;  %v9835_v57 = vadd.f32 %v3680_v35, %v9626_v59  ;;  %v3682_v31 = vpop.f32.mrb[122].mxu1  ;;  %v4371_v4 = vadd.f32 %v4307_v58, %v11024_v3 }
 0x463   : > { %v3801_v11 = vmul.f32 %v9831_v16, %v9831_v16  ;;  %v9841_v8 = vadd.f32 %v3682_v31, %v9623_v43  ;;  %v3684_v37 = vpop.f32.mrb[123].mxu1  ;;  %v4372_v2 = vadd.f32 %v4308_v13, %v11026_v26 }
 0x464   : > { %v3802_v0 = vmul.f32 %v9835_v57, %v9835_v57  ;;  %v9848_v61 = vadd.f32 %v3684_v37, %v9626_v59  ;;  %v4425_v33 = vpack.c.bf16 %v4371_v4, %v4369_v25 }
 0x465   : > { %v3865_v9 = vmul.f32 %v3801_v11, %v9831_v16  ;;  %v3803_v53 = vmul.f32 %v9841_v8, %v9841_v8  ;;  %v4426_v12 = vpack.c.bf16 %v4372_v2, %v4370_v60 }
 0x466   : > { %v3866_v46 = vmul.f32 %v3802_v0, %v9835_v57  ;;  %v3804_v6 = vmul.f32 %v9848_v61, %v9848_v61 }
 0x467   : > { %v3929_v15 = vmul.f32 0.044715, %v3865_v9  ;;  %v3867_v51 = vmul.f32 %v3803_v53, %v9841_v8  ;;  %4648 = vmatprep.mubr.bf16.mxu0 %v4426_v12 }
 0x468   : > { %v3930_v19 = vmul.f32 0.044715, %v3866_v46  ;;  %v3868_v29 = vmul.f32 %v3804_v6, %v9848_v61  ;;  %4649 = vmatmul.mubr.bf16.gmra.mrb[112].mxu0 %v4425_v33 }
 0x469   : > { %v6160_v39 = vpop.eup %6159  ;;  %v3993_v34 = vadd.f32 %v3929_v15, %v9831_v16  ;;  %v3931_v45 = vmul.f32 0.044715, %v3867_v51 }
 0x46a   : > { %v6162_v28 = vpop.eup %6161  ;;  %v3994_v21 = vadd.f32 %v3930_v19, %v9835_v57  ;;  %v3932_v35 = vmul.f32 0.044715, %v3868_v29  ;;  %v3688_v11 = vpop.f32.mrb[124].mxu1  ;;  %v4181_v1 = vadd.f32 1.0, %v6160_v39 }
 0x46b   : > { %v6164_v58 = vpop.eup %6163  ;;  %v4057_v31 = vmul.f32 0.7978846, %v3993_v34  ;;  %v3995_v13 = vadd.f32 %v3931_v45, %v9841_v8  ;;  %v4182_v37 = vadd.f32 1.0, %v6162_v28  ;;  %v9865_v0 = vadd.f32 %v3688_v11, %v9623_v43  ;;  %v3690_v17 = vpop.f32.mrb[125].mxu1 }
 0x46c   : > { %v6166_v25 = vpop.eup %6165  ;;  %v4058_v3 = vmul.f32 0.7978846, %v3994_v21  ;;  %v3996_v4 = vadd.f32 %v3932_v35, %v9848_v61  ;;  %v4183_v60 = vadd.f32 1.0, %v6164_v58  ;;  %v9868_v2 = vadd.f32 %v3690_v17, %v9626_v59  ;;  %v3692_v9 = vpop.f32.mrb[126].mxu1 }
 0x46d   : > { %6167 = vtanh.f32 %v4057_v31  ;;  %v4059_v26 = vmul.f32 0.7978846, %v3995_v13  ;;  %v4184_v53 = vadd.f32 1.0, %v6166_v25  ;;  %v3805_v46 = vmul.f32 %v9865_v0, %v9865_v0  ;;  %v3694_v12 = vpop.f32.mrb[127].mxu1 }
 0x46e   : > { %6169 = vtanh.f32 %v4058_v3  ;;  %v4060_v33 = vmul.f32 0.7978846, %v3996_v4  ;;  %v9873_v6 = vadd.f32 %v3692_v9, %v9623_v43  ;;  %v3806_v15 = vmul.f32 %v9868_v2, %v9868_v2  ;;  %v11027_v3 = vld [vmem:[#allocation62_spill] sm:$0xff] }
 0x46f   : > { %6171 = vtanh.f32 %v4059_v26  ;;  %v9878_v51 = vadd.f32 %v3694_v12, %v9626_v59  ;;  %v4246_v19 = vmul.f32 0.5, %v4182_v37  ;;  %v3869_v29 = vmul.f32 %v3805_v46, %v9865_v0  ;;  %v11029_v12 = vld [vmem:[#allocation33_spill] sm:$0xff] }
 0x470   : > { %6173 = vtanh.f32 %v4060_v33  ;;  %v3807_v39 = vmul.f32 %v9873_v6, %v9873_v6  ;;  %v4248_v34 = vmul.f32 0.5, %v4184_v53  ;;  %v3870_v45 = vmul.f32 %v3806_v15, %v9868_v2  ;;  %v11028_v53 = vld [vmem:[#allocation42_spill] sm:$0xff] }
 0x471   : > { %v3808_v28 = vmul.f32 %v9878_v51, %v9878_v51  ;;  %v4310_v21 = vmul.f32 %v4246_v19, %v9804_v22  ;;  %v4245_v35 = vmul.f32 0.5, %v4181_v1  ;;  %v3933_v58 = vmul.f32 0.044715, %v3869_v29  ;;  %v11030_v29 = vld [vmem:[#allocation37_spill] sm:$0xff] }
 0x472   : > { %v3871_v31 = vmul.f32 %v3807_v39, %v9873_v6  ;;  %v4312_v13 = vmul.f32 %v4248_v34, %v9814_v54  ;;  %v4247_v11 = vmul.f32 0.5, %v4183_v60  ;;  %v3934_v37 = vmul.f32 0.044715, %v3870_v45 }
 0x473   : > { %v3872_v25 = vmul.f32 %v3808_v28, %v9878_v51  ;;  %v4374_v4 = vadd.f32 %v4310_v21, %v11027_v3  ;;  %v4309_v17 = vmul.f32 %v4245_v35, %v9801_v24  ;;  %v3997_v26 = vadd.f32 %v3933_v58, %v9865_v0 }
 0x474   : > { %v3935_v9 = vmul.f32 0.044715, %v3871_v31  ;;  %v4376_v33 = vadd.f32 %v4312_v13, %v11028_v53  ;;  %v4311_v22 = vmul.f32 %v4247_v11, %v9809_v40  ;;  %v3998_v1 = vadd.f32 %v3934_v37, %v9868_v2 }
 0x475   : > { %v3936_v46 = vmul.f32 0.044715, %v3872_v25  ;;  %v4373_v54 = vadd.f32 %v4309_v17, %v11029_v12  ;;  %v4061_v60 = vmul.f32 0.7978846, %v3997_v26 }
 0x476   : > { %v3999_v15 = vadd.f32 %v3935_v9, %v9873_v6  ;;  %v4428_v19 = vpack.c.bf16 %v4376_v33, %v4374_v4  ;;  %v4375_v39 = vadd.f32 %v4311_v22, %v11030_v29  ;;  %v4062_v24 = vmul.f32 0.7978846, %v3998_v1 }
 0x477   : > { %v6168_v34 = vpop.eup %6167  ;;  %v4000_v45 = vadd.f32 %v3936_v46, %v9878_v51  ;;  %v3698_v28 = vpop.f32.mrb[128].mxu1  ;;  %6175 = vtanh.f32 %v4061_v60 }
 0x478   : > { %v6170_v21 = vpop.eup %6169  ;;  %v4063_v35 = vmul.f32 0.7978846, %v3999_v15  ;;  %v9901_v40 = vadd.f32 %v3698_v28, %v9623_v43  ;;  %v3700_v58 = vpop.f32.mrb[129].mxu1  ;;  %4656 = vmatprep.mubr.bf16.mxu0 %v4428_v19  ;;  %v4427_v31 = vpack.c.bf16 %v4375_v39, %v4373_v54  ;;  %6177 = vtanh.f32 %v4062_v24 }
 0x479   : > { %v6172_v13 = vpop.eup %6171  ;;  %v4064_v11 = vmul.f32 0.7978846, %v4000_v45  ;;  %v9904_v37 = vadd.f32 %v3700_v58, %v9626_v59  ;;  %v3702_v25 = vpop.f32.mrb[130].mxu1  ;;  %v4186_v3 = vadd.f32 1.0, %v6170_v21  ;;  %v4185_v53 = vadd.f32 1.0, %v6168_v34 }
 0x47a   : > { %v6174_v4 = vpop.eup %6173  ;;  %6179 = vtanh.f32 %v4063_v35  ;;  %v3809_v17 = vmul.f32 %v9901_v40, %v9901_v40  ;;  %v9909_v26 = vadd.f32 %v3702_v25, %v9623_v43  ;;  %v3704_v9 = vpop.f32.mrb[131].mxu1  ;;  %4657 = vmatmul.mubr.bf16.gmra.mrb[116].mxu0 %v4427_v31  ;;  %v4187_v60 = vadd.f32 1.0, %v6172_v13 }
 0x47b   : > { %6181 = vtanh.f32 %v4064_v11  ;;  %v3810_v33 = vmul.f32 %v9904_v37, %v9904_v37  ;;  %v9914_v22 = vadd.f32 %v3704_v9, %v9626_v59  ;;  %v4188_v1 = vadd.f32 1.0, %v6174_v4 }
 0x47c   : > { %v3873_v46 = vmul.f32 %v3809_v17, %v9901_v40  ;;  %v3811_v12 = vmul.f32 %v9909_v26, %v9909_v26  ;;  %v4250_v54 = vmul.f32 0.5, %v4186_v3  ;;  %v4249_v39 = vmul.f32 0.5, %v4185_v53  ;;  %v11031_v17 = vld [vmem:[#allocation43_spill] sm:$0xff]  ;;  %v11032_v53 = vld [vmem:[#allocation61_spill] sm:$0xff] }
 0x47d   : > { %v3874_v15 = vmul.f32 %v3810_v33, %v9904_v37  ;;  %v3812_v19 = vmul.f32 %v9914_v22, %v9914_v22  ;;  %v4252_v29 = vmul.f32 0.5, %v4188_v1  ;;  %v4251_v28 = vmul.f32 0.5, %v4187_v60 }
 0x47e   : > { %v3937_v34 = vmul.f32 0.044715, %v3873_v46  ;;  %v3875_v24 = vmul.f32 %v3811_v12, %v9909_v26  ;;  %v4314_v45 = vmul.f32 %v4250_v54, %v9835_v57  ;;  %v4313_v31 = vmul.f32 %v4249_v39, %v9831_v16  ;;  %v11033_v12 = vld [vmem:[#allocation47_spill] sm:$0xff]  ;;  %v11034_v54 = vld [vmem:[#allocation44_spill] sm:$0xff] }
 0x47f   : > { %v3938_v21 = vmul.f32 0.044715, %v3874_v15  ;;  %v3876_v35 = vmul.f32 %v3812_v19, %v9914_v22  ;;  %v4316_v58 = vmul.f32 %v4252_v29, %v9848_v61  ;;  %v4315_v25 = vmul.f32 %v4251_v28, %v9841_v8 }
 0x480   : > { %v4001_v13 = vadd.f32 %v3937_v34, %v9901_v40  ;;  %v3939_v11 = vmul.f32 0.044715, %v3875_v24  ;;  %v4378_v9 = vadd.f32 %v4314_v45, %v11031_v17  ;;  %v4377_v61 = vadd.f32 %v4313_v31, %v11033_v12 }
 0x481   : > { %v4002_v3 = vadd.f32 %v3938_v21, %v9904_v37  ;;  %v3940_v4 = vmul.f32 0.044715, %v3876_v35  ;;  %v4380_v57 = vadd.f32 %v4316_v58, %v11032_v53  ;;  %v6176_v33 = vpop.eup %6175  ;;  %v4379_v16 = vadd.f32 %v4315_v25, %v11034_v54  ;;  %v11037_v54 = vld [vmem:[#allocation45_spill] sm:$0xff] }
 0x482   : > { %v4065_v1 = vmul.f32 0.7978846, %v4001_v13  ;;  %v4003_v46 = vadd.f32 %v3939_v11, %v9909_v26  ;;  %v6178_v60 = vpop.eup %6177  ;;  %v4189_v29 = vadd.f32 1.0, %v6176_v33 }
 0x483   : > { %v4066_v15 = vmul.f32 0.7978846, %v4002_v3  ;;  %v4004_v19 = vadd.f32 %v3940_v4, %v9914_v22  ;;  %v4430_v8 = vpack.c.bf16 %v4380_v57, %v4378_v9  ;;  %v4429_v24 = vpack.c.bf16 %v4379_v16, %v4377_v61  ;;  %v11035_v57 = vld [vmem:[#allocation48_spill] sm:$0xff] }
 0x484   : > { %v6180_v39 = vpop.eup %6179  ;;  %6183 = vtanh.f32 %v4065_v1  ;;  %v4067_v34 = vmul.f32 0.7978846, %v4003_v46  ;;  %v4190_v45 = vadd.f32 1.0, %v6178_v60  ;;  %v4253_v58 = vmul.f32 0.5, %v4189_v29  ;;  %v11036_v1 = vld [vmem:[#allocation49_spill] sm:$0xff]  ;;  %v11038_v60 = vld [vmem:[#allocation46_spill] sm:$0xff] }
 0x485   : > { %v6182_v28 = vpop.eup %6181  ;;  %6185 = vtanh.f32 %v4066_v15  ;;  %v4068_v21 = vmul.f32 0.7978846, %v4004_v19  ;;  %4664 = vmatprep.mubr.bf16.mxu0 %v4430_v8  ;;  %v4191_v35 = vadd.f32 1.0, %v6180_v39 }
 0x486   : > { %6187 = vtanh.f32 %v4067_v34  ;;  %4665 = vmatmul.mubr.bf16.gmra.mrb[120].mxu0 %v4429_v24  ;;  %v4192_v31 = vadd.f32 1.0, %v6182_v28  ;;  %v4254_v13 = vmul.f32 0.5, %v4190_v45  ;;  %v4317_v25 = vmul.f32 %v4253_v58, %v9865_v0 }
 0x487   : > { %6189 = vtanh.f32 %v4068_v21  ;;  %v4255_v11 = vmul.f32 0.5, %v4191_v35 }
 0x488   : > { %v4256_v3 = vmul.f32 0.5, %v4192_v31  ;;  %v4318_v4 = vmul.f32 %v4254_v13, %v9868_v2  ;;  %v4381_v33 = vadd.f32 %v4317_v25, %v11035_v57 }
 0x489   : > { %v4319_v17 = vmul.f32 %v4255_v11, %v9873_v6 }
 0x48a   : > { %v4320_v9 = vmul.f32 %v4256_v3, %v9878_v51  ;;  %v4382_v16 = vadd.f32 %v4318_v4, %v11037_v54 }
 0x48b   : > { %v3708_v53 = vpop.f32.mrb[132].mxu1  ;;  %v4383_v46 = vadd.f32 %v4319_v17, %v11036_v1 }
 0x48c   : > { %v9943_v12 = vadd.f32 %v3708_v53, %v9623_v43  ;;  %v3710_v61 = vpop.f32.mrb[133].mxu1  ;;  %v4384_v0 = vadd.f32 %v4320_v9, %v11038_v60 }
 0x48d   : > { %v9948_v15 = vadd.f32 %v3710_v61, %v9626_v59  ;;  %v3712_v2 = vpop.f32.mrb[134].mxu1  ;;  %v4431_v6 = vpack.c.bf16 %v4383_v46, %v4381_v33 }
 0x48e   : > { %v6184_v19 = vpop.eup %6183  ;;  %v3813_v51 = vmul.f32 %v9943_v12, %v9943_v12  ;;  %v9953_v8 = vadd.f32 %v3712_v2, %v9623_v43  ;;  %v3714_v29 = vpop.f32.mrb[135].mxu1  ;;  %v4432_v39 = vpack.c.bf16 %v4384_v0, %v4382_v16 }
 0x48f   : > { %v6186_v34 = vpop.eup %6185  ;;  %v3814_v24 = vmul.f32 %v9948_v15, %v9948_v15  ;;  %v9958_v45 = vadd.f32 %v3714_v29, %v9626_v59  ;;  %v4193_v28 = vadd.f32 1.0, %v6184_v19 }
 0x490   : > { %v6188_v21 = vpop.eup %6187  ;;  %v3877_v35 = vmul.f32 %v3813_v51, %v9943_v12  ;;  %v3815_v58 = vmul.f32 %v9953_v8, %v9953_v8  ;;  %4672 = vmatprep.mubr.bf16.mxu0 %v4432_v39  ;;  %v4194_v31 = vadd.f32 1.0, %v6186_v34 }
 0x491   : > { %v6190_v13 = vpop.eup %6189  ;;  %v3878_v11 = vmul.f32 %v3814_v24, %v9948_v15  ;;  %v3816_v25 = vmul.f32 %v9958_v45, %v9958_v45  ;;  %4673 = vmatmul.mubr.bf16.gmra.mrb[124].mxu0 %v4431_v6  ;;  %v4195_v3 = vadd.f32 1.0, %v6188_v21  ;;  %v4257_v4 = vmul.f32 0.5, %v4193_v28  ;;  %v11040_v21 = vld [vmem:[#allocation14_spill] sm:$0xff] }
 0x492   : > { %v3941_v17 = vmul.f32 0.044715, %v3877_v35  ;;  %v3879_v9 = vmul.f32 %v3815_v58, %v9953_v8  ;;  %v4196_v53 = vadd.f32 1.0, %v6190_v13  ;;  %v4258_v57 = vmul.f32 0.5, %v4194_v31  ;;  %v11042_v13 = vld [vmem:[#allocation20_spill] sm:$0xff] }
 0x493   : > { %v3942_v33 = vmul.f32 0.044715, %v3878_v11  ;;  %v3880_v1 = vmul.f32 %v3816_v25, %v9958_v45  ;;  %v4259_v46 = vmul.f32 0.5, %v4195_v3  ;;  %v4321_v61 = vmul.f32 %v4257_v4, %v9901_v40  ;;  %v11039_v40 = vld [vmem:[#allocation13_spill] sm:$0xff] }
 0x494   : > { %v4005_v54 = vadd.f32 %v3941_v17, %v9943_v12  ;;  %v3943_v16 = vmul.f32 0.044715, %v3879_v9  ;;  %v4260_v60 = vmul.f32 0.5, %v4196_v53  ;;  %v4322_v0 = vmul.f32 %v4258_v57, %v9904_v37  ;;  %v11041_v37 = vld [vmem:[#allocation16_spill] sm:$0xff] }
 0x495   : > { %v4006_v2 = vadd.f32 %v3942_v33, %v9948_v15  ;;  %v3944_v6 = vmul.f32 0.044715, %v3880_v1  ;;  %v4323_v19 = vmul.f32 %v4259_v46, %v9909_v26  ;;  %v4385_v28 = vadd.f32 %v4321_v61, %v11039_v40 }
 0x496   : > { %v4069_v51 = vmul.f32 0.7978846, %v4005_v54  ;;  %v4007_v29 = vadd.f32 %v3943_v16, %v9953_v8  ;;  %v4324_v39 = vmul.f32 %v4260_v60, %v9914_v22  ;;  %v4386_v31 = vadd.f32 %v4322_v0, %v11041_v37 }
 0x497   : > { %v4070_v34 = vmul.f32 0.7978846, %v4006_v2  ;;  %v4008_v24 = vadd.f32 %v3944_v6, %v9958_v45  ;;  %v4387_v35 = vadd.f32 %v4323_v19, %v11040_v21 }
 0x498   : > { %6191 = vtanh.f32 %v4069_v51  ;;  %v4071_v58 = vmul.f32 0.7978846, %v4007_v29  ;;  %v4388_v11 = vadd.f32 %v4324_v39, %v11042_v13 }
 0x499   : > { %6193 = vtanh.f32 %v4070_v34  ;;  %v4072_v26 = vmul.f32 0.7978846, %v4008_v24  ;;  %v4433_v25 = vpack.c.bf16 %v4387_v35, %v4385_v28 }
 0x49a   : > { %6195 = vtanh.f32 %v4071_v58  ;;  %v4434_v3 = vpack.c.bf16 %v4388_v11, %v4386_v31 }
 0x49b   : > { %6197 = vtanh.f32 %v4072_v26  ;;  %v3718_v22 = vpop.f32.mrb[136].mxu1 }
 0x49c   : > { %4680 = vmatprep.mubr.bf16.mxu0 %v4434_v3  ;;  %v9981_v4 = vadd.f32 %v3718_v22, %v9623_v43  ;;  %v3720_v17 = vpop.f32.mrb[137].mxu1 }
 0x49d   : > { %4681 = vmatmul.mubr.bf16.gmra.mrb[128].mxu0 %v4433_v25  ;;  %v9984_v9 = vadd.f32 %v3720_v17, %v9626_v59  ;;  %v3722_v53 = vpop.f32.mrb[138].mxu1 }
 0x49e   : > { %v3817_v57 = vmul.f32 %v9981_v4, %v9981_v4  ;;  %v9989_v33 = vadd.f32 %v3722_v53, %v9623_v43  ;;  %v3724_v1 = vpop.f32.mrb[139].mxu1 }
 0x49f   : > { %v3818_v46 = vmul.f32 %v9984_v9, %v9984_v9  ;;  %v9994_v61 = vadd.f32 %v3724_v1, %v9626_v59 }
 0x4a0   : > { %v3881_v54 = vmul.f32 %v3817_v57, %v9981_v4  ;;  %v3819_v16 = vmul.f32 %v9989_v33, %v9989_v33 }
 0x4a1   : > { %v3882_v0 = vmul.f32 %v3818_v46, %v9984_v9  ;;  %v3820_v2 = vmul.f32 %v9994_v61, %v9994_v61 }
 0x4a2   : > { %v6192_v60 = vpop.eup %6191  ;;  %v3945_v19 = vmul.f32 0.044715, %v3881_v54  ;;  %v3883_v51 = vmul.f32 %v3819_v16, %v9989_v33 }
 0x4a3   : > { %v6194_v6 = vpop.eup %6193  ;;  %v4197_v29 = vadd.f32 1.0, %v6192_v60  ;;  %v3946_v34 = vmul.f32 0.044715, %v3882_v0  ;;  %v3884_v24 = vmul.f32 %v3820_v2, %v9994_v61 }
 0x4a4   : > { %v6196_v39 = vpop.eup %6195  ;;  %v4198_v40 = vadd.f32 1.0, %v6194_v6  ;;  %v4009_v21 = vadd.f32 %v3945_v19, %v9981_v4  ;;  %v3947_v35 = vmul.f32 0.044715, %v3883_v51 }
 0x4a5   : > { %v6198_v28 = vpop.eup %6197  ;;  %v4199_v58 = vadd.f32 1.0, %v6196_v39  ;;  %v4261_v37 = vmul.f32 0.5, %v4197_v29  ;;  %v4010_v31 = vadd.f32 %v3946_v34, %v9984_v9  ;;  %v3948_v13 = vmul.f32 0.044715, %v3884_v24  ;;  %v3728_v11 = vpop.f32.mrb[140].mxu1 }
 0x4a6   : > { %v4200_v26 = vadd.f32 1.0, %v6198_v28  ;;  %v4262_v25 = vmul.f32 0.5, %v4198_v40  ;;  %v4073_v3 = vmul.f32 0.7978846, %v4009_v21  ;;  %v4011_v22 = vadd.f32 %v3947_v35, %v9989_v33  ;;  %v3730_v53 = vpop.f32.mrb[141].mxu1 }
 0x4a7   : > { %v10008_v17 = vadd.f32 %v3728_v11, %v9623_v43  ;;  %v4263_v57 = vmul.f32 0.5, %v4199_v58  ;;  %v4074_v1 = vmul.f32 0.7978846, %v4010_v31  ;;  %v4012_v46 = vadd.f32 %v3948_v13, %v9994_v61  ;;  %v3732_v16 = vpop.f32.mrb[142].mxu1  ;;  %v11043_v13 = vld [vmem:[#allocation10_spill] sm:$0xff] }
 0x4a8   : > { %v10012_v54 = vadd.f32 %v3730_v53, %v9626_v59  ;;  %v4264_v60 = vmul.f32 0.5, %v4200_v26  ;;  %6199 = vtanh.f32 %v4073_v3  ;;  %v4075_v0 = vmul.f32 0.7978846, %v4011_v22  ;;  %v3734_v19 = vpop.f32.mrb[143].mxu1 }
 0x4a9   : > { %v3821_v2 = vmul.f32 %v10008_v17, %v10008_v17  ;;  %v10017_v6 = vadd.f32 %v3732_v16, %v9623_v43  ;;  %6201 = vtanh.f32 %v4074_v1  ;;  %v4076_v51 = vmul.f32 0.7978846, %v4012_v46 }
 0x4aa   : > { %v3822_v29 = vmul.f32 %v10012_v54, %v10012_v54  ;;  %v10022_v39 = vadd.f32 %v3734_v19, %v9626_v59  ;;  %6203 = vtanh.f32 %v4075_v0  ;;  %v4326_v40 = vmul.f32 %v4262_v25, %v9948_v15  ;;  %v11044_v15 = vld [vmem:[#allocation12_spill] sm:$0xff]  ;;  %v11045_v0 = vld [vmem:[#allocation19_spill] sm:$0xff] }
 0x4ab   : > { %v3885_v34 = vmul.f32 %v3821_v2, %v10008_v17  ;;  %v3823_v24 = vmul.f32 %v10017_v6, %v10017_v6  ;;  %6205 = vtanh.f32 %v4076_v51  ;;  %v4328_v35 = vmul.f32 %v4264_v60, %v9958_v45 }
 0x4ac   : > { %v3886_v28 = vmul.f32 %v3822_v29, %v10012_v54  ;;  %v3824_v21 = vmul.f32 %v10022_v39, %v10022_v39  ;;  %v4390_v11 = vadd.f32 %v4326_v40, %v11043_v13  ;;  %v4325_v26 = vmul.f32 %v4261_v37, %v9943_v12 }
 0x4ad   : > { %v3949_v58 = vmul.f32 0.044715, %v3885_v34  ;;  %v3887_v31 = vmul.f32 %v3823_v24, %v10017_v6  ;;  %v3738_v53 = vpop.f32.mrb[144].mxu1  ;;  %v4392_v25 = vadd.f32 %v4328_v35, %v11044_v15  ;;  %v4327_v1 = vmul.f32 %v4263_v57, %v9953_v8 }
 0x4ae   : > { %v3950_v3 = vmul.f32 0.044715, %v3886_v28  ;;  %v3888_v22 = vmul.f32 %v3824_v21, %v10022_v39  ;;  %v10040_v45 = vadd.f32 %v3738_v53, %v9623_v43  ;;  %v3740_v60 = vpop.f32.mrb[145].mxu1  ;;  %v4389_v2 = vadd.f32 %v4325_v26, %v11045_v0 }
 0x4af   : > { %v4013_v46 = vadd.f32 %v3949_v58, %v10008_v17  ;;  %v3951_v16 = vmul.f32 0.044715, %v3887_v31  ;;  %v10045_v37 = vadd.f32 %v3740_v60, %v9626_v59  ;;  %v3742_v51 = vpop.f32.mrb[146].mxu1  ;;  %v4436_v29 = vpack.c.bf16 %v4392_v25, %v4390_v11  ;;  %v11046_v60 = vld [vmem:[#allocation64_spill] sm:$0xff] }
 0x4b0   : > { %v4014_v19 = vadd.f32 %v3950_v3, %v10012_v54  ;;  %v3952_v12 = vmul.f32 0.044715, %v3888_v22  ;;  %v3825_v57 = vmul.f32 %v10040_v45, %v10040_v45  ;;  %v10051_v24 = vadd.f32 %v3742_v51, %v9623_v43  ;;  %v3744_v40 = vpop.f32.mrb[147].mxu1 }
 0x4b1   : > { %v4077_v34 = vmul.f32 0.7978846, %v4013_v46  ;;  %v4015_v8 = vadd.f32 %v3951_v16, %v10017_v6  ;;  %v3826_v35 = vmul.f32 %v10045_v37, %v10045_v37  ;;  %v10057_v58 = vadd.f32 %v3744_v40, %v9626_v59  ;;  %4688 = vmatprep.mubr.bf16.mxu0 %v4436_v29 }
 0x4b2   : > { %v4078_v28 = vmul.f32 0.7978846, %v4014_v19  ;;  %v4016_v21 = vadd.f32 %v3952_v12, %v10022_v39  ;;  %v10059_v31 = vpop.eup %6199  ;;  %v3889_v11 = vmul.f32 %v3825_v57, %v10040_v45  ;;  %v3827_v26 = vmul.f32 %v10051_v24, %v10051_v24 }
 0x4b3   : > { %6207 = vtanh.f32 %v4077_v34  ;;  %v4079_v13 = vmul.f32 0.7978846, %v4015_v8  ;;  %v6202_v3 = vpop.eup %6201  ;;  %v3890_v53 = vmul.f32 %v3826_v35, %v10045_v37  ;;  %v3828_v15 = vmul.f32 %v10057_v58, %v10057_v58 }
 0x4b4   : > { %6209 = vtanh.f32 %v4078_v28  ;;  %v4080_v22 = vmul.f32 0.7978846, %v4016_v21  ;;  %v10067_v25 = vpop.eup %6203  ;;  %v3953_v46 = vmul.f32 0.044715, %v3889_v11  ;;  %v3891_v16 = vmul.f32 %v3827_v26, %v10051_v24 }
 0x4b5   : > { %6211 = vtanh.f32 %v4079_v13  ;;  %v4391_v0 = vadd.f32 %v4327_v1, %v11046_v60  ;;  %v6206_v19 = vpop.eup %6205  ;;  %v3954_v12 = vmul.f32 0.044715, %v3890_v53  ;;  %v3892_v51 = vmul.f32 %v3828_v15, %v10057_v58  ;;  %v3748_v29 = vpop.f32.mrb[148].mxu1 }
 0x4b6   : > { %6213 = vtanh.f32 %v4080_v22  ;;  %v4202_v34 = vadd.f32 1.0, %v6202_v3  ;;  %v4017_v8 = vadd.f32 %v3953_v46, %v10040_v45  ;;  %v3955_v57 = vmul.f32 0.044715, %v3891_v16  ;;  %v3750_v28 = vpop.f32.mrb[149].mxu1 }
 0x4b7   : > { %v10074_v40 = vadd.f32 %v3748_v29, %v9623_v43  ;;  %v4435_v21 = vpack.c.bf16 %v4391_v0, %v4389_v2  ;;  %v4018_v35 = vadd.f32 %v3954_v12, %v10045_v37  ;;  %v3956_v13 = vmul.f32 0.044715, %v3892_v51  ;;  %v3752_v11 = vpop.f32.mrb[150].mxu1 }
 0x4b8   : > { %v10078_v1 = vadd.f32 %v3750_v28, %v9626_v59  ;;  %v4204_v26 = vadd.f32 1.0, %v6206_v19  ;;  %v4081_v22 = vmul.f32 0.7978846, %v4017_v8  ;;  %v4019_v53 = vadd.f32 %v3955_v57, %v10051_v24  ;;  %v3754_v46 = vpop.f32.mrb[151].mxu1 }
 0x4b9   : > { %v3829_v3 = vmul.f32 %v10074_v40, %v10074_v40  ;;  %v10084_v15 = vadd.f32 %v3752_v11, %v9623_v43  ;;  %4689 = vmatmul.mubr.bf16.gmra.mrb[132].mxu0 %v4435_v21  ;;  %v4082_v2 = vmul.f32 0.7978846, %v4018_v35  ;;  %v4020_v16 = vadd.f32 %v3956_v13, %v10057_v58 }
 0x4ba   : > { %v3830_v60 = vmul.f32 %v10078_v1, %v10078_v1  ;;  %v10090_v0 = vadd.f32 %v3754_v46, %v9626_v59  ;;  %6215 = vtanh.f32 %v4081_v22  ;;  %v4083_v19 = vmul.f32 0.7978846, %v4019_v53 }
 0x4bb   : > { %v3893_v12 = vmul.f32 %v3829_v3, %v10074_v40  ;;  %v3831_v51 = vmul.f32 %v10084_v15, %v10084_v15  ;;  %6217 = vtanh.f32 %v4082_v2  ;;  %v4084_v29 = vmul.f32 0.7978846, %v4020_v16 }
 0x4bc   : > { %v3894_v8 = vmul.f32 %v3830_v60, %v10078_v1  ;;  %v3832_v57 = vmul.f32 %v10090_v0, %v10090_v0  ;;  %6219 = vtanh.f32 %v4083_v19  ;;  %v4266_v13 = vmul.f32 0.5, %v4202_v34 }
 0x4bd   : > { %v10098_v28 = vpop.eup %6207  ;;  %v3957_v21 = vmul.f32 0.044715, %v3893_v12  ;;  %v3895_v35 = vmul.f32 %v3831_v51, %v10084_v15  ;;  %6221 = vtanh.f32 %v4084_v29  ;;  %v3758_v3 = vpop.f32.mrb[152].mxu1  ;;  %v4268_v46 = vmul.f32 0.5, %v4204_v26 }
 0x4be   : > { %v10101_v11 = vpop.eup %6209  ;;  %v3958_v22 = vmul.f32 0.044715, %v3894_v8  ;;  %v3896_v53 = vmul.f32 %v3832_v57, %v10090_v0  ;;  %v10108_v49 = vadd.f32 %v3758_v3, %v9623_v43  ;;  %v3760_v19 = vpop.f32.mrb[153].mxu1  ;;  %v4330_v12 = vmul.f32 %v4266_v13, %v9984_v9 }
 0x4bf   : > { %v10104_v2 = vpop.eup %6211  ;;  %v4021_v16 = vadd.f32 %v3957_v21, %v10074_v40  ;;  %v3959_v60 = vmul.f32 0.044715, %v3895_v35  ;;  %v10115_v8 = vadd.f32 %v3760_v19, %v9626_v59  ;;  %v3762_v26 = vpop.f32.mrb[154].mxu1  ;;  %v4332_v57 = vmul.f32 %v4268_v46, %v9994_v61 }
 0x4c0   : > { %11047 = vst [vmem:[#allocation15_spill] sm:$0xff] %v10108_v49  ;;  %v10111_v34 = vpop.eup %6213  ;;  %v4022_v51 = vadd.f32 %v3958_v22, %v10078_v1  ;;  %v3960_v29 = vmul.f32 0.044715, %v3896_v53  ;;  %v3833_v35 = vmul.f32 %v10108_v49, %v10108_v49  ;;  %v10122_v3 = vadd.f32 %v3762_v26, %v9623_v43  ;;  %v3764_v9 = vpop.f32.mrb[155].mxu1 }
 0x4c1   : > { %v4085_v42 = vmul.f32 0.7978846, %v4021_v16  ;;  %v4023_v21 = vadd.f32 %v3959_v60, %v10084_v15  ;;  %v3834_v53 = vmul.f32 %v10115_v8, %v10115_v8  ;;  %v10128_v19 = vadd.f32 %v3764_v9, %v9626_v59 }
 0x4c2   : > { %v4086_v13 = vmul.f32 0.7978846, %v4022_v51  ;;  %v4024_v22 = vadd.f32 %v3960_v29, %v10090_v0  ;;  %v3897_v46 = vmul.f32 %v3833_v35, %v10108_v49  ;;  %v3835_v16 = vmul.f32 %v10122_v3, %v10122_v3 }
 0x4c3   : > { %6223 = vtanh.f32 %v4085_v42  ;;  %v4087_v61 = vmul.f32 0.7978846, %v4023_v21  ;;  %v3898_v26 = vmul.f32 %v3834_v53, %v10115_v8  ;;  %v3836_v51 = vmul.f32 %v10128_v19, %v10128_v19 }
 0x4c4   : > { %6225 = vtanh.f32 %v4086_v13  ;;  %v4088_v60 = vmul.f32 0.7978846, %v4024_v22  ;;  %v10136_v29 = vpop.eup %6215  ;;  %v3961_v5 = vmul.f32 0.044715, %v3897_v46  ;;  %v3899_v9 = vmul.f32 %v3835_v16, %v10122_v3 }
 0x4c5   : > { %6227 = vtanh.f32 %v4087_v61  ;;  %v4394_v42 = vadd.f32 %v4330_v12, %v9456_v14  ;;  %v10140_v21 = vpop.eup %6217  ;;  %v3962_v35 = vmul.f32 0.044715, %v3898_v26  ;;  %v3900_v13 = vmul.f32 %v3836_v51, %v10128_v19  ;;  %v3768_v53 = vpop.f32.mrb[156].mxu1 }
 0x4c6   : > { %6229 = vtanh.f32 %v4088_v60  ;;  %v4396_v22 = vadd.f32 %v4332_v57, %v9460_v27  ;;  %v10144_v23 = vpop.eup %6219  ;;  %v4025_v62 = vadd.f32 %v3961_v5, %v10108_v49  ;;  %v3963_v38 = vmul.f32 0.044715, %v3899_v9  ;;  %v3770_v16 = vpop.f32.mrb[157].mxu1 }
 0x4c7   : > { %v4201_v61 = vadd.f32 1.0, %v10059_v31  ;;  %v4203_v46 = vadd.f32 1.0, %v10067_v25  ;;  %v10149_v14 = vpop.eup %6221  ;;  %v4026_v12 = vadd.f32 %v3962_v35, %v10115_v8  ;;  %v3964_v60 = vmul.f32 0.044715, %v3900_v13  ;;  %v3772_v27 = vpop.f32.mrb[158].mxu1 }
 0x4c8   : > { %v4438_v26 = vpack.c.bf16 %v4396_v22, %v4394_v42  ;;  %v10153_v51 = vadd.f32 %v3768_v53, %v9623_v43  ;;  %v4089_v57 = vmul.f32 0.7978846, %v4025_v62  ;;  %v4027_v48 = vadd.f32 %v3963_v38, %v10122_v3  ;;  %v3774_v63 = vpop.f32.mrb[159].mxu1 }
 0x4c9   : > { %v4265_v5 = vmul.f32 0.5, %v4201_v61  ;;  %v4267_v9 = vmul.f32 0.5, %v4203_v46  ;;  %v4090_v31 = vmul.f32 0.7978846, %v4026_v12  ;;  %v4028_v25 = vadd.f32 %v3964_v60, %v10128_v19 }
 0x4ca   : > { %4696 = vmatprep.mubr.bf16.mxu0 %v4438_v26  ;;  %v3837_v49 = vmul.f32 %v10153_v51, %v10153_v51  ;;  %v10160_v35 = vadd.f32 %v3770_v16, %v9626_v59  ;;  %6231 = vtanh.f32 %v4089_v57  ;;  %v4091_v42 = vmul.f32 0.7978846, %v4027_v48 }
 0x4cb   : > { %v4329_v13 = vmul.f32 %v4265_v5, %v9981_v4  ;;  %v4331_v62 = vmul.f32 %v4267_v9, %v9989_v33  ;;  %6233 = vtanh.f32 %v4090_v31  ;;  %v4092_v38 = vmul.f32 0.7978846, %v4028_v25 }
 0x4cc   : > { %v3901_v22 = vmul.f32 %v3837_v49, %v10153_v51  ;;  %v3838_v53 = vmul.f32 %v10160_v35, %v10160_v35  ;;  %6235 = vtanh.f32 %v4091_v42  ;;  %v10172_v48 = vadd.f32 %v3772_v27, %v9623_v43 }
 0x4cd   : > { %v10167_v61 = vpop.eup %6223  ;;  %v4393_v46 = vadd.f32 %v4329_v13, %v9477_v18  ;;  %v4395_v16 = vadd.f32 %v4331_v62, %v9480_v47  ;;  %6237 = vtanh.f32 %v4092_v38  ;;  %v10176_v49 = vadd.f32 %v3774_v63, %v9626_v59 }
 0x4ce   : > { %v6226_v4 = vpop.eup %6225  ;;  %v3965_v33 = vmul.f32 0.044715, %v3901_v22  ;;  %v3902_v12 = vmul.f32 %v3838_v53, %v10160_v35  ;;  %v3839_v57 = vmul.f32 %v10172_v48, %v10172_v48  ;;  %v4206_v18 = vadd.f32 1.0, %v10101_v11 }
 0x4cf   : > { %v10178_v60 = vpop.eup %6227  ;;  %v4437_v26 = vpack.c.bf16 %v4395_v16, %v4393_v46  ;;  %v4208_v47 = vadd.f32 1.0, %v10111_v34  ;;  %v3840_v9 = vmul.f32 %v10176_v49, %v10176_v49  ;;  %v4205_v63 = vadd.f32 1.0, %v10098_v28 }
 0x4d0   : > { %v6230_v43 = vpop.eup %6229  ;;  %v4029_v27 = vadd.f32 %v3965_v33, %v10153_v51  ;;  %v3966_v5 = vmul.f32 0.044715, %v3902_v12  ;;  %v3903_v59 = vmul.f32 %v3839_v57, %v10172_v48  ;;  %v4270_v31 = vmul.f32 0.5, %v4206_v18 }
 0x4d1   : > { %4697 = vmatmul.mubr.bf16.gmra.mrb[136].mxu0 %v4437_v26  ;;  %v4272_v25 = vmul.f32 0.5, %v4208_v47  ;;  %v4207_v42 = vadd.f32 1.0, %v10104_v2  ;;  %v3904_v34 = vmul.f32 %v3840_v9, %v10176_v49  ;;  %v4269_v62 = vmul.f32 0.5, %v4205_v63 }
 0x4d2   : > { %v4093_v13 = vmul.f32 0.7978846, %v4029_v27  ;;  %v4030_v11 = vadd.f32 %v3966_v5, %v10160_v35  ;;  %v3967_v38 = vmul.f32 0.044715, %v3903_v59  ;;  %v4334_v22 = vmul.f32 %v4270_v31, %v10012_v54 }
 0x4d3   : > { %v4336_v53 = vmul.f32 %v4272_v25, %v10022_v39  ;;  %v4271_v46 = vmul.f32 0.5, %v4207_v42  ;;  %v3968_v16 = vmul.f32 0.044715, %v3904_v34  ;;  %v4333_v33 = vmul.f32 %v4269_v62, %v10008_v17 }
 0x4d4   : > { %6239 = vtanh.f32 %v4093_v13  ;;  %v4094_v28 = vmul.f32 0.7978846, %v4030_v11  ;;  %v6232_v12 = vpop.eup %6231  ;;  %v4031_v2 = vadd.f32 %v3967_v38, %v10172_v48  ;;  %v4398_v26 = vadd.f32 %v4334_v22, %v9511_v32 }
 0x4d5   : > { %v4400_v57 = vadd.f32 %v4336_v53, %v9514_v7  ;;  %v4335_v18 = vmul.f32 %v4271_v46, %v10017_v6  ;;  %v6234_v47 = vpop.eup %6233  ;;  %v4032_v54 = vadd.f32 %v3968_v16, %v10176_v49  ;;  %v4397_v39 = vadd.f32 %v4333_v33, %v9525_v36 }
 0x4d6   : > { %6241 = vtanh.f32 %v4094_v28  ;;  %v4210_v27 = vadd.f32 1.0, %v10140_v21  ;;  %v6236_v5 = vpop.eup %6235  ;;  %v4095_v9 = vmul.f32 0.7978846, %v4031_v2  ;;  %v4212_v59 = vadd.f32 1.0, %v10149_v14 }
 0x4d7   : > { %v4440_v17 = vpack.c.bf16 %v4400_v57, %v4398_v26  ;;  %v4399_v63 = vadd.f32 %v4335_v18, %v9529_v10  ;;  %v6238_v32 = vpop.eup %6237  ;;  %v4096_v31 = vmul.f32 0.7978846, %v4032_v54  ;;  %v4209_v6 = vadd.f32 1.0, %v10136_v29 }
 0x4d8   : > { %v4274_v7 = vmul.f32 0.5, %v4210_v27  ;;  %v4211_v25 = vadd.f32 1.0, %v10144_v23  ;;  %6243 = vtanh.f32 %v4095_v9  ;;  %v4276_v36 = vmul.f32 0.5, %v4212_v59 }
 0x4d9   : > { %4704 = vmatprep.mubr.bf16.mxu0 %v4440_v17  ;;  %v4439_v42 = vpack.c.bf16 %v4399_v63, %v4397_v39  ;;  %v4214_v13 = vadd.f32 1.0, %v6226_v4  ;;  %6245 = vtanh.f32 %v4096_v31  ;;  %v4273_v11 = vmul.f32 0.5, %v4209_v6  ;;  %v11050_v6 = vld [vmem:[#allocation23_spill] sm:$0xff] }
 0x4da   : > { %v4338_v21 = vmul.f32 %v4274_v7, %v10045_v37  ;;  %v4275_v34 = vmul.f32 0.5, %v4211_v25  ;;  %v4340_v10 = vmul.f32 %v4276_v36, %v10057_v58  ;;  %v4216_v14 = vadd.f32 1.0, %v6230_v43 }
 0x4db   : > { %4705 = vmatmul.mubr.bf16.gmra.mrb[140].mxu0 %v4439_v42  ;;  %v4278_v62 = vmul.f32 0.5, %v4214_v13  ;;  %v4213_v38 = vadd.f32 1.0, %v10167_v61  ;;  %v4337_v23 = vmul.f32 %v4273_v11, %v10040_v45  ;;  %v4215_v4 = vadd.f32 1.0, %v10178_v60  ;;  %v11051_v13 = vld [vmem:[#allocation30_spill] sm:$0xff] }
 0x4dc   : > { %v4402_v29 = vadd.f32 %v4338_v21, %v9543_v44  ;;  %v4339_v22 = vmul.f32 %v4275_v34, %v10051_v24  ;;  %v4404_v53 = vadd.f32 %v4340_v10, %v9546_v55  ;;  %v4280_v37 = vmul.f32 0.5, %v4216_v14  ;;  %v11052_v11 = vld [vmem:[#allocation26_spill] sm:$0xff] }
 0x4dd   : > { %v4342_v46 = vmul.f32 %v4278_v62, %v10078_v1  ;;  %v4277_v28 = vmul.f32 0.5, %v4213_v38  ;;  %v4401_v58 = vadd.f32 %v4337_v23, %v9555_v41  ;;  %v4279_v61 = vmul.f32 0.5, %v4215_v4  ;;  %v11053_v23 = vld [vmem:[#allocation27_spill] sm:$0xff]  ;;  %v11054_v4 = vld [vmem:[#allocation25_spill] sm:$0xff] }
 0x4de   : > { %v6240_v16 = vpop.eup %6239  ;;  %v4403_v43 = vadd.f32 %v4339_v22, %v9550_v50  ;;  %v4218_v33 = vadd.f32 1.0, %v6234_v47  ;;  %v4442_v44 = vpack.c.bf16 %v4404_v53, %v4402_v29  ;;  %v4344_v45 = vmul.f32 %v4280_v37, %v10090_v0  ;;  %v11055_v53 = vld [vmem:[#allocation63_spill] sm:$0xff] }
 0x4df   : > { %v4406_v24 = vadd.f32 %v4342_v46, %v9559_v30  ;;  %v4341_v60 = vmul.f32 %v4277_v28, %v10074_v40  ;;  %v4343_v26 = vmul.f32 %v4279_v61, %v10084_v15  ;;  %v4220_v1 = vadd.f32 1.0, %v6238_v32  ;;  %v11056_v46 = vld [vmem:[#allocation28_spill] sm:$0xff] }
 0x4e0   : > { %v6242_v2 = vpop.eup %6241  ;;  %v4441_v55 = vpack.c.bf16 %v4403_v43, %v4401_v58  ;;  %v4282_v57 = vmul.f32 0.5, %v4218_v33  ;;  %4712 = vmatprep.mubr.bf16.mxu0 %v4442_v44  ;;  %v4408_v41 = vadd.f32 %v4344_v45, %v9564_v52  ;;  %v4217_v18 = vadd.f32 1.0, %v6232_v12 }
 0x4e1   : > { %v4405_v50 = vadd.f32 %v4341_v60, %v9583_v20  ;;  %v4219_v47 = vadd.f32 1.0, %v6236_v5  ;;  %v4407_v54 = vadd.f32 %v4343_v26, %v9574_v56  ;;  %v4284_v0 = vmul.f32 0.5, %v4220_v1  ;;  %v11048_v20 = vld [vmem:[#allocation15_spill] sm:$0xff] }
 0x4e2   : > { %v4346_v30 = vmul.f32 %v4282_v57, %v10115_v8  ;;  %v4222_v39 = vadd.f32 1.0, %v6242_v2  ;;  %v6244_v40 = vpop.eup %6243  ;;  %v4444_v27 = vpack.c.bf16 %v4408_v41, %v4406_v24  ;;  %v4281_v9 = vmul.f32 0.5, %v4217_v18  ;;  %v11049_v8 = vld [vmem:[#allocation66_spill] sm:$0xff] }
 0x4e3   : > { %4713 = vmatmul.mubr.bf16.gmra.mrb[144].mxu0 %v4441_v55  ;;  %v4283_v15 = vmul.f32 0.5, %v4219_v47  ;;  %v4221_v17 = vadd.f32 1.0, %v6240_v16  ;;  %v6246_v63 = vpop.eup %6245  ;;  %v4443_v59 = vpack.c.bf16 %v4407_v54, %v4405_v50  ;;  %v4348_v52 = vmul.f32 %v4284_v0, %v10128_v19 }
 0x4e4   : > { %v4286_v32 = vmul.f32 0.5, %v4222_v39  ;;  %4720 = vmatprep.mubr.bf16.mxu0 %v4444_v27  ;;  %v4345_v12 = vmul.f32 %v4281_v9, %v11048_v20  ;;  %v4224_v5 = vadd.f32 1.0, %v6246_v63  ;;  %v4223_v31 = vadd.f32 1.0, %v6244_v40 }
 0x4e5   : > { %v4347_v56 = vmul.f32 %v4283_v15, %v10122_v3  ;;  %v4410_v7 = vadd.f32 %v4346_v30, %v11049_v8  ;;  %v4412_v25 = vadd.f32 %v4348_v52, %v11050_v6  ;;  %v4285_v36 = vmul.f32 0.5, %v4221_v17 }
 0x4e6   : > { %v4350_v42 = vmul.f32 %v4286_v32, %v10160_v35  ;;  %v4409_v21 = vadd.f32 %v4345_v12, %v11051_v13  ;;  %v4288_v19 = vmul.f32 0.5, %v4224_v5  ;;  %v4287_v10 = vmul.f32 0.5, %v4223_v31 }
 0x4e7   : > { %v4411_v34 = vadd.f32 %v4347_v56, %v11052_v11  ;;  %v4446_v14 = vpack.c.bf16 %v4412_v25, %v4410_v7  ;;  %v4349_v62 = vmul.f32 %v4285_v36, %v10153_v51  ;;  %v10243_v51 = vld [vmem:[%s10523_s6] ss:$0 sm:$0xff] }
 0x4e8   : > { %v4352_v3 = vmul.f32 %v4288_v19, %v10176_v49  ;;  %v4351_v29 = vmul.f32 %v4287_v10, %v10172_v48  ;;  %v4414_v22 = vadd.f32 %v4350_v42, %v11053_v23  ;;  %v6312_v19 = vld [vmem:[%s6547_s18 + $0x8] sm:$0xff] }
 0x4e9   : > { %v4445_v38 = vpack.c.bf16 %v4411_v34, %v4409_v21  ;;  %v4413_v37 = vadd.f32 %v4349_v62, %v11055_v53  ;;  %v6311_v21 = vld [vmem:[%s6547_s18] sm:$0xff] }
 0x4ea   : > { %v4416_v35 = vadd.f32 %v4352_v3, %v11054_v4  ;;  %v4415_v28 = vadd.f32 %v4351_v29, %v11056_v46 }
 0x4eb   : > { %4721 = vmatmul.mubr.bf16.gmra.mrb[148].mxu0 %v4443_v59 }
 0x4ec   : > { %4728 = vmatprep.mubr.bf16.mxu0 %v4446_v14  ;;  %v4448_v16 = vpack.c.bf16 %v4416_v35, %v4414_v22  ;;  %v4447_v58 = vpack.c.bf16 %v4415_v28, %v4413_v37 }
 0x4f2   : > { %v5397_v43 = vpop.f32.mrb[96].mxu0 }
 0x4f3   : > { %v5398_v49 = vpop.f32.mrb[97].mxu0  ;;  %4729 = vmatmul.mubr.bf16.gmra.mrb[152].mxu0 %v4445_v38 }
 0x4f4   : > { %v5399_v48 = vadd.f32 %v5398_v49, %v5397_v43  ;;  %v5400_v61 = vpop.f32.mrb[98].mxu0  ;;  %4736 = vmatprep.mubr.bf16.mxu0 %v4448_v16 }
 0x4f5   : > { %v5401_v33 = vpop.f32.mrb[99].mxu0 }
 0x4f6   : > { %v4619_v44 = vadd.f32 %v5399_v48, %v10243_v51  ;;  %v5402_v45 = vadd.f32 %v5401_v33, %v5400_v61 }
 0x4f8   : > { %v4745_v24 = vmul.f32 %v4619_v44, %v4619_v44  ;;  %v4622_v60 = vadd.f32 %v5402_v45, %v10243_v51 }
 0x4fa   : > { %v4777_v2 = vmul.f32 %v4745_v24, %v4619_v44  ;;  %v4746_v55 = vmul.f32 %v4622_v60, %v4622_v60 }
 0x4fb   : > { %4737 = vmatmul.mubr.bf16.gmra.mrb[156].mxu0 %v4447_v58 }
 0x4fc   : > { %v4809_v26 = vmul.f32 0.044715, %v4777_v2  ;;  %v4778_v1 = vmul.f32 %v4746_v55, %v4622_v60  ;;  %v6314_v55 = vld [vmem:[%s6547_s18 + $0x18] sm:$0xff] }
 0x4fe   : > { %v4841_v57 = vadd.f32 %v4809_v26, %v4619_v44  ;;  %v4810_v41 = vmul.f32 0.044715, %v4778_v1 }
 0x500   : > { %v4873_v50 = vmul.f32 0.7978846, %v4841_v57  ;;  %v4842_v18 = vadd.f32 %v4810_v41, %v4622_v60 }
 0x502   : > { %6247 = vtanh.f32 %v4873_v50  ;;  %v4874_v47 = vmul.f32 0.7978846, %v4842_v18 }
 0x504   : > { %6249 = vtanh.f32 %v4874_v47 }
 0x505   : > { %v5403_v54 = vpop.f32.mrb[100].mxu0 }
 0x506   : > { %v5404_v0 = vpop.f32.mrb[101].mxu0 }
 0x507   : > { %v5405_v30 = vadd.f32 %v5404_v0, %v5403_v54  ;;  %v5406_v39 = vpop.f32.mrb[102].mxu0 }
 0x508   : > { %v5407_v40 = vpop.f32.mrb[103].mxu0 }
 0x509   : > { %v4627_v27 = vadd.f32 %v5405_v30, %v10243_v51  ;;  %v5408_v9 = vadd.f32 %v5407_v40, %v5406_v39 }
 0x50b   : > { %v4747_v15 = vmul.f32 %v4627_v27, %v4627_v27  ;;  %v4630_v17 = vadd.f32 %v5408_v9, %v10243_v51 }
 0x50c   : > { %v6248_v52 = vpop.eup %6247 }
 0x50d   : > { %v4779_v63 = vmul.f32 %v4747_v15, %v4627_v27  ;;  %v4748_v59 = vmul.f32 %v4630_v17, %v4630_v17  ;;  %v4937_v12 = vadd.f32 1.0, %v6248_v52 }
 0x50e   : > { %v6250_v56 = vpop.eup %6249 }
 0x50f   : > { %v4811_v32 = vmul.f32 0.044715, %v4779_v63  ;;  %v4780_v20 = vmul.f32 %v4748_v59, %v4630_v17  ;;  %v4969_v8 = vmul.f32 0.5, %v4937_v12  ;;  %v4938_v7 = vadd.f32 1.0, %v6250_v56 }
 0x511   : > { %v4843_v5 = vadd.f32 %v4811_v32, %v4627_v27  ;;  %v4812_v31 = vmul.f32 0.044715, %v4780_v20  ;;  %v5001_v42 = vmul.f32 %v4969_v8, %v4619_v44  ;;  %v4970_v36 = vmul.f32 0.5, %v4938_v7  ;;  %v6313_v44 = vld [vmem:[%s6547_s18 + $0x10] sm:$0xff] }
 0x513   : > { %v4875_v6 = vmul.f32 0.7978846, %v4843_v5  ;;  %v4844_v25 = vadd.f32 %v4812_v31, %v4630_v17  ;;  %v5033_v11 = vadd.f32 %v6311_v21, %v5001_v42  ;;  %v5002_v34 = vmul.f32 %v4970_v36, %v4622_v60  ;;  %v6316_v21 = vld [vmem:[%s6547_s18 + $0x28] sm:$0xff] }
 0x515   : > { %6251 = vtanh.f32 %v4875_v6  ;;  %v4876_v13 = vmul.f32 0.7978846, %v4844_v25  ;;  %5065 = vst [vmem:[%s10253_s29] sm:$0xff] %v5033_v11  ;;  %v5034_v10 = vadd.f32 %v6312_v19, %v5002_v34  ;;  %v6315_v25 = vld [vmem:[%s6547_s18 + $0x20] sm:$0xff] }
 0x517   : > { %6253 = vtanh.f32 %v4876_v13  ;;  %5066 = vst [vmem:[%s10253_s29 + $0x8] sm:$0xff] %v5034_v10 }
 0x518   : > { %v5409_v14 = vpop.f32.mrb[104].mxu0 }
 0x519   : > { %v5410_v62 = vpop.f32.mrb[105].mxu0 }
 0x51a   : > { %v5411_v38 = vadd.f32 %v5410_v62, %v5409_v14  ;;  %v5412_v3 = vpop.f32.mrb[106].mxu0 }
 0x51b   : > { %v5413_v29 = vpop.f32.mrb[107].mxu0 }
 0x51c   : > { %v4635_v22 = vadd.f32 %v5411_v38, %v10243_v51  ;;  %v5414_v4 = vadd.f32 %v5413_v29, %v5412_v3 }
 0x51e   : > { %v4749_v37 = vmul.f32 %v4635_v22, %v4635_v22  ;;  %v4638_v46 = vadd.f32 %v5414_v4, %v10243_v51 }
 0x51f   : > { %v6252_v23 = vpop.eup %6251 }
 0x520   : > { %v4939_v35 = vadd.f32 1.0, %v6252_v23  ;;  %v4781_v58 = vmul.f32 %v4749_v37, %v4635_v22  ;;  %v4750_v43 = vmul.f32 %v4638_v46, %v4638_v46 }
 0x521   : > { %v6254_v53 = vpop.eup %6253 }
 0x522   : > { %v4971_v28 = vmul.f32 0.5, %v4939_v35  ;;  %v4940_v16 = vadd.f32 1.0, %v6254_v53  ;;  %v4813_v61 = vmul.f32 0.044715, %v4781_v58  ;;  %v4782_v33 = vmul.f32 %v4750_v43, %v4638_v46 }
 0x524   : > { %v5003_v49 = vmul.f32 %v4971_v28, %v4627_v27  ;;  %v4972_v48 = vmul.f32 0.5, %v4940_v16  ;;  %v4845_v60 = vadd.f32 %v4813_v61, %v4635_v22  ;;  %v4814_v2 = vmul.f32 0.044715, %v4782_v33  ;;  %v6317_v33 = vld [vmem:[%s6547_s18 + $0x30] sm:$0xff] }
 0x526   : > { %v5035_v45 = vadd.f32 %v6313_v44, %v5003_v49  ;;  %v5004_v24 = vmul.f32 %v4972_v48, %v4630_v17  ;;  %v4877_v1 = vmul.f32 0.7978846, %v4845_v60  ;;  %v4846_v57 = vadd.f32 %v4814_v2, %v4638_v46  ;;  %v6318_v2 = vld [vmem:[%s6547_s18 + $0x38] sm:$0xff] }
 0x527   : > { %v5415_v50 = vpop.f32.mrb[108].mxu0 }
 0x528   : > { %5067 = vst [vmem:[%s10253_s29 + $0x10] sm:$0xff] %v5035_v45  ;;  %v5036_v26 = vadd.f32 %v6314_v55, %v5004_v24  ;;  %6255 = vtanh.f32 %v4877_v1  ;;  %v4878_v41 = vmul.f32 0.7978846, %v4846_v57  ;;  %v5416_v18 = vpop.f32.mrb[109].mxu0 }
 0x529   : > { %v5417_v47 = vadd.f32 %v5416_v18, %v5415_v50  ;;  %v5418_v54 = vpop.f32.mrb[110].mxu0 }
 0x52a   : > { %5068 = vst [vmem:[%s10253_s29 + $0x18] sm:$0xff] %v5036_v26  ;;  %6257 = vtanh.f32 %v4878_v41  ;;  %v5419_v0 = vpop.f32.mrb[111].mxu0 }
 0x52b   : > { %v4643_v30 = vadd.f32 %v5417_v47, %v10243_v51  ;;  %v5420_v39 = vadd.f32 %v5419_v0, %v5418_v54 }
 0x52d   : > { %v4751_v40 = vmul.f32 %v4643_v30, %v4643_v30  ;;  %v4646_v27 = vadd.f32 %v5420_v39, %v10243_v51 }
 0x52f   : > { %v4783_v9 = vmul.f32 %v4751_v40, %v4643_v30  ;;  %v4752_v15 = vmul.f32 %v4646_v27, %v4646_v27 }
 0x531   : > { %v4815_v59 = vmul.f32 0.044715, %v4783_v9  ;;  %v4784_v52 = vmul.f32 %v4752_v15, %v4646_v27 }
 0x532   : > { %v6256_v17 = vpop.eup %6255 }
 0x533   : > { %v4941_v63 = vadd.f32 1.0, %v6256_v17  ;;  %v4847_v56 = vadd.f32 %v4815_v59, %v4643_v30  ;;  %v4816_v5 = vmul.f32 0.044715, %v4784_v52 }
 0x534   : > { %v6258_v32 = vpop.eup %6257 }
 0x535   : > { %v4973_v20 = vmul.f32 0.5, %v4941_v63  ;;  %v4942_v12 = vadd.f32 1.0, %v6258_v32  ;;  %v4879_v7 = vmul.f32 0.7978846, %v4847_v56  ;;  %v4848_v6 = vadd.f32 %v4816_v5, %v4646_v27 }
 0x537   : > { %v5005_v31 = vmul.f32 %v4973_v20, %v4635_v22  ;;  %v4974_v8 = vmul.f32 0.5, %v4942_v12  ;;  %6259 = vtanh.f32 %v4879_v7  ;;  %v4880_v13 = vmul.f32 0.7978846, %v4848_v6 }
 0x539   : > { %v5037_v42 = vadd.f32 %v6315_v25, %v5005_v31  ;;  %v5006_v36 = vmul.f32 %v4974_v8, %v4638_v46  ;;  %6261 = vtanh.f32 %v4880_v13 }
 0x53b   : > { %5069 = vst [vmem:[%s10253_s29 + $0x20] sm:$0xff] %v5037_v42  ;;  %v5038_v11 = vadd.f32 %v6316_v21, %v5006_v36  ;;  %v5421_v34 = vpop.f32.mrb[112].mxu0  ;;  %v6319_v36 = vld [vmem:[%s6547_s18 + $0x40] sm:$0xff] }
 0x53c   : > { %v5422_v19 = vpop.f32.mrb[113].mxu0 }
 0x53d   : > { %5070 = vst [vmem:[%s10253_s29 + $0x28] sm:$0xff] %v5038_v11  ;;  %v5423_v10 = vadd.f32 %v5422_v19, %v5421_v34  ;;  %v5424_v14 = vpop.f32.mrb[114].mxu0 }
 0x53e   : > { %v5425_v62 = vpop.f32.mrb[115].mxu0 }
 0x53f   : > { %v4651_v38 = vadd.f32 %v5423_v10, %v10243_v51  ;;  %v5426_v3 = vadd.f32 %v5425_v62, %v5424_v14  ;;  %v6320_v10 = vld [vmem:[%s6547_s18 + $0x48] sm:$0xff] }
 0x541   : > { %v6260_v29 = vpop.eup %6259  ;;  %v4753_v23 = vmul.f32 %v4651_v38, %v4651_v38  ;;  %v4654_v22 = vadd.f32 %v5426_v3, %v10243_v51 }
 0x542   : > { %v4943_v4 = vadd.f32 1.0, %v6260_v29 }
 0x543   : > { %v6262_v35 = vpop.eup %6261  ;;  %v4785_v53 = vmul.f32 %v4753_v23, %v4651_v38  ;;  %v4754_v37 = vmul.f32 %v4654_v22, %v4654_v22 }
 0x544   : > { %v4975_v46 = vmul.f32 0.5, %v4943_v4  ;;  %v4944_v28 = vadd.f32 1.0, %v6262_v35 }
 0x545   : > { %v4817_v16 = vmul.f32 0.044715, %v4785_v53  ;;  %v4786_v58 = vmul.f32 %v4754_v37, %v4654_v22 }
 0x546   : > { %v5007_v43 = vmul.f32 %v4975_v46, %v4643_v30  ;;  %v4976_v49 = vmul.f32 0.5, %v4944_v28 }
 0x547   : > { %v4849_v48 = vadd.f32 %v4817_v16, %v4651_v38  ;;  %v4818_v61 = vmul.f32 0.044715, %v4786_v58 }
 0x548   : > { %v5039_v44 = vadd.f32 %v6317_v33, %v5007_v43  ;;  %v5008_v45 = vmul.f32 %v4976_v49, %v4646_v27 }
 0x549   : > { %v4881_v24 = vmul.f32 0.7978846, %v4849_v48  ;;  %v4850_v60 = vadd.f32 %v4818_v61, %v4654_v22 }
 0x54a   : > { %5071 = vst [vmem:[%s10253_s29 + $0x30] sm:$0xff] %v5039_v44  ;;  %v5040_v55 = vadd.f32 %v6318_v2, %v5008_v45 }
 0x54b   : > { %6263 = vtanh.f32 %v4881_v24  ;;  %v4882_v26 = vmul.f32 0.7978846, %v4850_v60 }
 0x54c   : > { %5072 = vst [vmem:[%s10253_s29 + $0x38] sm:$0xff] %v5040_v55 }
 0x54d   : > { %v5427_v1 = vpop.f32.mrb[116].mxu0  ;;  %6265 = vtanh.f32 %v4882_v26 }
 0x54e   : > { %v5428_v57 = vpop.f32.mrb[117].mxu0 }
 0x54f   : > { %v5429_v41 = vadd.f32 %v5428_v57, %v5427_v1  ;;  %v5430_v50 = vpop.f32.mrb[118].mxu0 }
 0x550   : > { %v5431_v18 = vpop.f32.mrb[119].mxu0 }
 0x551   : > { %v4659_v47 = vadd.f32 %v5429_v41, %v10243_v51  ;;  %v5432_v54 = vadd.f32 %v5431_v18, %v5430_v50  ;;  %v6321_v50 = vld [vmem:[%s6547_s18 + $0x50] sm:$0xff] }
 0x553   : > { %v4755_v0 = vmul.f32 %v4659_v47, %v4659_v47  ;;  %v10278_v30 = vadd.f32 %v5432_v54, %v10243_v51 }
 0x555   : > { %v4787_v39 = vmul.f32 %v4755_v0, %v4659_v47  ;;  %v4756_v40 = vmul.f32 %v10278_v30, %v10278_v30  ;;  %v6264_v27 = vpop.eup %6263 }
 0x556   : > { %v4945_v9 = vadd.f32 1.0, %v6264_v27 }
 0x557   : > { %v4819_v15 = vmul.f32 0.044715, %v4787_v39  ;;  %v4788_v17 = vmul.f32 %v4756_v40, %v10278_v30  ;;  %v6266_v63 = vpop.eup %6265  ;;  %v6322_v40 = vld [vmem:[%s6547_s18 + $0x58] sm:$0xff] }
 0x558   : > { %v4977_v59 = vmul.f32 0.5, %v4945_v9  ;;  %v4946_v52 = vadd.f32 1.0, %v6266_v63 }
 0x559   : > { %v4851_v32 = vadd.f32 %v4819_v15, %v4659_v47  ;;  %v4820_v20 = vmul.f32 0.044715, %v4788_v17  ;;  %v5433_v12 = vpop.f32.mrb[120].mxu0 }
 0x55a   : > { %v5434_v56 = vpop.f32.mrb[121].mxu0  ;;  %v5009_v5 = vmul.f32 %v4977_v59, %v4651_v38  ;;  %v4978_v31 = vmul.f32 0.5, %v4946_v52 }
 0x55b   : > { %v4883_v8 = vmul.f32 0.7978846, %v4851_v32  ;;  %v4852_v7 = vadd.f32 %v4820_v20, %v10278_v30  ;;  %v5436_v6 = vpop.f32.mrb[122].mxu0  ;;  %v5435_v25 = vadd.f32 %v5434_v56, %v5433_v12 }
 0x55c   : > { %v5437_v42 = vpop.f32.mrb[123].mxu0  ;;  %v5041_v13 = vadd.f32 %v6319_v36, %v5009_v5  ;;  %v5010_v21 = vmul.f32 %v4978_v31, %v4654_v22 }
 0x55d   : > { %6267 = vtanh.f32 %v4883_v8  ;;  %v4884_v11 = vmul.f32 0.7978846, %v4852_v7  ;;  %v10286_v34 = vadd.f32 %v5435_v25, %v10243_v51  ;;  %v5438_v19 = vadd.f32 %v5437_v42, %v5436_v6 }
 0x55e   : > { %5073 = vst [vmem:[%s10253_s29 + $0x40] sm:$0xff] %v5041_v13  ;;  %v5042_v14 = vadd.f32 %v6320_v10, %v5010_v21 }
 0x55f   : > { %6269 = vtanh.f32 %v4884_v11  ;;  %v4757_v62 = vmul.f32 %v10286_v34, %v10286_v34  ;;  %v10293_v38 = vadd.f32 %v5438_v19, %v10243_v51 }
 0x560   : > { %5074 = vst [vmem:[%s10253_s29 + $0x48] sm:$0xff] %v5042_v14  ;;  %v6323_v14 = vld [vmem:[%s6547_s18 + $0x60] sm:$0xff] }
 0x561   : > { %v4789_v3 = vmul.f32 %v4757_v62, %v10286_v34  ;;  %v4758_v29 = vmul.f32 %v10293_v38, %v10293_v38 }
 0x563   : > { %v4821_v23 = vmul.f32 0.044715, %v4789_v3  ;;  %v4790_v22 = vmul.f32 %v4758_v29, %v10293_v38 }
 0x564   : > { %v5439_v4 = vpop.f32.mrb[124].mxu0 }
 0x565   : > { %v5440_v35 = vpop.f32.mrb[125].mxu0  ;;  %v4853_v53 = vadd.f32 %v4821_v23, %v10286_v34  ;;  %v4822_v37 = vmul.f32 0.044715, %v4790_v22  ;;  %v6324_v22 = vld [vmem:[%s6547_s18 + $0x68] sm:$0xff] }
 0x566   : > { %v5441_v46 = vadd.f32 %v5440_v35, %v5439_v4  ;;  %v5442_v28 = vpop.f32.mrb[126].mxu0 }
 0x567   : > { %v6268_v16 = vpop.eup %6267  ;;  %v5443_v58 = vpop.f32.mrb[127].mxu0  ;;  %v4885_v49 = vmul.f32 0.7978846, %v4853_v53  ;;  %v4854_v48 = vadd.f32 %v4822_v37, %v10293_v38 }
 0x568   : > { %v4947_v43 = vadd.f32 1.0, %v6268_v16  ;;  %v10303_v61 = vadd.f32 %v5441_v46, %v10243_v51  ;;  %v5444_v44 = vadd.f32 %v5443_v58, %v5442_v28 }
 0x569   : > { %v6270_v33 = vpop.eup %6269  ;;  %6271 = vtanh.f32 %v4885_v49  ;;  %v4886_v60 = vmul.f32 0.7978846, %v4854_v48  ;;  %v6325_v49 = vld [vmem:[%s6547_s18 + $0x70] sm:$0xff] }
 0x56a   : > { %v4979_v45 = vmul.f32 0.5, %v4947_v43  ;;  %v4948_v24 = vadd.f32 1.0, %v6270_v33  ;;  %v4759_v2 = vmul.f32 %v10303_v61, %v10303_v61  ;;  %v10308_v55 = vadd.f32 %v5444_v44, %v10243_v51  ;;  %v6326_v44 = vld [vmem:[%s6547_s18 + $0x78] sm:$0xff] }
 0x56b   : > { %6273 = vtanh.f32 %v4886_v60 }
 0x56c   : > { %v5011_v26 = vmul.f32 %v4979_v45, %v4659_v47  ;;  %v4980_v1 = vmul.f32 0.5, %v4948_v24  ;;  %v4791_v57 = vmul.f32 %v4759_v2, %v10303_v61  ;;  %v4760_v41 = vmul.f32 %v10308_v55, %v10308_v55 }
 0x56e   : > { %v5043_v18 = vadd.f32 %v6321_v50, %v5011_v26  ;;  %v5012_v54 = vmul.f32 %v4980_v1, %v10278_v30  ;;  %v4823_v0 = vmul.f32 0.044715, %v4791_v57  ;;  %v4792_v39 = vmul.f32 %v4760_v41, %v10308_v55 }
 0x570   : > { %5075 = vst [vmem:[%s10253_s29 + $0x50] sm:$0xff] %v5043_v18  ;;  %v5044_v27 = vadd.f32 %v6322_v40, %v5012_v54  ;;  %v5445_v9 = vpop.f32.mrb[128].mxu0  ;;  %v4855_v47 = vadd.f32 %v4823_v0, %v10303_v61  ;;  %v4824_v15 = vmul.f32 0.044715, %v4792_v39  ;;  %v6327_v40 = vld [vmem:[%s6547_s18 + $0x80] sm:$0xff] }
 0x571   : > { %v5446_v17 = vpop.f32.mrb[129].mxu0 }
 0x572   : > { %5076 = vst [vmem:[%s10253_s29 + $0x58] sm:$0xff] %v5044_v27  ;;  %v5447_v63 = vadd.f32 %v5446_v17, %v5445_v9  ;;  %v5448_v59 = vpop.f32.mrb[130].mxu0  ;;  %v4887_v52 = vmul.f32 0.7978846, %v4855_v47  ;;  %v4856_v32 = vadd.f32 %v4824_v15, %v10308_v55  ;;  %v6328_v17 = vld [vmem:[%s6547_s18 + $0x88] sm:$0xff] }
 0x573   : > { %v5449_v20 = vpop.f32.mrb[131].mxu0  ;;  %v6272_v12 = vpop.eup %6271 }
 0x574   : > { %v4683_v30 = vadd.f32 %v5447_v63, %v10243_v51  ;;  %v5450_v56 = vadd.f32 %v5449_v20, %v5448_v59  ;;  %v4949_v5 = vadd.f32 1.0, %v6272_v12  ;;  %6275 = vtanh.f32 %v4887_v52 }
 0x575   : > { %v4888_v31 = vmul.f32 0.7978846, %v4856_v32  ;;  %v6274_v8 = vpop.eup %6273 }
 0x576   : > { %v4761_v7 = vmul.f32 %v4683_v30, %v4683_v30  ;;  %v4686_v6 = vadd.f32 %v5450_v56, %v10243_v51  ;;  %v4981_v25 = vmul.f32 0.5, %v4949_v5  ;;  %v4950_v42 = vadd.f32 1.0, %v6274_v8 }
 0x577   : > { %6277 = vtanh.f32 %v4888_v31 }
 0x578   : > { %v4793_v36 = vmul.f32 %v4761_v7, %v4683_v30  ;;  %v4762_v13 = vmul.f32 %v4686_v6, %v4686_v6  ;;  %v5013_v21 = vmul.f32 %v4981_v25, %v10286_v34  ;;  %v4982_v11 = vmul.f32 0.5, %v4950_v42 }
 0x57a   : > { %v4825_v19 = vmul.f32 0.044715, %v4793_v36  ;;  %v4794_v10 = vmul.f32 %v4762_v13, %v4686_v6  ;;  %v5045_v62 = vadd.f32 %v6323_v14, %v5013_v21  ;;  %v5014_v3 = vmul.f32 %v4982_v11, %v10293_v38 }
 0x57c   : > { %v4857_v29 = vadd.f32 %v4825_v19, %v4683_v30  ;;  %v4826_v23 = vmul.f32 0.044715, %v4794_v10  ;;  %5077 = vst [vmem:[%s10253_s29 + $0x60] sm:$0xff] %v5045_v62  ;;  %v5046_v4 = vadd.f32 %v6324_v22, %v5014_v3 }
 0x57e   : > { %v4889_v35 = vmul.f32 0.7978846, %v4857_v29  ;;  %v4858_v53 = vadd.f32 %v4826_v23, %v4686_v6  ;;  %v6276_v37 = vpop.eup %6275  ;;  %5078 = vst [vmem:[%s10253_s29 + $0x68] sm:$0xff] %v5046_v4 }
 0x57f   : > { %v4951_v34 = vadd.f32 1.0, %v6276_v37 }
 0x580   : > { %6279 = vtanh.f32 %v4889_v35  ;;  %v4890_v46 = vmul.f32 0.7978846, %v4858_v53  ;;  %v6329_v35 = vld [vmem:[%s6547_s18 + $0x90] sm:$0xff] }
 0x581   : > { %v6278_v28 = vpop.eup %6277  ;;  %v4983_v16 = vmul.f32 0.5, %v4951_v34 }
 0x582   : > { %v4952_v58 = vadd.f32 1.0, %v6278_v28  ;;  %6281 = vtanh.f32 %v4890_v46 }
 0x583   : > { %v5015_v38 = vmul.f32 %v4983_v16, %v10303_v61  ;;  %v6330_v16 = vld [vmem:[%s6547_s18 + $0x98] sm:$0xff] }
 0x584   : > { %v4984_v43 = vmul.f32 0.5, %v4952_v58 }
 0x585   : > { %v5047_v48 = vadd.f32 %v6325_v49, %v5015_v38 }
 0x586   : > { %v5016_v33 = vmul.f32 %v4984_v43, %v10308_v55 }
 0x587   : > { %5079 = vst [vmem:[%s10253_s29 + $0x70] sm:$0xff] %v5047_v48 }
 0x588   : > { %v5048_v45 = vadd.f32 %v6326_v44, %v5016_v33 }
 0x58a   : > { %v6280_v24 = vpop.eup %6279  ;;  %5080 = vst [vmem:[%s10253_s29 + $0x78] sm:$0xff] %v5048_v45 }
 0x58b   : > { %v4953_v60 = vadd.f32 1.0, %v6280_v24 }
 0x58c   : > { %v6282_v2 = vpop.eup %6281  ;;  %v5451_v26 = vpop.f32.mrb[132].mxu0 }
 0x58d   : > { %v4985_v1 = vmul.f32 0.5, %v4953_v60  ;;  %v4954_v57 = vadd.f32 1.0, %v6282_v2  ;;  %v5452_v41 = vpop.f32.mrb[133].mxu0 }
 0x58e   : > { %v5453_v61 = vadd.f32 %v5452_v41, %v5451_v26  ;;  %v5454_v50 = vpop.f32.mrb[134].mxu0 }
 0x58f   : > { %v5017_v18 = vmul.f32 %v4985_v1, %v4683_v30  ;;  %v4986_v54 = vmul.f32 0.5, %v4954_v57  ;;  %v5455_v55 = vpop.f32.mrb[135].mxu0 }
 0x590   : > { %v4691_v0 = vadd.f32 %v5453_v61, %v10243_v51  ;;  %v5456_v39 = vadd.f32 %v5455_v55, %v5454_v50 }
 0x591   : > { %v5049_v27 = vadd.f32 %v6327_v40, %v5017_v18  ;;  %v5018_v9 = vmul.f32 %v4986_v54, %v4686_v6 }
 0x592   : > { %v4763_v47 = vmul.f32 %v4691_v0, %v4691_v0  ;;  %v4694_v15 = vadd.f32 %v5456_v39, %v10243_v51 }
 0x593   : > { %5081 = vst [vmem:[%s10253_s29 + $0x80] sm:$0xff] %v5049_v27  ;;  %v5050_v63 = vadd.f32 %v6328_v17, %v5018_v9 }
 0x594   : > { %v4795_v59 = vmul.f32 %v4763_v47, %v4691_v0  ;;  %v4764_v52 = vmul.f32 %v4694_v15, %v4694_v15 }
 0x595   : > { %5082 = vst [vmem:[%s10253_s29 + $0x88] sm:$0xff] %v5050_v63 }
 0x596   : > { %v4827_v32 = vmul.f32 0.044715, %v4795_v59  ;;  %v4796_v20 = vmul.f32 %v4764_v52, %v4694_v15 }
 0x598   : > { %v4859_v12 = vadd.f32 %v4827_v32, %v4691_v0  ;;  %v4828_v30 = vmul.f32 0.044715, %v4796_v20 }
 0x59a   : > { %v4891_v56 = vmul.f32 0.7978846, %v4859_v12  ;;  %v4860_v5 = vadd.f32 %v4828_v30, %v4694_v15 }
 0x59c   : > { %6283 = vtanh.f32 %v4891_v56  ;;  %v4892_v31 = vmul.f32 0.7978846, %v4860_v5 }
 0x59e   : > { %6285 = vtanh.f32 %v4892_v31 }
 0x5a4   : > { %v5457_v8 = vpop.f32.mrb[136].mxu0 }
 0x5a5   : > { %v5458_v7 = vpop.f32.mrb[137].mxu0 }
 0x5a6   : > { %v6284_v6 = vpop.eup %6283  ;;  %v5459_v25 = vadd.f32 %v5458_v7, %v5457_v8  ;;  %v5460_v42 = vpop.f32.mrb[138].mxu0 }
 0x5a7   : > { %v4955_v36 = vadd.f32 1.0, %v6284_v6  ;;  %v5461_v13 = vpop.f32.mrb[139].mxu0 }
 0x5a8   : > { %v6286_v21 = vpop.eup %6285  ;;  %v10342_v11 = vadd.f32 %v5459_v25, %v10243_v51  ;;  %v5462_v19 = vadd.f32 %v5461_v13, %v5460_v42 }
 0x5a9   : > { %v4987_v10 = vmul.f32 0.5, %v4955_v36  ;;  %v4956_v14 = vadd.f32 1.0, %v6286_v21 }
 0x5aa   : > { %v4765_v62 = vmul.f32 %v10342_v11, %v10342_v11  ;;  %v10347_v3 = vadd.f32 %v5462_v19, %v10243_v51 }
 0x5ab   : > { %v5019_v29 = vmul.f32 %v4987_v10, %v4691_v0  ;;  %v4988_v23 = vmul.f32 0.5, %v4956_v14 }
 0x5ac   : > { %v4797_v22 = vmul.f32 %v4765_v62, %v10342_v11  ;;  %v4766_v4 = vmul.f32 %v10347_v3, %v10347_v3 }
 0x5ad   : > { %v5051_v53 = vadd.f32 %v6329_v35, %v5019_v29  ;;  %v5020_v37 = vmul.f32 %v4988_v23, %v4694_v15 }
 0x5ae   : > { %v4829_v34 = vmul.f32 0.044715, %v4797_v22  ;;  %v4798_v46 = vmul.f32 %v4766_v4, %v10347_v3  ;;  %v5463_v28 = vpop.f32.mrb[140].mxu0 }
 0x5af   : > { %5083 = vst [vmem:[%s10253_s29 + $0x90] sm:$0xff] %v5051_v53  ;;  %v5052_v58 = vadd.f32 %v6330_v16, %v5020_v37  ;;  %v5464_v38 = vpop.f32.mrb[141].mxu0  ;;  %v6331_v37 = vld [vmem:[%s6547_s18 + $0xa0] sm:$0xff] }
 0x5b0   : > { %v4861_v43 = vadd.f32 %v4829_v34, %v10342_v11  ;;  %v4830_v49 = vmul.f32 0.044715, %v4798_v46  ;;  %v5465_v48 = vadd.f32 %v5464_v38, %v5463_v28  ;;  %v5466_v33 = vpop.f32.mrb[142].mxu0  ;;  %v6332_v38 = vld [vmem:[%s6547_s18 + $0xa8] sm:$0xff] }
 0x5b1   : > { %5084 = vst [vmem:[%s10253_s29 + $0x98] sm:$0xff] %v5052_v58  ;;  %v5467_v44 = vpop.f32.mrb[143].mxu0 }
 0x5b2   : > { %v4893_v45 = vmul.f32 0.7978846, %v4861_v43  ;;  %v4862_v24 = vadd.f32 %v4830_v49, %v10347_v3  ;;  %v10360_v60 = vadd.f32 %v5465_v48, %v10243_v51  ;;  %v5468_v2 = vadd.f32 %v5467_v44, %v5466_v33 }
 0x5b4   : > { %6287 = vtanh.f32 %v4893_v45  ;;  %v4894_v26 = vmul.f32 0.7978846, %v4862_v24  ;;  %v4767_v1 = vmul.f32 %v10360_v60, %v10360_v60  ;;  %v10365_v57 = vadd.f32 %v5468_v2, %v10243_v51 }
 0x5b6   : > { %6289 = vtanh.f32 %v4894_v26  ;;  %v4799_v41 = vmul.f32 %v4767_v1, %v10360_v60  ;;  %v4768_v61 = vmul.f32 %v10365_v57, %v10365_v57  ;;  %v5469_v50 = vpop.f32.mrb[144].mxu0 }
 0x5b7   : > { %v5470_v18 = vpop.f32.mrb[145].mxu0 }
 0x5b8   : > { %v4831_v54 = vmul.f32 0.044715, %v4799_v41  ;;  %v4800_v55 = vmul.f32 %v4768_v61, %v10365_v57  ;;  %v5471_v0 = vadd.f32 %v5470_v18, %v5469_v50  ;;  %v5472_v39 = vpop.f32.mrb[146].mxu0 }
 0x5b9   : > { %v5473_v40 = vpop.f32.mrb[147].mxu0 }
 0x5ba   : > { %v4863_v27 = vadd.f32 %v4831_v54, %v10360_v60  ;;  %v4832_v9 = vmul.f32 0.044715, %v4800_v55  ;;  %v10373_v47 = vadd.f32 %v5471_v0, %v10243_v51  ;;  %v5474_v15 = vadd.f32 %v5473_v40, %v5472_v39 }
 0x5bc   : > { %v4895_v17 = vmul.f32 0.7978846, %v4863_v27  ;;  %v4864_v63 = vadd.f32 %v4832_v9, %v10365_v57  ;;  %v4769_v59 = vmul.f32 %v10373_v47, %v10373_v47  ;;  %v10379_v52 = vadd.f32 %v5474_v15, %v10243_v51 }
 0x5be   : > { %v6288_v32 = vpop.eup %6287  ;;  %6291 = vtanh.f32 %v4895_v17  ;;  %v4896_v20 = vmul.f32 0.7978846, %v4864_v63  ;;  %v4801_v12 = vmul.f32 %v4769_v59, %v10373_v47  ;;  %v4770_v30 = vmul.f32 %v10379_v52, %v10379_v52  ;;  %v5475_v56 = vpop.f32.mrb[148].mxu0 }
 0x5bf   : > { %v4957_v5 = vadd.f32 1.0, %v6288_v32  ;;  %v5476_v31 = vpop.f32.mrb[149].mxu0  ;;  %v6333_v32 = vld [vmem:[%s6547_s18 + $0xb0] sm:$0xff] }
 0x5c0   : > { %v6290_v8 = vpop.eup %6289  ;;  %6293 = vtanh.f32 %v4896_v20  ;;  %v4833_v7 = vmul.f32 0.044715, %v4801_v12  ;;  %v4802_v6 = vmul.f32 %v4770_v30, %v10379_v52  ;;  %v5477_v25 = vadd.f32 %v5476_v31, %v5475_v56  ;;  %v5478_v42 = vpop.f32.mrb[150].mxu0 }
 0x5c1   : > { %v4989_v36 = vmul.f32 0.5, %v4957_v5  ;;  %v4958_v13 = vadd.f32 1.0, %v6290_v8  ;;  %v5479_v21 = vpop.f32.mrb[151].mxu0 }
 0x5c2   : > { %v4865_v19 = vadd.f32 %v4833_v7, %v10373_v47  ;;  %v4834_v10 = vmul.f32 0.044715, %v4802_v6  ;;  %v10387_v14 = vadd.f32 %v5477_v25, %v10243_v51  ;;  %v5480_v62 = vadd.f32 %v5479_v21, %v5478_v42  ;;  %v6334_v7 = vld [vmem:[%s6547_s18 + $0xb8] sm:$0xff] }
 0x5c3   : > { %v5021_v29 = vmul.f32 %v4989_v36, %v10342_v11  ;;  %v4990_v23 = vmul.f32 0.5, %v4958_v13 }
 0x5c4   : > { %v4897_v22 = vmul.f32 0.7978846, %v4865_v19  ;;  %v4866_v4 = vadd.f32 %v4834_v10, %v10379_v52  ;;  %v4771_v35 = vmul.f32 %v10387_v14, %v10387_v14  ;;  %v10394_v53 = vadd.f32 %v5480_v62, %v10243_v51 }
 0x5c5   : > { %v5053_v34 = vadd.f32 %v6331_v37, %v5021_v29  ;;  %v5022_v46 = vmul.f32 %v4990_v23, %v10347_v3 }
 0x5c6   : > { %6295 = vtanh.f32 %v4897_v22  ;;  %v4898_v28 = vmul.f32 0.7978846, %v4866_v4  ;;  %v4803_v16 = vmul.f32 %v4771_v35, %v10387_v14  ;;  %v4772_v11 = vmul.f32 %v10394_v53, %v10394_v53  ;;  %v5481_v58 = vpop.f32.mrb[152].mxu0 }
 0x5c7   : > { %5085 = vst [vmem:[%s10253_s29 + $0xa0] sm:$0xff] %v5053_v34  ;;  %v5054_v43 = vadd.f32 %v6332_v38, %v5022_v46  ;;  %v5482_v49 = vpop.f32.mrb[153].mxu0 }
 0x5c8   : > { %v6292_v48 = vpop.eup %6291  ;;  %6297 = vtanh.f32 %v4898_v28  ;;  %v4835_v33 = vmul.f32 0.044715, %v4803_v16  ;;  %v4804_v44 = vmul.f32 %v4772_v11, %v10394_v53  ;;  %v5483_v45 = vadd.f32 %v5482_v49, %v5481_v58  ;;  %v5484_v3 = vpop.f32.mrb[154].mxu0  ;;  %v6335_v16 = vld [vmem:[%s6547_s18 + $0xc0] sm:$0xff] }
 0x5c9   : > { %5086 = vst [vmem:[%s10253_s29 + $0xa8] sm:$0xff] %v5054_v43  ;;  %v4959_v24 = vadd.f32 1.0, %v6292_v48  ;;  %v5485_v2 = vpop.f32.mrb[155].mxu0 }
 0x5ca   : > { %v6294_v26 = vpop.eup %6293  ;;  %v4867_v1 = vadd.f32 %v4835_v33, %v10387_v14  ;;  %v4836_v41 = vmul.f32 0.044715, %v4804_v44  ;;  %v10407_v61 = vadd.f32 %v5483_v45, %v10243_v51  ;;  %v5486_v50 = vadd.f32 %v5485_v2, %v5484_v3 }
 0x5cb   : > { %v4991_v18 = vmul.f32 0.5, %v4959_v24  ;;  %v4960_v54 = vadd.f32 1.0, %v6294_v26 }
 0x5cc   : > { %v4899_v55 = vmul.f32 0.7978846, %v4867_v1  ;;  %v4868_v0 = vadd.f32 %v4836_v41, %v10394_v53  ;;  %v4773_v39 = vmul.f32 %v10407_v61, %v10407_v61  ;;  %v10413_v40 = vadd.f32 %v5486_v50, %v10243_v51  ;;  %v6337_v50 = vld [vmem:[%s6547_s18 + $0xd0] sm:$0xff] }
 0x5cd   : > { %v5023_v27 = vmul.f32 %v4991_v18, %v10360_v60  ;;  %v4992_v9 = vmul.f32 0.5, %v4960_v54 }
 0x5ce   : > { %6299 = vtanh.f32 %v4899_v55  ;;  %v4900_v15 = vmul.f32 0.7978846, %v4868_v0  ;;  %v4805_v17 = vmul.f32 %v4773_v39, %v10407_v61  ;;  %v4774_v63 = vmul.f32 %v10413_v40, %v10413_v40  ;;  %v5487_v59 = vpop.f32.mrb[156].mxu0  ;;  %v6338_v0 = vld [vmem:[%s6547_s18 + $0xd8] sm:$0xff] }
 0x5cf   : > { %v5055_v20 = vadd.f32 %v6333_v32, %v5023_v27  ;;  %v5024_v12 = vmul.f32 %v4992_v9, %v10365_v57  ;;  %v5488_v30 = vpop.f32.mrb[157].mxu0 }
 0x5d0   : > { %v6296_v56 = vpop.eup %6295  ;;  %6301 = vtanh.f32 %v4900_v15  ;;  %v4837_v60 = vmul.f32 0.044715, %v4805_v17  ;;  %v4806_v5 = vmul.f32 %v4774_v63, %v10413_v40  ;;  %v5489_v31 = vadd.f32 %v5488_v30, %v5487_v59  ;;  %v5490_v8 = vpop.f32.mrb[158].mxu0  ;;  %v6339_v59 = vld [vmem:[%s6547_s18 + $0xe0] sm:$0xff] }
 0x5d1   : > { %5087 = vst [vmem:[%s10253_s29 + $0xb0] sm:$0xff] %v5055_v20  ;;  %v5056_v6 = vadd.f32 %v6334_v7, %v5024_v12  ;;  %v4961_v25 = vadd.f32 1.0, %v6296_v56  ;;  %v5491_v42 = vpop.f32.mrb[159].mxu0  ;;  %v6340_v12 = vld [vmem:[%s6547_s18 + $0xe8] sm:$0xff] }
 0x5d2   : > { %v6298_v36 = vpop.eup %6297  ;;  %v4869_v13 = vadd.f32 %v4837_v60, %v10407_v61  ;;  %v4838_v21 = vmul.f32 0.044715, %v4806_v5  ;;  %v10426_v57 = vadd.f32 %v5489_v31, %v10243_v51  ;;  %v5492_v19 = vadd.f32 %v5491_v42, %v5490_v8 }
 0x5d3   : > { %5088 = vst [vmem:[%s10253_s29 + $0xb8] sm:$0xff] %v5056_v6  ;;  %v4993_v10 = vmul.f32 0.5, %v4961_v25  ;;  %v4962_v62 = vadd.f32 1.0, %v6298_v36  ;;  %v6342_v25 = vld [vmem:[%s6547_s18 + $0xf8] sm:$0xff] }
 0x5d4   : > { %v4901_v29 = vmul.f32 0.7978846, %v4869_v13  ;;  %v4870_v23 = vadd.f32 %v4838_v21, %v10413_v40  ;;  %v4775_v22 = vmul.f32 %v10426_v57, %v10426_v57  ;;  %v10433_v4 = vadd.f32 %v5492_v19, %v10243_v51 }
 0x5d5   : > { %v5025_v35 = vmul.f32 %v4993_v10, %v10373_v47  ;;  %v4994_v37 = vmul.f32 0.5, %v4962_v62  ;;  %v6336_v47 = vld [vmem:[%s6547_s18 + $0xc8] sm:$0xff] }
 0x5d6   : > { %6303 = vtanh.f32 %v4901_v29  ;;  %v4902_v34 = vmul.f32 0.7978846, %v4870_v23  ;;  %v4807_v46 = vmul.f32 %v4775_v22, %v10426_v57  ;;  %v4776_v28 = vmul.f32 %v10433_v4, %v10433_v4 }
 0x5d7   : > { %v5057_v11 = vadd.f32 %v6335_v16, %v5025_v35  ;;  %v5026_v58 = vmul.f32 %v4994_v37, %v10379_v52 }
 0x5d8   : > { %v6300_v38 = vpop.eup %6299  ;;  %6305 = vtanh.f32 %v4902_v34  ;;  %v4839_v43 = vmul.f32 0.044715, %v4807_v46  ;;  %v4808_v51 = vmul.f32 %v4776_v28, %v10433_v4 }
 0x5d9   : > { %5089 = vst [vmem:[%s10253_s29 + $0xc0] sm:$0xff] %v5057_v11  ;;  %v5058_v49 = vadd.f32 %v6336_v47, %v5026_v58  ;;  %v4963_v48 = vadd.f32 1.0, %v6300_v38 }
 0x5da   : > { %v6302_v33 = vpop.eup %6301  ;;  %v4871_v44 = vadd.f32 %v4839_v43, %v10426_v57  ;;  %v4840_v45 = vmul.f32 0.044715, %v4808_v51 }
 0x5db   : > { %5090 = vst [vmem:[%s10253_s29 + $0xc8] sm:$0xff] %v5058_v49  ;;  %v4995_v3 = vmul.f32 0.5, %v4963_v48  ;;  %v4964_v24 = vadd.f32 1.0, %v6302_v33 }
 0x5dc   : > { %v4903_v52 = vmul.f32 0.7978846, %v4871_v44  ;;  %v4872_v2 = vadd.f32 %v4840_v45, %v10433_v4 }
 0x5dd   : > { %v5027_v26 = vmul.f32 %v4995_v3, %v10387_v14  ;;  %v4996_v1 = vmul.f32 0.5, %v4964_v24 }
 0x5de   : > { %6307 = vtanh.f32 %v4903_v52  ;;  %v4904_v41 = vmul.f32 0.7978846, %v4872_v2 }
 0x5df   : > { %v5059_v18 = vadd.f32 %v6337_v50, %v5027_v26  ;;  %v5028_v54 = vmul.f32 %v4996_v1, %v10394_v53 }
 0x5e0   : > { %v6304_v55 = vpop.eup %6303  ;;  %6309 = vtanh.f32 %v4904_v41 }
 0x5e1   : > { %5091 = vst [vmem:[%s10253_s29 + $0xd0] sm:$0xff] %v5059_v18  ;;  %v5060_v39 = vadd.f32 %v6338_v0, %v5028_v54  ;;  %v4965_v27 = vadd.f32 1.0, %v6304_v55 }
 0x5e2   : > { %v6306_v9 = vpop.eup %6305 }
 0x5e3   : > { %5092 = vst [vmem:[%s10253_s29 + $0xd8] sm:$0xff] %v5060_v39  ;;  %v4997_v14 = vmul.f32 0.5, %v4965_v27  ;;  %v4966_v15 = vadd.f32 1.0, %v6306_v9 }
 0x5e5   : > { %v5029_v17 = vmul.f32 %v4997_v14, %v10407_v61  ;;  %v4998_v63 = vmul.f32 0.5, %v4966_v15 }
 0x5e7   : > { %v5061_v53 = vadd.f32 %v6339_v59, %v5029_v17  ;;  %v5030_v32 = vmul.f32 %v4998_v63, %v10413_v40  ;;  %v6341_v40 = vld [vmem:[%s6547_s18 + $0xf0] sm:$0xff] }
 0x5e8   : > { %v6308_v20 = vpop.eup %6307 }
 0x5e9   : > { %5093 = vst [vmem:[%s10253_s29 + $0xe0] sm:$0xff] %v5061_v53  ;;  %v5062_v30 = vadd.f32 %v6340_v12, %v5030_v32  ;;  %v4967_v56 = vadd.f32 1.0, %v6308_v20 }
 0x5ea   : > { %v6310_v60 = vpop.eup %6309 }
 0x5eb   : > { %5094 = vst [vmem:[%s10253_s29 + $0xe8] sm:$0xff] %v5062_v30  ;;  %v4999_v61 = vmul.f32 0.5, %v4967_v56  ;;  %v4968_v5 = vadd.f32 1.0, %v6310_v60 }
 0x5ed   : > { %v5031_v31 = vmul.f32 %v4999_v61, %v10426_v57  ;;  %v5000_v8 = vmul.f32 0.5, %v4968_v5 }
 0x5ef   : > { %v5063_v7 = vadd.f32 %v6341_v40, %v5031_v31  ;;  %v5032_v6 = vmul.f32 %v5000_v8, %v10433_v4 }
 0x5f1   : > { %5095 = vst [vmem:[%s10253_s29 + $0xf0] sm:$0xff] %v5063_v7  ;;  %v5064_v42 = vadd.f32 %v6342_v25, %v5032_v6 }
 0x5f3   : > { %5096 = vst [vmem:[%s10253_s29 + $0xf8] sm:$0xff] %v5064_v42 }
 0x5f4   : > { %6356 = shalt.err (!%p6353_p3)
}
 0x5f5   : > { %s6357_s18 = scalar_lea.hbm %s10467_s16, 4096  ;;  %s6361_s23 = scalar_lea.hbm %s10524_s7, 8192 }
 0x5f6   : > { %p6358_p4 = scmp.ne.s32.totalorder %s10467_s16, %s6357_s18  ;;  %p6362_p9 = scmp.lt.u32.totalorder %s10467_s16, %s10524_s7 }
 0x5f7   : > { %p6363_p10 = scmp.lt.u32.totalorder %s6361_s23, %s6357_s18  ;;  %p6365_p12 = scmp.lt.u32.totalorder %s6357_s18, %s10467_s16 }
 0x5f8   : > { %p6359_p7 = pnand %p6358_p4, %p6489_p5 }
 0x5f9   : > { %p6364_p11 = por %p6363_p10, %p6362_p9 }
 0x5fa   : > { %p6360_p8 = pneg %p6359_p7 }
 0x5fb   : > { %p6366_p13 = por %p6365_p12, %p6364_p11 }
 0x5fd   : > { %p6367_p0 = pnand %p6366_p13, %p6360_p8 }
 0x5ff   : > { %6370 = shalt.err (!%p6367_p0)
}
 0x600   : > { %s6409_s14 = smov 128   ;;  %s6410_s15 = smov 8  }
 0x601   : > { %5509 = dma.vmem_to_hbm [thread:$0]  (%p6489_p5), %s10469_s9, 4096, %s10467_s16, %s10476_s28, %s6409_s14, %s6409_s14, %s6410_s15  }
 0x602 PF: > { %p5515_p1 = scmp.ge.s32.totalorder %s6405_s27, 2  ;;  %s5126_s17 = sand.u32 1, %s6393_s24  }
 0x603   : > { %s5127_s19 = scalar_lea.sflag [#allocation3], %s5126_s17 }
 0x604   : > { %p5512_p2 = pnand %p5515_p1, %p6493_p6 }
 0x606   : > { %6388 = dma.done.wait (!%p5512_p2), %s5127_s19, 4096  }
 0x607   : > { %6390 = vsyncadd (!%p5512_p2), %s5127_s19, 4294963200  ;;  %p17_p3 = scmp.ge.s32.totalorder %s6476_s30, 4   ;;  %s11057_s24 = smov %s6397_s25 }
 0x608   : > { %s11058_s25 = smov %s6401_s26  ;;  %s11059_s26 = smov %s6487_s10 }
 0x609   : > { %s11060_s27 = smov %s6476_s30  ;;  %19 = sbr.rel (!%p17_p3) target bundleno = 3 (0x3), region = 87 }
 0x610   :  { %5132 = vsyncpa [#allocation3], 1 }
 0x611   :  { %5134 = vsyncpa [#allocation3 + $0x1], 1 }

</bundles_post_ra>
